<compile_context>
chip_gen: v7x
topology: tpu7x:2x2x1
jax: 0.10.0
libtpu: 0.0.40
codegen_flags: <defaults>
</compile_context>

<pallas_src>
import jax
import jax.numpy as jnp
from jax.experimental import pallas as pl
from jax.experimental.pallas import tpu as pltpu


def _round_up(n, m):
    return ((n + m - 1) // m) * m


def _resident_spec(shape):
    """BlockSpec for a grid-invariant (weight/bias) operand: constant index
    map and a single pipeline buffer (no double-buffer VMEM waste)."""
    ndim = len(shape)
    idx = lambda c: (0,) * ndim
    try:
        return pl.BlockSpec(shape, idx, pipeline_mode=pl.Buffered(1))
    except TypeError:  # older jax without pipeline_mode kwarg
        return pl.BlockSpec(shape, idx)


def _vmem_limit_bytes(rows, din0, Hp, Cp, num_layers, Bp):
    """Scoped-VMEM request derived from the actual kernel footprint."""
    w = 0
    d_in = din0
    for _ in range(num_layers):
        w += d_in * 3 * Hp * 2        # W_ih (bf16, single-buffered)
        w += 3 * Hp * 4               # folded input bias (f32)
        w += Hp * 3 * Hp * 2          # W_hh (bf16)
        w += Hp * 4                   # b_hn (f32)
        d_in = Hp
    w += Hp * Cp * 2 + Cp * 4         # FC weight/bias
    buf = (2 * rows * din0 * 2        # x chunk (bf16, double-buffered)
           + 2 * rows * Cp * 2        # out chunk (bf16, double-buffered)
           + w
           + rows * 3 * Hp * 4        # gi slab (f32)
           + rows * Hp * 4            # inter-layer activation slab (f32)
           + num_layers * Bp * Hp * 4)  # persistent hidden states
    # 2x safety + 4 MiB headroom for Mosaic internal scratch; keep inside the
    # v7x 64 MiB physical budget.
    return int(min(max(2 * buf + (4 << 20), 32 << 20), 56 << 20))


# ----------------------------------------------------------------------------
# Fused kernel: per grid step (one time chunk), run ALL GRU layers back-to-back
# and the FC epilogue, keeping inter-layer activations and hidden states in
# VMEM scratch.
# ----------------------------------------------------------------------------
def _make_fused_kernel(num_layers, t_chunk, Bp, Hp):
    def kernel(*refs):
        x_ref = refs[0]
        layer_refs = [refs[1 + 4 * l: 1 + 4 * (l + 1)] for l in range(num_layers)]
        wfc_ref = refs[1 + 4 * num_layers]
        bfc_ref = refs[2 + 4 * num_layers]
        out_ref = refs[3 + 4 * num_layers]
        h_scratch, gi_slab, act_slab = refs[4 + 4 * num_layers:]

        @pl.when(pl.program_id(0) == 0)
        def _():
            # h0 = zeros for every layer (PyTorch _init_hidden_).
            h_scratch[...] = jnp.zeros(h_scratch.shape, h_scratch.dtype)

        for l in range(num_layers):
            wih_ref, bin_ref, whh_ref, bhn_ref = layer_refs[l]
            layer_in = x_ref if l == 0 else act_slab

            # Hoisted per-chunk input projection: one big MXU matmul.
            # (Read happens before act_slab is overwritten by this layer's
            # recurrence, so reusing the slab across layers is safe.)
            gi_slab[...] = (
                jnp.dot(layer_in[...].astype(jnp.bfloat16), wih_ref[...],
                        preferred_element_type=jnp.float32)
                + bin_ref[...]
            )
            bhn = bhn_ref[...]

            # Serial recurrence over the chunk (static unroll; Hp is small).
            for t in range(t_chunk):
                r0 = t * Bp                                   # 8-row aligned
                gi_t = gi_slab[pl.ds(r0, Bp), :]              # (Bp, 3Hp) f32
                h_prev = h_scratch[l]                         # (Bp, Hp)  f32
                gh = jnp.dot(h_prev.astype(jnp.bfloat16), whh_ref[...],
                             preferred_element_type=jnp.float32)
                # Lane-aligned gate slices (each gate block is Hp = k*128).
                i_r = gi_t[:, 0:Hp]
                i_z = gi_t[:, Hp:2 * Hp]
                i_n = gi_t[:, 2 * Hp:3 * Hp]
                h_r = gh[:, 0:Hp]
                h_z = gh[:, Hp:2 * Hp]
                h_n = gh[:, 2 * Hp:3 * Hp] + bhn              # b_hn stays inside
                r = jax.nn.sigmoid(i_r + h_r)
                z = jax.nn.sigmoid(i_z + h_z)
                n = jnp.tanh(i_n + r * h_n)
                h_new = (1.0 - z) * n + z * h_prev
                h_scratch[l] = h_new
                act_slab[pl.ds(r0, Bp), :] = h_new            # tile-aligned vst

        # Fused FC epilogue: one (rows, Hp)x(Hp, Cp) matmul per chunk,
        # lane-dense bf16 writeback.
        out_ref[...] = (
            jnp.dot(act_slab[...].astype(jnp.bfloat16), wfc_ref[...],
                    preferred_element_type=jnp.float32)
            + bfc_ref[...]
        ).astype(out_ref.dtype)

    return kernel


def _fused_forward(x2d, layer_ws, fc_w, *, t_chunk, Bp, Hp, Cp):
    rows_total, din0 = x2d.shape
    rows = t_chunk * Bp
    n_chunks = rows_total // rows
    num_layers = len(layer_ws)
    wfc_p, bfc_p = fc_w

    in_specs = [pl.BlockSpec((rows, din0), lambda c: (c, 0))]
    operands = [x2d]
    for (wih_p, bias_in, whh_p, bhn) in layer_ws:
        in_specs += [_resident_spec(wih_p.shape),
                     _resident_spec(bias_in.shape),
                     _resident_spec(whh_p.shape),
                     _resident_spec(bhn.shape)]
        operands += [wih_p, bias_in, whh_p, bhn]
    in_specs += [_resident_spec(wfc_p.shape), _resident_spec(bfc_p.shape)]
    operands += [wfc_p, bfc_p]

    scratch = [
        pltpu.VMEM((num_layers, Bp, Hp), jnp.float32),  # persistent h per layer
        pltpu.VMEM((rows, 3 * Hp), jnp.float32),        # gi slab (per chunk)
        pltpu.VMEM((rows, Hp), jnp.float32),            # inter-layer activations
    ]

    kernel = _make_fused_kernel(num_layers, t_chunk, Bp, Hp)
    out = pl.pallas_call(
        kernel,
        out_shape=jax.ShapeDtypeStruct((rows_total, Cp), jnp.bfloat16),
        grid_spec=pltpu.PrefetchScalarGridSpec(
            num_scalar_prefetch=0,
            grid=(n_chunks,),
            in_specs=in_specs,
            out_specs=pl.BlockSpec((rows, Cp), lambda c: (c, 0)),
            scratch_shapes=scratch,
        ),
        compiler_params=pltpu.CompilerParams(
            # Recurrence: hidden state persists across chunks -> sequential.
            dimension_semantics=("arbitrary",),
            vmem_limit_bytes=_vmem_limit_bytes(rows, din0, Hp, Cp,
                                               num_layers, Bp),
        ),
    )(*operands)
    return out


# ----------------------------------------------------------------------------
# Weight preparation: transpose to (in, out), pad each gate block / class dim
# to 128 lanes, pad input rows to the layer's (padded) input width, fold
# biases, cast MXU operands to bf16 (biases stay f32).
# ----------------------------------------------------------------------------
def _pad_gate_cols(w_t, H, Hp):
    """w_t: (D, 3H) -> (D, 3Hp), each gate's column block padded H -> Hp."""
    if Hp == H:
        return w_t
    parts = [jnp.pad(w_t[:, g * H:(g + 1) * H], ((0, 0), (0, Hp - H)))
             for g in range(3)]
    return jnp.concatenate(parts, axis=1)


def _pad_gate_vec(b, H, Hp):
    if Hp == H:
        return b
    parts = [jnp.pad(b[g * H:(g + 1) * H], (0, Hp - H)) for g in range(3)]
    return jnp.concatenate(parts)


def _prep_gru_layer(p, Hp, d_in_padded):
    H = p["w_hh"].shape[1]
    D = p["w_ih"].shape[1]
    wih_t = p["w_ih"].T.astype(jnp.float32)                 # (D, 3H)
    wih_p = _pad_gate_cols(wih_t, H, Hp)                    # (D, 3Hp)
    if d_in_padded != D:
        # Layers >= 1 consume the previous layer's Hp-padded hidden slab whose
        # padded lanes are provably zero -> zero-pad the extra input rows.
        wih_p = jnp.pad(wih_p, ((0, d_in_padded - D), (0, 0)))
    wih_p = wih_p.astype(jnp.bfloat16)                      # (d_in_padded, 3Hp)
    whh_t = p["w_hh"].T.astype(jnp.float32)                 # (H, 3H)
    whh_p = jnp.pad(_pad_gate_cols(whh_t, H, Hp),
                    ((0, Hp - H), (0, 0))).astype(jnp.bfloat16)  # (Hp, 3Hp)
    b_ih = p["b_ih"].astype(jnp.float32)
    b_hh = p["b_hh"].astype(jnp.float32)
    # Fold b_hr, b_hz into the hoisted input-side bias; b_hn stays inside the
    # recurrence (it is multiplied by r).
    b_in_folded = b_ih + jnp.concatenate(
        [b_hh[:2 * H], jnp.zeros((H,), jnp.float32)])
    bias_in = _pad_gate_vec(b_in_folded, H, Hp).reshape(1, 3 * Hp)   # f32
    bhn = jnp.pad(b_hh[2 * H:], (0, Hp - H)).reshape(1, Hp)          # f32
    return wih_p, bias_in, whh_p, bhn


def _prep_fc(fc, Hp, Cp):
    C, H = fc["w"].shape
    w_t = fc["w"].T.astype(jnp.float32)                              # (H, C)
    w_p = jnp.pad(w_t, ((0, Hp - H), (0, Cp - C))).astype(jnp.bfloat16)
    b_p = jnp.pad(fc["b"].astype(jnp.float32), (0, Cp - C)).reshape(1, Cp)
    return w_p, b_p


# ----------------------------------------------------------------------------
# Full module forward.
# ----------------------------------------------------------------------------
def init_params(key, input_size, hidden_size, num_layers, num_classes):
    """PyTorch-default-style uniform(-1/sqrt(H), 1/sqrt(H)) params."""
    params = {"gru": [], "fc": None}
    bound = 1.0 / jnp.sqrt(jnp.float32(hidden_size))
    for layer in range(num_layers):
        d_in = input_size if layer == 0 else hidden_size
        key, k1, k2, k3, k4 = jax.random.split(key, 5)
        params["gru"].append(
            dict(
                w_ih=jax.random.uniform(k1, (3 * hidden_size, d_in), jnp.float32, -bound, bound),
                w_hh=jax.random.uniform(k2, (3 * hidden_size, hidden_size), jnp.float32, -bound, bound),
                b_ih=jax.random.uniform(k3, (3 * hidden_size,), jnp.float32, -bound, bound),
                b_hh=jax.random.uniform(k4, (3 * hidden_size,), jnp.float32, -bound, bound),
            )
        )
    key, k1, k2 = jax.random.split(key, 3)
    params["fc"] = dict(
        w=jax.random.uniform(k1, (num_classes, hidden_size), jnp.float32, -bound, bound),
        b=jax.random.uniform(k2, (num_classes,), jnp.float32, -bound, bound),
    )
    return params


def sequence_predictor_forward(x, params, *, t_chunk=32):
    """x: (B, 1, H, W) float32 -> (W, B, num_classes) float32.

    t_chunk default targets rows = t_chunk*Bp >= 256 (v6e/v7x MXU height);
    it is clamped to the sequence length for short sequences.
    """
    num_classes = params["fc"]["w"].shape[0]
    hidden = params["gru"][0]["w_hh"].shape[1]
    Hp = _round_up(hidden, 128)
    Cp = _round_up(num_classes, 128)

    # _prepare_features_: squeeze channel, permute to (W, B, H) == (T, B, D).
    x = jnp.squeeze(x, axis=1)
    x = jnp.transpose(x, (2, 0, 1)).astype(jnp.float32)
    T, B, Din0 = x.shape

    Bp = _round_up(B, 8)                     # sublane-aligned per-step rows
    tc = max(1, min(t_chunk, T))
    Tp = _round_up(T, tc)
    # Zero-padded trailing time steps are harmless (causal recurrence) and the
    # padded batch rows never influence the real rows; both are sliced off.
    x = jnp.pad(x, ((0, Tp - T), (0, Bp - B), (0, 0)))
    x2d = x.reshape(Tp * Bp, Din0).astype(jnp.bfloat16)

    layer_ws = []
    d_in = Din0
    for p in params["gru"]:
        layer_ws.append(_prep_gru_layer(p, Hp, d_in))
        d_in = Hp
    fc_w = _prep_fc(params["fc"], Hp, Cp)

    out2d = _fused_forward(x2d, layer_ws, fc_w, t_chunk=tc, Bp=Bp, Hp=Hp, Cp=Cp)
    out = out2d.reshape(Tp, Bp, Cp)[:T, :B, :num_classes]
    return out.astype(jnp.float32)           # upcast from bf16 outside kernel


# ----------------------------------------------------------------------------
# Pure-JAX reference (lax.scan GRU) mirroring the kernel's bf16/f32 dtype
# policy, for the correctness check.
# ----------------------------------------------------------------------------
def _reference_forward(x, params):
    x = jnp.transpose(jnp.squeeze(x, axis=1), (2, 0, 1)).astype(jnp.float32)

    def run_layer(x_seq, p):
        H = p["w_hh"].shape[1]
        wih = p["w_ih"].astype(jnp.bfloat16)
        whh = p["w_hh"].astype(jnp.bfloat16)
        b_ih = p["b_ih"].astype(jnp.float32)
        b_hh = p["b_hh"].astype(jnp.float32)
        x_bf = x_seq.astype(jnp.bfloat16)

        def step(h, x_t):
            gi = jnp.dot(x_t, wih.T, preferred_element_type=jnp.float32) + b_ih
            gh = jnp.dot(h.astype(jnp.bfloat16), whh.T,
                         preferred_element_type=jnp.float32) + b_hh
            i_r, i_z, i_n = gi[:, :H], gi[:, H:2 * H], gi[:, 2 * H:]
            h_r, h_z, h_n = gh[:, :H], gh[:, H:2 * H], gh[:, 2 * H:]
            r = jax.nn.sigmoid(i_r + h_r)
            z = jax.nn.sigmoid(i_z + h_z)
            n = jnp.tanh(i_n + r * h_n)
            h_new = (1.0 - z) * n + z * h
            return h_new, h_new

        h0 = jnp.zeros((x_seq.shape[1], H), jnp.float32)
        _, ys = jax.lax.scan(step, h0, x_bf)
        return ys

    for p in params["gru"]:
        x = run_layer(x, p)
    wfc = params["fc"]["w"].astype(jnp.bfloat16)
    bfc = params["fc"]["b"].astype(jnp.float32)
    return jnp.dot(x.astype(jnp.bfloat16), wfc.T,
                   preferred_element_type=jnp.float32) + bfc


if __name__ == "__main__":
    # Input image (B, C=1, H, W); GRU input_size = H, sequence length T = W.
    B, H_img, W_img = 2, 16, 16
    input_size = H_img
    hidden_size = 32
    num_layers = 2
    num_classes = 10

    key = jax.random.PRNGKey(0)
    key, kx = jax.random.split(key)
    x = jax.random.normal(kx, (B, 1, H_img, W_img), jnp.float32)

    params = init_params(key, input_size, hidden_size, num_layers, num_classes)

    out = sequence_predictor_forward(x, params)
    out = jax.block_until_ready(out)
    assert out.shape == (W_img, B, num_classes), out.shape
    assert bool(jnp.all(jnp.isfinite(out))), "non-finite output"

    ref = jax.block_until_ready(_reference_forward(x, params))
    max_err = float(jnp.max(jnp.abs(out - ref)))
    # Kernel logits are stored as bf16 (HBM writeback saving) -> ~0.4% rel
    # rounding on top of the shared bf16-matmul/f32-gate dtype policy.
    assert jnp.allclose(out, ref, atol=2e-2, rtol=2e-2), max_err

    print("KERNEL_OK")
</pallas_src>

<mosaic_0001>
module attributes {stable_mosaic.version = 11 : i64} {
  func.func @kernel(%arg0: i32, %arg1: memref<128x16xbf16, #tpu.memory_space<vmem>>, %arg2: memref<16x384xbf16, #tpu.memory_space<vmem>>, %arg3: memref<1x384xf32, #tpu.memory_space<vmem>>, %arg4: memref<128x384xbf16, #tpu.memory_space<vmem>>, %arg5: memref<1x128xf32, #tpu.memory_space<vmem>>, %arg6: memref<128x384xbf16, #tpu.memory_space<vmem>>, %arg7: memref<1x384xf32, #tpu.memory_space<vmem>>, %arg8: memref<128x384xbf16, #tpu.memory_space<vmem>>, %arg9: memref<1x128xf32, #tpu.memory_space<vmem>>, %arg10: memref<128x128xbf16, #tpu.memory_space<vmem>>, %arg11: memref<1x128xf32, #tpu.memory_space<vmem>>, %arg12: memref<128x128xbf16, #tpu.memory_space<vmem>>, %arg13: memref<2x8x128xf32, #tpu.memory_space<vmem>>, %arg14: memref<128x384xf32, #tpu.memory_space<vmem>>, %arg15: memref<128x128xf32, #tpu.memory_space<vmem>>) attributes {dimension_semantics = [#tpu.dimension_semantics<arbitrary>], iteration_bounds = array<i64: 1>, scalar_prefetch = 0 : i64, scratch_operands = 3 : i64, tpu.core_type = #tpu.core_type<tc>, window_params = [{transform_indices = @transform_0, window_bounds = array<i64: 128, 16>}, {pipeline_mode = #tpu.pipeline_mode<synchronous>, transform_indices = @transform_1, window_bounds = array<i64: 16, 384>}, {pipeline_mode = #tpu.pipeline_mode<synchronous>, transform_indices = @transform_2, window_bounds = array<i64: 1, 384>}, {pipeline_mode = #tpu.pipeline_mode<synchronous>, transform_indices = @transform_3, window_bounds = array<i64: 128, 384>}, {pipeline_mode = #tpu.pipeline_mode<synchronous>, transform_indices = @transform_4, window_bounds = array<i64: 1, 128>}, {pipeline_mode = #tpu.pipeline_mode<synchronous>, transform_indices = @transform_5, window_bounds = array<i64: 128, 384>}, {pipeline_mode = #tpu.pipeline_mode<synchronous>, transform_indices = @transform_6, window_bounds = array<i64: 1, 384>}, {pipeline_mode = #tpu.pipeline_mode<synchronous>, transform_indices = @transform_7, window_bounds = array<i64: 128, 384>}, {pipeline_mode = #tpu.pipeline_mode<synchronous>, transform_indices = @transform_8, window_bounds = array<i64: 1, 128>}, {pipeline_mode = #tpu.pipeline_mode<synchronous>, transform_indices = @transform_9, window_bounds = array<i64: 128, 128>}, {pipeline_mode = #tpu.pipeline_mode<synchronous>, transform_indices = @transform_10, window_bounds = array<i64: 1, 128>}, {transform_indices = @transform_11, window_bounds = array<i64: 128, 128>}]} {
    %c0_i32 = arith.constant 0 : i32
    %0 = arith.cmpi eq, %arg0, %c0_i32 : i32
    %1 = arith.extui %0 : i1 to i32
    %c0_i32_0 = arith.constant 0 : i32
    %2 = arith.cmpi ne, %1, %c0_i32_0 : i32
    scf.if %2 {
      %cst_526 = arith.constant 0.000000e+00 : f32
      %1245 = vector.broadcast %cst_526 : f32 to vector<2x8x128xf32>
      %c0_527 = arith.constant 0 : index
      %c0_528 = arith.constant 0 : index
      %c0_529 = arith.constant 0 : index
      %1246 = vector.load %arg13[%c0_527, %c0_528, %c0_529] : memref<2x8x128xf32, #tpu.memory_space<vmem>>, vector<2x8x128xf32>
      tpu.vector_store %arg13[%c0_527, %c0_528, %c0_529], %1245 {strides = array<i32>} : memref<2x8x128xf32, #tpu.memory_space<vmem>>, vector<2x8x128xf32>,
    } else {
    }
    %c0 = arith.constant 0 : index
    %c0_1 = arith.constant 0 : index
    %3 = vector.load %arg1[%c0, %c0_1] : memref<128x16xbf16, #tpu.memory_space<vmem>>, vector<128x16xbf16>
    %c0_2 = arith.constant 0 : index
    %c0_3 = arith.constant 0 : index
    %4 = vector.load %arg2[%c0_2, %c0_3] : memref<16x384xbf16, #tpu.memory_space<vmem>>, vector<16x384xbf16>
    %cst = arith.constant dense<0.000000e+00> : vector<128x384xf32>
    %5 = tpu.matmul %3, %4, %cst {dimension_numbers = #tpu.dot_dimension_numbers<[1], [0], [0], [1], [0, 0, 1, 1], [], []>} : vector<128x16xbf16>, vector<16x384xbf16>, vector<128x384xf32> -> vector<128x384xf32>
    %c0_4 = arith.constant 0 : index
    %c0_5 = arith.constant 0 : index
    %6 = vector.load %arg3[%c0_4, %c0_5] : memref<1x384xf32, #tpu.memory_space<vmem>>, vector<1x384xf32>
    %7 = vector.broadcast %6 : vector<1x384xf32> to vector<128x384xf32>
    %8 = arith.addf %5, %7 : vector<128x384xf32>
    %c0_6 = arith.constant 0 : index
    %c0_7 = arith.constant 0 : index
    %9 = vector.load %arg14[%c0_6, %c0_7] : memref<128x384xf32, #tpu.memory_space<vmem>>, vector<128x384xf32>
    tpu.vector_store %arg14[%c0_6, %c0_7], %8 {strides = array<i32>} : memref<128x384xf32, #tpu.memory_space<vmem>>, vector<128x384xf32>,
    %c0_8 = arith.constant 0 : index
    %c0_9 = arith.constant 0 : index
    %10 = vector.load %arg5[%c0_8, %c0_9] : memref<1x128xf32, #tpu.memory_space<vmem>>, vector<1x128xf32>
    %c0_10 = arith.constant 0 : index
    %c0_11 = arith.constant 0 : index
    %11 = vector.load %arg14[%c0_10, %c0_11] : memref<128x384xf32, #tpu.memory_space<vmem>>, vector<8x384xf32>
    %c0_12 = arith.constant 0 : index
    %c0_13 = arith.constant 0 : index
    %c0_14 = arith.constant 0 : index
    %12 = vector.load %arg13[%c0_12, %c0_13, %c0_14] : memref<2x8x128xf32, #tpu.memory_space<vmem>>, vector<1x8x128xf32>
    %13 = vector.shape_cast %12 : vector<1x8x128xf32> to vector<8x128xf32>
    %14 = arith.truncf %13 : vector<8x128xf32> to vector<8x128xbf16>
    %c0_15 = arith.constant 0 : index
    %c0_16 = arith.constant 0 : index
    %15 = vector.load %arg4[%c0_15, %c0_16] : memref<128x384xbf16, #tpu.memory_space<vmem>>, vector<128x384xbf16>
    %cst_17 = arith.constant dense<0.000000e+00> : vector<8x384xf32>
    %16 = tpu.matmul %14, %15, %cst_17 {dimension_numbers = #tpu.dot_dimension_numbers<[1], [0], [0], [1], [0, 0, 1, 1], [], []>} : vector<8x128xbf16>, vector<128x384xbf16>, vector<8x384xf32> -> vector<8x384xf32>
    %17 = vector.extract_strided_slice %11 {offsets = [0, 0], sizes = [8, 128], strides = [1, 1]} : vector<8x384xf32> to vector<8x128xf32>
    %18 = vector.extract_strided_slice %11 {offsets = [0, 128], sizes = [8, 128], strides = [1, 1]} : vector<8x384xf32> to vector<8x128xf32>
    %19 = vector.extract_strided_slice %11 {offsets = [0, 256], sizes = [8, 128], strides = [1, 1]} : vector<8x384xf32> to vector<8x128xf32>
    %20 = vector.extract_strided_slice %16 {offsets = [0, 0], sizes = [8, 128], strides = [1, 1]} : vector<8x384xf32> to vector<8x128xf32>
    %21 = vector.extract_strided_slice %16 {offsets = [0, 128], sizes = [8, 128], strides = [1, 1]} : vector<8x384xf32> to vector<8x128xf32>
    %22 = vector.extract_strided_slice %16 {offsets = [0, 256], sizes = [8, 128], strides = [1, 1]} : vector<8x384xf32> to vector<8x128xf32>
    %23 = vector.broadcast %10 : vector<1x128xf32> to vector<8x128xf32>
    %24 = arith.addf %22, %23 : vector<8x128xf32>
    %25 = arith.addf %17, %20 : vector<8x128xf32>
    %26 = arith.negf %25 : vector<8x128xf32>
    %27 = math.exp %26 : vector<8x128xf32>
    %cst_18 = arith.constant 1.000000e+00 : f32
    %28 = vector.broadcast %cst_18 : f32 to vector<8x128xf32>
    %29 = arith.addf %28, %27 : vector<8x128xf32>
    %30 = arith.divf %28, %29 : vector<8x128xf32>
    %31 = arith.addf %18, %21 : vector<8x128xf32>
    %32 = arith.negf %31 : vector<8x128xf32>
    %33 = math.exp %32 : vector<8x128xf32>
    %cst_19 = arith.constant 1.000000e+00 : f32
    %34 = vector.broadcast %cst_19 : f32 to vector<8x128xf32>
    %35 = arith.addf %34, %33 : vector<8x128xf32>
    %36 = arith.divf %34, %35 : vector<8x128xf32>
    %37 = arith.mulf %30, %24 : vector<8x128xf32>
    %38 = arith.addf %19, %37 : vector<8x128xf32>
    %39 = math.tanh %38 : vector<8x128xf32>
    %cst_20 = arith.constant 1.000000e+00 : f32
    %40 = vector.broadcast %cst_20 : f32 to vector<8x128xf32>
    %41 = arith.subf %40, %36 : vector<8x128xf32>
    %42 = arith.mulf %41, %39 : vector<8x128xf32>
    %43 = arith.mulf %36, %13 : vector<8x128xf32>
    %44 = arith.addf %42, %43 : vector<8x128xf32>
    %c0_21 = arith.constant 0 : index
    %c0_22 = arith.constant 0 : index
    %c0_23 = arith.constant 0 : index
    %45 = vector.load %arg13[%c0_21, %c0_22, %c0_23] : memref<2x8x128xf32, #tpu.memory_space<vmem>>, vector<1x8x128xf32>
    %46 = vector.shape_cast %45 : vector<1x8x128xf32> to vector<8x128xf32>
    %47 = vector.shape_cast %44 : vector<8x128xf32> to vector<1x8x128xf32>
    tpu.vector_store %arg13[%c0_21, %c0_22, %c0_23], %47 {strides = array<i32>} : memref<2x8x128xf32, #tpu.memory_space<vmem>>, vector<1x8x128xf32>,
    %c0_24 = arith.constant 0 : index
    %c0_25 = arith.constant 0 : index
    %48 = vector.load %arg15[%c0_24, %c0_25] : memref<128x128xf32, #tpu.memory_space<vmem>>, vector<8x128xf32>
    tpu.vector_store %arg15[%c0_24, %c0_25], %44 {strides = array<i32>} : memref<128x128xf32, #tpu.memory_space<vmem>>, vector<8x128xf32>,
    %c8 = arith.constant 8 : index
    %c0_26 = arith.constant 0 : index
    %49 = vector.load %arg14[%c8, %c0_26] : memref<128x384xf32, #tpu.memory_space<vmem>>, vector<8x384xf32>
    %c0_27 = arith.constant 0 : index
    %c0_28 = arith.constant 0 : index
    %c0_29 = arith.constant 0 : index
    %50 = vector.load %arg13[%c0_27, %c0_28, %c0_29] : memref<2x8x128xf32, #tpu.memory_space<vmem>>, vector<1x8x128xf32>
    %51 = vector.shape_cast %50 : vector<1x8x128xf32> to vector<8x128xf32>
    %52 = arith.truncf %51 : vector<8x128xf32> to vector<8x128xbf16>
    %c0_30 = arith.constant 0 : index
    %c0_31 = arith.constant 0 : index
    %53 = vector.load %arg4[%c0_30, %c0_31] : memref<128x384xbf16, #tpu.memory_space<vmem>>, vector<128x384xbf16>
    %cst_32 = arith.constant dense<0.000000e+00> : vector<8x384xf32>
    %54 = tpu.matmul %52, %53, %cst_32 {dimension_numbers = #tpu.dot_dimension_numbers<[1], [0], [0], [1], [0, 0, 1, 1], [], []>} : vector<8x128xbf16>, vector<128x384xbf16>, vector<8x384xf32> -> vector<8x384xf32>
    %55 = vector.extract_strided_slice %49 {offsets = [0, 0], sizes = [8, 128], strides = [1, 1]} : vector<8x384xf32> to vector<8x128xf32>
    %56 = vector.extract_strided_slice %49 {offsets = [0, 128], sizes = [8, 128], strides = [1, 1]} : vector<8x384xf32> to vector<8x128xf32>
    %57 = vector.extract_strided_slice %49 {offsets = [0, 256], sizes = [8, 128], strides = [1, 1]} : vector<8x384xf32> to vector<8x128xf32>
    %58 = vector.extract_strided_slice %54 {offsets = [0, 0], sizes = [8, 128], strides = [1, 1]} : vector<8x384xf32> to vector<8x128xf32>
    %59 = vector.extract_strided_slice %54 {offsets = [0, 128], sizes = [8, 128], strides = [1, 1]} : vector<8x384xf32> to vector<8x128xf32>
    %60 = vector.extract_strided_slice %54 {offsets = [0, 256], sizes = [8, 128], strides = [1, 1]} : vector<8x384xf32> to vector<8x128xf32>
    %61 = vector.broadcast %10 : vector<1x128xf32> to vector<8x128xf32>
    %62 = arith.addf %60, %61 : vector<8x128xf32>
    %63 = arith.addf %55, %58 : vector<8x128xf32>
    %64 = arith.negf %63 : vector<8x128xf32>
    %65 = math.exp %64 : vector<8x128xf32>
    %cst_33 = arith.constant 1.000000e+00 : f32
    %66 = vector.broadcast %cst_33 : f32 to vector<8x128xf32>
    %67 = arith.addf %66, %65 : vector<8x128xf32>
    %68 = arith.divf %66, %67 : vector<8x128xf32>
    %69 = arith.addf %56, %59 : vector<8x128xf32>
    %70 = arith.negf %69 : vector<8x128xf32>
    %71 = math.exp %70 : vector<8x128xf32>
    %cst_34 = arith.constant 1.000000e+00 : f32
    %72 = vector.broadcast %cst_34 : f32 to vector<8x128xf32>
    %73 = arith.addf %72, %71 : vector<8x128xf32>
    %74 = arith.divf %72, %73 : vector<8x128xf32>
    %75 = arith.mulf %68, %62 : vector<8x128xf32>
    %76 = arith.addf %57, %75 : vector<8x128xf32>
    %77 = math.tanh %76 : vector<8x128xf32>
    %cst_35 = arith.constant 1.000000e+00 : f32
    %78 = vector.broadcast %cst_35 : f32 to vector<8x128xf32>
    %79 = arith.subf %78, %74 : vector<8x128xf32>
    %80 = arith.mulf %79, %77 : vector<8x128xf32>
    %81 = arith.mulf %74, %51 : vector<8x128xf32>
    %82 = arith.addf %80, %81 : vector<8x128xf32>
    %c0_36 = arith.constant 0 : index
    %c0_37 = arith.constant 0 : index
    %c0_38 = arith.constant 0 : index
    %83 = vector.load %arg13[%c0_36, %c0_37, %c0_38] : memref<2x8x128xf32, #tpu.memory_space<vmem>>, vector<1x8x128xf32>
    %84 = vector.shape_cast %83 : vector<1x8x128xf32> to vector<8x128xf32>
    %85 = vector.shape_cast %82 : vector<8x128xf32> to vector<1x8x128xf32>
    tpu.vector_store %arg13[%c0_36, %c0_37, %c0_38], %85 {strides = array<i32>} : memref<2x8x128xf32, #tpu.memory_space<vmem>>, vector<1x8x128xf32>,
    %c8_39 = arith.constant 8 : index
    %c0_40 = arith.constant 0 : index
    %86 = vector.load %arg15[%c8_39, %c0_40] : memref<128x128xf32, #tpu.memory_space<vmem>>, vector<8x128xf32>
    tpu.vector_store %arg15[%c8_39, %c0_40], %82 {strides = array<i32>} : memref<128x128xf32, #tpu.memory_space<vmem>>, vector<8x128xf32>,
    %c16 = arith.constant 16 : index
    %c0_41 = arith.constant 0 : index
    %87 = vector.load %arg14[%c16, %c0_41] : memref<128x384xf32, #tpu.memory_space<vmem>>, vector<8x384xf32>
    %c0_42 = arith.constant 0 : index
    %c0_43 = arith.constant 0 : index
    %c0_44 = arith.constant 0 : index
    %88 = vector.load %arg13[%c0_42, %c0_43, %c0_44] : memref<2x8x128xf32, #tpu.memory_space<vmem>>, vector<1x8x128xf32>
    %89 = vector.shape_cast %88 : vector<1x8x128xf32> to vector<8x128xf32>
    %90 = arith.truncf %89 : vector<8x128xf32> to vector<8x128xbf16>
    %c0_45 = arith.constant 0 : index
    %c0_46 = arith.constant 0 : index
    %91 = vector.load %arg4[%c0_45, %c0_46] : memref<128x384xbf16, #tpu.memory_space<vmem>>, vector<128x384xbf16>
    %cst_47 = arith.constant dense<0.000000e+00> : vector<8x384xf32>
    %92 = tpu.matmul %90, %91, %cst_47 {dimension_numbers = #tpu.dot_dimension_numbers<[1], [0], [0], [1], [0, 0, 1, 1], [], []>} : vector<8x128xbf16>, vector<128x384xbf16>, vector<8x384xf32> -> vector<8x384xf32>
    %93 = vector.extract_strided_slice %87 {offsets = [0, 0], sizes = [8, 128], strides = [1, 1]} : vector<8x384xf32> to vector<8x128xf32>
    %94 = vector.extract_strided_slice %87 {offsets = [0, 128], sizes = [8, 128], strides = [1, 1]} : vector<8x384xf32> to vector<8x128xf32>
    %95 = vector.extract_strided_slice %87 {offsets = [0, 256], sizes = [8, 128], strides = [1, 1]} : vector<8x384xf32> to vector<8x128xf32>
    %96 = vector.extract_strided_slice %92 {offsets = [0, 0], sizes = [8, 128], strides = [1, 1]} : vector<8x384xf32> to vector<8x128xf32>
    %97 = vector.extract_strided_slice %92 {offsets = [0, 128], sizes = [8, 128], strides = [1, 1]} : vector<8x384xf32> to vector<8x128xf32>
    %98 = vector.extract_strided_slice %92 {offsets = [0, 256], sizes = [8, 128], strides = [1, 1]} : vector<8x384xf32> to vector<8x128xf32>
    %99 = vector.broadcast %10 : vector<1x128xf32> to vector<8x128xf32>
    %100 = arith.addf %98, %99 : vector<8x128xf32>
    %101 = arith.addf %93, %96 : vector<8x128xf32>
    %102 = arith.negf %101 : vector<8x128xf32>
    %103 = math.exp %102 : vector<8x128xf32>
    %cst_48 = arith.constant 1.000000e+00 : f32
    %104 = vector.broadcast %cst_48 : f32 to vector<8x128xf32>
    %105 = arith.addf %104, %103 : vector<8x128xf32>
    %106 = arith.divf %104, %105 : vector<8x128xf32>
    %107 = arith.addf %94, %97 : vector<8x128xf32>
    %108 = arith.negf %107 : vector<8x128xf32>
    %109 = math.exp %108 : vector<8x128xf32>
    %cst_49 = arith.constant 1.000000e+00 : f32
    %110 = vector.broadcast %cst_49 : f32 to vector<8x128xf32>
    %111 = arith.addf %110, %109 : vector<8x128xf32>
    %112 = arith.divf %110, %111 : vector<8x128xf32>
    %113 = arith.mulf %106, %100 : vector<8x128xf32>
    %114 = arith.addf %95, %113 : vector<8x128xf32>
    %115 = math.tanh %114 : vector<8x128xf32>
    %cst_50 = arith.constant 1.000000e+00 : f32
    %116 = vector.broadcast %cst_50 : f32 to vector<8x128xf32>
    %117 = arith.subf %116, %112 : vector<8x128xf32>
    %118 = arith.mulf %117, %115 : vector<8x128xf32>
    %119 = arith.mulf %112, %89 : vector<8x128xf32>
    %120 = arith.addf %118, %119 : vector<8x128xf32>
    %c0_51 = arith.constant 0 : index
    %c0_52 = arith.constant 0 : index
    %c0_53 = arith.constant 0 : index
    %121 = vector.load %arg13[%c0_51, %c0_52, %c0_53] : memref<2x8x128xf32, #tpu.memory_space<vmem>>, vector<1x8x128xf32>
    %122 = vector.shape_cast %121 : vector<1x8x128xf32> to vector<8x128xf32>
    %123 = vector.shape_cast %120 : vector<8x128xf32> to vector<1x8x128xf32>
    tpu.vector_store %arg13[%c0_51, %c0_52, %c0_53], %123 {strides = array<i32>} : memref<2x8x128xf32, #tpu.memory_space<vmem>>, vector<1x8x128xf32>,
    %c16_54 = arith.constant 16 : index
    %c0_55 = arith.constant 0 : index
    %124 = vector.load %arg15[%c16_54, %c0_55] : memref<128x128xf32, #tpu.memory_space<vmem>>, vector<8x128xf32>
    tpu.vector_store %arg15[%c16_54, %c0_55], %120 {strides = array<i32>} : memref<128x128xf32, #tpu.memory_space<vmem>>, vector<8x128xf32>,
    %c24 = arith.constant 24 : index
    %c0_56 = arith.constant 0 : index
    %125 = vector.load %arg14[%c24, %c0_56] : memref<128x384xf32, #tpu.memory_space<vmem>>, vector<8x384xf32>
    %c0_57 = arith.constant 0 : index
    %c0_58 = arith.constant 0 : index
    %c0_59 = arith.constant 0 : index
    %126 = vector.load %arg13[%c0_57, %c0_58, %c0_59] : memref<2x8x128xf32, #tpu.memory_space<vmem>>, vector<1x8x128xf32>
    %127 = vector.shape_cast %126 : vector<1x8x128xf32> to vector<8x128xf32>
    %128 = arith.truncf %127 : vector<8x128xf32> to vector<8x128xbf16>
    %c0_60 = arith.constant 0 : index
    %c0_61 = arith.constant 0 : index
    %129 = vector.load %arg4[%c0_60, %c0_61] : memref<128x384xbf16, #tpu.memory_space<vmem>>, vector<128x384xbf16>
    %cst_62 = arith.constant dense<0.000000e+00> : vector<8x384xf32>
    %130 = tpu.matmul %128, %129, %cst_62 {dimension_numbers = #tpu.dot_dimension_numbers<[1], [0], [0], [1], [0, 0, 1, 1], [], []>} : vector<8x128xbf16>, vector<128x384xbf16>, vector<8x384xf32> -> vector<8x384xf32>
    %131 = vector.extract_strided_slice %125 {offsets = [0, 0], sizes = [8, 128], strides = [1, 1]} : vector<8x384xf32> to vector<8x128xf32>
    %132 = vector.extract_strided_slice %125 {offsets = [0, 128], sizes = [8, 128], strides = [1, 1]} : vector<8x384xf32> to vector<8x128xf32>
    %133 = vector.extract_strided_slice %125 {offsets = [0, 256], sizes = [8, 128], strides = [1, 1]} : vector<8x384xf32> to vector<8x128xf32>
    %134 = vector.extract_strided_slice %130 {offsets = [0, 0], sizes = [8, 128], strides = [1, 1]} : vector<8x384xf32> to vector<8x128xf32>
    %135 = vector.extract_strided_slice %130 {offsets = [0, 128], sizes = [8, 128], strides = [1, 1]} : vector<8x384xf32> to vector<8x128xf32>
    %136 = vector.extract_strided_slice %130 {offsets = [0, 256], sizes = [8, 128], strides = [1, 1]} : vector<8x384xf32> to vector<8x128xf32>
    %137 = vector.broadcast %10 : vector<1x128xf32> to vector<8x128xf32>
    %138 = arith.addf %136, %137 : vector<8x128xf32>
    %139 = arith.addf %131, %134 : vector<8x128xf32>
    %140 = arith.negf %139 : vector<8x128xf32>
    %141 = math.exp %140 : vector<8x128xf32>
    %cst_63 = arith.constant 1.000000e+00 : f32
    %142 = vector.broadcast %cst_63 : f32 to vector<8x128xf32>
    %143 = arith.addf %142, %141 : vector<8x128xf32>
    %144 = arith.divf %142, %143 : vector<8x128xf32>
    %145 = arith.addf %132, %135 : vector<8x128xf32>
    %146 = arith.negf %145 : vector<8x128xf32>
    %147 = math.exp %146 : vector<8x128xf32>
    %cst_64 = arith.constant 1.000000e+00 : f32
    %148 = vector.broadcast %cst_64 : f32 to vector<8x128xf32>
    %149 = arith.addf %148, %147 : vector<8x128xf32>
    %150 = arith.divf %148, %149 : vector<8x128xf32>
    %151 = arith.mulf %144, %138 : vector<8x128xf32>
    %152 = arith.addf %133, %151 : vector<8x128xf32>
    %153 = math.tanh %152 : vector<8x128xf32>
    %cst_65 = arith.constant 1.000000e+00 : f32
    %154 = vector.broadcast %cst_65 : f32 to vector<8x128xf32>
    %155 = arith.subf %154, %150 : vector<8x128xf32>
    %156 = arith.mulf %155, %153 : vector<8x128xf32>
    %157 = arith.mulf %150, %127 : vector<8x128xf32>
    %158 = arith.addf %156, %157 : vector<8x128xf32>
    %c0_66 = arith.constant 0 : index
    %c0_67 = arith.constant 0 : index
    %c0_68 = arith.constant 0 : index
    %159 = vector.load %arg13[%c0_66, %c0_67, %c0_68] : memref<2x8x128xf32, #tpu.memory_space<vmem>>, vector<1x8x128xf32>
    %160 = vector.shape_cast %159 : vector<1x8x128xf32> to vector<8x128xf32>
    %161 = vector.shape_cast %158 : vector<8x128xf32> to vector<1x8x128xf32>
    tpu.vector_store %arg13[%c0_66, %c0_67, %c0_68], %161 {strides = array<i32>} : memref<2x8x128xf32, #tpu.memory_space<vmem>>, vector<1x8x128xf32>,
    %c24_69 = arith.constant 24 : index
    %c0_70 = arith.constant 0 : index
    %162 = vector.load %arg15[%c24_69, %c0_70] : memref<128x128xf32, #tpu.memory_space<vmem>>, vector<8x128xf32>
    tpu.vector_store %arg15[%c24_69, %c0_70], %158 {strides = array<i32>} : memref<128x128xf32, #tpu.memory_space<vmem>>, vector<8x128xf32>,
    %c32 = arith.constant 32 : index
    %c0_71 = arith.constant 0 : index
    %163 = vector.load %arg14[%c32, %c0_71] : memref<128x384xf32, #tpu.memory_space<vmem>>, vector<8x384xf32>
    %c0_72 = arith.constant 0 : index
    %c0_73 = arith.constant 0 : index
    %c0_74 = arith.constant 0 : index
    %164 = vector.load %arg13[%c0_72, %c0_73, %c0_74] : memref<2x8x128xf32, #tpu.memory_space<vmem>>, vector<1x8x128xf32>
    %165 = vector.shape_cast %164 : vector<1x8x128xf32> to vector<8x128xf32>
    %166 = arith.truncf %165 : vector<8x128xf32> to vector<8x128xbf16>
    %c0_75 = arith.constant 0 : index
    %c0_76 = arith.constant 0 : index
    %167 = vector.load %arg4[%c0_75, %c0_76] : memref<128x384xbf16, #tpu.memory_space<vmem>>, vector<128x384xbf16>
    %cst_77 = arith.constant dense<0.000000e+00> : vector<8x384xf32>
    %168 = tpu.matmul %166, %167, %cst_77 {dimension_numbers = #tpu.dot_dimension_numbers<[1], [0], [0], [1], [0, 0, 1, 1], [], []>} : vector<8x128xbf16>, vector<128x384xbf16>, vector<8x384xf32> -> vector<8x384xf32>
    %169 = vector.extract_strided_slice %163 {offsets = [0, 0], sizes = [8, 128], strides = [1, 1]} : vector<8x384xf32> to vector<8x128xf32>
    %170 = vector.extract_strided_slice %163 {offsets = [0, 128], sizes = [8, 128], strides = [1, 1]} : vector<8x384xf32> to vector<8x128xf32>
    %171 = vector.extract_strided_slice %163 {offsets = [0, 256], sizes = [8, 128], strides = [1, 1]} : vector<8x384xf32> to vector<8x128xf32>
    %172 = vector.extract_strided_slice %168 {offsets = [0, 0], sizes = [8, 128], strides = [1, 1]} : vector<8x384xf32> to vector<8x128xf32>
    %173 = vector.extract_strided_slice %168 {offsets = [0, 128], sizes = [8, 128], strides = [1, 1]} : vector<8x384xf32> to vector<8x128xf32>
    %174 = vector.extract_strided_slice %168 {offsets = [0, 256], sizes = [8, 128], strides = [1, 1]} : vector<8x384xf32> to vector<8x128xf32>
    %175 = vector.broadcast %10 : vector<1x128xf32> to vector<8x128xf32>
    %176 = arith.addf %174, %175 : vector<8x128xf32>
    %177 = arith.addf %169, %172 : vector<8x128xf32>
    %178 = arith.negf %177 : vector<8x128xf32>
    %179 = math.exp %178 : vector<8x128xf32>
    %cst_78 = arith.constant 1.000000e+00 : f32
    %180 = vector.broadcast %cst_78 : f32 to vector<8x128xf32>
    %181 = arith.addf %180, %179 : vector<8x128xf32>
    %182 = arith.divf %180, %181 : vector<8x128xf32>
    %183 = arith.addf %170, %173 : vector<8x128xf32>
    %184 = arith.negf %183 : vector<8x128xf32>
    %185 = math.exp %184 : vector<8x128xf32>
    %cst_79 = arith.constant 1.000000e+00 : f32
    %186 = vector.broadcast %cst_79 : f32 to vector<8x128xf32>
    %187 = arith.addf %186, %185 : vector<8x128xf32>
    %188 = arith.divf %186, %187 : vector<8x128xf32>
    %189 = arith.mulf %182, %176 : vector<8x128xf32>
    %190 = arith.addf %171, %189 : vector<8x128xf32>
    %191 = math.tanh %190 : vector<8x128xf32>
    %cst_80 = arith.constant 1.000000e+00 : f32
    %192 = vector.broadcast %cst_80 : f32 to vector<8x128xf32>
    %193 = arith.subf %192, %188 : vector<8x128xf32>
    %194 = arith.mulf %193, %191 : vector<8x128xf32>
    %195 = arith.mulf %188, %165 : vector<8x128xf32>
    %196 = arith.addf %194, %195 : vector<8x128xf32>
    %c0_81 = arith.constant 0 : index
    %c0_82 = arith.constant 0 : index
    %c0_83 = arith.constant 0 : index
    %197 = vector.load %arg13[%c0_81, %c0_82, %c0_83] : memref<2x8x128xf32, #tpu.memory_space<vmem>>, vector<1x8x128xf32>
    %198 = vector.shape_cast %197 : vector<1x8x128xf32> to vector<8x128xf32>
    %199 = vector.shape_cast %196 : vector<8x128xf32> to vector<1x8x128xf32>
    tpu.vector_store %arg13[%c0_81, %c0_82, %c0_83], %199 {strides = array<i32>} : memref<2x8x128xf32, #tpu.memory_space<vmem>>, vector<1x8x128xf32>,
    %c32_84 = arith.constant 32 : index
    %c0_85 = arith.constant 0 : index
    %200 = vector.load %arg15[%c32_84, %c0_85] : memref<128x128xf32, #tpu.memory_space<vmem>>, vector<8x128xf32>
    tpu.vector_store %arg15[%c32_84, %c0_85], %196 {strides = array<i32>} : memref<128x128xf32, #tpu.memory_space<vmem>>, vector<8x128xf32>,
    %c40 = arith.constant 40 : index
    %c0_86 = arith.constant 0 : index
    %201 = vector.load %arg14[%c40, %c0_86] : memref<128x384xf32, #tpu.memory_space<vmem>>, vector<8x384xf32>
    %c0_87 = arith.constant 0 : index
    %c0_88 = arith.constant 0 : index
    %c0_89 = arith.constant 0 : index
    %202 = vector.load %arg13[%c0_87, %c0_88, %c0_89] : memref<2x8x128xf32, #tpu.memory_space<vmem>>, vector<1x8x128xf32>
    %203 = vector.shape_cast %202 : vector<1x8x128xf32> to vector<8x128xf32>
    %204 = arith.truncf %203 : vector<8x128xf32> to vector<8x128xbf16>
    %c0_90 = arith.constant 0 : index
    %c0_91 = arith.constant 0 : index
    %205 = vector.load %arg4[%c0_90, %c0_91] : memref<128x384xbf16, #tpu.memory_space<vmem>>, vector<128x384xbf16>
    %cst_92 = arith.constant dense<0.000000e+00> : vector<8x384xf32>
    %206 = tpu.matmul %204, %205, %cst_92 {dimension_numbers = #tpu.dot_dimension_numbers<[1], [0], [0], [1], [0, 0, 1, 1], [], []>} : vector<8x128xbf16>, vector<128x384xbf16>, vector<8x384xf32> -> vector<8x384xf32>
    %207 = vector.extract_strided_slice %201 {offsets = [0, 0], sizes = [8, 128], strides = [1, 1]} : vector<8x384xf32> to vector<8x128xf32>
    %208 = vector.extract_strided_slice %201 {offsets = [0, 128], sizes = [8, 128], strides = [1, 1]} : vector<8x384xf32> to vector<8x128xf32>
    %209 = vector.extract_strided_slice %201 {offsets = [0, 256], sizes = [8, 128], strides = [1, 1]} : vector<8x384xf32> to vector<8x128xf32>
    %210 = vector.extract_strided_slice %206 {offsets = [0, 0], sizes = [8, 128], strides = [1, 1]} : vector<8x384xf32> to vector<8x128xf32>
    %211 = vector.extract_strided_slice %206 {offsets = [0, 128], sizes = [8, 128], strides = [1, 1]} : vector<8x384xf32> to vector<8x128xf32>
    %212 = vector.extract_strided_slice %206 {offsets = [0, 256], sizes = [8, 128], strides = [1, 1]} : vector<8x384xf32> to vector<8x128xf32>
    %213 = vector.broadcast %10 : vector<1x128xf32> to vector<8x128xf32>
    %214 = arith.addf %212, %213 : vector<8x128xf32>
    %215 = arith.addf %207, %210 : vector<8x128xf32>
    %216 = arith.negf %215 : vector<8x128xf32>
    %217 = math.exp %216 : vector<8x128xf32>
    %cst_93 = arith.constant 1.000000e+00 : f32
    %218 = vector.broadcast %cst_93 : f32 to vector<8x128xf32>
    %219 = arith.addf %218, %217 : vector<8x128xf32>
    %220 = arith.divf %218, %219 : vector<8x128xf32>
    %221 = arith.addf %208, %211 : vector<8x128xf32>
    %222 = arith.negf %221 : vector<8x128xf32>
    %223 = math.exp %222 : vector<8x128xf32>
    %cst_94 = arith.constant 1.000000e+00 : f32
    %224 = vector.broadcast %cst_94 : f32 to vector<8x128xf32>
    %225 = arith.addf %224, %223 : vector<8x128xf32>
    %226 = arith.divf %224, %225 : vector<8x128xf32>
    %227 = arith.mulf %220, %214 : vector<8x128xf32>
    %228 = arith.addf %209, %227 : vector<8x128xf32>
    %229 = math.tanh %228 : vector<8x128xf32>
    %cst_95 = arith.constant 1.000000e+00 : f32
    %230 = vector.broadcast %cst_95 : f32 to vector<8x128xf32>
    %231 = arith.subf %230, %226 : vector<8x128xf32>
    %232 = arith.mulf %231, %229 : vector<8x128xf32>
    %233 = arith.mulf %226, %203 : vector<8x128xf32>
    %234 = arith.addf %232, %233 : vector<8x128xf32>
    %c0_96 = arith.constant 0 : index
    %c0_97 = arith.constant 0 : index
    %c0_98 = arith.constant 0 : index
    %235 = vector.load %arg13[%c0_96, %c0_97, %c0_98] : memref<2x8x128xf32, #tpu.memory_space<vmem>>, vector<1x8x128xf32>
    %236 = vector.shape_cast %235 : vector<1x8x128xf32> to vector<8x128xf32>
    %237 = vector.shape_cast %234 : vector<8x128xf32> to vector<1x8x128xf32>
    tpu.vector_store %arg13[%c0_96, %c0_97, %c0_98], %237 {strides = array<i32>} : memref<2x8x128xf32, #tpu.memory_space<vmem>>, vector<1x8x128xf32>,
    %c40_99 = arith.constant 40 : index
    %c0_100 = arith.constant 0 : index
    %238 = vector.load %arg15[%c40_99, %c0_100] : memref<128x128xf32, #tpu.memory_space<vmem>>, vector<8x128xf32>
    tpu.vector_store %arg15[%c40_99, %c0_100], %234 {strides = array<i32>} : memref<128x128xf32, #tpu.memory_space<vmem>>, vector<8x128xf32>,
    %c48 = arith.constant 48 : index
    %c0_101 = arith.constant 0 : index
    %239 = vector.load %arg14[%c48, %c0_101] : memref<128x384xf32, #tpu.memory_space<vmem>>, vector<8x384xf32>
    %c0_102 = arith.constant 0 : index
    %c0_103 = arith.constant 0 : index
    %c0_104 = arith.constant 0 : index
    %240 = vector.load %arg13[%c0_102, %c0_103, %c0_104] : memref<2x8x128xf32, #tpu.memory_space<vmem>>, vector<1x8x128xf32>
    %241 = vector.shape_cast %240 : vector<1x8x128xf32> to vector<8x128xf32>
    %242 = arith.truncf %241 : vector<8x128xf32> to vector<8x128xbf16>
    %c0_105 = arith.constant 0 : index
    %c0_106 = arith.constant 0 : index
    %243 = vector.load %arg4[%c0_105, %c0_106] : memref<128x384xbf16, #tpu.memory_space<vmem>>, vector<128x384xbf16>
    %cst_107 = arith.constant dense<0.000000e+00> : vector<8x384xf32>
    %244 = tpu.matmul %242, %243, %cst_107 {dimension_numbers = #tpu.dot_dimension_numbers<[1], [0], [0], [1], [0, 0, 1, 1], [], []>} : vector<8x128xbf16>, vector<128x384xbf16>, vector<8x384xf32> -> vector<8x384xf32>
    %245 = vector.extract_strided_slice %239 {offsets = [0, 0], sizes = [8, 128], strides = [1, 1]} : vector<8x384xf32> to vector<8x128xf32>
    %246 = vector.extract_strided_slice %239 {offsets = [0, 128], sizes = [8, 128], strides = [1, 1]} : vector<8x384xf32> to vector<8x128xf32>
    %247 = vector.extract_strided_slice %239 {offsets = [0, 256], sizes = [8, 128], strides = [1, 1]} : vector<8x384xf32> to vector<8x128xf32>
    %248 = vector.extract_strided_slice %244 {offsets = [0, 0], sizes = [8, 128], strides = [1, 1]} : vector<8x384xf32> to vector<8x128xf32>
    %249 = vector.extract_strided_slice %244 {offsets = [0, 128], sizes = [8, 128], strides = [1, 1]} : vector<8x384xf32> to vector<8x128xf32>
    %250 = vector.extract_strided_slice %244 {offsets = [0, 256], sizes = [8, 128], strides = [1, 1]} : vector<8x384xf32> to vector<8x128xf32>
    %251 = vector.broadcast %10 : vector<1x128xf32> to vector<8x128xf32>
    %252 = arith.addf %250, %251 : vector<8x128xf32>
    %253 = arith.addf %245, %248 : vector<8x128xf32>
    %254 = arith.negf %253 : vector<8x128xf32>
    %255 = math.exp %254 : vector<8x128xf32>
    %cst_108 = arith.constant 1.000000e+00 : f32
    %256 = vector.broadcast %cst_108 : f32 to vector<8x128xf32>
    %257 = arith.addf %256, %255 : vector<8x128xf32>
    %258 = arith.divf %256, %257 : vector<8x128xf32>
    %259 = arith.addf %246, %249 : vector<8x128xf32>
    %260 = arith.negf %259 : vector<8x128xf32>
    %261 = math.exp %260 : vector<8x128xf32>
    %cst_109 = arith.constant 1.000000e+00 : f32
    %262 = vector.broadcast %cst_109 : f32 to vector<8x128xf32>
    %263 = arith.addf %262, %261 : vector<8x128xf32>
    %264 = arith.divf %262, %263 : vector<8x128xf32>
    %265 = arith.mulf %258, %252 : vector<8x128xf32>
    %266 = arith.addf %247, %265 : vector<8x128xf32>
    %267 = math.tanh %266 : vector<8x128xf32>
    %cst_110 = arith.constant 1.000000e+00 : f32
    %268 = vector.broadcast %cst_110 : f32 to vector<8x128xf32>
    %269 = arith.subf %268, %264 : vector<8x128xf32>
    %270 = arith.mulf %269, %267 : vector<8x128xf32>
    %271 = arith.mulf %264, %241 : vector<8x128xf32>
    %272 = arith.addf %270, %271 : vector<8x128xf32>
    %c0_111 = arith.constant 0 : index
    %c0_112 = arith.constant 0 : index
    %c0_113 = arith.constant 0 : index
    %273 = vector.load %arg13[%c0_111, %c0_112, %c0_113] : memref<2x8x128xf32, #tpu.memory_space<vmem>>, vector<1x8x128xf32>
    %274 = vector.shape_cast %273 : vector<1x8x128xf32> to vector<8x128xf32>
    %275 = vector.shape_cast %272 : vector<8x128xf32> to vector<1x8x128xf32>
    tpu.vector_store %arg13[%c0_111, %c0_112, %c0_113], %275 {strides = array<i32>} : memref<2x8x128xf32, #tpu.memory_space<vmem>>, vector<1x8x128xf32>,
    %c48_114 = arith.constant 48 : index
    %c0_115 = arith.constant 0 : index
    %276 = vector.load %arg15[%c48_114, %c0_115] : memref<128x128xf32, #tpu.memory_space<vmem>>, vector<8x128xf32>
    tpu.vector_store %arg15[%c48_114, %c0_115], %272 {strides = array<i32>} : memref<128x128xf32, #tpu.memory_space<vmem>>, vector<8x128xf32>,
    %c56 = arith.constant 56 : index
    %c0_116 = arith.constant 0 : index
    %277 = vector.load %arg14[%c56, %c0_116] : memref<128x384xf32, #tpu.memory_space<vmem>>, vector<8x384xf32>
    %c0_117 = arith.constant 0 : index
    %c0_118 = arith.constant 0 : index
    %c0_119 = arith.constant 0 : index
    %278 = vector.load %arg13[%c0_117, %c0_118, %c0_119] : memref<2x8x128xf32, #tpu.memory_space<vmem>>, vector<1x8x128xf32>
    %279 = vector.shape_cast %278 : vector<1x8x128xf32> to vector<8x128xf32>
    %280 = arith.truncf %279 : vector<8x128xf32> to vector<8x128xbf16>
    %c0_120 = arith.constant 0 : index
    %c0_121 = arith.constant 0 : index
    %281 = vector.load %arg4[%c0_120, %c0_121] : memref<128x384xbf16, #tpu.memory_space<vmem>>, vector<128x384xbf16>
    %cst_122 = arith.constant dense<0.000000e+00> : vector<8x384xf32>
    %282 = tpu.matmul %280, %281, %cst_122 {dimension_numbers = #tpu.dot_dimension_numbers<[1], [0], [0], [1], [0, 0, 1, 1], [], []>} : vector<8x128xbf16>, vector<128x384xbf16>, vector<8x384xf32> -> vector<8x384xf32>
    %283 = vector.extract_strided_slice %277 {offsets = [0, 0], sizes = [8, 128], strides = [1, 1]} : vector<8x384xf32> to vector<8x128xf32>
    %284 = vector.extract_strided_slice %277 {offsets = [0, 128], sizes = [8, 128], strides = [1, 1]} : vector<8x384xf32> to vector<8x128xf32>
    %285 = vector.extract_strided_slice %277 {offsets = [0, 256], sizes = [8, 128], strides = [1, 1]} : vector<8x384xf32> to vector<8x128xf32>
    %286 = vector.extract_strided_slice %282 {offsets = [0, 0], sizes = [8, 128], strides = [1, 1]} : vector<8x384xf32> to vector<8x128xf32>
    %287 = vector.extract_strided_slice %282 {offsets = [0, 128], sizes = [8, 128], strides = [1, 1]} : vector<8x384xf32> to vector<8x128xf32>
    %288 = vector.extract_strided_slice %282 {offsets = [0, 256], sizes = [8, 128], strides = [1, 1]} : vector<8x384xf32> to vector<8x128xf32>
    %289 = vector.broadcast %10 : vector<1x128xf32> to vector<8x128xf32>
    %290 = arith.addf %288, %289 : vector<8x128xf32>
    %291 = arith.addf %283, %286 : vector<8x128xf32>
    %292 = arith.negf %291 : vector<8x128xf32>
    %293 = math.exp %292 : vector<8x128xf32>
    %cst_123 = arith.constant 1.000000e+00 : f32
    %294 = vector.broadcast %cst_123 : f32 to vector<8x128xf32>
    %295 = arith.addf %294, %293 : vector<8x128xf32>
    %296 = arith.divf %294, %295 : vector<8x128xf32>
    %297 = arith.addf %284, %287 : vector<8x128xf32>
    %298 = arith.negf %297 : vector<8x128xf32>
    %299 = math.exp %298 : vector<8x128xf32>
    %cst_124 = arith.constant 1.000000e+00 : f32
    %300 = vector.broadcast %cst_124 : f32 to vector<8x128xf32>
    %301 = arith.addf %300, %299 : vector<8x128xf32>
    %302 = arith.divf %300, %301 : vector<8x128xf32>
    %303 = arith.mulf %296, %290 : vector<8x128xf32>
    %304 = arith.addf %285, %303 : vector<8x128xf32>
    %305 = math.tanh %304 : vector<8x128xf32>
    %cst_125 = arith.constant 1.000000e+00 : f32
    %306 = vector.broadcast %cst_125 : f32 to vector<8x128xf32>
    %307 = arith.subf %306, %302 : vector<8x128xf32>
    %308 = arith.mulf %307, %305 : vector<8x128xf32>
    %309 = arith.mulf %302, %279 : vector<8x128xf32>
    %310 = arith.addf %308, %309 : vector<8x128xf32>
    %c0_126 = arith.constant 0 : index
    %c0_127 = arith.constant 0 : index
    %c0_128 = arith.constant 0 : index
    %311 = vector.load %arg13[%c0_126, %c0_127, %c0_128] : memref<2x8x128xf32, #tpu.memory_space<vmem>>, vector<1x8x128xf32>
    %312 = vector.shape_cast %311 : vector<1x8x128xf32> to vector<8x128xf32>
    %313 = vector.shape_cast %310 : vector<8x128xf32> to vector<1x8x128xf32>
    tpu.vector_store %arg13[%c0_126, %c0_127, %c0_128], %313 {strides = array<i32>} : memref<2x8x128xf32, #tpu.memory_space<vmem>>, vector<1x8x128xf32>,
    %c56_129 = arith.constant 56 : index
    %c0_130 = arith.constant 0 : index
    %314 = vector.load %arg15[%c56_129, %c0_130] : memref<128x128xf32, #tpu.memory_space<vmem>>, vector<8x128xf32>
    tpu.vector_store %arg15[%c56_129, %c0_130], %310 {strides = array<i32>} : memref<128x128xf32, #tpu.memory_space<vmem>>, vector<8x128xf32>,
    %c64 = arith.constant 64 : index
    %c0_131 = arith.constant 0 : index
    %315 = vector.load %arg14[%c64, %c0_131] : memref<128x384xf32, #tpu.memory_space<vmem>>, vector<8x384xf32>
    %c0_132 = arith.constant 0 : index
    %c0_133 = arith.constant 0 : index
    %c0_134 = arith.constant 0 : index
    %316 = vector.load %arg13[%c0_132, %c0_133, %c0_134] : memref<2x8x128xf32, #tpu.memory_space<vmem>>, vector<1x8x128xf32>
    %317 = vector.shape_cast %316 : vector<1x8x128xf32> to vector<8x128xf32>
    %318 = arith.truncf %317 : vector<8x128xf32> to vector<8x128xbf16>
    %c0_135 = arith.constant 0 : index
    %c0_136 = arith.constant 0 : index
    %319 = vector.load %arg4[%c0_135, %c0_136] : memref<128x384xbf16, #tpu.memory_space<vmem>>, vector<128x384xbf16>
    %cst_137 = arith.constant dense<0.000000e+00> : vector<8x384xf32>
    %320 = tpu.matmul %318, %319, %cst_137 {dimension_numbers = #tpu.dot_dimension_numbers<[1], [0], [0], [1], [0, 0, 1, 1], [], []>} : vector<8x128xbf16>, vector<128x384xbf16>, vector<8x384xf32> -> vector<8x384xf32>
    %321 = vector.extract_strided_slice %315 {offsets = [0, 0], sizes = [8, 128], strides = [1, 1]} : vector<8x384xf32> to vector<8x128xf32>
    %322 = vector.extract_strided_slice %315 {offsets = [0, 128], sizes = [8, 128], strides = [1, 1]} : vector<8x384xf32> to vector<8x128xf32>
    %323 = vector.extract_strided_slice %315 {offsets = [0, 256], sizes = [8, 128], strides = [1, 1]} : vector<8x384xf32> to vector<8x128xf32>
    %324 = vector.extract_strided_slice %320 {offsets = [0, 0], sizes = [8, 128], strides = [1, 1]} : vector<8x384xf32> to vector<8x128xf32>
    %325 = vector.extract_strided_slice %320 {offsets = [0, 128], sizes = [8, 128], strides = [1, 1]} : vector<8x384xf32> to vector<8x128xf32>
    %326 = vector.extract_strided_slice %320 {offsets = [0, 256], sizes = [8, 128], strides = [1, 1]} : vector<8x384xf32> to vector<8x128xf32>
    %327 = vector.broadcast %10 : vector<1x128xf32> to vector<8x128xf32>
    %328 = arith.addf %326, %327 : vector<8x128xf32>
    %329 = arith.addf %321, %324 : vector<8x128xf32>
    %330 = arith.negf %329 : vector<8x128xf32>
    %331 = math.exp %330 : vector<8x128xf32>
    %cst_138 = arith.constant 1.000000e+00 : f32
    %332 = vector.broadcast %cst_138 : f32 to vector<8x128xf32>
    %333 = arith.addf %332, %331 : vector<8x128xf32>
    %334 = arith.divf %332, %333 : vector<8x128xf32>
    %335 = arith.addf %322, %325 : vector<8x128xf32>
    %336 = arith.negf %335 : vector<8x128xf32>
    %337 = math.exp %336 : vector<8x128xf32>
    %cst_139 = arith.constant 1.000000e+00 : f32
    %338 = vector.broadcast %cst_139 : f32 to vector<8x128xf32>
    %339 = arith.addf %338, %337 : vector<8x128xf32>
    %340 = arith.divf %338, %339 : vector<8x128xf32>
    %341 = arith.mulf %334, %328 : vector<8x128xf32>
    %342 = arith.addf %323, %341 : vector<8x128xf32>
    %343 = math.tanh %342 : vector<8x128xf32>
    %cst_140 = arith.constant 1.000000e+00 : f32
    %344 = vector.broadcast %cst_140 : f32 to vector<8x128xf32>
    %345 = arith.subf %344, %340 : vector<8x128xf32>
    %346 = arith.mulf %345, %343 : vector<8x128xf32>
    %347 = arith.mulf %340, %317 : vector<8x128xf32>
    %348 = arith.addf %346, %347 : vector<8x128xf32>
    %c0_141 = arith.constant 0 : index
    %c0_142 = arith.constant 0 : index
    %c0_143 = arith.constant 0 : index
    %349 = vector.load %arg13[%c0_141, %c0_142, %c0_143] : memref<2x8x128xf32, #tpu.memory_space<vmem>>, vector<1x8x128xf32>
    %350 = vector.shape_cast %349 : vector<1x8x128xf32> to vector<8x128xf32>
    %351 = vector.shape_cast %348 : vector<8x128xf32> to vector<1x8x128xf32>
    tpu.vector_store %arg13[%c0_141, %c0_142, %c0_143], %351 {strides = array<i32>} : memref<2x8x128xf32, #tpu.memory_space<vmem>>, vector<1x8x128xf32>,
    %c64_144 = arith.constant 64 : index
    %c0_145 = arith.constant 0 : index
    %352 = vector.load %arg15[%c64_144, %c0_145] : memref<128x128xf32, #tpu.memory_space<vmem>>, vector<8x128xf32>
    tpu.vector_store %arg15[%c64_144, %c0_145], %348 {strides = array<i32>} : memref<128x128xf32, #tpu.memory_space<vmem>>, vector<8x128xf32>,
    %c72 = arith.constant 72 : index
    %c0_146 = arith.constant 0 : index
    %353 = vector.load %arg14[%c72, %c0_146] : memref<128x384xf32, #tpu.memory_space<vmem>>, vector<8x384xf32>
    %c0_147 = arith.constant 0 : index
    %c0_148 = arith.constant 0 : index
    %c0_149 = arith.constant 0 : index
    %354 = vector.load %arg13[%c0_147, %c0_148, %c0_149] : memref<2x8x128xf32, #tpu.memory_space<vmem>>, vector<1x8x128xf32>
    %355 = vector.shape_cast %354 : vector<1x8x128xf32> to vector<8x128xf32>
    %356 = arith.truncf %355 : vector<8x128xf32> to vector<8x128xbf16>
    %c0_150 = arith.constant 0 : index
    %c0_151 = arith.constant 0 : index
    %357 = vector.load %arg4[%c0_150, %c0_151] : memref<128x384xbf16, #tpu.memory_space<vmem>>, vector<128x384xbf16>
    %cst_152 = arith.constant dense<0.000000e+00> : vector<8x384xf32>
    %358 = tpu.matmul %356, %357, %cst_152 {dimension_numbers = #tpu.dot_dimension_numbers<[1], [0], [0], [1], [0, 0, 1, 1], [], []>} : vector<8x128xbf16>, vector<128x384xbf16>, vector<8x384xf32> -> vector<8x384xf32>
    %359 = vector.extract_strided_slice %353 {offsets = [0, 0], sizes = [8, 128], strides = [1, 1]} : vector<8x384xf32> to vector<8x128xf32>
    %360 = vector.extract_strided_slice %353 {offsets = [0, 128], sizes = [8, 128], strides = [1, 1]} : vector<8x384xf32> to vector<8x128xf32>
    %361 = vector.extract_strided_slice %353 {offsets = [0, 256], sizes = [8, 128], strides = [1, 1]} : vector<8x384xf32> to vector<8x128xf32>
    %362 = vector.extract_strided_slice %358 {offsets = [0, 0], sizes = [8, 128], strides = [1, 1]} : vector<8x384xf32> to vector<8x128xf32>
    %363 = vector.extract_strided_slice %358 {offsets = [0, 128], sizes = [8, 128], strides = [1, 1]} : vector<8x384xf32> to vector<8x128xf32>
    %364 = vector.extract_strided_slice %358 {offsets = [0, 256], sizes = [8, 128], strides = [1, 1]} : vector<8x384xf32> to vector<8x128xf32>
    %365 = vector.broadcast %10 : vector<1x128xf32> to vector<8x128xf32>
    %366 = arith.addf %364, %365 : vector<8x128xf32>
    %367 = arith.addf %359, %362 : vector<8x128xf32>
    %368 = arith.negf %367 : vector<8x128xf32>
    %369 = math.exp %368 : vector<8x128xf32>
    %cst_153 = arith.constant 1.000000e+00 : f32
    %370 = vector.broadcast %cst_153 : f32 to vector<8x128xf32>
    %371 = arith.addf %370, %369 : vector<8x128xf32>
    %372 = arith.divf %370, %371 : vector<8x128xf32>
    %373 = arith.addf %360, %363 : vector<8x128xf32>
    %374 = arith.negf %373 : vector<8x128xf32>
    %375 = math.exp %374 : vector<8x128xf32>
    %cst_154 = arith.constant 1.000000e+00 : f32
    %376 = vector.broadcast %cst_154 : f32 to vector<8x128xf32>
    %377 = arith.addf %376, %375 : vector<8x128xf32>
    %378 = arith.divf %376, %377 : vector<8x128xf32>
    %379 = arith.mulf %372, %366 : vector<8x128xf32>
    %380 = arith.addf %361, %379 : vector<8x128xf32>
    %381 = math.tanh %380 : vector<8x128xf32>
    %cst_155 = arith.constant 1.000000e+00 : f32
    %382 = vector.broadcast %cst_155 : f32 to vector<8x128xf32>
    %383 = arith.subf %382, %378 : vector<8x128xf32>
    %384 = arith.mulf %383, %381 : vector<8x128xf32>
    %385 = arith.mulf %378, %355 : vector<8x128xf32>
    %386 = arith.addf %384, %385 : vector<8x128xf32>
    %c0_156 = arith.constant 0 : index
    %c0_157 = arith.constant 0 : index
    %c0_158 = arith.constant 0 : index
    %387 = vector.load %arg13[%c0_156, %c0_157, %c0_158] : memref<2x8x128xf32, #tpu.memory_space<vmem>>, vector<1x8x128xf32>
    %388 = vector.shape_cast %387 : vector<1x8x128xf32> to vector<8x128xf32>
    %389 = vector.shape_cast %386 : vector<8x128xf32> to vector<1x8x128xf32>
    tpu.vector_store %arg13[%c0_156, %c0_157, %c0_158], %389 {strides = array<i32>} : memref<2x8x128xf32, #tpu.memory_space<vmem>>, vector<1x8x128xf32>,
    %c72_159 = arith.constant 72 : index
    %c0_160 = arith.constant 0 : index
    %390 = vector.load %arg15[%c72_159, %c0_160] : memref<128x128xf32, #tpu.memory_space<vmem>>, vector<8x128xf32>
    tpu.vector_store %arg15[%c72_159, %c0_160], %386 {strides = array<i32>} : memref<128x128xf32, #tpu.memory_space<vmem>>, vector<8x128xf32>,
    %c80 = arith.constant 80 : index
    %c0_161 = arith.constant 0 : index
    %391 = vector.load %arg14[%c80, %c0_161] : memref<128x384xf32, #tpu.memory_space<vmem>>, vector<8x384xf32>
    %c0_162 = arith.constant 0 : index
    %c0_163 = arith.constant 0 : index
    %c0_164 = arith.constant 0 : index
    %392 = vector.load %arg13[%c0_162, %c0_163, %c0_164] : memref<2x8x128xf32, #tpu.memory_space<vmem>>, vector<1x8x128xf32>
    %393 = vector.shape_cast %392 : vector<1x8x128xf32> to vector<8x128xf32>
    %394 = arith.truncf %393 : vector<8x128xf32> to vector<8x128xbf16>
    %c0_165 = arith.constant 0 : index
    %c0_166 = arith.constant 0 : index
    %395 = vector.load %arg4[%c0_165, %c0_166] : memref<128x384xbf16, #tpu.memory_space<vmem>>, vector<128x384xbf16>
    %cst_167 = arith.constant dense<0.000000e+00> : vector<8x384xf32>
    %396 = tpu.matmul %394, %395, %cst_167 {dimension_numbers = #tpu.dot_dimension_numbers<[1], [0], [0], [1], [0, 0, 1, 1], [], []>} : vector<8x128xbf16>, vector<128x384xbf16>, vector<8x384xf32> -> vector<8x384xf32>
    %397 = vector.extract_strided_slice %391 {offsets = [0, 0], sizes = [8, 128], strides = [1, 1]} : vector<8x384xf32> to vector<8x128xf32>
    %398 = vector.extract_strided_slice %391 {offsets = [0, 128], sizes = [8, 128], strides = [1, 1]} : vector<8x384xf32> to vector<8x128xf32>
    %399 = vector.extract_strided_slice %391 {offsets = [0, 256], sizes = [8, 128], strides = [1, 1]} : vector<8x384xf32> to vector<8x128xf32>
    %400 = vector.extract_strided_slice %396 {offsets = [0, 0], sizes = [8, 128], strides = [1, 1]} : vector<8x384xf32> to vector<8x128xf32>
    %401 = vector.extract_strided_slice %396 {offsets = [0, 128], sizes = [8, 128], strides = [1, 1]} : vector<8x384xf32> to vector<8x128xf32>
    %402 = vector.extract_strided_slice %396 {offsets = [0, 256], sizes = [8, 128], strides = [1, 1]} : vector<8x384xf32> to vector<8x128xf32>
    %403 = vector.broadcast %10 : vector<1x128xf32> to vector<8x128xf32>
    %404 = arith.addf %402, %403 : vector<8x128xf32>
    %405 = arith.addf %397, %400 : vector<8x128xf32>
    %406 = arith.negf %405 : vector<8x128xf32>
    %407 = math.exp %406 : vector<8x128xf32>
    %cst_168 = arith.constant 1.000000e+00 : f32
    %408 = vector.broadcast %cst_168 : f32 to vector<8x128xf32>
    %409 = arith.addf %408, %407 : vector<8x128xf32>
    %410 = arith.divf %408, %409 : vector<8x128xf32>
    %411 = arith.addf %398, %401 : vector<8x128xf32>
    %412 = arith.negf %411 : vector<8x128xf32>
    %413 = math.exp %412 : vector<8x128xf32>
    %cst_169 = arith.constant 1.000000e+00 : f32
    %414 = vector.broadcast %cst_169 : f32 to vector<8x128xf32>
    %415 = arith.addf %414, %413 : vector<8x128xf32>
    %416 = arith.divf %414, %415 : vector<8x128xf32>
    %417 = arith.mulf %410, %404 : vector<8x128xf32>
    %418 = arith.addf %399, %417 : vector<8x128xf32>
    %419 = math.tanh %418 : vector<8x128xf32>
    %cst_170 = arith.constant 1.000000e+00 : f32
    %420 = vector.broadcast %cst_170 : f32 to vector<8x128xf32>
    %421 = arith.subf %420, %416 : vector<8x128xf32>
    %422 = arith.mulf %421, %419 : vector<8x128xf32>
    %423 = arith.mulf %416, %393 : vector<8x128xf32>
    %424 = arith.addf %422, %423 : vector<8x128xf32>
    %c0_171 = arith.constant 0 : index
    %c0_172 = arith.constant 0 : index
    %c0_173 = arith.constant 0 : index
    %425 = vector.load %arg13[%c0_171, %c0_172, %c0_173] : memref<2x8x128xf32, #tpu.memory_space<vmem>>, vector<1x8x128xf32>
    %426 = vector.shape_cast %425 : vector<1x8x128xf32> to vector<8x128xf32>
    %427 = vector.shape_cast %424 : vector<8x128xf32> to vector<1x8x128xf32>
    tpu.vector_store %arg13[%c0_171, %c0_172, %c0_173], %427 {strides = array<i32>} : memref<2x8x128xf32, #tpu.memory_space<vmem>>, vector<1x8x128xf32>,
    %c80_174 = arith.constant 80 : index
    %c0_175 = arith.constant 0 : index
    %428 = vector.load %arg15[%c80_174, %c0_175] : memref<128x128xf32, #tpu.memory_space<vmem>>, vector<8x128xf32>
    tpu.vector_store %arg15[%c80_174, %c0_175], %424 {strides = array<i32>} : memref<128x128xf32, #tpu.memory_space<vmem>>, vector<8x128xf32>,
    %c88 = arith.constant 88 : index
    %c0_176 = arith.constant 0 : index
    %429 = vector.load %arg14[%c88, %c0_176] : memref<128x384xf32, #tpu.memory_space<vmem>>, vector<8x384xf32>
    %c0_177 = arith.constant 0 : index
    %c0_178 = arith.constant 0 : index
    %c0_179 = arith.constant 0 : index
    %430 = vector.load %arg13[%c0_177, %c0_178, %c0_179] : memref<2x8x128xf32, #tpu.memory_space<vmem>>, vector<1x8x128xf32>
    %431 = vector.shape_cast %430 : vector<1x8x128xf32> to vector<8x128xf32>
    %432 = arith.truncf %431 : vector<8x128xf32> to vector<8x128xbf16>
    %c0_180 = arith.constant 0 : index
    %c0_181 = arith.constant 0 : index
    %433 = vector.load %arg4[%c0_180, %c0_181] : memref<128x384xbf16, #tpu.memory_space<vmem>>, vector<128x384xbf16>
    %cst_182 = arith.constant dense<0.000000e+00> : vector<8x384xf32>
    %434 = tpu.matmul %432, %433, %cst_182 {dimension_numbers = #tpu.dot_dimension_numbers<[1], [0], [0], [1], [0, 0, 1, 1], [], []>} : vector<8x128xbf16>, vector<128x384xbf16>, vector<8x384xf32> -> vector<8x384xf32>
    %435 = vector.extract_strided_slice %429 {offsets = [0, 0], sizes = [8, 128], strides = [1, 1]} : vector<8x384xf32> to vector<8x128xf32>
    %436 = vector.extract_strided_slice %429 {offsets = [0, 128], sizes = [8, 128], strides = [1, 1]} : vector<8x384xf32> to vector<8x128xf32>
    %437 = vector.extract_strided_slice %429 {offsets = [0, 256], sizes = [8, 128], strides = [1, 1]} : vector<8x384xf32> to vector<8x128xf32>
    %438 = vector.extract_strided_slice %434 {offsets = [0, 0], sizes = [8, 128], strides = [1, 1]} : vector<8x384xf32> to vector<8x128xf32>
    %439 = vector.extract_strided_slice %434 {offsets = [0, 128], sizes = [8, 128], strides = [1, 1]} : vector<8x384xf32> to vector<8x128xf32>
    %440 = vector.extract_strided_slice %434 {offsets = [0, 256], sizes = [8, 128], strides = [1, 1]} : vector<8x384xf32> to vector<8x128xf32>
    %441 = vector.broadcast %10 : vector<1x128xf32> to vector<8x128xf32>
    %442 = arith.addf %440, %441 : vector<8x128xf32>
    %443 = arith.addf %435, %438 : vector<8x128xf32>
    %444 = arith.negf %443 : vector<8x128xf32>
    %445 = math.exp %444 : vector<8x128xf32>
    %cst_183 = arith.constant 1.000000e+00 : f32
    %446 = vector.broadcast %cst_183 : f32 to vector<8x128xf32>
    %447 = arith.addf %446, %445 : vector<8x128xf32>
    %448 = arith.divf %446, %447 : vector<8x128xf32>
    %449 = arith.addf %436, %439 : vector<8x128xf32>
    %450 = arith.negf %449 : vector<8x128xf32>
    %451 = math.exp %450 : vector<8x128xf32>
    %cst_184 = arith.constant 1.000000e+00 : f32
    %452 = vector.broadcast %cst_184 : f32 to vector<8x128xf32>
    %453 = arith.addf %452, %451 : vector<8x128xf32>
    %454 = arith.divf %452, %453 : vector<8x128xf32>
    %455 = arith.mulf %448, %442 : vector<8x128xf32>
    %456 = arith.addf %437, %455 : vector<8x128xf32>
    %457 = math.tanh %456 : vector<8x128xf32>
    %cst_185 = arith.constant 1.000000e+00 : f32
    %458 = vector.broadcast %cst_185 : f32 to vector<8x128xf32>
    %459 = arith.subf %458, %454 : vector<8x128xf32>
    %460 = arith.mulf %459, %457 : vector<8x128xf32>
    %461 = arith.mulf %454, %431 : vector<8x128xf32>
    %462 = arith.addf %460, %461 : vector<8x128xf32>
    %c0_186 = arith.constant 0 : index
    %c0_187 = arith.constant 0 : index
    %c0_188 = arith.constant 0 : index
    %463 = vector.load %arg13[%c0_186, %c0_187, %c0_188] : memref<2x8x128xf32, #tpu.memory_space<vmem>>, vector<1x8x128xf32>
    %464 = vector.shape_cast %463 : vector<1x8x128xf32> to vector<8x128xf32>
    %465 = vector.shape_cast %462 : vector<8x128xf32> to vector<1x8x128xf32>
    tpu.vector_store %arg13[%c0_186, %c0_187, %c0_188], %465 {strides = array<i32>} : memref<2x8x128xf32, #tpu.memory_space<vmem>>, vector<1x8x128xf32>,
    %c88_189 = arith.constant 88 : index
    %c0_190 = arith.constant 0 : index
    %466 = vector.load %arg15[%c88_189, %c0_190] : memref<128x128xf32, #tpu.memory_space<vmem>>, vector<8x128xf32>
    tpu.vector_store %arg15[%c88_189, %c0_190], %462 {strides = array<i32>} : memref<128x128xf32, #tpu.memory_space<vmem>>, vector<8x128xf32>,
    %c96 = arith.constant 96 : index
    %c0_191 = arith.constant 0 : index
    %467 = vector.load %arg14[%c96, %c0_191] : memref<128x384xf32, #tpu.memory_space<vmem>>, vector<8x384xf32>
    %c0_192 = arith.constant 0 : index
    %c0_193 = arith.constant 0 : index
    %c0_194 = arith.constant 0 : index
    %468 = vector.load %arg13[%c0_192, %c0_193, %c0_194] : memref<2x8x128xf32, #tpu.memory_space<vmem>>, vector<1x8x128xf32>
    %469 = vector.shape_cast %468 : vector<1x8x128xf32> to vector<8x128xf32>
    %470 = arith.truncf %469 : vector<8x128xf32> to vector<8x128xbf16>
    %c0_195 = arith.constant 0 : index
    %c0_196 = arith.constant 0 : index
    %471 = vector.load %arg4[%c0_195, %c0_196] : memref<128x384xbf16, #tpu.memory_space<vmem>>, vector<128x384xbf16>
    %cst_197 = arith.constant dense<0.000000e+00> : vector<8x384xf32>
    %472 = tpu.matmul %470, %471, %cst_197 {dimension_numbers = #tpu.dot_dimension_numbers<[1], [0], [0], [1], [0, 0, 1, 1], [], []>} : vector<8x128xbf16>, vector<128x384xbf16>, vector<8x384xf32> -> vector<8x384xf32>
    %473 = vector.extract_strided_slice %467 {offsets = [0, 0], sizes = [8, 128], strides = [1, 1]} : vector<8x384xf32> to vector<8x128xf32>
    %474 = vector.extract_strided_slice %467 {offsets = [0, 128], sizes = [8, 128], strides = [1, 1]} : vector<8x384xf32> to vector<8x128xf32>
    %475 = vector.extract_strided_slice %467 {offsets = [0, 256], sizes = [8, 128], strides = [1, 1]} : vector<8x384xf32> to vector<8x128xf32>
    %476 = vector.extract_strided_slice %472 {offsets = [0, 0], sizes = [8, 128], strides = [1, 1]} : vector<8x384xf32> to vector<8x128xf32>
    %477 = vector.extract_strided_slice %472 {offsets = [0, 128], sizes = [8, 128], strides = [1, 1]} : vector<8x384xf32> to vector<8x128xf32>
    %478 = vector.extract_strided_slice %472 {offsets = [0, 256], sizes = [8, 128], strides = [1, 1]} : vector<8x384xf32> to vector<8x128xf32>
    %479 = vector.broadcast %10 : vector<1x128xf32> to vector<8x128xf32>
    %480 = arith.addf %478, %479 : vector<8x128xf32>
    %481 = arith.addf %473, %476 : vector<8x128xf32>
    %482 = arith.negf %481 : vector<8x128xf32>
    %483 = math.exp %482 : vector<8x128xf32>
    %cst_198 = arith.constant 1.000000e+00 : f32
    %484 = vector.broadcast %cst_198 : f32 to vector<8x128xf32>
    %485 = arith.addf %484, %483 : vector<8x128xf32>
    %486 = arith.divf %484, %485 : vector<8x128xf32>
    %487 = arith.addf %474, %477 : vector<8x128xf32>
    %488 = arith.negf %487 : vector<8x128xf32>
    %489 = math.exp %488 : vector<8x128xf32>
    %cst_199 = arith.constant 1.000000e+00 : f32
    %490 = vector.broadcast %cst_199 : f32 to vector<8x128xf32>
    %491 = arith.addf %490, %489 : vector<8x128xf32>
    %492 = arith.divf %490, %491 : vector<8x128xf32>
    %493 = arith.mulf %486, %480 : vector<8x128xf32>
    %494 = arith.addf %475, %493 : vector<8x128xf32>
    %495 = math.tanh %494 : vector<8x128xf32>
    %cst_200 = arith.constant 1.000000e+00 : f32
    %496 = vector.broadcast %cst_200 : f32 to vector<8x128xf32>
    %497 = arith.subf %496, %492 : vector<8x128xf32>
    %498 = arith.mulf %497, %495 : vector<8x128xf32>
    %499 = arith.mulf %492, %469 : vector<8x128xf32>
    %500 = arith.addf %498, %499 : vector<8x128xf32>
    %c0_201 = arith.constant 0 : index
    %c0_202 = arith.constant 0 : index
    %c0_203 = arith.constant 0 : index
    %501 = vector.load %arg13[%c0_201, %c0_202, %c0_203] : memref<2x8x128xf32, #tpu.memory_space<vmem>>, vector<1x8x128xf32>
    %502 = vector.shape_cast %501 : vector<1x8x128xf32> to vector<8x128xf32>
    %503 = vector.shape_cast %500 : vector<8x128xf32> to vector<1x8x128xf32>
    tpu.vector_store %arg13[%c0_201, %c0_202, %c0_203], %503 {strides = array<i32>} : memref<2x8x128xf32, #tpu.memory_space<vmem>>, vector<1x8x128xf32>,
    %c96_204 = arith.constant 96 : index
    %c0_205 = arith.constant 0 : index
    %504 = vector.load %arg15[%c96_204, %c0_205] : memref<128x128xf32, #tpu.memory_space<vmem>>, vector<8x128xf32>
    tpu.vector_store %arg15[%c96_204, %c0_205], %500 {strides = array<i32>} : memref<128x128xf32, #tpu.memory_space<vmem>>, vector<8x128xf32>,
    %c104 = arith.constant 104 : index
    %c0_206 = arith.constant 0 : index
    %505 = vector.load %arg14[%c104, %c0_206] : memref<128x384xf32, #tpu.memory_space<vmem>>, vector<8x384xf32>
    %c0_207 = arith.constant 0 : index
    %c0_208 = arith.constant 0 : index
    %c0_209 = arith.constant 0 : index
    %506 = vector.load %arg13[%c0_207, %c0_208, %c0_209] : memref<2x8x128xf32, #tpu.memory_space<vmem>>, vector<1x8x128xf32>
    %507 = vector.shape_cast %506 : vector<1x8x128xf32> to vector<8x128xf32>
    %508 = arith.truncf %507 : vector<8x128xf32> to vector<8x128xbf16>
    %c0_210 = arith.constant 0 : index
    %c0_211 = arith.constant 0 : index
    %509 = vector.load %arg4[%c0_210, %c0_211] : memref<128x384xbf16, #tpu.memory_space<vmem>>, vector<128x384xbf16>
    %cst_212 = arith.constant dense<0.000000e+00> : vector<8x384xf32>
    %510 = tpu.matmul %508, %509, %cst_212 {dimension_numbers = #tpu.dot_dimension_numbers<[1], [0], [0], [1], [0, 0, 1, 1], [], []>} : vector<8x128xbf16>, vector<128x384xbf16>, vector<8x384xf32> -> vector<8x384xf32>
    %511 = vector.extract_strided_slice %505 {offsets = [0, 0], sizes = [8, 128], strides = [1, 1]} : vector<8x384xf32> to vector<8x128xf32>
    %512 = vector.extract_strided_slice %505 {offsets = [0, 128], sizes = [8, 128], strides = [1, 1]} : vector<8x384xf32> to vector<8x128xf32>
    %513 = vector.extract_strided_slice %505 {offsets = [0, 256], sizes = [8, 128], strides = [1, 1]} : vector<8x384xf32> to vector<8x128xf32>
    %514 = vector.extract_strided_slice %510 {offsets = [0, 0], sizes = [8, 128], strides = [1, 1]} : vector<8x384xf32> to vector<8x128xf32>
    %515 = vector.extract_strided_slice %510 {offsets = [0, 128], sizes = [8, 128], strides = [1, 1]} : vector<8x384xf32> to vector<8x128xf32>
    %516 = vector.extract_strided_slice %510 {offsets = [0, 256], sizes = [8, 128], strides = [1, 1]} : vector<8x384xf32> to vector<8x128xf32>
    %517 = vector.broadcast %10 : vector<1x128xf32> to vector<8x128xf32>
    %518 = arith.addf %516, %517 : vector<8x128xf32>
    %519 = arith.addf %511, %514 : vector<8x128xf32>
    %520 = arith.negf %519 : vector<8x128xf32>
    %521 = math.exp %520 : vector<8x128xf32>
    %cst_213 = arith.constant 1.000000e+00 : f32
    %522 = vector.broadcast %cst_213 : f32 to vector<8x128xf32>
    %523 = arith.addf %522, %521 : vector<8x128xf32>
    %524 = arith.divf %522, %523 : vector<8x128xf32>
    %525 = arith.addf %512, %515 : vector<8x128xf32>
    %526 = arith.negf %525 : vector<8x128xf32>
    %527 = math.exp %526 : vector<8x128xf32>
    %cst_214 = arith.constant 1.000000e+00 : f32
    %528 = vector.broadcast %cst_214 : f32 to vector<8x128xf32>
    %529 = arith.addf %528, %527 : vector<8x128xf32>
    %530 = arith.divf %528, %529 : vector<8x128xf32>
    %531 = arith.mulf %524, %518 : vector<8x128xf32>
    %532 = arith.addf %513, %531 : vector<8x128xf32>
    %533 = math.tanh %532 : vector<8x128xf32>
    %cst_215 = arith.constant 1.000000e+00 : f32
    %534 = vector.broadcast %cst_215 : f32 to vector<8x128xf32>
    %535 = arith.subf %534, %530 : vector<8x128xf32>
    %536 = arith.mulf %535, %533 : vector<8x128xf32>
    %537 = arith.mulf %530, %507 : vector<8x128xf32>
    %538 = arith.addf %536, %537 : vector<8x128xf32>
    %c0_216 = arith.constant 0 : index
    %c0_217 = arith.constant 0 : index
    %c0_218 = arith.constant 0 : index
    %539 = vector.load %arg13[%c0_216, %c0_217, %c0_218] : memref<2x8x128xf32, #tpu.memory_space<vmem>>, vector<1x8x128xf32>
    %540 = vector.shape_cast %539 : vector<1x8x128xf32> to vector<8x128xf32>
    %541 = vector.shape_cast %538 : vector<8x128xf32> to vector<1x8x128xf32>
    tpu.vector_store %arg13[%c0_216, %c0_217, %c0_218], %541 {strides = array<i32>} : memref<2x8x128xf32, #tpu.memory_space<vmem>>, vector<1x8x128xf32>,
    %c104_219 = arith.constant 104 : index
    %c0_220 = arith.constant 0 : index
    %542 = vector.load %arg15[%c104_219, %c0_220] : memref<128x128xf32, #tpu.memory_space<vmem>>, vector<8x128xf32>
    tpu.vector_store %arg15[%c104_219, %c0_220], %538 {strides = array<i32>} : memref<128x128xf32, #tpu.memory_space<vmem>>, vector<8x128xf32>,
    %c112 = arith.constant 112 : index
    %c0_221 = arith.constant 0 : index
    %543 = vector.load %arg14[%c112, %c0_221] : memref<128x384xf32, #tpu.memory_space<vmem>>, vector<8x384xf32>
    %c0_222 = arith.constant 0 : index
    %c0_223 = arith.constant 0 : index
    %c0_224 = arith.constant 0 : index
    %544 = vector.load %arg13[%c0_222, %c0_223, %c0_224] : memref<2x8x128xf32, #tpu.memory_space<vmem>>, vector<1x8x128xf32>
    %545 = vector.shape_cast %544 : vector<1x8x128xf32> to vector<8x128xf32>
    %546 = arith.truncf %545 : vector<8x128xf32> to vector<8x128xbf16>
    %c0_225 = arith.constant 0 : index
    %c0_226 = arith.constant 0 : index
    %547 = vector.load %arg4[%c0_225, %c0_226] : memref<128x384xbf16, #tpu.memory_space<vmem>>, vector<128x384xbf16>
    %cst_227 = arith.constant dense<0.000000e+00> : vector<8x384xf32>
    %548 = tpu.matmul %546, %547, %cst_227 {dimension_numbers = #tpu.dot_dimension_numbers<[1], [0], [0], [1], [0, 0, 1, 1], [], []>} : vector<8x128xbf16>, vector<128x384xbf16>, vector<8x384xf32> -> vector<8x384xf32>
    %549 = vector.extract_strided_slice %543 {offsets = [0, 0], sizes = [8, 128], strides = [1, 1]} : vector<8x384xf32> to vector<8x128xf32>
    %550 = vector.extract_strided_slice %543 {offsets = [0, 128], sizes = [8, 128], strides = [1, 1]} : vector<8x384xf32> to vector<8x128xf32>
    %551 = vector.extract_strided_slice %543 {offsets = [0, 256], sizes = [8, 128], strides = [1, 1]} : vector<8x384xf32> to vector<8x128xf32>
    %552 = vector.extract_strided_slice %548 {offsets = [0, 0], sizes = [8, 128], strides = [1, 1]} : vector<8x384xf32> to vector<8x128xf32>
    %553 = vector.extract_strided_slice %548 {offsets = [0, 128], sizes = [8, 128], strides = [1, 1]} : vector<8x384xf32> to vector<8x128xf32>
    %554 = vector.extract_strided_slice %548 {offsets = [0, 256], sizes = [8, 128], strides = [1, 1]} : vector<8x384xf32> to vector<8x128xf32>
    %555 = vector.broadcast %10 : vector<1x128xf32> to vector<8x128xf32>
    %556 = arith.addf %554, %555 : vector<8x128xf32>
    %557 = arith.addf %549, %552 : vector<8x128xf32>
    %558 = arith.negf %557 : vector<8x128xf32>
    %559 = math.exp %558 : vector<8x128xf32>
    %cst_228 = arith.constant 1.000000e+00 : f32
    %560 = vector.broadcast %cst_228 : f32 to vector<8x128xf32>
    %561 = arith.addf %560, %559 : vector<8x128xf32>
    %562 = arith.divf %560, %561 : vector<8x128xf32>
    %563 = arith.addf %550, %553 : vector<8x128xf32>
    %564 = arith.negf %563 : vector<8x128xf32>
    %565 = math.exp %564 : vector<8x128xf32>
    %cst_229 = arith.constant 1.000000e+00 : f32
    %566 = vector.broadcast %cst_229 : f32 to vector<8x128xf32>
    %567 = arith.addf %566, %565 : vector<8x128xf32>
    %568 = arith.divf %566, %567 : vector<8x128xf32>
    %569 = arith.mulf %562, %556 : vector<8x128xf32>
    %570 = arith.addf %551, %569 : vector<8x128xf32>
    %571 = math.tanh %570 : vector<8x128xf32>
    %cst_230 = arith.constant 1.000000e+00 : f32
    %572 = vector.broadcast %cst_230 : f32 to vector<8x128xf32>
    %573 = arith.subf %572, %568 : vector<8x128xf32>
    %574 = arith.mulf %573, %571 : vector<8x128xf32>
    %575 = arith.mulf %568, %545 : vector<8x128xf32>
    %576 = arith.addf %574, %575 : vector<8x128xf32>
    %c0_231 = arith.constant 0 : index
    %c0_232 = arith.constant 0 : index
    %c0_233 = arith.constant 0 : index
    %577 = vector.load %arg13[%c0_231, %c0_232, %c0_233] : memref<2x8x128xf32, #tpu.memory_space<vmem>>, vector<1x8x128xf32>
    %578 = vector.shape_cast %577 : vector<1x8x128xf32> to vector<8x128xf32>
    %579 = vector.shape_cast %576 : vector<8x128xf32> to vector<1x8x128xf32>
    tpu.vector_store %arg13[%c0_231, %c0_232, %c0_233], %579 {strides = array<i32>} : memref<2x8x128xf32, #tpu.memory_space<vmem>>, vector<1x8x128xf32>,
    %c112_234 = arith.constant 112 : index
    %c0_235 = arith.constant 0 : index
    %580 = vector.load %arg15[%c112_234, %c0_235] : memref<128x128xf32, #tpu.memory_space<vmem>>, vector<8x128xf32>
    tpu.vector_store %arg15[%c112_234, %c0_235], %576 {strides = array<i32>} : memref<128x128xf32, #tpu.memory_space<vmem>>, vector<8x128xf32>,
    %c120 = arith.constant 120 : index
    %c0_236 = arith.constant 0 : index
    %581 = vector.load %arg14[%c120, %c0_236] : memref<128x384xf32, #tpu.memory_space<vmem>>, vector<8x384xf32>
    %c0_237 = arith.constant 0 : index
    %c0_238 = arith.constant 0 : index
    %c0_239 = arith.constant 0 : index
    %582 = vector.load %arg13[%c0_237, %c0_238, %c0_239] : memref<2x8x128xf32, #tpu.memory_space<vmem>>, vector<1x8x128xf32>
    %583 = vector.shape_cast %582 : vector<1x8x128xf32> to vector<8x128xf32>
    %584 = arith.truncf %583 : vector<8x128xf32> to vector<8x128xbf16>
    %c0_240 = arith.constant 0 : index
    %c0_241 = arith.constant 0 : index
    %585 = vector.load %arg4[%c0_240, %c0_241] : memref<128x384xbf16, #tpu.memory_space<vmem>>, vector<128x384xbf16>
    %cst_242 = arith.constant dense<0.000000e+00> : vector<8x384xf32>
    %586 = tpu.matmul %584, %585, %cst_242 {dimension_numbers = #tpu.dot_dimension_numbers<[1], [0], [0], [1], [0, 0, 1, 1], [], []>} : vector<8x128xbf16>, vector<128x384xbf16>, vector<8x384xf32> -> vector<8x384xf32>
    %587 = vector.extract_strided_slice %581 {offsets = [0, 0], sizes = [8, 128], strides = [1, 1]} : vector<8x384xf32> to vector<8x128xf32>
    %588 = vector.extract_strided_slice %581 {offsets = [0, 128], sizes = [8, 128], strides = [1, 1]} : vector<8x384xf32> to vector<8x128xf32>
    %589 = vector.extract_strided_slice %581 {offsets = [0, 256], sizes = [8, 128], strides = [1, 1]} : vector<8x384xf32> to vector<8x128xf32>
    %590 = vector.extract_strided_slice %586 {offsets = [0, 0], sizes = [8, 128], strides = [1, 1]} : vector<8x384xf32> to vector<8x128xf32>
    %591 = vector.extract_strided_slice %586 {offsets = [0, 128], sizes = [8, 128], strides = [1, 1]} : vector<8x384xf32> to vector<8x128xf32>
    %592 = vector.extract_strided_slice %586 {offsets = [0, 256], sizes = [8, 128], strides = [1, 1]} : vector<8x384xf32> to vector<8x128xf32>
    %593 = vector.broadcast %10 : vector<1x128xf32> to vector<8x128xf32>
    %594 = arith.addf %592, %593 : vector<8x128xf32>
    %595 = arith.addf %587, %590 : vector<8x128xf32>
    %596 = arith.negf %595 : vector<8x128xf32>
    %597 = math.exp %596 : vector<8x128xf32>
    %cst_243 = arith.constant 1.000000e+00 : f32
    %598 = vector.broadcast %cst_243 : f32 to vector<8x128xf32>
    %599 = arith.addf %598, %597 : vector<8x128xf32>
    %600 = arith.divf %598, %599 : vector<8x128xf32>
    %601 = arith.addf %588, %591 : vector<8x128xf32>
    %602 = arith.negf %601 : vector<8x128xf32>
    %603 = math.exp %602 : vector<8x128xf32>
    %cst_244 = arith.constant 1.000000e+00 : f32
    %604 = vector.broadcast %cst_244 : f32 to vector<8x128xf32>
    %605 = arith.addf %604, %603 : vector<8x128xf32>
    %606 = arith.divf %604, %605 : vector<8x128xf32>
    %607 = arith.mulf %600, %594 : vector<8x128xf32>
    %608 = arith.addf %589, %607 : vector<8x128xf32>
    %609 = math.tanh %608 : vector<8x128xf32>
    %cst_245 = arith.constant 1.000000e+00 : f32
    %610 = vector.broadcast %cst_245 : f32 to vector<8x128xf32>
    %611 = arith.subf %610, %606 : vector<8x128xf32>
    %612 = arith.mulf %611, %609 : vector<8x128xf32>
    %613 = arith.mulf %606, %583 : vector<8x128xf32>
    %614 = arith.addf %612, %613 : vector<8x128xf32>
    %c0_246 = arith.constant 0 : index
    %c0_247 = arith.constant 0 : index
    %c0_248 = arith.constant 0 : index
    %615 = vector.load %arg13[%c0_246, %c0_247, %c0_248] : memref<2x8x128xf32, #tpu.memory_space<vmem>>, vector<1x8x128xf32>
    %616 = vector.shape_cast %615 : vector<1x8x128xf32> to vector<8x128xf32>
    %617 = vector.shape_cast %614 : vector<8x128xf32> to vector<1x8x128xf32>
    tpu.vector_store %arg13[%c0_246, %c0_247, %c0_248], %617 {strides = array<i32>} : memref<2x8x128xf32, #tpu.memory_space<vmem>>, vector<1x8x128xf32>,
    %c120_249 = arith.constant 120 : index
    %c0_250 = arith.constant 0 : index
    %618 = vector.load %arg15[%c120_249, %c0_250] : memref<128x128xf32, #tpu.memory_space<vmem>>, vector<8x128xf32>
    tpu.vector_store %arg15[%c120_249, %c0_250], %614 {strides = array<i32>} : memref<128x128xf32, #tpu.memory_space<vmem>>, vector<8x128xf32>,
    %c0_251 = arith.constant 0 : index
    %c0_252 = arith.constant 0 : index
    %619 = vector.load %arg15[%c0_251, %c0_252] : memref<128x128xf32, #tpu.memory_space<vmem>>, vector<128x128xf32>
    %620 = arith.truncf %619 : vector<128x128xf32> to vector<128x128xbf16>
    %c0_253 = arith.constant 0 : index
    %c0_254 = arith.constant 0 : index
    %621 = vector.load %arg6[%c0_253, %c0_254] : memref<128x384xbf16, #tpu.memory_space<vmem>>, vector<128x384xbf16>
    %cst_255 = arith.constant dense<0.000000e+00> : vector<128x384xf32>
    %622 = tpu.matmul %620, %621, %cst_255 {dimension_numbers = #tpu.dot_dimension_numbers<[1], [0], [0], [1], [0, 0, 1, 1], [], []>} : vector<128x128xbf16>, vector<128x384xbf16>, vector<128x384xf32> -> vector<128x384xf32>
    %c0_256 = arith.constant 0 : index
    %c0_257 = arith.constant 0 : index
    %623 = vector.load %arg7[%c0_256, %c0_257] : memref<1x384xf32, #tpu.memory_space<vmem>>, vector<1x384xf32>
    %624 = vector.broadcast %623 : vector<1x384xf32> to vector<128x384xf32>
    %625 = arith.addf %622, %624 : vector<128x384xf32>
    %c0_258 = arith.constant 0 : index
    %c0_259 = arith.constant 0 : index
    %626 = vector.load %arg14[%c0_258, %c0_259] : memref<128x384xf32, #tpu.memory_space<vmem>>, vector<128x384xf32>
    tpu.vector_store %arg14[%c0_258, %c0_259], %625 {strides = array<i32>} : memref<128x384xf32, #tpu.memory_space<vmem>>, vector<128x384xf32>,
    %c0_260 = arith.constant 0 : index
    %c0_261 = arith.constant 0 : index
    %627 = vector.load %arg9[%c0_260, %c0_261] : memref<1x128xf32, #tpu.memory_space<vmem>>, vector<1x128xf32>
    %c0_262 = arith.constant 0 : index
    %c0_263 = arith.constant 0 : index
    %628 = vector.load %arg14[%c0_262, %c0_263] : memref<128x384xf32, #tpu.memory_space<vmem>>, vector<8x384xf32>
    %c1 = arith.constant 1 : index
    %c0_264 = arith.constant 0 : index
    %c0_265 = arith.constant 0 : index
    %629 = vector.load %arg13[%c1, %c0_264, %c0_265] : memref<2x8x128xf32, #tpu.memory_space<vmem>>, vector<1x8x128xf32>
    %630 = vector.shape_cast %629 : vector<1x8x128xf32> to vector<8x128xf32>
    %631 = arith.truncf %630 : vector<8x128xf32> to vector<8x128xbf16>
    %c0_266 = arith.constant 0 : index
    %c0_267 = arith.constant 0 : index
    %632 = vector.load %arg8[%c0_266, %c0_267] : memref<128x384xbf16, #tpu.memory_space<vmem>>, vector<128x384xbf16>
    %cst_268 = arith.constant dense<0.000000e+00> : vector<8x384xf32>
    %633 = tpu.matmul %631, %632, %cst_268 {dimension_numbers = #tpu.dot_dimension_numbers<[1], [0], [0], [1], [0, 0, 1, 1], [], []>} : vector<8x128xbf16>, vector<128x384xbf16>, vector<8x384xf32> -> vector<8x384xf32>
    %634 = vector.extract_strided_slice %628 {offsets = [0, 0], sizes = [8, 128], strides = [1, 1]} : vector<8x384xf32> to vector<8x128xf32>
    %635 = vector.extract_strided_slice %628 {offsets = [0, 128], sizes = [8, 128], strides = [1, 1]} : vector<8x384xf32> to vector<8x128xf32>
    %636 = vector.extract_strided_slice %628 {offsets = [0, 256], sizes = [8, 128], strides = [1, 1]} : vector<8x384xf32> to vector<8x128xf32>
    %637 = vector.extract_strided_slice %633 {offsets = [0, 0], sizes = [8, 128], strides = [1, 1]} : vector<8x384xf32> to vector<8x128xf32>
    %638 = vector.extract_strided_slice %633 {offsets = [0, 128], sizes = [8, 128], strides = [1, 1]} : vector<8x384xf32> to vector<8x128xf32>
    %639 = vector.extract_strided_slice %633 {offsets = [0, 256], sizes = [8, 128], strides = [1, 1]} : vector<8x384xf32> to vector<8x128xf32>
    %640 = vector.broadcast %627 : vector<1x128xf32> to vector<8x128xf32>
    %641 = arith.addf %639, %640 : vector<8x128xf32>
    %642 = arith.addf %634, %637 : vector<8x128xf32>
    %643 = arith.negf %642 : vector<8x128xf32>
    %644 = math.exp %643 : vector<8x128xf32>
    %cst_269 = arith.constant 1.000000e+00 : f32
    %645 = vector.broadcast %cst_269 : f32 to vector<8x128xf32>
    %646 = arith.addf %645, %644 : vector<8x128xf32>
    %647 = arith.divf %645, %646 : vector<8x128xf32>
    %648 = arith.addf %635, %638 : vector<8x128xf32>
    %649 = arith.negf %648 : vector<8x128xf32>
    %650 = math.exp %649 : vector<8x128xf32>
    %cst_270 = arith.constant 1.000000e+00 : f32
    %651 = vector.broadcast %cst_270 : f32 to vector<8x128xf32>
    %652 = arith.addf %651, %650 : vector<8x128xf32>
    %653 = arith.divf %651, %652 : vector<8x128xf32>
    %654 = arith.mulf %647, %641 : vector<8x128xf32>
    %655 = arith.addf %636, %654 : vector<8x128xf32>
    %656 = math.tanh %655 : vector<8x128xf32>
    %cst_271 = arith.constant 1.000000e+00 : f32
    %657 = vector.broadcast %cst_271 : f32 to vector<8x128xf32>
    %658 = arith.subf %657, %653 : vector<8x128xf32>
    %659 = arith.mulf %658, %656 : vector<8x128xf32>
    %660 = arith.mulf %653, %630 : vector<8x128xf32>
    %661 = arith.addf %659, %660 : vector<8x128xf32>
    %c1_272 = arith.constant 1 : index
    %c0_273 = arith.constant 0 : index
    %c0_274 = arith.constant 0 : index
    %662 = vector.load %arg13[%c1_272, %c0_273, %c0_274] : memref<2x8x128xf32, #tpu.memory_space<vmem>>, vector<1x8x128xf32>
    %663 = vector.shape_cast %662 : vector<1x8x128xf32> to vector<8x128xf32>
    %664 = vector.shape_cast %661 : vector<8x128xf32> to vector<1x8x128xf32>
    tpu.vector_store %arg13[%c1_272, %c0_273, %c0_274], %664 {strides = array<i32>} : memref<2x8x128xf32, #tpu.memory_space<vmem>>, vector<1x8x128xf32>,
    %c0_275 = arith.constant 0 : index
    %c0_276 = arith.constant 0 : index
    %665 = vector.load %arg15[%c0_275, %c0_276] : memref<128x128xf32, #tpu.memory_space<vmem>>, vector<8x128xf32>
    tpu.vector_store %arg15[%c0_275, %c0_276], %661 {strides = array<i32>} : memref<128x128xf32, #tpu.memory_space<vmem>>, vector<8x128xf32>,
    %c8_277 = arith.constant 8 : index
    %c0_278 = arith.constant 0 : index
    %666 = vector.load %arg14[%c8_277, %c0_278] : memref<128x384xf32, #tpu.memory_space<vmem>>, vector<8x384xf32>
    %c1_279 = arith.constant 1 : index
    %c0_280 = arith.constant 0 : index
    %c0_281 = arith.constant 0 : index
    %667 = vector.load %arg13[%c1_279, %c0_280, %c0_281] : memref<2x8x128xf32, #tpu.memory_space<vmem>>, vector<1x8x128xf32>
    %668 = vector.shape_cast %667 : vector<1x8x128xf32> to vector<8x128xf32>
    %669 = arith.truncf %668 : vector<8x128xf32> to vector<8x128xbf16>
    %c0_282 = arith.constant 0 : index
    %c0_283 = arith.constant 0 : index
    %670 = vector.load %arg8[%c0_282, %c0_283] : memref<128x384xbf16, #tpu.memory_space<vmem>>, vector<128x384xbf16>
    %cst_284 = arith.constant dense<0.000000e+00> : vector<8x384xf32>
    %671 = tpu.matmul %669, %670, %cst_284 {dimension_numbers = #tpu.dot_dimension_numbers<[1], [0], [0], [1], [0, 0, 1, 1], [], []>} : vector<8x128xbf16>, vector<128x384xbf16>, vector<8x384xf32> -> vector<8x384xf32>
    %672 = vector.extract_strided_slice %666 {offsets = [0, 0], sizes = [8, 128], strides = [1, 1]} : vector<8x384xf32> to vector<8x128xf32>
    %673 = vector.extract_strided_slice %666 {offsets = [0, 128], sizes = [8, 128], strides = [1, 1]} : vector<8x384xf32> to vector<8x128xf32>
    %674 = vector.extract_strided_slice %666 {offsets = [0, 256], sizes = [8, 128], strides = [1, 1]} : vector<8x384xf32> to vector<8x128xf32>
    %675 = vector.extract_strided_slice %671 {offsets = [0, 0], sizes = [8, 128], strides = [1, 1]} : vector<8x384xf32> to vector<8x128xf32>
    %676 = vector.extract_strided_slice %671 {offsets = [0, 128], sizes = [8, 128], strides = [1, 1]} : vector<8x384xf32> to vector<8x128xf32>
    %677 = vector.extract_strided_slice %671 {offsets = [0, 256], sizes = [8, 128], strides = [1, 1]} : vector<8x384xf32> to vector<8x128xf32>
    %678 = vector.broadcast %627 : vector<1x128xf32> to vector<8x128xf32>
    %679 = arith.addf %677, %678 : vector<8x128xf32>
    %680 = arith.addf %672, %675 : vector<8x128xf32>
    %681 = arith.negf %680 : vector<8x128xf32>
    %682 = math.exp %681 : vector<8x128xf32>
    %cst_285 = arith.constant 1.000000e+00 : f32
    %683 = vector.broadcast %cst_285 : f32 to vector<8x128xf32>
    %684 = arith.addf %683, %682 : vector<8x128xf32>
    %685 = arith.divf %683, %684 : vector<8x128xf32>
    %686 = arith.addf %673, %676 : vector<8x128xf32>
    %687 = arith.negf %686 : vector<8x128xf32>
    %688 = math.exp %687 : vector<8x128xf32>
    %cst_286 = arith.constant 1.000000e+00 : f32
    %689 = vector.broadcast %cst_286 : f32 to vector<8x128xf32>
    %690 = arith.addf %689, %688 : vector<8x128xf32>
    %691 = arith.divf %689, %690 : vector<8x128xf32>
    %692 = arith.mulf %685, %679 : vector<8x128xf32>
    %693 = arith.addf %674, %692 : vector<8x128xf32>
    %694 = math.tanh %693 : vector<8x128xf32>
    %cst_287 = arith.constant 1.000000e+00 : f32
    %695 = vector.broadcast %cst_287 : f32 to vector<8x128xf32>
    %696 = arith.subf %695, %691 : vector<8x128xf32>
    %697 = arith.mulf %696, %694 : vector<8x128xf32>
    %698 = arith.mulf %691, %668 : vector<8x128xf32>
    %699 = arith.addf %697, %698 : vector<8x128xf32>
    %c1_288 = arith.constant 1 : index
    %c0_289 = arith.constant 0 : index
    %c0_290 = arith.constant 0 : index
    %700 = vector.load %arg13[%c1_288, %c0_289, %c0_290] : memref<2x8x128xf32, #tpu.memory_space<vmem>>, vector<1x8x128xf32>
    %701 = vector.shape_cast %700 : vector<1x8x128xf32> to vector<8x128xf32>
    %702 = vector.shape_cast %699 : vector<8x128xf32> to vector<1x8x128xf32>
    tpu.vector_store %arg13[%c1_288, %c0_289, %c0_290], %702 {strides = array<i32>} : memref<2x8x128xf32, #tpu.memory_space<vmem>>, vector<1x8x128xf32>,
    %c8_291 = arith.constant 8 : index
    %c0_292 = arith.constant 0 : index
    %703 = vector.load %arg15[%c8_291, %c0_292] : memref<128x128xf32, #tpu.memory_space<vmem>>, vector<8x128xf32>
    tpu.vector_store %arg15[%c8_291, %c0_292], %699 {strides = array<i32>} : memref<128x128xf32, #tpu.memory_space<vmem>>, vector<8x128xf32>,
    %c16_293 = arith.constant 16 : index
    %c0_294 = arith.constant 0 : index
    %704 = vector.load %arg14[%c16_293, %c0_294] : memref<128x384xf32, #tpu.memory_space<vmem>>, vector<8x384xf32>
    %c1_295 = arith.constant 1 : index
    %c0_296 = arith.constant 0 : index
    %c0_297 = arith.constant 0 : index
    %705 = vector.load %arg13[%c1_295, %c0_296, %c0_297] : memref<2x8x128xf32, #tpu.memory_space<vmem>>, vector<1x8x128xf32>
    %706 = vector.shape_cast %705 : vector<1x8x128xf32> to vector<8x128xf32>
    %707 = arith.truncf %706 : vector<8x128xf32> to vector<8x128xbf16>
    %c0_298 = arith.constant 0 : index
    %c0_299 = arith.constant 0 : index
    %708 = vector.load %arg8[%c0_298, %c0_299] : memref<128x384xbf16, #tpu.memory_space<vmem>>, vector<128x384xbf16>
    %cst_300 = arith.constant dense<0.000000e+00> : vector<8x384xf32>
    %709 = tpu.matmul %707, %708, %cst_300 {dimension_numbers = #tpu.dot_dimension_numbers<[1], [0], [0], [1], [0, 0, 1, 1], [], []>} : vector<8x128xbf16>, vector<128x384xbf16>, vector<8x384xf32> -> vector<8x384xf32>
    %710 = vector.extract_strided_slice %704 {offsets = [0, 0], sizes = [8, 128], strides = [1, 1]} : vector<8x384xf32> to vector<8x128xf32>
    %711 = vector.extract_strided_slice %704 {offsets = [0, 128], sizes = [8, 128], strides = [1, 1]} : vector<8x384xf32> to vector<8x128xf32>
    %712 = vector.extract_strided_slice %704 {offsets = [0, 256], sizes = [8, 128], strides = [1, 1]} : vector<8x384xf32> to vector<8x128xf32>
    %713 = vector.extract_strided_slice %709 {offsets = [0, 0], sizes = [8, 128], strides = [1, 1]} : vector<8x384xf32> to vector<8x128xf32>
    %714 = vector.extract_strided_slice %709 {offsets = [0, 128], sizes = [8, 128], strides = [1, 1]} : vector<8x384xf32> to vector<8x128xf32>
    %715 = vector.extract_strided_slice %709 {offsets = [0, 256], sizes = [8, 128], strides = [1, 1]} : vector<8x384xf32> to vector<8x128xf32>
    %716 = vector.broadcast %627 : vector<1x128xf32> to vector<8x128xf32>
    %717 = arith.addf %715, %716 : vector<8x128xf32>
    %718 = arith.addf %710, %713 : vector<8x128xf32>
    %719 = arith.negf %718 : vector<8x128xf32>
    %720 = math.exp %719 : vector<8x128xf32>
    %cst_301 = arith.constant 1.000000e+00 : f32
    %721 = vector.broadcast %cst_301 : f32 to vector<8x128xf32>
    %722 = arith.addf %721, %720 : vector<8x128xf32>
    %723 = arith.divf %721, %722 : vector<8x128xf32>
    %724 = arith.addf %711, %714 : vector<8x128xf32>
    %725 = arith.negf %724 : vector<8x128xf32>
    %726 = math.exp %725 : vector<8x128xf32>
    %cst_302 = arith.constant 1.000000e+00 : f32
    %727 = vector.broadcast %cst_302 : f32 to vector<8x128xf32>
    %728 = arith.addf %727, %726 : vector<8x128xf32>
    %729 = arith.divf %727, %728 : vector<8x128xf32>
    %730 = arith.mulf %723, %717 : vector<8x128xf32>
    %731 = arith.addf %712, %730 : vector<8x128xf32>
    %732 = math.tanh %731 : vector<8x128xf32>
    %cst_303 = arith.constant 1.000000e+00 : f32
    %733 = vector.broadcast %cst_303 : f32 to vector<8x128xf32>
    %734 = arith.subf %733, %729 : vector<8x128xf32>
    %735 = arith.mulf %734, %732 : vector<8x128xf32>
    %736 = arith.mulf %729, %706 : vector<8x128xf32>
    %737 = arith.addf %735, %736 : vector<8x128xf32>
    %c1_304 = arith.constant 1 : index
    %c0_305 = arith.constant 0 : index
    %c0_306 = arith.constant 0 : index
    %738 = vector.load %arg13[%c1_304, %c0_305, %c0_306] : memref<2x8x128xf32, #tpu.memory_space<vmem>>, vector<1x8x128xf32>
    %739 = vector.shape_cast %738 : vector<1x8x128xf32> to vector<8x128xf32>
    %740 = vector.shape_cast %737 : vector<8x128xf32> to vector<1x8x128xf32>
    tpu.vector_store %arg13[%c1_304, %c0_305, %c0_306], %740 {strides = array<i32>} : memref<2x8x128xf32, #tpu.memory_space<vmem>>, vector<1x8x128xf32>,
    %c16_307 = arith.constant 16 : index
    %c0_308 = arith.constant 0 : index
    %741 = vector.load %arg15[%c16_307, %c0_308] : memref<128x128xf32, #tpu.memory_space<vmem>>, vector<8x128xf32>
    tpu.vector_store %arg15[%c16_307, %c0_308], %737 {strides = array<i32>} : memref<128x128xf32, #tpu.memory_space<vmem>>, vector<8x128xf32>,
    %c24_309 = arith.constant 24 : index
    %c0_310 = arith.constant 0 : index
    %742 = vector.load %arg14[%c24_309, %c0_310] : memref<128x384xf32, #tpu.memory_space<vmem>>, vector<8x384xf32>
    %c1_311 = arith.constant 1 : index
    %c0_312 = arith.constant 0 : index
    %c0_313 = arith.constant 0 : index
    %743 = vector.load %arg13[%c1_311, %c0_312, %c0_313] : memref<2x8x128xf32, #tpu.memory_space<vmem>>, vector<1x8x128xf32>
    %744 = vector.shape_cast %743 : vector<1x8x128xf32> to vector<8x128xf32>
    %745 = arith.truncf %744 : vector<8x128xf32> to vector<8x128xbf16>
    %c0_314 = arith.constant 0 : index
    %c0_315 = arith.constant 0 : index
    %746 = vector.load %arg8[%c0_314, %c0_315] : memref<128x384xbf16, #tpu.memory_space<vmem>>, vector<128x384xbf16>
    %cst_316 = arith.constant dense<0.000000e+00> : vector<8x384xf32>
    %747 = tpu.matmul %745, %746, %cst_316 {dimension_numbers = #tpu.dot_dimension_numbers<[1], [0], [0], [1], [0, 0, 1, 1], [], []>} : vector<8x128xbf16>, vector<128x384xbf16>, vector<8x384xf32> -> vector<8x384xf32>
    %748 = vector.extract_strided_slice %742 {offsets = [0, 0], sizes = [8, 128], strides = [1, 1]} : vector<8x384xf32> to vector<8x128xf32>
    %749 = vector.extract_strided_slice %742 {offsets = [0, 128], sizes = [8, 128], strides = [1, 1]} : vector<8x384xf32> to vector<8x128xf32>
    %750 = vector.extract_strided_slice %742 {offsets = [0, 256], sizes = [8, 128], strides = [1, 1]} : vector<8x384xf32> to vector<8x128xf32>
    %751 = vector.extract_strided_slice %747 {offsets = [0, 0], sizes = [8, 128], strides = [1, 1]} : vector<8x384xf32> to vector<8x128xf32>
    %752 = vector.extract_strided_slice %747 {offsets = [0, 128], sizes = [8, 128], strides = [1, 1]} : vector<8x384xf32> to vector<8x128xf32>
    %753 = vector.extract_strided_slice %747 {offsets = [0, 256], sizes = [8, 128], strides = [1, 1]} : vector<8x384xf32> to vector<8x128xf32>
    %754 = vector.broadcast %627 : vector<1x128xf32> to vector<8x128xf32>
    %755 = arith.addf %753, %754 : vector<8x128xf32>
    %756 = arith.addf %748, %751 : vector<8x128xf32>
    %757 = arith.negf %756 : vector<8x128xf32>
    %758 = math.exp %757 : vector<8x128xf32>
    %cst_317 = arith.constant 1.000000e+00 : f32
    %759 = vector.broadcast %cst_317 : f32 to vector<8x128xf32>
    %760 = arith.addf %759, %758 : vector<8x128xf32>
    %761 = arith.divf %759, %760 : vector<8x128xf32>
    %762 = arith.addf %749, %752 : vector<8x128xf32>
    %763 = arith.negf %762 : vector<8x128xf32>
    %764 = math.exp %763 : vector<8x128xf32>
    %cst_318 = arith.constant 1.000000e+00 : f32
    %765 = vector.broadcast %cst_318 : f32 to vector<8x128xf32>
    %766 = arith.addf %765, %764 : vector<8x128xf32>
    %767 = arith.divf %765, %766 : vector<8x128xf32>
    %768 = arith.mulf %761, %755 : vector<8x128xf32>
    %769 = arith.addf %750, %768 : vector<8x128xf32>
    %770 = math.tanh %769 : vector<8x128xf32>
    %cst_319 = arith.constant 1.000000e+00 : f32
    %771 = vector.broadcast %cst_319 : f32 to vector<8x128xf32>
    %772 = arith.subf %771, %767 : vector<8x128xf32>
    %773 = arith.mulf %772, %770 : vector<8x128xf32>
    %774 = arith.mulf %767, %744 : vector<8x128xf32>
    %775 = arith.addf %773, %774 : vector<8x128xf32>
    %c1_320 = arith.constant 1 : index
    %c0_321 = arith.constant 0 : index
    %c0_322 = arith.constant 0 : index
    %776 = vector.load %arg13[%c1_320, %c0_321, %c0_322] : memref<2x8x128xf32, #tpu.memory_space<vmem>>, vector<1x8x128xf32>
    %777 = vector.shape_cast %776 : vector<1x8x128xf32> to vector<8x128xf32>
    %778 = vector.shape_cast %775 : vector<8x128xf32> to vector<1x8x128xf32>
    tpu.vector_store %arg13[%c1_320, %c0_321, %c0_322], %778 {strides = array<i32>} : memref<2x8x128xf32, #tpu.memory_space<vmem>>, vector<1x8x128xf32>,
    %c24_323 = arith.constant 24 : index
    %c0_324 = arith.constant 0 : index
    %779 = vector.load %arg15[%c24_323, %c0_324] : memref<128x128xf32, #tpu.memory_space<vmem>>, vector<8x128xf32>
    tpu.vector_store %arg15[%c24_323, %c0_324], %775 {strides = array<i32>} : memref<128x128xf32, #tpu.memory_space<vmem>>, vector<8x128xf32>,
    %c32_325 = arith.constant 32 : index
    %c0_326 = arith.constant 0 : index
    %780 = vector.load %arg14[%c32_325, %c0_326] : memref<128x384xf32, #tpu.memory_space<vmem>>, vector<8x384xf32>
    %c1_327 = arith.constant 1 : index
    %c0_328 = arith.constant 0 : index
    %c0_329 = arith.constant 0 : index
    %781 = vector.load %arg13[%c1_327, %c0_328, %c0_329] : memref<2x8x128xf32, #tpu.memory_space<vmem>>, vector<1x8x128xf32>
    %782 = vector.shape_cast %781 : vector<1x8x128xf32> to vector<8x128xf32>
    %783 = arith.truncf %782 : vector<8x128xf32> to vector<8x128xbf16>
    %c0_330 = arith.constant 0 : index
    %c0_331 = arith.constant 0 : index
    %784 = vector.load %arg8[%c0_330, %c0_331] : memref<128x384xbf16, #tpu.memory_space<vmem>>, vector<128x384xbf16>
    %cst_332 = arith.constant dense<0.000000e+00> : vector<8x384xf32>
    %785 = tpu.matmul %783, %784, %cst_332 {dimension_numbers = #tpu.dot_dimension_numbers<[1], [0], [0], [1], [0, 0, 1, 1], [], []>} : vector<8x128xbf16>, vector<128x384xbf16>, vector<8x384xf32> -> vector<8x384xf32>
    %786 = vector.extract_strided_slice %780 {offsets = [0, 0], sizes = [8, 128], strides = [1, 1]} : vector<8x384xf32> to vector<8x128xf32>
    %787 = vector.extract_strided_slice %780 {offsets = [0, 128], sizes = [8, 128], strides = [1, 1]} : vector<8x384xf32> to vector<8x128xf32>
    %788 = vector.extract_strided_slice %780 {offsets = [0, 256], sizes = [8, 128], strides = [1, 1]} : vector<8x384xf32> to vector<8x128xf32>
    %789 = vector.extract_strided_slice %785 {offsets = [0, 0], sizes = [8, 128], strides = [1, 1]} : vector<8x384xf32> to vector<8x128xf32>
    %790 = vector.extract_strided_slice %785 {offsets = [0, 128], sizes = [8, 128], strides = [1, 1]} : vector<8x384xf32> to vector<8x128xf32>
    %791 = vector.extract_strided_slice %785 {offsets = [0, 256], sizes = [8, 128], strides = [1, 1]} : vector<8x384xf32> to vector<8x128xf32>
    %792 = vector.broadcast %627 : vector<1x128xf32> to vector<8x128xf32>
    %793 = arith.addf %791, %792 : vector<8x128xf32>
    %794 = arith.addf %786, %789 : vector<8x128xf32>
    %795 = arith.negf %794 : vector<8x128xf32>
    %796 = math.exp %795 : vector<8x128xf32>
    %cst_333 = arith.constant 1.000000e+00 : f32
    %797 = vector.broadcast %cst_333 : f32 to vector<8x128xf32>
    %798 = arith.addf %797, %796 : vector<8x128xf32>
    %799 = arith.divf %797, %798 : vector<8x128xf32>
    %800 = arith.addf %787, %790 : vector<8x128xf32>
    %801 = arith.negf %800 : vector<8x128xf32>
    %802 = math.exp %801 : vector<8x128xf32>
    %cst_334 = arith.constant 1.000000e+00 : f32
    %803 = vector.broadcast %cst_334 : f32 to vector<8x128xf32>
    %804 = arith.addf %803, %802 : vector<8x128xf32>
    %805 = arith.divf %803, %804 : vector<8x128xf32>
    %806 = arith.mulf %799, %793 : vector<8x128xf32>
    %807 = arith.addf %788, %806 : vector<8x128xf32>
    %808 = math.tanh %807 : vector<8x128xf32>
    %cst_335 = arith.constant 1.000000e+00 : f32
    %809 = vector.broadcast %cst_335 : f32 to vector<8x128xf32>
    %810 = arith.subf %809, %805 : vector<8x128xf32>
    %811 = arith.mulf %810, %808 : vector<8x128xf32>
    %812 = arith.mulf %805, %782 : vector<8x128xf32>
    %813 = arith.addf %811, %812 : vector<8x128xf32>
    %c1_336 = arith.constant 1 : index
    %c0_337 = arith.constant 0 : index
    %c0_338 = arith.constant 0 : index
    %814 = vector.load %arg13[%c1_336, %c0_337, %c0_338] : memref<2x8x128xf32, #tpu.memory_space<vmem>>, vector<1x8x128xf32>
    %815 = vector.shape_cast %814 : vector<1x8x128xf32> to vector<8x128xf32>
    %816 = vector.shape_cast %813 : vector<8x128xf32> to vector<1x8x128xf32>
    tpu.vector_store %arg13[%c1_336, %c0_337, %c0_338], %816 {strides = array<i32>} : memref<2x8x128xf32, #tpu.memory_space<vmem>>, vector<1x8x128xf32>,
    %c32_339 = arith.constant 32 : index
    %c0_340 = arith.constant 0 : index
    %817 = vector.load %arg15[%c32_339, %c0_340] : memref<128x128xf32, #tpu.memory_space<vmem>>, vector<8x128xf32>
    tpu.vector_store %arg15[%c32_339, %c0_340], %813 {strides = array<i32>} : memref<128x128xf32, #tpu.memory_space<vmem>>, vector<8x128xf32>,
    %c40_341 = arith.constant 40 : index
    %c0_342 = arith.constant 0 : index
    %818 = vector.load %arg14[%c40_341, %c0_342] : memref<128x384xf32, #tpu.memory_space<vmem>>, vector<8x384xf32>
    %c1_343 = arith.constant 1 : index
    %c0_344 = arith.constant 0 : index
    %c0_345 = arith.constant 0 : index
    %819 = vector.load %arg13[%c1_343, %c0_344, %c0_345] : memref<2x8x128xf32, #tpu.memory_space<vmem>>, vector<1x8x128xf32>
    %820 = vector.shape_cast %819 : vector<1x8x128xf32> to vector<8x128xf32>
    %821 = arith.truncf %820 : vector<8x128xf32> to vector<8x128xbf16>
    %c0_346 = arith.constant 0 : index
    %c0_347 = arith.constant 0 : index
    %822 = vector.load %arg8[%c0_346, %c0_347] : memref<128x384xbf16, #tpu.memory_space<vmem>>, vector<128x384xbf16>
    %cst_348 = arith.constant dense<0.000000e+00> : vector<8x384xf32>
    %823 = tpu.matmul %821, %822, %cst_348 {dimension_numbers = #tpu.dot_dimension_numbers<[1], [0], [0], [1], [0, 0, 1, 1], [], []>} : vector<8x128xbf16>, vector<128x384xbf16>, vector<8x384xf32> -> vector<8x384xf32>
    %824 = vector.extract_strided_slice %818 {offsets = [0, 0], sizes = [8, 128], strides = [1, 1]} : vector<8x384xf32> to vector<8x128xf32>
    %825 = vector.extract_strided_slice %818 {offsets = [0, 128], sizes = [8, 128], strides = [1, 1]} : vector<8x384xf32> to vector<8x128xf32>
    %826 = vector.extract_strided_slice %818 {offsets = [0, 256], sizes = [8, 128], strides = [1, 1]} : vector<8x384xf32> to vector<8x128xf32>
    %827 = vector.extract_strided_slice %823 {offsets = [0, 0], sizes = [8, 128], strides = [1, 1]} : vector<8x384xf32> to vector<8x128xf32>
    %828 = vector.extract_strided_slice %823 {offsets = [0, 128], sizes = [8, 128], strides = [1, 1]} : vector<8x384xf32> to vector<8x128xf32>
    %829 = vector.extract_strided_slice %823 {offsets = [0, 256], sizes = [8, 128], strides = [1, 1]} : vector<8x384xf32> to vector<8x128xf32>
    %830 = vector.broadcast %627 : vector<1x128xf32> to vector<8x128xf32>
    %831 = arith.addf %829, %830 : vector<8x128xf32>
    %832 = arith.addf %824, %827 : vector<8x128xf32>
    %833 = arith.negf %832 : vector<8x128xf32>
    %834 = math.exp %833 : vector<8x128xf32>
    %cst_349 = arith.constant 1.000000e+00 : f32
    %835 = vector.broadcast %cst_349 : f32 to vector<8x128xf32>
    %836 = arith.addf %835, %834 : vector<8x128xf32>
    %837 = arith.divf %835, %836 : vector<8x128xf32>
    %838 = arith.addf %825, %828 : vector<8x128xf32>
    %839 = arith.negf %838 : vector<8x128xf32>
    %840 = math.exp %839 : vector<8x128xf32>
    %cst_350 = arith.constant 1.000000e+00 : f32
    %841 = vector.broadcast %cst_350 : f32 to vector<8x128xf32>
    %842 = arith.addf %841, %840 : vector<8x128xf32>
    %843 = arith.divf %841, %842 : vector<8x128xf32>
    %844 = arith.mulf %837, %831 : vector<8x128xf32>
    %845 = arith.addf %826, %844 : vector<8x128xf32>
    %846 = math.tanh %845 : vector<8x128xf32>
    %cst_351 = arith.constant 1.000000e+00 : f32
    %847 = vector.broadcast %cst_351 : f32 to vector<8x128xf32>
    %848 = arith.subf %847, %843 : vector<8x128xf32>
    %849 = arith.mulf %848, %846 : vector<8x128xf32>
    %850 = arith.mulf %843, %820 : vector<8x128xf32>
    %851 = arith.addf %849, %850 : vector<8x128xf32>
    %c1_352 = arith.constant 1 : index
    %c0_353 = arith.constant 0 : index
    %c0_354 = arith.constant 0 : index
    %852 = vector.load %arg13[%c1_352, %c0_353, %c0_354] : memref<2x8x128xf32, #tpu.memory_space<vmem>>, vector<1x8x128xf32>
    %853 = vector.shape_cast %852 : vector<1x8x128xf32> to vector<8x128xf32>
    %854 = vector.shape_cast %851 : vector<8x128xf32> to vector<1x8x128xf32>
    tpu.vector_store %arg13[%c1_352, %c0_353, %c0_354], %854 {strides = array<i32>} : memref<2x8x128xf32, #tpu.memory_space<vmem>>, vector<1x8x128xf32>,
    %c40_355 = arith.constant 40 : index
    %c0_356 = arith.constant 0 : index
    %855 = vector.load %arg15[%c40_355, %c0_356] : memref<128x128xf32, #tpu.memory_space<vmem>>, vector<8x128xf32>
    tpu.vector_store %arg15[%c40_355, %c0_356], %851 {strides = array<i32>} : memref<128x128xf32, #tpu.memory_space<vmem>>, vector<8x128xf32>,
    %c48_357 = arith.constant 48 : index
    %c0_358 = arith.constant 0 : index
    %856 = vector.load %arg14[%c48_357, %c0_358] : memref<128x384xf32, #tpu.memory_space<vmem>>, vector<8x384xf32>
    %c1_359 = arith.constant 1 : index
    %c0_360 = arith.constant 0 : index
    %c0_361 = arith.constant 0 : index
    %857 = vector.load %arg13[%c1_359, %c0_360, %c0_361] : memref<2x8x128xf32, #tpu.memory_space<vmem>>, vector<1x8x128xf32>
    %858 = vector.shape_cast %857 : vector<1x8x128xf32> to vector<8x128xf32>
    %859 = arith.truncf %858 : vector<8x128xf32> to vector<8x128xbf16>
    %c0_362 = arith.constant 0 : index
    %c0_363 = arith.constant 0 : index
    %860 = vector.load %arg8[%c0_362, %c0_363] : memref<128x384xbf16, #tpu.memory_space<vmem>>, vector<128x384xbf16>
    %cst_364 = arith.constant dense<0.000000e+00> : vector<8x384xf32>
    %861 = tpu.matmul %859, %860, %cst_364 {dimension_numbers = #tpu.dot_dimension_numbers<[1], [0], [0], [1], [0, 0, 1, 1], [], []>} : vector<8x128xbf16>, vector<128x384xbf16>, vector<8x384xf32> -> vector<8x384xf32>
    %862 = vector.extract_strided_slice %856 {offsets = [0, 0], sizes = [8, 128], strides = [1, 1]} : vector<8x384xf32> to vector<8x128xf32>
    %863 = vector.extract_strided_slice %856 {offsets = [0, 128], sizes = [8, 128], strides = [1, 1]} : vector<8x384xf32> to vector<8x128xf32>
    %864 = vector.extract_strided_slice %856 {offsets = [0, 256], sizes = [8, 128], strides = [1, 1]} : vector<8x384xf32> to vector<8x128xf32>
    %865 = vector.extract_strided_slice %861 {offsets = [0, 0], sizes = [8, 128], strides = [1, 1]} : vector<8x384xf32> to vector<8x128xf32>
    %866 = vector.extract_strided_slice %861 {offsets = [0, 128], sizes = [8, 128], strides = [1, 1]} : vector<8x384xf32> to vector<8x128xf32>
    %867 = vector.extract_strided_slice %861 {offsets = [0, 256], sizes = [8, 128], strides = [1, 1]} : vector<8x384xf32> to vector<8x128xf32>
    %868 = vector.broadcast %627 : vector<1x128xf32> to vector<8x128xf32>
    %869 = arith.addf %867, %868 : vector<8x128xf32>
    %870 = arith.addf %862, %865 : vector<8x128xf32>
    %871 = arith.negf %870 : vector<8x128xf32>
    %872 = math.exp %871 : vector<8x128xf32>
    %cst_365 = arith.constant 1.000000e+00 : f32
    %873 = vector.broadcast %cst_365 : f32 to vector<8x128xf32>
    %874 = arith.addf %873, %872 : vector<8x128xf32>
    %875 = arith.divf %873, %874 : vector<8x128xf32>
    %876 = arith.addf %863, %866 : vector<8x128xf32>
    %877 = arith.negf %876 : vector<8x128xf32>
    %878 = math.exp %877 : vector<8x128xf32>
    %cst_366 = arith.constant 1.000000e+00 : f32
    %879 = vector.broadcast %cst_366 : f32 to vector<8x128xf32>
    %880 = arith.addf %879, %878 : vector<8x128xf32>
    %881 = arith.divf %879, %880 : vector<8x128xf32>
    %882 = arith.mulf %875, %869 : vector<8x128xf32>
    %883 = arith.addf %864, %882 : vector<8x128xf32>
    %884 = math.tanh %883 : vector<8x128xf32>
    %cst_367 = arith.constant 1.000000e+00 : f32
    %885 = vector.broadcast %cst_367 : f32 to vector<8x128xf32>
    %886 = arith.subf %885, %881 : vector<8x128xf32>
    %887 = arith.mulf %886, %884 : vector<8x128xf32>
    %888 = arith.mulf %881, %858 : vector<8x128xf32>
    %889 = arith.addf %887, %888 : vector<8x128xf32>
    %c1_368 = arith.constant 1 : index
    %c0_369 = arith.constant 0 : index
    %c0_370 = arith.constant 0 : index
    %890 = vector.load %arg13[%c1_368, %c0_369, %c0_370] : memref<2x8x128xf32, #tpu.memory_space<vmem>>, vector<1x8x128xf32>
    %891 = vector.shape_cast %890 : vector<1x8x128xf32> to vector<8x128xf32>
    %892 = vector.shape_cast %889 : vector<8x128xf32> to vector<1x8x128xf32>
    tpu.vector_store %arg13[%c1_368, %c0_369, %c0_370], %892 {strides = array<i32>} : memref<2x8x128xf32, #tpu.memory_space<vmem>>, vector<1x8x128xf32>,
    %c48_371 = arith.constant 48 : index
    %c0_372 = arith.constant 0 : index
    %893 = vector.load %arg15[%c48_371, %c0_372] : memref<128x128xf32, #tpu.memory_space<vmem>>, vector<8x128xf32>
    tpu.vector_store %arg15[%c48_371, %c0_372], %889 {strides = array<i32>} : memref<128x128xf32, #tpu.memory_space<vmem>>, vector<8x128xf32>,
    %c56_373 = arith.constant 56 : index
    %c0_374 = arith.constant 0 : index
    %894 = vector.load %arg14[%c56_373, %c0_374] : memref<128x384xf32, #tpu.memory_space<vmem>>, vector<8x384xf32>
    %c1_375 = arith.constant 1 : index
    %c0_376 = arith.constant 0 : index
    %c0_377 = arith.constant 0 : index
    %895 = vector.load %arg13[%c1_375, %c0_376, %c0_377] : memref<2x8x128xf32, #tpu.memory_space<vmem>>, vector<1x8x128xf32>
    %896 = vector.shape_cast %895 : vector<1x8x128xf32> to vector<8x128xf32>
    %897 = arith.truncf %896 : vector<8x128xf32> to vector<8x128xbf16>
    %c0_378 = arith.constant 0 : index
    %c0_379 = arith.constant 0 : index
    %898 = vector.load %arg8[%c0_378, %c0_379] : memref<128x384xbf16, #tpu.memory_space<vmem>>, vector<128x384xbf16>
    %cst_380 = arith.constant dense<0.000000e+00> : vector<8x384xf32>
    %899 = tpu.matmul %897, %898, %cst_380 {dimension_numbers = #tpu.dot_dimension_numbers<[1], [0], [0], [1], [0, 0, 1, 1], [], []>} : vector<8x128xbf16>, vector<128x384xbf16>, vector<8x384xf32> -> vector<8x384xf32>
    %900 = vector.extract_strided_slice %894 {offsets = [0, 0], sizes = [8, 128], strides = [1, 1]} : vector<8x384xf32> to vector<8x128xf32>
    %901 = vector.extract_strided_slice %894 {offsets = [0, 128], sizes = [8, 128], strides = [1, 1]} : vector<8x384xf32> to vector<8x128xf32>
    %902 = vector.extract_strided_slice %894 {offsets = [0, 256], sizes = [8, 128], strides = [1, 1]} : vector<8x384xf32> to vector<8x128xf32>
    %903 = vector.extract_strided_slice %899 {offsets = [0, 0], sizes = [8, 128], strides = [1, 1]} : vector<8x384xf32> to vector<8x128xf32>
    %904 = vector.extract_strided_slice %899 {offsets = [0, 128], sizes = [8, 128], strides = [1, 1]} : vector<8x384xf32> to vector<8x128xf32>
    %905 = vector.extract_strided_slice %899 {offsets = [0, 256], sizes = [8, 128], strides = [1, 1]} : vector<8x384xf32> to vector<8x128xf32>
    %906 = vector.broadcast %627 : vector<1x128xf32> to vector<8x128xf32>
    %907 = arith.addf %905, %906 : vector<8x128xf32>
    %908 = arith.addf %900, %903 : vector<8x128xf32>
    %909 = arith.negf %908 : vector<8x128xf32>
    %910 = math.exp %909 : vector<8x128xf32>
    %cst_381 = arith.constant 1.000000e+00 : f32
    %911 = vector.broadcast %cst_381 : f32 to vector<8x128xf32>
    %912 = arith.addf %911, %910 : vector<8x128xf32>
    %913 = arith.divf %911, %912 : vector<8x128xf32>
    %914 = arith.addf %901, %904 : vector<8x128xf32>
    %915 = arith.negf %914 : vector<8x128xf32>
    %916 = math.exp %915 : vector<8x128xf32>
    %cst_382 = arith.constant 1.000000e+00 : f32
    %917 = vector.broadcast %cst_382 : f32 to vector<8x128xf32>
    %918 = arith.addf %917, %916 : vector<8x128xf32>
    %919 = arith.divf %917, %918 : vector<8x128xf32>
    %920 = arith.mulf %913, %907 : vector<8x128xf32>
    %921 = arith.addf %902, %920 : vector<8x128xf32>
    %922 = math.tanh %921 : vector<8x128xf32>
    %cst_383 = arith.constant 1.000000e+00 : f32
    %923 = vector.broadcast %cst_383 : f32 to vector<8x128xf32>
    %924 = arith.subf %923, %919 : vector<8x128xf32>
    %925 = arith.mulf %924, %922 : vector<8x128xf32>
    %926 = arith.mulf %919, %896 : vector<8x128xf32>
    %927 = arith.addf %925, %926 : vector<8x128xf32>
    %c1_384 = arith.constant 1 : index
    %c0_385 = arith.constant 0 : index
    %c0_386 = arith.constant 0 : index
    %928 = vector.load %arg13[%c1_384, %c0_385, %c0_386] : memref<2x8x128xf32, #tpu.memory_space<vmem>>, vector<1x8x128xf32>
    %929 = vector.shape_cast %928 : vector<1x8x128xf32> to vector<8x128xf32>
    %930 = vector.shape_cast %927 : vector<8x128xf32> to vector<1x8x128xf32>
    tpu.vector_store %arg13[%c1_384, %c0_385, %c0_386], %930 {strides = array<i32>} : memref<2x8x128xf32, #tpu.memory_space<vmem>>, vector<1x8x128xf32>,
    %c56_387 = arith.constant 56 : index
    %c0_388 = arith.constant 0 : index
    %931 = vector.load %arg15[%c56_387, %c0_388] : memref<128x128xf32, #tpu.memory_space<vmem>>, vector<8x128xf32>
    tpu.vector_store %arg15[%c56_387, %c0_388], %927 {strides = array<i32>} : memref<128x128xf32, #tpu.memory_space<vmem>>, vector<8x128xf32>,
    %c64_389 = arith.constant 64 : index
    %c0_390 = arith.constant 0 : index
    %932 = vector.load %arg14[%c64_389, %c0_390] : memref<128x384xf32, #tpu.memory_space<vmem>>, vector<8x384xf32>
    %c1_391 = arith.constant 1 : index
    %c0_392 = arith.constant 0 : index
    %c0_393 = arith.constant 0 : index
    %933 = vector.load %arg13[%c1_391, %c0_392, %c0_393] : memref<2x8x128xf32, #tpu.memory_space<vmem>>, vector<1x8x128xf32>
    %934 = vector.shape_cast %933 : vector<1x8x128xf32> to vector<8x128xf32>
    %935 = arith.truncf %934 : vector<8x128xf32> to vector<8x128xbf16>
    %c0_394 = arith.constant 0 : index
    %c0_395 = arith.constant 0 : index
    %936 = vector.load %arg8[%c0_394, %c0_395] : memref<128x384xbf16, #tpu.memory_space<vmem>>, vector<128x384xbf16>
    %cst_396 = arith.constant dense<0.000000e+00> : vector<8x384xf32>
    %937 = tpu.matmul %935, %936, %cst_396 {dimension_numbers = #tpu.dot_dimension_numbers<[1], [0], [0], [1], [0, 0, 1, 1], [], []>} : vector<8x128xbf16>, vector<128x384xbf16>, vector<8x384xf32> -> vector<8x384xf32>
    %938 = vector.extract_strided_slice %932 {offsets = [0, 0], sizes = [8, 128], strides = [1, 1]} : vector<8x384xf32> to vector<8x128xf32>
    %939 = vector.extract_strided_slice %932 {offsets = [0, 128], sizes = [8, 128], strides = [1, 1]} : vector<8x384xf32> to vector<8x128xf32>
    %940 = vector.extract_strided_slice %932 {offsets = [0, 256], sizes = [8, 128], strides = [1, 1]} : vector<8x384xf32> to vector<8x128xf32>
    %941 = vector.extract_strided_slice %937 {offsets = [0, 0], sizes = [8, 128], strides = [1, 1]} : vector<8x384xf32> to vector<8x128xf32>
    %942 = vector.extract_strided_slice %937 {offsets = [0, 128], sizes = [8, 128], strides = [1, 1]} : vector<8x384xf32> to vector<8x128xf32>
    %943 = vector.extract_strided_slice %937 {offsets = [0, 256], sizes = [8, 128], strides = [1, 1]} : vector<8x384xf32> to vector<8x128xf32>
    %944 = vector.broadcast %627 : vector<1x128xf32> to vector<8x128xf32>
    %945 = arith.addf %943, %944 : vector<8x128xf32>
    %946 = arith.addf %938, %941 : vector<8x128xf32>
    %947 = arith.negf %946 : vector<8x128xf32>
    %948 = math.exp %947 : vector<8x128xf32>
    %cst_397 = arith.constant 1.000000e+00 : f32
    %949 = vector.broadcast %cst_397 : f32 to vector<8x128xf32>
    %950 = arith.addf %949, %948 : vector<8x128xf32>
    %951 = arith.divf %949, %950 : vector<8x128xf32>
    %952 = arith.addf %939, %942 : vector<8x128xf32>
    %953 = arith.negf %952 : vector<8x128xf32>
    %954 = math.exp %953 : vector<8x128xf32>
    %cst_398 = arith.constant 1.000000e+00 : f32
    %955 = vector.broadcast %cst_398 : f32 to vector<8x128xf32>
    %956 = arith.addf %955, %954 : vector<8x128xf32>
    %957 = arith.divf %955, %956 : vector<8x128xf32>
    %958 = arith.mulf %951, %945 : vector<8x128xf32>
    %959 = arith.addf %940, %958 : vector<8x128xf32>
    %960 = math.tanh %959 : vector<8x128xf32>
    %cst_399 = arith.constant 1.000000e+00 : f32
    %961 = vector.broadcast %cst_399 : f32 to vector<8x128xf32>
    %962 = arith.subf %961, %957 : vector<8x128xf32>
    %963 = arith.mulf %962, %960 : vector<8x128xf32>
    %964 = arith.mulf %957, %934 : vector<8x128xf32>
    %965 = arith.addf %963, %964 : vector<8x128xf32>
    %c1_400 = arith.constant 1 : index
    %c0_401 = arith.constant 0 : index
    %c0_402 = arith.constant 0 : index
    %966 = vector.load %arg13[%c1_400, %c0_401, %c0_402] : memref<2x8x128xf32, #tpu.memory_space<vmem>>, vector<1x8x128xf32>
    %967 = vector.shape_cast %966 : vector<1x8x128xf32> to vector<8x128xf32>
    %968 = vector.shape_cast %965 : vector<8x128xf32> to vector<1x8x128xf32>
    tpu.vector_store %arg13[%c1_400, %c0_401, %c0_402], %968 {strides = array<i32>} : memref<2x8x128xf32, #tpu.memory_space<vmem>>, vector<1x8x128xf32>,
    %c64_403 = arith.constant 64 : index
    %c0_404 = arith.constant 0 : index
    %969 = vector.load %arg15[%c64_403, %c0_404] : memref<128x128xf32, #tpu.memory_space<vmem>>, vector<8x128xf32>
    tpu.vector_store %arg15[%c64_403, %c0_404], %965 {strides = array<i32>} : memref<128x128xf32, #tpu.memory_space<vmem>>, vector<8x128xf32>,
    %c72_405 = arith.constant 72 : index
    %c0_406 = arith.constant 0 : index
    %970 = vector.load %arg14[%c72_405, %c0_406] : memref<128x384xf32, #tpu.memory_space<vmem>>, vector<8x384xf32>
    %c1_407 = arith.constant 1 : index
    %c0_408 = arith.constant 0 : index
    %c0_409 = arith.constant 0 : index
    %971 = vector.load %arg13[%c1_407, %c0_408, %c0_409] : memref<2x8x128xf32, #tpu.memory_space<vmem>>, vector<1x8x128xf32>
    %972 = vector.shape_cast %971 : vector<1x8x128xf32> to vector<8x128xf32>
    %973 = arith.truncf %972 : vector<8x128xf32> to vector<8x128xbf16>
    %c0_410 = arith.constant 0 : index
    %c0_411 = arith.constant 0 : index
    %974 = vector.load %arg8[%c0_410, %c0_411] : memref<128x384xbf16, #tpu.memory_space<vmem>>, vector<128x384xbf16>
    %cst_412 = arith.constant dense<0.000000e+00> : vector<8x384xf32>
    %975 = tpu.matmul %973, %974, %cst_412 {dimension_numbers = #tpu.dot_dimension_numbers<[1], [0], [0], [1], [0, 0, 1, 1], [], []>} : vector<8x128xbf16>, vector<128x384xbf16>, vector<8x384xf32> -> vector<8x384xf32>
    %976 = vector.extract_strided_slice %970 {offsets = [0, 0], sizes = [8, 128], strides = [1, 1]} : vector<8x384xf32> to vector<8x128xf32>
    %977 = vector.extract_strided_slice %970 {offsets = [0, 128], sizes = [8, 128], strides = [1, 1]} : vector<8x384xf32> to vector<8x128xf32>
    %978 = vector.extract_strided_slice %970 {offsets = [0, 256], sizes = [8, 128], strides = [1, 1]} : vector<8x384xf32> to vector<8x128xf32>
    %979 = vector.extract_strided_slice %975 {offsets = [0, 0], sizes = [8, 128], strides = [1, 1]} : vector<8x384xf32> to vector<8x128xf32>
    %980 = vector.extract_strided_slice %975 {offsets = [0, 128], sizes = [8, 128], strides = [1, 1]} : vector<8x384xf32> to vector<8x128xf32>
    %981 = vector.extract_strided_slice %975 {offsets = [0, 256], sizes = [8, 128], strides = [1, 1]} : vector<8x384xf32> to vector<8x128xf32>
    %982 = vector.broadcast %627 : vector<1x128xf32> to vector<8x128xf32>
    %983 = arith.addf %981, %982 : vector<8x128xf32>
    %984 = arith.addf %976, %979 : vector<8x128xf32>
    %985 = arith.negf %984 : vector<8x128xf32>
    %986 = math.exp %985 : vector<8x128xf32>
    %cst_413 = arith.constant 1.000000e+00 : f32
    %987 = vector.broadcast %cst_413 : f32 to vector<8x128xf32>
    %988 = arith.addf %987, %986 : vector<8x128xf32>
    %989 = arith.divf %987, %988 : vector<8x128xf32>
    %990 = arith.addf %977, %980 : vector<8x128xf32>
    %991 = arith.negf %990 : vector<8x128xf32>
    %992 = math.exp %991 : vector<8x128xf32>
    %cst_414 = arith.constant 1.000000e+00 : f32
    %993 = vector.broadcast %cst_414 : f32 to vector<8x128xf32>
    %994 = arith.addf %993, %992 : vector<8x128xf32>
    %995 = arith.divf %993, %994 : vector<8x128xf32>
    %996 = arith.mulf %989, %983 : vector<8x128xf32>
    %997 = arith.addf %978, %996 : vector<8x128xf32>
    %998 = math.tanh %997 : vector<8x128xf32>
    %cst_415 = arith.constant 1.000000e+00 : f32
    %999 = vector.broadcast %cst_415 : f32 to vector<8x128xf32>
    %1000 = arith.subf %999, %995 : vector<8x128xf32>
    %1001 = arith.mulf %1000, %998 : vector<8x128xf32>
    %1002 = arith.mulf %995, %972 : vector<8x128xf32>
    %1003 = arith.addf %1001, %1002 : vector<8x128xf32>
    %c1_416 = arith.constant 1 : index
    %c0_417 = arith.constant 0 : index
    %c0_418 = arith.constant 0 : index
    %1004 = vector.load %arg13[%c1_416, %c0_417, %c0_418] : memref<2x8x128xf32, #tpu.memory_space<vmem>>, vector<1x8x128xf32>
    %1005 = vector.shape_cast %1004 : vector<1x8x128xf32> to vector<8x128xf32>
    %1006 = vector.shape_cast %1003 : vector<8x128xf32> to vector<1x8x128xf32>
    tpu.vector_store %arg13[%c1_416, %c0_417, %c0_418], %1006 {strides = array<i32>} : memref<2x8x128xf32, #tpu.memory_space<vmem>>, vector<1x8x128xf32>,
    %c72_419 = arith.constant 72 : index
    %c0_420 = arith.constant 0 : index
    %1007 = vector.load %arg15[%c72_419, %c0_420] : memref<128x128xf32, #tpu.memory_space<vmem>>, vector<8x128xf32>
    tpu.vector_store %arg15[%c72_419, %c0_420], %1003 {strides = array<i32>} : memref<128x128xf32, #tpu.memory_space<vmem>>, vector<8x128xf32>,
    %c80_421 = arith.constant 80 : index
    %c0_422 = arith.constant 0 : index
    %1008 = vector.load %arg14[%c80_421, %c0_422] : memref<128x384xf32, #tpu.memory_space<vmem>>, vector<8x384xf32>
    %c1_423 = arith.constant 1 : index
    %c0_424 = arith.constant 0 : index
    %c0_425 = arith.constant 0 : index
    %1009 = vector.load %arg13[%c1_423, %c0_424, %c0_425] : memref<2x8x128xf32, #tpu.memory_space<vmem>>, vector<1x8x128xf32>
    %1010 = vector.shape_cast %1009 : vector<1x8x128xf32> to vector<8x128xf32>
    %1011 = arith.truncf %1010 : vector<8x128xf32> to vector<8x128xbf16>
    %c0_426 = arith.constant 0 : index
    %c0_427 = arith.constant 0 : index
    %1012 = vector.load %arg8[%c0_426, %c0_427] : memref<128x384xbf16, #tpu.memory_space<vmem>>, vector<128x384xbf16>
    %cst_428 = arith.constant dense<0.000000e+00> : vector<8x384xf32>
    %1013 = tpu.matmul %1011, %1012, %cst_428 {dimension_numbers = #tpu.dot_dimension_numbers<[1], [0], [0], [1], [0, 0, 1, 1], [], []>} : vector<8x128xbf16>, vector<128x384xbf16>, vector<8x384xf32> -> vector<8x384xf32>
    %1014 = vector.extract_strided_slice %1008 {offsets = [0, 0], sizes = [8, 128], strides = [1, 1]} : vector<8x384xf32> to vector<8x128xf32>
    %1015 = vector.extract_strided_slice %1008 {offsets = [0, 128], sizes = [8, 128], strides = [1, 1]} : vector<8x384xf32> to vector<8x128xf32>
    %1016 = vector.extract_strided_slice %1008 {offsets = [0, 256], sizes = [8, 128], strides = [1, 1]} : vector<8x384xf32> to vector<8x128xf32>
    %1017 = vector.extract_strided_slice %1013 {offsets = [0, 0], sizes = [8, 128], strides = [1, 1]} : vector<8x384xf32> to vector<8x128xf32>
    %1018 = vector.extract_strided_slice %1013 {offsets = [0, 128], sizes = [8, 128], strides = [1, 1]} : vector<8x384xf32> to vector<8x128xf32>
    %1019 = vector.extract_strided_slice %1013 {offsets = [0, 256], sizes = [8, 128], strides = [1, 1]} : vector<8x384xf32> to vector<8x128xf32>
    %1020 = vector.broadcast %627 : vector<1x128xf32> to vector<8x128xf32>
    %1021 = arith.addf %1019, %1020 : vector<8x128xf32>
    %1022 = arith.addf %1014, %1017 : vector<8x128xf32>
    %1023 = arith.negf %1022 : vector<8x128xf32>
    %1024 = math.exp %1023 : vector<8x128xf32>
    %cst_429 = arith.constant 1.000000e+00 : f32
    %1025 = vector.broadcast %cst_429 : f32 to vector<8x128xf32>
    %1026 = arith.addf %1025, %1024 : vector<8x128xf32>
    %1027 = arith.divf %1025, %1026 : vector<8x128xf32>
    %1028 = arith.addf %1015, %1018 : vector<8x128xf32>
    %1029 = arith.negf %1028 : vector<8x128xf32>
    %1030 = math.exp %1029 : vector<8x128xf32>
    %cst_430 = arith.constant 1.000000e+00 : f32
    %1031 = vector.broadcast %cst_430 : f32 to vector<8x128xf32>
    %1032 = arith.addf %1031, %1030 : vector<8x128xf32>
    %1033 = arith.divf %1031, %1032 : vector<8x128xf32>
    %1034 = arith.mulf %1027, %1021 : vector<8x128xf32>
    %1035 = arith.addf %1016, %1034 : vector<8x128xf32>
    %1036 = math.tanh %1035 : vector<8x128xf32>
    %cst_431 = arith.constant 1.000000e+00 : f32
    %1037 = vector.broadcast %cst_431 : f32 to vector<8x128xf32>
    %1038 = arith.subf %1037, %1033 : vector<8x128xf32>
    %1039 = arith.mulf %1038, %1036 : vector<8x128xf32>
    %1040 = arith.mulf %1033, %1010 : vector<8x128xf32>
    %1041 = arith.addf %1039, %1040 : vector<8x128xf32>
    %c1_432 = arith.constant 1 : index
    %c0_433 = arith.constant 0 : index
    %c0_434 = arith.constant 0 : index
    %1042 = vector.load %arg13[%c1_432, %c0_433, %c0_434] : memref<2x8x128xf32, #tpu.memory_space<vmem>>, vector<1x8x128xf32>
    %1043 = vector.shape_cast %1042 : vector<1x8x128xf32> to vector<8x128xf32>
    %1044 = vector.shape_cast %1041 : vector<8x128xf32> to vector<1x8x128xf32>
    tpu.vector_store %arg13[%c1_432, %c0_433, %c0_434], %1044 {strides = array<i32>} : memref<2x8x128xf32, #tpu.memory_space<vmem>>, vector<1x8x128xf32>,
    %c80_435 = arith.constant 80 : index
    %c0_436 = arith.constant 0 : index
    %1045 = vector.load %arg15[%c80_435, %c0_436] : memref<128x128xf32, #tpu.memory_space<vmem>>, vector<8x128xf32>
    tpu.vector_store %arg15[%c80_435, %c0_436], %1041 {strides = array<i32>} : memref<128x128xf32, #tpu.memory_space<vmem>>, vector<8x128xf32>,
    %c88_437 = arith.constant 88 : index
    %c0_438 = arith.constant 0 : index
    %1046 = vector.load %arg14[%c88_437, %c0_438] : memref<128x384xf32, #tpu.memory_space<vmem>>, vector<8x384xf32>
    %c1_439 = arith.constant 1 : index
    %c0_440 = arith.constant 0 : index
    %c0_441 = arith.constant 0 : index
    %1047 = vector.load %arg13[%c1_439, %c0_440, %c0_441] : memref<2x8x128xf32, #tpu.memory_space<vmem>>, vector<1x8x128xf32>
    %1048 = vector.shape_cast %1047 : vector<1x8x128xf32> to vector<8x128xf32>
    %1049 = arith.truncf %1048 : vector<8x128xf32> to vector<8x128xbf16>
    %c0_442 = arith.constant 0 : index
    %c0_443 = arith.constant 0 : index
    %1050 = vector.load %arg8[%c0_442, %c0_443] : memref<128x384xbf16, #tpu.memory_space<vmem>>, vector<128x384xbf16>
    %cst_444 = arith.constant dense<0.000000e+00> : vector<8x384xf32>
    %1051 = tpu.matmul %1049, %1050, %cst_444 {dimension_numbers = #tpu.dot_dimension_numbers<[1], [0], [0], [1], [0, 0, 1, 1], [], []>} : vector<8x128xbf16>, vector<128x384xbf16>, vector<8x384xf32> -> vector<8x384xf32>
    %1052 = vector.extract_strided_slice %1046 {offsets = [0, 0], sizes = [8, 128], strides = [1, 1]} : vector<8x384xf32> to vector<8x128xf32>
    %1053 = vector.extract_strided_slice %1046 {offsets = [0, 128], sizes = [8, 128], strides = [1, 1]} : vector<8x384xf32> to vector<8x128xf32>
    %1054 = vector.extract_strided_slice %1046 {offsets = [0, 256], sizes = [8, 128], strides = [1, 1]} : vector<8x384xf32> to vector<8x128xf32>
    %1055 = vector.extract_strided_slice %1051 {offsets = [0, 0], sizes = [8, 128], strides = [1, 1]} : vector<8x384xf32> to vector<8x128xf32>
    %1056 = vector.extract_strided_slice %1051 {offsets = [0, 128], sizes = [8, 128], strides = [1, 1]} : vector<8x384xf32> to vector<8x128xf32>
    %1057 = vector.extract_strided_slice %1051 {offsets = [0, 256], sizes = [8, 128], strides = [1, 1]} : vector<8x384xf32> to vector<8x128xf32>
    %1058 = vector.broadcast %627 : vector<1x128xf32> to vector<8x128xf32>
    %1059 = arith.addf %1057, %1058 : vector<8x128xf32>
    %1060 = arith.addf %1052, %1055 : vector<8x128xf32>
    %1061 = arith.negf %1060 : vector<8x128xf32>
    %1062 = math.exp %1061 : vector<8x128xf32>
    %cst_445 = arith.constant 1.000000e+00 : f32
    %1063 = vector.broadcast %cst_445 : f32 to vector<8x128xf32>
    %1064 = arith.addf %1063, %1062 : vector<8x128xf32>
    %1065 = arith.divf %1063, %1064 : vector<8x128xf32>
    %1066 = arith.addf %1053, %1056 : vector<8x128xf32>
    %1067 = arith.negf %1066 : vector<8x128xf32>
    %1068 = math.exp %1067 : vector<8x128xf32>
    %cst_446 = arith.constant 1.000000e+00 : f32
    %1069 = vector.broadcast %cst_446 : f32 to vector<8x128xf32>
    %1070 = arith.addf %1069, %1068 : vector<8x128xf32>
    %1071 = arith.divf %1069, %1070 : vector<8x128xf32>
    %1072 = arith.mulf %1065, %1059 : vector<8x128xf32>
    %1073 = arith.addf %1054, %1072 : vector<8x128xf32>
    %1074 = math.tanh %1073 : vector<8x128xf32>
    %cst_447 = arith.constant 1.000000e+00 : f32
    %1075 = vector.broadcast %cst_447 : f32 to vector<8x128xf32>
    %1076 = arith.subf %1075, %1071 : vector<8x128xf32>
    %1077 = arith.mulf %1076, %1074 : vector<8x128xf32>
    %1078 = arith.mulf %1071, %1048 : vector<8x128xf32>
    %1079 = arith.addf %1077, %1078 : vector<8x128xf32>
    %c1_448 = arith.constant 1 : index
    %c0_449 = arith.constant 0 : index
    %c0_450 = arith.constant 0 : index
    %1080 = vector.load %arg13[%c1_448, %c0_449, %c0_450] : memref<2x8x128xf32, #tpu.memory_space<vmem>>, vector<1x8x128xf32>
    %1081 = vector.shape_cast %1080 : vector<1x8x128xf32> to vector<8x128xf32>
    %1082 = vector.shape_cast %1079 : vector<8x128xf32> to vector<1x8x128xf32>
    tpu.vector_store %arg13[%c1_448, %c0_449, %c0_450], %1082 {strides = array<i32>} : memref<2x8x128xf32, #tpu.memory_space<vmem>>, vector<1x8x128xf32>,
    %c88_451 = arith.constant 88 : index
    %c0_452 = arith.constant 0 : index
    %1083 = vector.load %arg15[%c88_451, %c0_452] : memref<128x128xf32, #tpu.memory_space<vmem>>, vector<8x128xf32>
    tpu.vector_store %arg15[%c88_451, %c0_452], %1079 {strides = array<i32>} : memref<128x128xf32, #tpu.memory_space<vmem>>, vector<8x128xf32>,
    %c96_453 = arith.constant 96 : index
    %c0_454 = arith.constant 0 : index
    %1084 = vector.load %arg14[%c96_453, %c0_454] : memref<128x384xf32, #tpu.memory_space<vmem>>, vector<8x384xf32>
    %c1_455 = arith.constant 1 : index
    %c0_456 = arith.constant 0 : index
    %c0_457 = arith.constant 0 : index
    %1085 = vector.load %arg13[%c1_455, %c0_456, %c0_457] : memref<2x8x128xf32, #tpu.memory_space<vmem>>, vector<1x8x128xf32>
    %1086 = vector.shape_cast %1085 : vector<1x8x128xf32> to vector<8x128xf32>
    %1087 = arith.truncf %1086 : vector<8x128xf32> to vector<8x128xbf16>
    %c0_458 = arith.constant 0 : index
    %c0_459 = arith.constant 0 : index
    %1088 = vector.load %arg8[%c0_458, %c0_459] : memref<128x384xbf16, #tpu.memory_space<vmem>>, vector<128x384xbf16>
    %cst_460 = arith.constant dense<0.000000e+00> : vector<8x384xf32>
    %1089 = tpu.matmul %1087, %1088, %cst_460 {dimension_numbers = #tpu.dot_dimension_numbers<[1], [0], [0], [1], [0, 0, 1, 1], [], []>} : vector<8x128xbf16>, vector<128x384xbf16>, vector<8x384xf32> -> vector<8x384xf32>
    %1090 = vector.extract_strided_slice %1084 {offsets = [0, 0], sizes = [8, 128], strides = [1, 1]} : vector<8x384xf32> to vector<8x128xf32>
    %1091 = vector.extract_strided_slice %1084 {offsets = [0, 128], sizes = [8, 128], strides = [1, 1]} : vector<8x384xf32> to vector<8x128xf32>
    %1092 = vector.extract_strided_slice %1084 {offsets = [0, 256], sizes = [8, 128], strides = [1, 1]} : vector<8x384xf32> to vector<8x128xf32>
    %1093 = vector.extract_strided_slice %1089 {offsets = [0, 0], sizes = [8, 128], strides = [1, 1]} : vector<8x384xf32> to vector<8x128xf32>
    %1094 = vector.extract_strided_slice %1089 {offsets = [0, 128], sizes = [8, 128], strides = [1, 1]} : vector<8x384xf32> to vector<8x128xf32>
    %1095 = vector.extract_strided_slice %1089 {offsets = [0, 256], sizes = [8, 128], strides = [1, 1]} : vector<8x384xf32> to vector<8x128xf32>
    %1096 = vector.broadcast %627 : vector<1x128xf32> to vector<8x128xf32>
    %1097 = arith.addf %1095, %1096 : vector<8x128xf32>
    %1098 = arith.addf %1090, %1093 : vector<8x128xf32>
    %1099 = arith.negf %1098 : vector<8x128xf32>
    %1100 = math.exp %1099 : vector<8x128xf32>
    %cst_461 = arith.constant 1.000000e+00 : f32
    %1101 = vector.broadcast %cst_461 : f32 to vector<8x128xf32>
    %1102 = arith.addf %1101, %1100 : vector<8x128xf32>
    %1103 = arith.divf %1101, %1102 : vector<8x128xf32>
    %1104 = arith.addf %1091, %1094 : vector<8x128xf32>
    %1105 = arith.negf %1104 : vector<8x128xf32>
    %1106 = math.exp %1105 : vector<8x128xf32>
    %cst_462 = arith.constant 1.000000e+00 : f32
    %1107 = vector.broadcast %cst_462 : f32 to vector<8x128xf32>
    %1108 = arith.addf %1107, %1106 : vector<8x128xf32>
    %1109 = arith.divf %1107, %1108 : vector<8x128xf32>
    %1110 = arith.mulf %1103, %1097 : vector<8x128xf32>
    %1111 = arith.addf %1092, %1110 : vector<8x128xf32>
    %1112 = math.tanh %1111 : vector<8x128xf32>
    %cst_463 = arith.constant 1.000000e+00 : f32
    %1113 = vector.broadcast %cst_463 : f32 to vector<8x128xf32>
    %1114 = arith.subf %1113, %1109 : vector<8x128xf32>
    %1115 = arith.mulf %1114, %1112 : vector<8x128xf32>
    %1116 = arith.mulf %1109, %1086 : vector<8x128xf32>
    %1117 = arith.addf %1115, %1116 : vector<8x128xf32>
    %c1_464 = arith.constant 1 : index
    %c0_465 = arith.constant 0 : index
    %c0_466 = arith.constant 0 : index
    %1118 = vector.load %arg13[%c1_464, %c0_465, %c0_466] : memref<2x8x128xf32, #tpu.memory_space<vmem>>, vector<1x8x128xf32>
    %1119 = vector.shape_cast %1118 : vector<1x8x128xf32> to vector<8x128xf32>
    %1120 = vector.shape_cast %1117 : vector<8x128xf32> to vector<1x8x128xf32>
    tpu.vector_store %arg13[%c1_464, %c0_465, %c0_466], %1120 {strides = array<i32>} : memref<2x8x128xf32, #tpu.memory_space<vmem>>, vector<1x8x128xf32>,
    %c96_467 = arith.constant 96 : index
    %c0_468 = arith.constant 0 : index
    %1121 = vector.load %arg15[%c96_467, %c0_468] : memref<128x128xf32, #tpu.memory_space<vmem>>, vector<8x128xf32>
    tpu.vector_store %arg15[%c96_467, %c0_468], %1117 {strides = array<i32>} : memref<128x128xf32, #tpu.memory_space<vmem>>, vector<8x128xf32>,
    %c104_469 = arith.constant 104 : index
    %c0_470 = arith.constant 0 : index
    %1122 = vector.load %arg14[%c104_469, %c0_470] : memref<128x384xf32, #tpu.memory_space<vmem>>, vector<8x384xf32>
    %c1_471 = arith.constant 1 : index
    %c0_472 = arith.constant 0 : index
    %c0_473 = arith.constant 0 : index
    %1123 = vector.load %arg13[%c1_471, %c0_472, %c0_473] : memref<2x8x128xf32, #tpu.memory_space<vmem>>, vector<1x8x128xf32>
    %1124 = vector.shape_cast %1123 : vector<1x8x128xf32> to vector<8x128xf32>
    %1125 = arith.truncf %1124 : vector<8x128xf32> to vector<8x128xbf16>
    %c0_474 = arith.constant 0 : index
    %c0_475 = arith.constant 0 : index
    %1126 = vector.load %arg8[%c0_474, %c0_475] : memref<128x384xbf16, #tpu.memory_space<vmem>>, vector<128x384xbf16>
    %cst_476 = arith.constant dense<0.000000e+00> : vector<8x384xf32>
    %1127 = tpu.matmul %1125, %1126, %cst_476 {dimension_numbers = #tpu.dot_dimension_numbers<[1], [0], [0], [1], [0, 0, 1, 1], [], []>} : vector<8x128xbf16>, vector<128x384xbf16>, vector<8x384xf32> -> vector<8x384xf32>
    %1128 = vector.extract_strided_slice %1122 {offsets = [0, 0], sizes = [8, 128], strides = [1, 1]} : vector<8x384xf32> to vector<8x128xf32>
    %1129 = vector.extract_strided_slice %1122 {offsets = [0, 128], sizes = [8, 128], strides = [1, 1]} : vector<8x384xf32> to vector<8x128xf32>
    %1130 = vector.extract_strided_slice %1122 {offsets = [0, 256], sizes = [8, 128], strides = [1, 1]} : vector<8x384xf32> to vector<8x128xf32>
    %1131 = vector.extract_strided_slice %1127 {offsets = [0, 0], sizes = [8, 128], strides = [1, 1]} : vector<8x384xf32> to vector<8x128xf32>
    %1132 = vector.extract_strided_slice %1127 {offsets = [0, 128], sizes = [8, 128], strides = [1, 1]} : vector<8x384xf32> to vector<8x128xf32>
    %1133 = vector.extract_strided_slice %1127 {offsets = [0, 256], sizes = [8, 128], strides = [1, 1]} : vector<8x384xf32> to vector<8x128xf32>
    %1134 = vector.broadcast %627 : vector<1x128xf32> to vector<8x128xf32>
    %1135 = arith.addf %1133, %1134 : vector<8x128xf32>
    %1136 = arith.addf %1128, %1131 : vector<8x128xf32>
    %1137 = arith.negf %1136 : vector<8x128xf32>
    %1138 = math.exp %1137 : vector<8x128xf32>
    %cst_477 = arith.constant 1.000000e+00 : f32
    %1139 = vector.broadcast %cst_477 : f32 to vector<8x128xf32>
    %1140 = arith.addf %1139, %1138 : vector<8x128xf32>
    %1141 = arith.divf %1139, %1140 : vector<8x128xf32>
    %1142 = arith.addf %1129, %1132 : vector<8x128xf32>
    %1143 = arith.negf %1142 : vector<8x128xf32>
    %1144 = math.exp %1143 : vector<8x128xf32>
    %cst_478 = arith.constant 1.000000e+00 : f32
    %1145 = vector.broadcast %cst_478 : f32 to vector<8x128xf32>
    %1146 = arith.addf %1145, %1144 : vector<8x128xf32>
    %1147 = arith.divf %1145, %1146 : vector<8x128xf32>
    %1148 = arith.mulf %1141, %1135 : vector<8x128xf32>
    %1149 = arith.addf %1130, %1148 : vector<8x128xf32>
    %1150 = math.tanh %1149 : vector<8x128xf32>
    %cst_479 = arith.constant 1.000000e+00 : f32
    %1151 = vector.broadcast %cst_479 : f32 to vector<8x128xf32>
    %1152 = arith.subf %1151, %1147 : vector<8x128xf32>
    %1153 = arith.mulf %1152, %1150 : vector<8x128xf32>
    %1154 = arith.mulf %1147, %1124 : vector<8x128xf32>
    %1155 = arith.addf %1153, %1154 : vector<8x128xf32>
    %c1_480 = arith.constant 1 : index
    %c0_481 = arith.constant 0 : index
    %c0_482 = arith.constant 0 : index
    %1156 = vector.load %arg13[%c1_480, %c0_481, %c0_482] : memref<2x8x128xf32, #tpu.memory_space<vmem>>, vector<1x8x128xf32>
    %1157 = vector.shape_cast %1156 : vector<1x8x128xf32> to vector<8x128xf32>
    %1158 = vector.shape_cast %1155 : vector<8x128xf32> to vector<1x8x128xf32>
    tpu.vector_store %arg13[%c1_480, %c0_481, %c0_482], %1158 {strides = array<i32>} : memref<2x8x128xf32, #tpu.memory_space<vmem>>, vector<1x8x128xf32>,
    %c104_483 = arith.constant 104 : index
    %c0_484 = arith.constant 0 : index
    %1159 = vector.load %arg15[%c104_483, %c0_484] : memref<128x128xf32, #tpu.memory_space<vmem>>, vector<8x128xf32>
    tpu.vector_store %arg15[%c104_483, %c0_484], %1155 {strides = array<i32>} : memref<128x128xf32, #tpu.memory_space<vmem>>, vector<8x128xf32>,
    %c112_485 = arith.constant 112 : index
    %c0_486 = arith.constant 0 : index
    %1160 = vector.load %arg14[%c112_485, %c0_486] : memref<128x384xf32, #tpu.memory_space<vmem>>, vector<8x384xf32>
    %c1_487 = arith.constant 1 : index
    %c0_488 = arith.constant 0 : index
    %c0_489 = arith.constant 0 : index
    %1161 = vector.load %arg13[%c1_487, %c0_488, %c0_489] : memref<2x8x128xf32, #tpu.memory_space<vmem>>, vector<1x8x128xf32>
    %1162 = vector.shape_cast %1161 : vector<1x8x128xf32> to vector<8x128xf32>
    %1163 = arith.truncf %1162 : vector<8x128xf32> to vector<8x128xbf16>
    %c0_490 = arith.constant 0 : index
    %c0_491 = arith.constant 0 : index
    %1164 = vector.load %arg8[%c0_490, %c0_491] : memref<128x384xbf16, #tpu.memory_space<vmem>>, vector<128x384xbf16>
    %cst_492 = arith.constant dense<0.000000e+00> : vector<8x384xf32>
    %1165 = tpu.matmul %1163, %1164, %cst_492 {dimension_numbers = #tpu.dot_dimension_numbers<[1], [0], [0], [1], [0, 0, 1, 1], [], []>} : vector<8x128xbf16>, vector<128x384xbf16>, vector<8x384xf32> -> vector<8x384xf32>
    %1166 = vector.extract_strided_slice %1160 {offsets = [0, 0], sizes = [8, 128], strides = [1, 1]} : vector<8x384xf32> to vector<8x128xf32>
    %1167 = vector.extract_strided_slice %1160 {offsets = [0, 128], sizes = [8, 128], strides = [1, 1]} : vector<8x384xf32> to vector<8x128xf32>
    %1168 = vector.extract_strided_slice %1160 {offsets = [0, 256], sizes = [8, 128], strides = [1, 1]} : vector<8x384xf32> to vector<8x128xf32>
    %1169 = vector.extract_strided_slice %1165 {offsets = [0, 0], sizes = [8, 128], strides = [1, 1]} : vector<8x384xf32> to vector<8x128xf32>
    %1170 = vector.extract_strided_slice %1165 {offsets = [0, 128], sizes = [8, 128], strides = [1, 1]} : vector<8x384xf32> to vector<8x128xf32>
    %1171 = vector.extract_strided_slice %1165 {offsets = [0, 256], sizes = [8, 128], strides = [1, 1]} : vector<8x384xf32> to vector<8x128xf32>
    %1172 = vector.broadcast %627 : vector<1x128xf32> to vector<8x128xf32>
    %1173 = arith.addf %1171, %1172 : vector<8x128xf32>
    %1174 = arith.addf %1166, %1169 : vector<8x128xf32>
    %1175 = arith.negf %1174 : vector<8x128xf32>
    %1176 = math.exp %1175 : vector<8x128xf32>
    %cst_493 = arith.constant 1.000000e+00 : f32
    %1177 = vector.broadcast %cst_493 : f32 to vector<8x128xf32>
    %1178 = arith.addf %1177, %1176 : vector<8x128xf32>
    %1179 = arith.divf %1177, %1178 : vector<8x128xf32>
    %1180 = arith.addf %1167, %1170 : vector<8x128xf32>
    %1181 = arith.negf %1180 : vector<8x128xf32>
    %1182 = math.exp %1181 : vector<8x128xf32>
    %cst_494 = arith.constant 1.000000e+00 : f32
    %1183 = vector.broadcast %cst_494 : f32 to vector<8x128xf32>
    %1184 = arith.addf %1183, %1182 : vector<8x128xf32>
    %1185 = arith.divf %1183, %1184 : vector<8x128xf32>
    %1186 = arith.mulf %1179, %1173 : vector<8x128xf32>
    %1187 = arith.addf %1168, %1186 : vector<8x128xf32>
    %1188 = math.tanh %1187 : vector<8x128xf32>
    %cst_495 = arith.constant 1.000000e+00 : f32
    %1189 = vector.broadcast %cst_495 : f32 to vector<8x128xf32>
    %1190 = arith.subf %1189, %1185 : vector<8x128xf32>
    %1191 = arith.mulf %1190, %1188 : vector<8x128xf32>
    %1192 = arith.mulf %1185, %1162 : vector<8x128xf32>
    %1193 = arith.addf %1191, %1192 : vector<8x128xf32>
    %c1_496 = arith.constant 1 : index
    %c0_497 = arith.constant 0 : index
    %c0_498 = arith.constant 0 : index
    %1194 = vector.load %arg13[%c1_496, %c0_497, %c0_498] : memref<2x8x128xf32, #tpu.memory_space<vmem>>, vector<1x8x128xf32>
    %1195 = vector.shape_cast %1194 : vector<1x8x128xf32> to vector<8x128xf32>
    %1196 = vector.shape_cast %1193 : vector<8x128xf32> to vector<1x8x128xf32>
    tpu.vector_store %arg13[%c1_496, %c0_497, %c0_498], %1196 {strides = array<i32>} : memref<2x8x128xf32, #tpu.memory_space<vmem>>, vector<1x8x128xf32>,
    %c112_499 = arith.constant 112 : index
    %c0_500 = arith.constant 0 : index
    %1197 = vector.load %arg15[%c112_499, %c0_500] : memref<128x128xf32, #tpu.memory_space<vmem>>, vector<8x128xf32>
    tpu.vector_store %arg15[%c112_499, %c0_500], %1193 {strides = array<i32>} : memref<128x128xf32, #tpu.memory_space<vmem>>, vector<8x128xf32>,
    %c120_501 = arith.constant 120 : index
    %c0_502 = arith.constant 0 : index
    %1198 = vector.load %arg14[%c120_501, %c0_502] : memref<128x384xf32, #tpu.memory_space<vmem>>, vector<8x384xf32>
    %c1_503 = arith.constant 1 : index
    %c0_504 = arith.constant 0 : index
    %c0_505 = arith.constant 0 : index
    %1199 = vector.load %arg13[%c1_503, %c0_504, %c0_505] : memref<2x8x128xf32, #tpu.memory_space<vmem>>, vector<1x8x128xf32>
    %1200 = vector.shape_cast %1199 : vector<1x8x128xf32> to vector<8x128xf32>
    %1201 = arith.truncf %1200 : vector<8x128xf32> to vector<8x128xbf16>
    %c0_506 = arith.constant 0 : index
    %c0_507 = arith.constant 0 : index
    %1202 = vector.load %arg8[%c0_506, %c0_507] : memref<128x384xbf16, #tpu.memory_space<vmem>>, vector<128x384xbf16>
    %cst_508 = arith.constant dense<0.000000e+00> : vector<8x384xf32>
    %1203 = tpu.matmul %1201, %1202, %cst_508 {dimension_numbers = #tpu.dot_dimension_numbers<[1], [0], [0], [1], [0, 0, 1, 1], [], []>} : vector<8x128xbf16>, vector<128x384xbf16>, vector<8x384xf32> -> vector<8x384xf32>
    %1204 = vector.extract_strided_slice %1198 {offsets = [0, 0], sizes = [8, 128], strides = [1, 1]} : vector<8x384xf32> to vector<8x128xf32>
    %1205 = vector.extract_strided_slice %1198 {offsets = [0, 128], sizes = [8, 128], strides = [1, 1]} : vector<8x384xf32> to vector<8x128xf32>
    %1206 = vector.extract_strided_slice %1198 {offsets = [0, 256], sizes = [8, 128], strides = [1, 1]} : vector<8x384xf32> to vector<8x128xf32>
    %1207 = vector.extract_strided_slice %1203 {offsets = [0, 0], sizes = [8, 128], strides = [1, 1]} : vector<8x384xf32> to vector<8x128xf32>
    %1208 = vector.extract_strided_slice %1203 {offsets = [0, 128], sizes = [8, 128], strides = [1, 1]} : vector<8x384xf32> to vector<8x128xf32>
    %1209 = vector.extract_strided_slice %1203 {offsets = [0, 256], sizes = [8, 128], strides = [1, 1]} : vector<8x384xf32> to vector<8x128xf32>
    %1210 = vector.broadcast %627 : vector<1x128xf32> to vector<8x128xf32>
    %1211 = arith.addf %1209, %1210 : vector<8x128xf32>
    %1212 = arith.addf %1204, %1207 : vector<8x128xf32>
    %1213 = arith.negf %1212 : vector<8x128xf32>
    %1214 = math.exp %1213 : vector<8x128xf32>
    %cst_509 = arith.constant 1.000000e+00 : f32
    %1215 = vector.broadcast %cst_509 : f32 to vector<8x128xf32>
    %1216 = arith.addf %1215, %1214 : vector<8x128xf32>
    %1217 = arith.divf %1215, %1216 : vector<8x128xf32>
    %1218 = arith.addf %1205, %1208 : vector<8x128xf32>
    %1219 = arith.negf %1218 : vector<8x128xf32>
    %1220 = math.exp %1219 : vector<8x128xf32>
    %cst_510 = arith.constant 1.000000e+00 : f32
    %1221 = vector.broadcast %cst_510 : f32 to vector<8x128xf32>
    %1222 = arith.addf %1221, %1220 : vector<8x128xf32>
    %1223 = arith.divf %1221, %1222 : vector<8x128xf32>
    %1224 = arith.mulf %1217, %1211 : vector<8x128xf32>
    %1225 = arith.addf %1206, %1224 : vector<8x128xf32>
    %1226 = math.tanh %1225 : vector<8x128xf32>
    %cst_511 = arith.constant 1.000000e+00 : f32
    %1227 = vector.broadcast %cst_511 : f32 to vector<8x128xf32>
    %1228 = arith.subf %1227, %1223 : vector<8x128xf32>
    %1229 = arith.mulf %1228, %1226 : vector<8x128xf32>
    %1230 = arith.mulf %1223, %1200 : vector<8x128xf32>
    %1231 = arith.addf %1229, %1230 : vector<8x128xf32>
    %c1_512 = arith.constant 1 : index
    %c0_513 = arith.constant 0 : index
    %c0_514 = arith.constant 0 : index
    %1232 = vector.load %arg13[%c1_512, %c0_513, %c0_514] : memref<2x8x128xf32, #tpu.memory_space<vmem>>, vector<1x8x128xf32>
    %1233 = vector.shape_cast %1232 : vector<1x8x128xf32> to vector<8x128xf32>
    %1234 = vector.shape_cast %1231 : vector<8x128xf32> to vector<1x8x128xf32>
    tpu.vector_store %arg13[%c1_512, %c0_513, %c0_514], %1234 {strides = array<i32>} : memref<2x8x128xf32, #tpu.memory_space<vmem>>, vector<1x8x128xf32>,
    %c120_515 = arith.constant 120 : index
    %c0_516 = arith.constant 0 : index
    %1235 = vector.load %arg15[%c120_515, %c0_516] : memref<128x128xf32, #tpu.memory_space<vmem>>, vector<8x128xf32>
    tpu.vector_store %arg15[%c120_515, %c0_516], %1231 {strides = array<i32>} : memref<128x128xf32, #tpu.memory_space<vmem>>, vector<8x128xf32>,
    %c0_517 = arith.constant 0 : index
    %c0_518 = arith.constant 0 : index
    %1236 = vector.load %arg15[%c0_517, %c0_518] : memref<128x128xf32, #tpu.memory_space<vmem>>, vector<128x128xf32>
    %1237 = arith.truncf %1236 : vector<128x128xf32> to vector<128x128xbf16>
    %c0_519 = arith.constant 0 : index
    %c0_520 = arith.constant 0 : index
    %1238 = vector.load %arg10[%c0_519, %c0_520] : memref<128x128xbf16, #tpu.memory_space<vmem>>, vector<128x128xbf16>
    %cst_521 = arith.constant dense<0.000000e+00> : vector<128x128xf32>
    %1239 = tpu.matmul %1237, %1238, %cst_521 {dimension_numbers = #tpu.dot_dimension_numbers<[1], [0], [0], [1], [0, 0, 1, 1], [], []>} : vector<128x128xbf16>, vector<128x128xbf16>, vector<128x128xf32> -> vector<128x128xf32>
    %c0_522 = arith.constant 0 : index
    %c0_523 = arith.constant 0 : index
    %1240 = vector.load %arg11[%c0_522, %c0_523] : memref<1x128xf32, #tpu.memory_space<vmem>>, vector<1x128xf32>
    %1241 = vector.broadcast %1240 : vector<1x128xf32> to vector<128x128xf32>
    %1242 = arith.addf %1239, %1241 : vector<128x128xf32>
    %1243 = arith.truncf %1242 : vector<128x128xf32> to vector<128x128xbf16>
    %c0_524 = arith.constant 0 : index
    %c0_525 = arith.constant 0 : index
    %1244 = vector.load %arg12[%c0_524, %c0_525] : memref<128x128xbf16, #tpu.memory_space<vmem>>, vector<128x128xbf16>
    tpu.vector_store %arg12[%c0_524, %c0_525], %1243 {strides = array<i32>} : memref<128x128xbf16, #tpu.memory_space<vmem>>, vector<128x128xbf16>,
    return
  }
  func.func @transform_0(%arg0: i32) -> (i32, i32) {
    %c0_i32 = arith.constant 0 : i32
    %c0_i32_0 = arith.constant 0 : i32
    return %arg0, %c0_i32 : i32, i32
  }
  func.func @transform_1(%arg0: i32) -> (i32, i32) {
    %c0_i32 = arith.constant 0 : i32
    %c0_i32_0 = arith.constant 0 : i32
    %c0_i32_1 = arith.constant 0 : i32
    return %c0_i32, %c0_i32_0 : i32, i32
  }
  func.func @transform_2(%arg0: i32) -> (i32, i32) {
    %c0_i32 = arith.constant 0 : i32
    %c0_i32_0 = arith.constant 0 : i32
    %c0_i32_1 = arith.constant 0 : i32
    return %c0_i32, %c0_i32_0 : i32, i32
  }
  func.func @transform_3(%arg0: i32) -> (i32, i32) {
    %c0_i32 = arith.constant 0 : i32
    %c0_i32_0 = arith.constant 0 : i32
    %c0_i32_1 = arith.constant 0 : i32
    return %c0_i32, %c0_i32_0 : i32, i32
  }
  func.func @transform_4(%arg0: i32) -> (i32, i32) {
    %c0_i32 = arith.constant 0 : i32
    %c0_i32_0 = arith.constant 0 : i32
    %c0_i32_1 = arith.constant 0 : i32
    return %c0_i32, %c0_i32_0 : i32, i32
  }
  func.func @transform_5(%arg0: i32) -> (i32, i32) {
    %c0_i32 = arith.constant 0 : i32
    %c0_i32_0 = arith.constant 0 : i32
    %c0_i32_1 = arith.constant 0 : i32
    return %c0_i32, %c0_i32_0 : i32, i32
  }
  func.func @transform_6(%arg0: i32) -> (i32, i32) {
    %c0_i32 = arith.constant 0 : i32
    %c0_i32_0 = arith.constant 0 : i32
    %c0_i32_1 = arith.constant 0 : i32
    return %c0_i32, %c0_i32_0 : i32, i32
  }
  func.func @transform_7(%arg0: i32) -> (i32, i32) {
    %c0_i32 = arith.constant 0 : i32
    %c0_i32_0 = arith.constant 0 : i32
    %c0_i32_1 = arith.constant 0 : i32
    return %c0_i32, %c0_i32_0 : i32, i32
  }
  func.func @transform_8(%arg0: i32) -> (i32, i32) {
    %c0_i32 = arith.constant 0 : i32
    %c0_i32_0 = arith.constant 0 : i32
    %c0_i32_1 = arith.constant 0 : i32
    return %c0_i32, %c0_i32_0 : i32, i32
  }
  func.func @transform_9(%arg0: i32) -> (i32, i32) {
    %c0_i32 = arith.constant 0 : i32
    %c0_i32_0 = arith.constant 0 : i32
    %c0_i32_1 = arith.constant 0 : i32
    return %c0_i32, %c0_i32_0 : i32, i32
  }
  func.func @transform_10(%arg0: i32) -> (i32, i32) {
    %c0_i32 = arith.constant 0 : i32
    %c0_i32_0 = arith.constant 0 : i32
    %c0_i32_1 = arith.constant 0 : i32
    return %c0_i32, %c0_i32_0 : i32, i32
  }
  func.func @transform_11(%arg0: i32) -> (i32, i32) {
    %c0_i32 = arith.constant 0 : i32
    %c0_i32_0 = arith.constant 0 : i32
    return %arg0, %c0_i32 : i32, i32
  }
}

</mosaic_0001>

<bundles_post_ra>
// kernel: tpu_custom_call.1
= control target key start
LH: loop header
LB: loop body
LE: loop exit
PB: predicated region body
PF: predicated region fallthrough
CT: control target
= control target key end

     0   :  { %16 = vsyncpa [#allocation6], 0  ;;  %s14788_s0 = inlined_call_operand.vmem [shape: bf16[128,16], index: 0, kind: input, shape index: {}]   ;;  %s14789_s1 = inlined_call_operand.vmem [shape: bf16[16,384], index: 1, kind: input, shape index: {}]   ;;  %s14790_s2 = inlined_call_operand.vmem [shape: f32[1,384], index: 2, kind: input, shape index: {}]   ;;  %s14791_s3 = inlined_call_operand.hbm [shape: bf16[128,384], index: 3, kind: input, shape index: {}]   ;;  %s14792_s4 = inlined_call_operand.vmem [shape: f32[1,128], index: 4, kind: input, shape index: {}]   ;;  %s14793_s5 = inlined_call_operand.hbm [shape: bf16[128,384], index: 5, kind: input, shape index: {}]   ;;  %s14794_s6 = inlined_call_operand.vmem [shape: f32[1,384], index: 6, kind: input, shape index: {}]   ;;  %s14795_s7 = inlined_call_operand.hbm [shape: bf16[128,384], index: 7, kind: input, shape index: {}]   ;;  %s14796_s8 = inlined_call_operand.vmem [shape: f32[1,128], index: 8, kind: input, shape index: {}]   ;;  %s14797_s9 = inlined_call_operand.vmem [shape: bf16[128,128], index: 9, kind: input, shape index: {}]   ;;  %s14798_s10 = inlined_call_operand.vmem [shape: f32[1,128], index: 10, kind: input, shape index: {}]   ;;  %s14799_s11 = inlined_call_operand.hbm [shape: bf16[128,128], index: 11, kind: output, shape index: {}]  }
   0x1   :  { %17 = vsyncpa [#allocation9], 0 }
   0x2   :  { %18 = vsyncpa [#allocation7], 0  ;;  %s12839_s17 = smov [#allocation8]   ;;  %s12840_s19 = smov [#allocation5]  }
   0x3   :  { %s44_s18 = sshll.u32 %s12839_s17, 4  ;;  %s30_s20 = sshll.u32 %s12840_s19, 4  ;;  %s45_s18 = int_to_ptr.vmem [resolvable:$true] %s44_s18  ;;  %s12911_s20 = int_to_ptr.vmem [resolvable:$true] %s30_s20 }
   0x4   :  { %s12745_s23 = scalar_lea.hbm %s14793_s5, 3072 }
   0x5   :  { %p12746_p0 = scmp.ne.s32.totalorder %s14793_s5, %s12745_s23  ;;  %p12749_p1 = scmp.lt.u32.totalorder %s12745_s23, %s14793_s5 }
   0x7   :  { %p12751_p2 = pnand %p12749_p1, %p12746_p0 }
   0x9   :  { %12754 = shalt.err (!%p12751_p2)
}
   0xa   :  { %s12755_s28 = scalar_lea.vmem %s45_s18, 3072  ;;  %p12760_p4 = scmp.lt.s32.totalorder %s45_s18, %s45_s18 }
   0xb   :  { %p12756_p3 = scmp.ne.s32.totalorder %s45_s18, %s12755_s28  ;;  %p12761_p5 = scmp.lt.s32.totalorder %s12755_s28, %s12755_s28 }
   0xd   :  { %p12762_p6 = por %p12761_p5, %p12760_p4 }
   0xf   :  { %p12763_p7 = pnand %p12762_p6, %p12756_p3 }
  0x11   :  { %12766 = shalt.err (!%p12763_p7)
}
  0x12   :  { %s12841_s29 = smov 192   ;;  %s12842_s30 = smov 12  }
  0x13   :  { %50 = dma.hbm_to_vmem [thread:$0]  %s14793_s5, 3072, %s45_s18, [#allocation9], %s12841_s29, %s12841_s29, %s12842_s30  }
  0x14   :  { %s12767_s16 = scalar_lea.hbm %s14791_s3, 3072 }
  0x15   :  { %p12768_p8 = scmp.ne.s32.totalorder %s14791_s3, %s12767_s16  ;;  %p12771_p9 = scmp.lt.u32.totalorder %s12767_s16, %s14791_s3 }
  0x17   :  { %p12773_p10 = pnand %p12771_p9, %p12768_p8 }
  0x19   :  { %12776 = shalt.err (!%p12773_p10)
}
  0x1a   :  { %s12777_s23 = scalar_lea.vmem %s12911_s20, 3072  ;;  %p12782_p12 = scmp.lt.s32.totalorder %s12911_s20, %s12911_s20 }
  0x1b   :  { %p12778_p11 = scmp.ne.s32.totalorder %s12911_s20, %s12777_s23  ;;  %p12783_p13 = scmp.lt.s32.totalorder %s12777_s23, %s12777_s23 }
  0x1d   :  { %p12784_p0 = por %p12783_p13, %p12782_p12 }
  0x1f   :  { %p12785_p1 = pnand %p12784_p0, %p12778_p11 }
  0x21   :  { %12788 = shalt.err (!%p12785_p1)
}
  0x22   :  { %36 = dma.hbm_to_vmem [thread:$0]  %s14791_s3, 3072, %s12911_s20, [#allocation6], %s12841_s29, %s12841_s29, %s12842_s30  }
  0x23   :  { %s12843_s24 = smov [#allocation10]   ;;  %s12789_s28 = scalar_lea.hbm %s14795_s7, 3072 }
  0x24   :  { %s58_s25 = sshll.u32 %s12843_s24, 4  ;;  %p12790_p2 = scmp.ne.s32.totalorder %s14795_s7, %s12789_s28  ;;  %s59_s25 = int_to_ptr.vmem [resolvable:$true] %s58_s25 }
  0x25   :  { %p12793_p3 = scmp.lt.u32.totalorder %s12789_s28, %s14795_s7 }
  0x27   :  { %p12795_p4 = pnand %p12793_p3, %p12790_p2 }
  0x29   :  { %12798 = shalt.err (!%p12795_p4)
}
  0x2a   :  { %s12799_s16 = scalar_lea.vmem %s59_s25, 3072  ;;  %p12804_p6 = scmp.lt.s32.totalorder %s59_s25, %s59_s25 }
  0x2b   :  { %p12800_p5 = scmp.ne.s32.totalorder %s59_s25, %s12799_s16  ;;  %p12805_p7 = scmp.lt.s32.totalorder %s12799_s16, %s12799_s16 }
  0x2d   :  { %p12806_p8 = por %p12805_p7, %p12804_p6 }
  0x2f   :  { %p12807_p9 = pnand %p12806_p8, %p12800_p5 }
  0x31   :  { %12810 = shalt.err (!%p12807_p9)
}
  0x32   :  { %64 = dma.hbm_to_vmem [thread:$0]  %s14795_s7, 3072, %s59_s25, [#allocation9], %s12841_s29, %s12841_s29, %s12842_s30  }
  0x33   :  { %12833 = dma.done.wait [#allocation6], 3072  }
  0x34   :  { %12834 = vsyncadd [#allocation6], 4294964224 }
  0x35   :  { %12835 = dma.done.wait [#allocation9], 6144  }
  0x36   :  { %12836 = vsyncadd [#allocation9], 4294961152  ;;  %v14807_v0 = vmov 0   ;;  %v11905_v1 = vld [vmem:[%s14789_s1 + $0x4] ss:$12 sps:$4 sm:$0xff]   ;;  %vm180_vm0 = vcmask 130048   ;;  %v109_v46 = vlaneseq }
  0x37   :  { %277 = vmatprep.mubr.bf16.mxu1 %v14807_v0  ;;  %237 = vmatprep.mubr.bf16.mxu0 %v14807_v0  ;;  %v11907_v2 = vld [vmem:[%s14789_s1] ss:$12 sps:$4 sm:$0xff]   ;;  %v11909_v4 = vld [vmem:[%s14789_s1 + $0x8] ss:$12 sps:$4 sm:$0xff]   ;;  %v14805_v5 = vmov 0.0   ;;  %v13019_v14 = vld [vmem:[%s14788_s0 + $0x38] sm:$0xff]  }
  0x38   :  { %11891 = vmatprep.subr.bf16.mxu1 %v11905_v1  ;;  %v12974_v3 = vld [vmem:[%s14788_s0 + $0x20] sm:$0xff]   ;;  %205 = vmatprep.subr.bf16.mxu0 %v11905_v1  ;;  %v12986_v7 = vld [vmem:[#allocation5 + $0x4] ss:$12 sps:$4 sm:$0xff]   ;;  %v13006_v10 = vld [vmem:[%s14788_s0 + $0x30] sm:$0xff]   ;;  %vm12846_vm1 = vmmov 0   ;;  %v14803_v33 = vmov 0.0|0.0  }
  0x39   :  { %11892 = vmatpush1.bf16.msra.mxu1 %v11907_v2  ;;  %206 = vmatpush1.bf16.msra.mxu0 %v11907_v2  ;;  %v11913_v6 = vld [vmem:[%s14788_s0] sm:$0xff]   ;;  %v12992_v8 = vld [vmem:[%s14788_s0 + $0x28] sm:$0xff]   ;;  %v11921_v13 = vld [vmem:[%s14788_s0 + $0x10] sm:$0xff]   ;;  %v13066_v47 = vshrl.u32 %v109_v46, 7 }
  0x3a   :  { %11187 = vmatprep.subr.bf16.mxu0 %v14805_v5  ;;  %11169 = vmatprep.subr.bf16.mxu1 %v11909_v4  ;;  %v11914_v9 = vld [vmem:[%s14788_s0 + $0x8] sm:$0xff]   ;;  %v11942_v12 = vld [vmem:[#allocation5 + $0x20] ss:$12 sps:$4 sm:$0xff]   ;;  %v11943_v15 = vld [vmem:[#allocation5 + $0x38] ss:$12 sps:$4 sm:$0xff]  }
  0x3b   :  { %v11938_v11 = vld [vmem:[#allocation5 + $0x8] ss:$12 sps:$4 sm:$0xff]   ;;  %v11922_v16 = vld [vmem:[%s14788_s0 + $0x18] sm:$0xff]   ;;  %v11944_v17 = vld [vmem:[#allocation5 + $0x50] ss:$12 sps:$4 sm:$0xff]   ;;  %14811 = vst [vmem:[#allocation15_spill] sm:$0xff] %v13066_v47 }
  0x3c   :  { %9882 = vmatmul.mubr.msk.bf16.vlgmr.msra.gmra.mrb[0].mxu1 %vm180_vm0, %v12974_v3  ;;  %9878 = vmatmul.mubr.msk.bf16.vlgmr.msra.gmra.mrb[0].mxu0 %vm180_vm0, %v11913_v6  ;;  %v11945_v18 = vld [vmem:[#allocation5 + $0x68] ss:$12 sps:$4 sm:$0xff]   ;;  %v11915_v19 = vld [vmem:[#allocation5] ss:$12 sps:$4 sm:$0xff]   ;;  %v11918_v22 = vld [vmem:[#allocation5 + $0x18] ss:$12 sps:$4 sm:$0xff]  }
  0x3d   :  { %11170 = vmatpush3.bf16.msra.mxu1 %v11909_v4  ;;  %287 = vmatprep.mubr.bf16.mxu1 %v14807_v0  ;;  %v11920_v20 = vld [vmem:[#allocation5 + $0x1c] ss:$12 sps:$4 sm:$0xff]   ;;  %v11946_v21 = vld [vmem:[#allocation5 + $0x80] ss:$12 sps:$4 sm:$0xff]   ;;  %v11947_v24 = vld [vmem:[#allocation5 + $0x98] ss:$12 sps:$4 sm:$0xff]  }
  0x3e   :  { %247 = vmatprep.mubr.bf16.mxu0 %v14807_v0  ;;  %629 = vmatprep.subr.bf16.mxu1 %v12986_v7  ;;  %v11925_v23 = vld [vmem:[#allocation5 + $0x34] ss:$12 sps:$4 sm:$0xff]   ;;  %v11923_v25 = vld [vmem:[#allocation5 + $0x30] ss:$12 sps:$4 sm:$0xff]   ;;  %v11928_v26 = vld [vmem:[#allocation5 + $0x4c] ss:$12 sps:$4 sm:$0xff]  }
  0x3f   :  { %11188 = vmatpush3.bf16.msra.mxu0 %v11938_v11  ;;  %v11948_v27 = vld [vmem:[#allocation5 + $0xb0] ss:$12 sps:$4 sm:$0xff]   ;;  %v11926_v28 = vld [vmem:[#allocation5 + $0x48] ss:$12 sps:$4 sm:$0xff]   ;;  %v11929_v30 = vld [vmem:[#allocation5 + $0x60] ss:$12 sps:$4 sm:$0xff]  }
  0x40   :  { %11189 = vmatprep.subr.bf16.mxu0 %v14805_v5  ;;  %v11931_v29 = vld [vmem:[#allocation5 + $0x64] ss:$12 sps:$4 sm:$0xff]   ;;  %v11934_v31 = vld [vmem:[#allocation5 + $0x7c] ss:$12 sps:$4 sm:$0xff]   ;;  %v11937_v34 = vld [vmem:[#allocation5 + $0x94] ss:$12 sps:$4 sm:$0xff]  }
  0x41   :  { %v11932_v32 = vld [vmem:[#allocation5 + $0x78] ss:$12 sps:$4 sm:$0xff]   ;;  %v11935_v35 = vld [vmem:[#allocation5 + $0x90] ss:$12 sps:$4 sm:$0xff]   ;;  %v11939_v37 = vld [vmem:[#allocation5 + $0xa8] ss:$12 sps:$4 sm:$0xff]  }
  0x42   :  { %v11941_v36 = vld [vmem:[#allocation5 + $0xac] ss:$12 sps:$4 sm:$0xff]   ;;  %v11949_v38 = vld [vmem:[#allocation5 + $0x8] ss:$12 sps:$4 sm:$0xff]   ;;  %v11952_v41 = vld [vmem:[#allocation5 + $0x50] ss:$12 sps:$4 sm:$0xff]  }
  0x43   :  { %11190 = vmatpush3.bf16.msra.mxu0 %v11942_v12  ;;  %v11950_v39 = vld [vmem:[#allocation5 + $0x20] ss:$12 sps:$4 sm:$0xff]   ;;  %v11951_v40 = vld [vmem:[#allocation5 + $0x38] ss:$12 sps:$4 sm:$0xff]   ;;  %v11953_v42 = vld [vmem:[#allocation5 + $0x68] ss:$12 sps:$4 sm:$0xff]  }
  0x44   :  { %9883 = vmatmul.mubr.msk.bf16.gmra.mrb[4].mxu1 %vm180_vm0, %v12992_v8  ;;  %9879 = vmatmul.mubr.msk.bf16.gmra.mrb[4].mxu0 %vm180_vm0, %v11914_v9  ;;  %v11954_v43 = vld [vmem:[#allocation5 + $0x80] ss:$12 sps:$4 sm:$0xff]   ;;  %v11955_v44 = vld [vmem:[#allocation5 + $0x98] ss:$12 sps:$4 sm:$0xff]   ;;  %v11956_v45 = vld [vmem:[#allocation5 + $0xb0] ss:$12 sps:$4 sm:$0xff]  }
  0x45   :  { %297 = vmatprep.mubr.bf16.mxu1 %v14807_v0  ;;  %257 = vmatprep.mubr.bf16.mxu0 %v14807_v0  ;;  %v14802_v48 = vsub.s32 0, %v13066_v47  ;;  %v14801_v49 = vsub.s32 1, %v13066_v47  ;;  %v107_v50 = vld [vmem:[%s14790_s2] sm:$0x7] }
  0x46   :  { %11191 = vmatprep.subr.bf16.mxu0 %v14805_v5 }
  0x47   :  { %11192 = vmatpush3.bf16.msra.mxu0 %v11943_v15  ;;  %v13075_v51 = vrot.slane %v107_v50, %v14802_v48  ;;  %v13079_v52 = vrot.slane %v107_v50, %v14801_v49 }
  0x48   :  { %11193 = vmatprep.subr.bf16.mxu0 %v14805_v5 }
  0x4b   :  { %11194 = vmatpush3.bf16.msra.mxu0 %v11944_v17 }
  0x4c   :  { %9884 = vmatmul.mubr.msk.bf16.gmra.mrb[8].mxu1 %vm180_vm0, %v13006_v10  ;;  %9880 = vmatmul.mubr.msk.bf16.gmra.mrb[8].mxu0 %vm180_vm0, %v11921_v13 }
  0x4d   :  { %307 = vmatprep.mubr.bf16.mxu1 %v14807_v0  ;;  %267 = vmatprep.mubr.bf16.mxu0 %v14807_v0 }
  0x4e   :  { %11195 = vmatprep.subr.bf16.mxu0 %v14805_v5 }
  0x4f   :  { %11196 = vmatpush3.bf16.msra.mxu0 %v11945_v18 }
  0x50   :  { %11197 = vmatprep.subr.bf16.mxu0 %v14805_v5 }
  0x53   :  { %11198 = vmatpush3.bf16.msra.mxu0 %v11946_v21 }
  0x54   :  { %9885 = vmatmul.mubr.msk.bf16.gmra.mrb[12].mxu1 %vm180_vm0, %v13019_v14  ;;  %9881 = vmatmul.mubr.msk.bf16.gmra.mrb[12].mxu0 %vm180_vm0, %v11922_v16 }
  0x55   :  { %11171 = vmatprep.mubr.msk.bf16.mxu1 %vm180_vm0, %v11913_v6  ;;  %11203 = vmatprep.mubr.msk.bf16.mxu0 %vm12846_vm1, %v14805_v5 }
  0x56   :  { %11199 = vmatprep.subr.bf16.mxu0 %v14805_v5 }
  0x57   :  { %11200 = vmatpush3.bf16.msra.mxu0 %v11947_v24 }
  0x58   :  { %11201 = vmatprep.subr.bf16.mxu0 %v14805_v5 }
  0x5b   :  { %11202 = vmatpush3.bf16.msra.mxu0 %v11948_v27 }
  0x5c   :  { %11172 = vmatmul.mubr.msk.bf16.vlgmr.msra.gmra.mrb[16].mxu1 %vm180_vm0, %v11914_v9  ;;  %11207 = vmatprep.subr.bf16.mxu0 %v14805_v5 }
  0x5d   :  { %630 = vmatpush1.bf16.msra.mxu1 %v11915_v19  ;;  %11175 = vmatprep.mubr.msk.bf16.mxu1 %vm180_vm0, %v11921_v13 }
  0x5e   :  { %631 = vmatprep.subr.bf16.mxu1 %v11920_v20  ;;  %11204 = vmatmul.mubr.bf16.vlgmr.msra.gmra.mrb[16].mxu0 %v14803_v33 }
  0x5f   :  { %11223 = vmatprep.mubr.msk.bf16.mxu0 %vm12846_vm1, %v14805_v5  ;;  %11208 = vmatpush3.bf16.msra.mxu0 %v11949_v38 }
  0x60   :  { %11209 = vmatprep.subr.bf16.mxu0 %v14805_v5 }
  0x61   :  { %632 = vmatpush1.bf16.msra.mxu1 %v11918_v22 }
  0x62   :  { %633 = vmatprep.subr.bf16.mxu1 %v11925_v23 }
  0x63   :  { %11210 = vmatpush3.bf16.msra.mxu0 %v11950_v39 }
  0x64   :  { %11176 = vmatmul.mubr.msk.bf16.gmra.mrb[20].mxu1 %vm180_vm0, %v11922_v16  ;;  %11211 = vmatprep.subr.bf16.mxu0 %v14805_v5 }
  0x65   :  { %634 = vmatpush1.bf16.msra.mxu1 %v11923_v25  ;;  %11179 = vmatprep.mubr.msk.bf16.mxu1 %vm180_vm0, %v12974_v3 }
  0x66   :  { %635 = vmatprep.subr.bf16.mxu1 %v11928_v26 }
  0x67   :  { %11212 = vmatpush3.bf16.msra.mxu0 %v11951_v40 }
  0x68   :  { %11213 = vmatprep.subr.bf16.mxu0 %v14805_v5 }
  0x69   :  { %636 = vmatpush1.bf16.msra.mxu1 %v11926_v28 }
  0x6a   :  { %637 = vmatprep.subr.bf16.mxu1 %v11931_v29 }
  0x6b   :  { %11214 = vmatpush3.bf16.msra.mxu0 %v11952_v41  ;;  %v14800_v41 = vsub.s32 2, %v13066_v47 }
  0x6c   :  { %11180 = vmatmul.mubr.msk.bf16.gmra.mrb[24].mxu1 %vm180_vm0, %v12992_v8  ;;  %11215 = vmatprep.subr.bf16.mxu0 %v14805_v5 }
  0x6d   :  { %638 = vmatpush1.bf16.msra.mxu1 %v11929_v30  ;;  %11183 = vmatprep.mubr.msk.bf16.mxu1 %vm180_vm0, %v13006_v10 }
  0x6e   :  { %639 = vmatprep.subr.bf16.mxu1 %v11934_v31 }
  0x6f   :  { %11216 = vmatpush3.bf16.msra.mxu0 %v11953_v42 }
  0x70   :  { %11217 = vmatprep.subr.bf16.mxu0 %v14805_v5 }
  0x71   :  { %640 = vmatpush1.bf16.msra.mxu1 %v11932_v32 }
  0x72   :  { %641 = vmatprep.subr.bf16.mxu1 %v11937_v34 }
  0x73   :  { %11218 = vmatpush3.bf16.msra.mxu0 %v11954_v43 }
  0x74   :  { %11184 = vmatmul.mubr.msk.bf16.gmra.mrb[28].mxu1 %vm180_vm0, %v13019_v14  ;;  %11219 = vmatprep.subr.bf16.mxu0 %v14805_v5 }
  0x75   :  { %642 = vmatpush1.bf16.msra.mxu1 %v11935_v35  ;;  %661 = vmatprep.mubr.bf16.mxu1 %v14807_v0 }
  0x76   :  { %643 = vmatprep.subr.bf16.mxu1 %v11941_v36 }
  0x77   :  { %11220 = vmatpush3.bf16.msra.mxu0 %v11955_v44 }
  0x78   :  { %11221 = vmatprep.subr.bf16.mxu0 %v14805_v5 }
  0x79   :  { %644 = vmatpush1.bf16.msra.mxu1 %v11939_v37 }
  0x7a   :  { %905 = vmatprep.subr.bf16.mxu1 %v12986_v7 }
  0x7b   :  { %11222 = vmatpush3.bf16.msra.mxu0 %v11956_v45 }
  0x7c   :  { %662 = vmatmul.mubr.bf16.vlgmr.msra.gmra.mrb[32].mxu1 %v14803_v33  ;;  %11227 = vmatprep.subr.bf16.mxu0 %v14805_v5 }
  0x7d   :  { %906 = vmatpush1.bf16.msra.mxu1 %v11915_v19  ;;  %937 = vmatprep.mubr.bf16.mxu1 %v14807_v0 }
  0x7e   :  { %907 = vmatprep.subr.bf16.mxu1 %v11920_v20 }
  0x81   :  { %908 = vmatpush1.bf16.msra.mxu1 %v11918_v22 }
  0x82   :  { %909 = vmatprep.subr.bf16.mxu1 %v11925_v23 }
  0x85   :  { %910 = vmatpush1.bf16.msra.mxu1 %v11923_v25 }
  0x86   :  { %911 = vmatprep.subr.bf16.mxu1 %v11928_v26 }
  0x89   :  { %912 = vmatpush1.bf16.msra.mxu1 %v11926_v28 }
  0x8a   :  { %913 = vmatprep.subr.bf16.mxu1 %v11931_v29 }
  0x8d   :  { %914 = vmatpush1.bf16.msra.mxu1 %v11929_v30 }
  0x8e   :  { %915 = vmatprep.subr.bf16.mxu1 %v11934_v31 }
  0x91   :  { %916 = vmatpush1.bf16.msra.mxu1 %v11932_v32 }
  0x92   :  { %917 = vmatprep.subr.bf16.mxu1 %v11937_v34 }
  0x95   :  { %918 = vmatpush1.bf16.msra.mxu1 %v11935_v35 }
  0x96   :  { %919 = vmatprep.subr.bf16.mxu1 %v11941_v36 }
  0x99   :  { %920 = vmatpush1.bf16.msra.mxu1 %v11939_v37 }
  0x9a   :  { %1175 = vmatprep.subr.bf16.mxu1 %v12986_v7 }
 0x10f   :  { %v279_v53 = vpop.f32.mrb[0].mxu1  ;;  %v13090_v60 = vpop.f32.mrb[0].mxu0 }
 0x110   :  { %v13082_v54 = vadd.f32 %v279_v53, %v13075_v51  ;;  %v281_v55 = vpop.f32.mrb[1].mxu1  ;;  %v13095_v62 = vpop.f32.mrb[1].mxu0 }
 0x111   :  { %v13085_v56 = vadd.f32 %v281_v55, %v13079_v52  ;;  %v283_v57 = vpop.f32.mrb[2].mxu1  ;;  %v243_v63 = vpop.f32.mrb[2].mxu0 }
 0x112   :  { %v13088_v58 = vadd.f32 %v283_v57, %v13075_v51  ;;  %v285_v59 = vpop.f32.mrb[3].mxu1  ;;  %v13098_v1 = vadd.f32 %v243_v63, %v13075_v51  ;;  %v245_v2 = vpop.f32.mrb[3].mxu0 }
 0x113   :  { %v13093_v61 = vadd.f32 %v285_v59, %v13079_v52  ;;  %v13101_v3 = vadd.f32 %v245_v2, %v13079_v52  ;;  %v120_v59 = vrot.slane %v107_v50, %v14800_v41 }
 0x117   :  { %v289_v4 = vpop.f32.mrb[4].mxu1  ;;  %v249_v12 = vpop.f32.mrb[4].mxu0 }
 0x118   :  { %v13104_v6 = vadd.f32 %v289_v4, %v13075_v51  ;;  %v291_v7 = vpop.f32.mrb[5].mxu1  ;;  %v13116_v14 = vadd.f32 %v249_v12, %v13075_v51  ;;  %v251_v15 = vpop.f32.mrb[5].mxu0 }
 0x119   :  { %v13107_v8 = vadd.f32 %v291_v7, %v13079_v52  ;;  %v293_v9 = vpop.f32.mrb[6].mxu1  ;;  %v13119_v16 = vadd.f32 %v251_v15, %v13079_v52  ;;  %v253_v17 = vpop.f32.mrb[6].mxu0 }
 0x11a   :  { %v13110_v10 = vadd.f32 %v293_v9, %v13075_v51  ;;  %v295_v11 = vpop.f32.mrb[7].mxu1  ;;  %v13122_v18 = vadd.f32 %v253_v17, %v13075_v51  ;;  %v255_v19 = vpop.f32.mrb[7].mxu0 }
 0x11b   :  { %14812 = vst [vmem:[#allocation16_spill] sm:$0xff] %v13107_v8  ;;  %v13113_v13 = vadd.f32 %v295_v11, %v13079_v52  ;;  %v13125_v20 = vadd.f32 %v255_v19, %v13079_v52 }
 0x11c   :  { %14813 = vst [vmem:[#allocation17_spill] sm:$0xff] %v13110_v10 }
 0x11d   :  { %14814 = vst [vmem:[#allocation18_spill] sm:$0xff] %v13113_v13 }
 0x11f   :  { %v299_v21 = vpop.f32.mrb[8].mxu1  ;;  %v259_v28 = vpop.f32.mrb[8].mxu0 }
 0x120   :  { %v13128_v22 = vadd.f32 %v299_v21, %v13075_v51  ;;  %v301_v23 = vpop.f32.mrb[9].mxu1  ;;  %v13140_v30 = vadd.f32 %v259_v28, %v13075_v51  ;;  %v261_v31 = vpop.f32.mrb[9].mxu0 }
 0x121   :  { %v13131_v24 = vadd.f32 %v301_v23, %v13079_v52  ;;  %v303_v25 = vpop.f32.mrb[10].mxu1  ;;  %v13143_v32 = vadd.f32 %v261_v31, %v13079_v52  ;;  %v263_v34 = vpop.f32.mrb[10].mxu0 }
 0x122   :  { %14815 = vst [vmem:[#allocation19_spill] sm:$0xff] %v13128_v22  ;;  %v13134_v26 = vadd.f32 %v303_v25, %v13075_v51  ;;  %v305_v27 = vpop.f32.mrb[11].mxu1  ;;  %v13146_v35 = vadd.f32 %v263_v34, %v13075_v51  ;;  %v265_v36 = vpop.f32.mrb[11].mxu0 }
 0x123   :  { %14816 = vst [vmem:[#allocation20_spill] sm:$0xff] %v13131_v24  ;;  %v13137_v29 = vadd.f32 %v305_v27, %v13079_v52  ;;  %v13149_v37 = vadd.f32 %v265_v36, %v13079_v52 }
 0x124   :  { %14817 = vst [vmem:[#allocation21_spill] sm:$0xff] %v13134_v26 }
 0x125   :  { %14818 = vst [vmem:[#allocation22_spill] sm:$0xff] %v13137_v29 }
 0x127   :  { %v309_v38 = vpop.f32.mrb[12].mxu1  ;;  %v269_v46 = vpop.f32.mrb[12].mxu0 }
 0x128   :  { %v13152_v39 = vadd.f32 %v309_v38, %v13075_v51  ;;  %v311_v40 = vpop.f32.mrb[13].mxu1  ;;  %v13165_v55 = vadd.f32 %v269_v46, %v13075_v51  ;;  %v271_v57 = vpop.f32.mrb[13].mxu0 }
 0x129   :  { %v13156_v42 = vadd.f32 %v311_v40, %v13079_v52  ;;  %v313_v43 = vpop.f32.mrb[14].mxu1  ;;  %v13170_v63 = vadd.f32 %v271_v57, %v13079_v52  ;;  %v273_v2 = vpop.f32.mrb[14].mxu0 }
 0x12a   :  { %14819 = vst [vmem:[#allocation23_spill] sm:$0xff] %v13152_v39  ;;  %v13159_v44 = vadd.f32 %v313_v43, %v13075_v51  ;;  %v315_v45 = vpop.f32.mrb[15].mxu1  ;;  %v13173_v4 = vadd.f32 %v273_v2, %v13075_v51  ;;  %v275_v7 = vpop.f32.mrb[15].mxu0  ;;  %v11961_v39 = vld [vmem:[#allocation5 + $0x68] ss:$12 sps:$4 sm:$0xff]  }
 0x12b   :  { %14820 = vst [vmem:[#allocation24_spill] sm:$0xff] %v13156_v42  ;;  %v13162_v53 = vadd.f32 %v315_v45, %v13079_v52  ;;  %v13176_v9 = vadd.f32 %v275_v7, %v13079_v52  ;;  %v11960_v42 = vld [vmem:[#allocation5 + $0x50] ss:$12 sps:$4 sm:$0xff]  }
 0x12c   :  { %14821 = vst [vmem:[#allocation25_spill] sm:$0xff] %v13159_v44  ;;  %v11958_v44 = vld [vmem:[#allocation5 + $0x20] ss:$12 sps:$4 sm:$0xff]  }
 0x12d   :  { %14822 = vst [vmem:[#allocation26_spill] sm:$0xff] %v13162_v53  ;;  %v11957_v53 = vld [vmem:[#allocation5 + $0x8] ss:$12 sps:$4 sm:$0xff]  }
 0x12f   :  { %v11173_v11 = vpop.f32.mrb[16].mxu1 }
 0x130   :  { %v13178_v12 = vadd.f32 %v11173_v11, %v120_v59  ;;  %v352_v15 = vpop.f32.mrb[17].mxu1 }
 0x131   :  { %v11174_v17 = vpop.f32.mrb[18].mxu1  ;;  %v704_v40 = vpop.f32.mrb[16].mxu0 }
 0x132   :  { %v13180_v19 = vadd.f32 %v11174_v17, %v120_v59  ;;  %v355_v21 = vpop.f32.mrb[19].mxu1  ;;  %v11205_v45 = vpop.f32.mrb[17].mxu0 }
 0x133   :  { %v13182_v50 = vadd.f32 %v355_v21, %v120_v59  ;;  %v707_v2 = vpop.f32.mrb[18].mxu0 }
 0x134   :  { %v11206_v17 = vpop.f32.mrb[19].mxu0 }
 0x137   :  { %v11177_v23 = vpop.f32.mrb[20].mxu1 }
 0x138   :  { %v13184_v25 = vadd.f32 %v11177_v23, %v120_v59  ;;  %v368_v27 = vpop.f32.mrb[21].mxu1 }
 0x139   :  { %v13186_v28 = vadd.f32 %v368_v27, %v120_v59  ;;  %v11178_v31 = vpop.f32.mrb[22].mxu1 }
 0x13a   :  { %v13188_v34 = vadd.f32 %v11178_v31, %v120_v59  ;;  %v371_v36 = vpop.f32.mrb[23].mxu1 }
 0x13b   :  { %v13190_v38 = vadd.f32 %v371_v36, %v120_v59 }
 0x13f   :  { %v11181_v43 = vpop.f32.mrb[24].mxu1 }
 0x140   :  { %v13192_v46 = vadd.f32 %v11181_v43, %v120_v59  ;;  %v384_v57 = vpop.f32.mrb[25].mxu1 }
 0x141   :  { %v13194_v7 = vadd.f32 %v384_v57, %v120_v59  ;;  %v11182_v11 = vpop.f32.mrb[26].mxu1  ;;  %v240_v57 = vadd.f32 %v13090_v60, %v13075_v51  ;;  %v13215_v51 = vld [vmem:[%s14792_s4] ss:$0 sm:$0xff] }
 0x142   :  { %14823 = vst [vmem:[#allocation27_spill] sm:$0xff] %v13192_v46  ;;  %v13196_v21 = vadd.f32 %v11182_v11, %v120_v59  ;;  %v387_v23 = vpop.f32.mrb[27].mxu1  ;;  %v242_v11 = vadd.f32 %v13095_v62, %v13079_v52  ;;  %v716_v60 = vadd.f32 %v13215_v51, %v704_v40  ;;  %v14830_v40 = vmov 0.0  }
 0x143   :  { %v13198_v27 = vadd.f32 %v387_v23, %v120_v59 }
 0x144   :  { %14824 = vst [vmem:[#allocation28_spill] sm:$0xff] %v13196_v21 }
 0x147   :  { %v11185_v31 = vpop.f32.mrb[28].mxu1 }
 0x148   :  { %v13200_v41 = vadd.f32 %v11185_v31, %v120_v59  ;;  %v400_v36 = vpop.f32.mrb[29].mxu1 }
 0x149   :  { %v13202_v49 = vadd.f32 %v400_v36, %v120_v59  ;;  %v11186_v45 = vpop.f32.mrb[30].mxu1 }
 0x14a   :  { %14825 = vst [vmem:[#allocation29_spill] sm:$0xff] %v13200_v41  ;;  %v13204_v43 = vadd.f32 %v11186_v45, %v120_v59  ;;  %v403_v48 = vpop.f32.mrb[31].mxu1  ;;  %v11959_v41 = vld [vmem:[#allocation5 + $0x38] ss:$12 sps:$4 sm:$0xff]  }
 0x14b   :  { %14826 = vst [vmem:[#allocation30_spill] sm:$0xff] %v13202_v49  ;;  %v13206_v2 = vadd.f32 %v403_v48, %v120_v59 }
 0x14c   :  { %14827 = vst [vmem:[#allocation31_spill] sm:$0xff] %v13204_v43 }
 0x14d   :  { %14828 = vst [vmem:[#allocation32_spill] sm:$0xff] %v13206_v2  ;;  %v11962_v2 = vld [vmem:[#allocation5 + $0x80] ss:$12 sps:$4 sm:$0xff]  }
 0x14f   :  { %v663_v17 = vpop.f32.mrb[32].mxu1 }
 0x150   :  { %v717_v23 = vadd.f32 %v663_v17, %v240_v57  ;;  %v665_v33 = vpop.f32.mrb[33].mxu1 }
 0x151   :  { %v724_v31 = vadd.f32 %v665_v33, %v242_v11  ;;  %v667_v5 = vpop.f32.mrb[34].mxu1  ;;  %v353_v33 = vadd.f32 %v352_v15, %v120_v59  ;;  %v14829_v59 = vmov 0   ;;  %v13226_v15 = vld [vmem:[#allocation5 + $0x1c] ss:$12 sps:$4 sm:$0xff]  }
 0x152   :  { %v9919_v0 = vmul.f32 -1.442695, %v717_v23  ;;  %v668_v36 = vpop.f32.mrb[35].mxu1 }
 0x153   :  { %v9920_v47 = vmul.f32 -1.442695, %v724_v31  ;;  %v13222_v36 = vld [vmem:[#allocation5] ss:$12 sps:$4 sm:$0xff]  }
 0x154   :  { %12405 = vpow2.f32 %v9919_v0 }
 0x155   :  { %12407 = vpow2.f32 %v9920_v47 }
 0x15e   :  { %v12406_v45 = vpop.eup %12405 }
 0x15f   :  { %v721_v43 = vadd.f32 1.0, %v12406_v45  ;;  %v12408_v48 = vpop.eup %12407  ;;  %v13231_v45 = vld [vmem:[#allocation5 + $0x18] ss:$12 sps:$4 sm:$0xff]  }
 0x160   :  { %v728_v52 = vadd.f32 1.0, %v12408_v48  ;;  %v13234_v48 = vld [vmem:[#allocation5 + $0x34] ss:$12 sps:$4 sm:$0xff]  }
 0x161   :  { %12409 = vrcp.f32 %v721_v43 }
 0x162   :  { %12411 = vrcp.f32 %v728_v52  ;;  %v13237_v52 = vld [vmem:[#allocation5 + $0x30] ss:$12 sps:$4 sm:$0xff]  }
 0x16b   :  { %v12410_v62 = vpop.eup %12409 }
 0x16c   :  { %v731_v5 = vmul.f32 %v12410_v62, %v716_v60  ;;  %v12412_v0 = vpop.eup %12411  ;;  %v13240_v60 = vld [vmem:[#allocation5 + $0x4c] ss:$12 sps:$4 sm:$0xff]   ;;  %v13243_v62 = vld [vmem:[#allocation5 + $0x48] ss:$12 sps:$4 sm:$0xff]  }
 0x16d   :  { %v734_v47 = vsub.f32 1.0, %v12412_v0  ;;  %v736_v43 = vmul.f32 0.0, %v12412_v0  ;;  %v13255_v0 = vld [vmem:[#allocation5 + $0x78] ss:$12 sps:$4 sm:$0xff]  }
 0x16e   :  { %v732_v57 = vadd.f32 %v731_v5, %v353_v33  ;;  %v13246_v33 = vld [vmem:[#allocation5 + $0x64] ss:$12 sps:$4 sm:$0xff]   ;;  %v13249_v5 = vld [vmem:[#allocation5 + $0x60] ss:$12 sps:$4 sm:$0xff]  }
 0x170   :  { %12413 = vtanh.f32 %v732_v57  ;;  %v13252_v57 = vld [vmem:[#allocation5 + $0x7c] ss:$12 sps:$4 sm:$0xff]  }
 0x17a   :  { %v12414_v11 = vpop.eup %12413 }
 0x17b   :  { %v735_v17 = vmul.f32 %v12414_v11, %v734_v47  ;;  %v13258_v47 = vld [vmem:[#allocation5 + $0x94] ss:$12 sps:$4 sm:$0xff]   ;;  %v13261_v11 = vld [vmem:[#allocation5 + $0x90] ss:$12 sps:$4 sm:$0xff]  }
 0x17d   :  { %v13218_v23 = vadd.f32 %v736_v43, %v735_v17  ;;  %v13264_v17 = vld [vmem:[#allocation5 + $0xac] ss:$12 sps:$4 sm:$0xff]   ;;  %v13267_v43 = vld [vmem:[#allocation5 + $0xa8] ss:$12 sps:$4 sm:$0xff]  }
 0x17f   :  { %v744_v31 = vpack.c.bf16 %v13218_v23, %v13218_v23 }
 0x181   :  { %938 = vmatmul.mubr.bf16.vlgmr.msra.gmra.mrb[36].mxu1 %v744_v31  ;;  %11224 = vmatmul.mubr.bf16.vlgmr.msra.gmra.mrb[20].mxu0 %v744_v31  ;;  %v12740_v31 = vld [vmem:[#allocation5 + $0x4] ss:$12 sps:$4 sm:$0xff]  }
 0x182   :  { %1176 = vmatpush1.bf16.msra.mxu1 %v13222_v36  ;;  %1207 = vmatprep.mubr.bf16.mxu1 %v14829_v59 }
 0x183   :  { %1177 = vmatprep.subr.bf16.mxu1 %v13226_v15  ;;  %11243 = vmatprep.mubr.msk.bf16.mxu0 %vm12846_vm1, %v14830_v40 }
 0x184   :  { %11228 = vmatpush3.bf16.msra.mxu0 %v11957_v53  ;;  %v11963_v53 = vld [vmem:[#allocation5 + $0x98] ss:$12 sps:$4 sm:$0xff]  }
 0x185   :  { %11229 = vmatprep.subr.bf16.mxu0 %v14830_v40 }
 0x186   :  { %1178 = vmatpush1.bf16.msra.mxu1 %v13231_v45 }
 0x187   :  { %1179 = vmatprep.subr.bf16.mxu1 %v13234_v48 }
 0x188   :  { %11230 = vmatpush3.bf16.msra.mxu0 %v11958_v44  ;;  %v11964_v44 = vld [vmem:[#allocation5 + $0xb0] ss:$12 sps:$4 sm:$0xff]  }
 0x189   :  { %11231 = vmatprep.subr.bf16.mxu0 %v14830_v40 }
 0x18a   :  { %1180 = vmatpush1.bf16.msra.mxu1 %v13237_v52 }
 0x18b   :  { %1181 = vmatprep.subr.bf16.mxu1 %v13240_v60 }
 0x18c   :  { %11232 = vmatpush3.bf16.msra.mxu0 %v11959_v41 }
 0x18d   :  { %11233 = vmatprep.subr.bf16.mxu0 %v14830_v40 }
 0x18e   :  { %1182 = vmatpush1.bf16.msra.mxu1 %v13243_v62 }
 0x18f   :  { %1183 = vmatprep.subr.bf16.mxu1 %v13246_v33 }
 0x190   :  { %11234 = vmatpush3.bf16.msra.mxu0 %v11960_v42 }
 0x191   :  { %11235 = vmatprep.subr.bf16.mxu0 %v14830_v40 }
 0x192   :  { %1184 = vmatpush1.bf16.msra.mxu1 %v13249_v5 }
 0x193   :  { %1185 = vmatprep.subr.bf16.mxu1 %v13252_v57 }
 0x194   :  { %11236 = vmatpush3.bf16.msra.mxu0 %v11961_v39 }
 0x195   :  { %11237 = vmatprep.subr.bf16.mxu0 %v14830_v40 }
 0x196   :  { %1186 = vmatpush1.bf16.msra.mxu1 %v13255_v0 }
 0x197   :  { %1187 = vmatprep.subr.bf16.mxu1 %v13258_v47 }
 0x198   :  { %11238 = vmatpush3.bf16.msra.mxu0 %v11962_v2 }
 0x199   :  { %11239 = vmatprep.subr.bf16.mxu0 %v14830_v40 }
 0x19a   :  { %1188 = vmatpush1.bf16.msra.mxu1 %v13261_v11 }
 0x19b   :  { %1189 = vmatprep.subr.bf16.mxu1 %v13264_v17 }
 0x19c   :  { %11240 = vmatpush3.bf16.msra.mxu0 %v11963_v53 }
 0x19d   :  { %11241 = vmatprep.subr.bf16.mxu0 %v14830_v40 }
 0x19e   :  { %1190 = vmatpush1.bf16.msra.mxu1 %v13267_v43 }
 0x19f   :  { %1445 = vmatprep.subr.bf16.mxu1 %v12740_v31 }
 0x1a0   :  { %11242 = vmatpush3.bf16.msra.mxu0 %v11964_v44 }
 0x1a1   :  { %11247 = vmatprep.subr.bf16.mxu0 %v14830_v40 }
 0x254   :  { %v939_v41 = vpop.f32.mrb[36].mxu1  ;;  %v980_v42 = vpop.f32.mrb[20].mxu0 }
 0x255   :  { %v987_v31 = vadd.f32 %v939_v41, %v13098_v1  ;;  %v941_v29 = vpop.f32.mrb[37].mxu1  ;;  %v11225_v39 = vpop.f32.mrb[21].mxu0  ;;  %v986_v8 = vadd.f32 %v13215_v51, %v980_v42 }
 0x256   :  { %v994_v26 = vadd.f32 %v941_v29, %v13101_v3  ;;  %v943_v49 = vpop.f32.mrb[38].mxu1  ;;  %v983_v2 = vpop.f32.mrb[22].mxu0 }
 0x257   :  { %v9945_v24 = vmul.f32 -1.442695, %v987_v31  ;;  %v944_v22 = vpop.f32.mrb[39].mxu1  ;;  %v11226_v21 = vpop.f32.mrb[23].mxu0 }
 0x258   :  { %v9946_v53 = vmul.f32 -1.442695, %v994_v26 }
 0x259   :  { %12415 = vpow2.f32 %v9945_v24 }
 0x25a   :  { %12417 = vpow2.f32 %v9946_v53 }
 0x263   :  { %v12416_v13 = vpop.eup %12415 }
 0x264   :  { %v991_v44 = vadd.f32 1.0, %v12416_v13  ;;  %v12418_v10 = vpop.eup %12417 }
 0x265   :  { %v998_v46 = vadd.f32 1.0, %v12418_v10  ;;  %v11966_v10 = vld [vmem:[#allocation5 + $0x20] ss:$12 sps:$4 sm:$0xff]  }
 0x266   :  { %12419 = vrcp.f32 %v991_v44 }
 0x267   :  { %12421 = vrcp.f32 %v998_v46  ;;  %v11968_v46 = vld [vmem:[#allocation5 + $0x50] ss:$12 sps:$4 sm:$0xff]  }
 0x270   :  { %v12420_v1 = vpop.eup %12419 }
 0x271   :  { %v1001_v41 = vmul.f32 %v12420_v1, %v986_v8  ;;  %v12422_v49 = vpop.eup %12421  ;;  %v11965_v8 = vld [vmem:[#allocation5 + $0x8] ss:$12 sps:$4 sm:$0xff]  }
 0x272   :  { %v1004_v29 = vsub.f32 1.0, %v12422_v49  ;;  %v1006_v24 = vmul.f32 %v12422_v49, %v13218_v23 }
 0x273   :  { %v1002_v3 = vadd.f32 %v1001_v41, %v13182_v50  ;;  %v11967_v50 = vld [vmem:[#allocation5 + $0x38] ss:$12 sps:$4 sm:$0xff]  }
 0x275   :  { %12423 = vtanh.f32 %v1002_v3 }
 0x27f   :  { %v12424_v22 = vpop.eup %12423 }
 0x280   :  { %v1005_v21 = vmul.f32 %v12424_v22, %v1004_v29 }
 0x282   :  { %v13283_v26 = vadd.f32 %v1006_v24, %v1005_v21 }
 0x284   :  { %v1014_v13 = vpack.c.bf16 %v13283_v26, %v13283_v26 }
 0x286   :  { %1208 = vmatmul.mubr.bf16.vlgmr.msra.gmra.mrb[40].mxu1 %v1014_v13  ;;  %11244 = vmatmul.mubr.bf16.vlgmr.msra.gmra.mrb[24].mxu0 %v1014_v13  ;;  %v13327_v13 = vld [vmem:[#allocation5] ss:$12 sps:$4 sm:$0xff]  }
 0x287   :  { %1446 = vmatpush1.bf16.msra.mxu1 %v13222_v36  ;;  %1477 = vmatprep.mubr.bf16.mxu1 %v14829_v59  ;;  %v11969_v36 = vld [vmem:[#allocation5 + $0x68] ss:$12 sps:$4 sm:$0xff]  }
 0x288   :  { %1447 = vmatprep.subr.bf16.mxu1 %v13226_v15  ;;  %11263 = vmatprep.mubr.msk.bf16.mxu0 %vm12846_vm1, %v14830_v40  ;;  %v11970_v15 = vld [vmem:[#allocation5 + $0x80] ss:$12 sps:$4 sm:$0xff]  }
 0x289   :  { %11248 = vmatpush3.bf16.msra.mxu0 %v11965_v8  ;;  %v11976_v8 = vld [vmem:[#allocation5 + $0x8] ss:$12 sps:$4 sm:$0xff]  }
 0x28a   :  { %11249 = vmatprep.subr.bf16.mxu0 %v14830_v40 }
 0x28b   :  { %1448 = vmatpush1.bf16.msra.mxu1 %v13231_v45  ;;  %v11971_v45 = vld [vmem:[#allocation5 + $0x98] ss:$12 sps:$4 sm:$0xff]  }
 0x28c   :  { %1449 = vmatprep.subr.bf16.mxu1 %v13234_v48  ;;  %v11972_v48 = vld [vmem:[#allocation5 + $0xb0] ss:$12 sps:$4 sm:$0xff]  }
 0x28d   :  { %11250 = vmatpush3.bf16.msra.mxu0 %v11966_v10  ;;  %v13331_v10 = vld [vmem:[#allocation5 + $0x1c] ss:$12 sps:$4 sm:$0xff]  }
 0x28e   :  { %11251 = vmatprep.subr.bf16.mxu0 %v14830_v40 }
 0x28f   :  { %1450 = vmatpush1.bf16.msra.mxu1 %v13237_v52 }
 0x290   :  { %1451 = vmatprep.subr.bf16.mxu1 %v13240_v60 }
 0x291   :  { %11252 = vmatpush3.bf16.msra.mxu0 %v11967_v50  ;;  %v13334_v50 = vld [vmem:[#allocation5 + $0x18] ss:$12 sps:$4 sm:$0xff]  }
 0x292   :  { %11253 = vmatprep.subr.bf16.mxu0 %v14830_v40 }
 0x293   :  { %1452 = vmatpush1.bf16.msra.mxu1 %v13243_v62 }
 0x294   :  { %1453 = vmatprep.subr.bf16.mxu1 %v13246_v33 }
 0x295   :  { %11254 = vmatpush3.bf16.msra.mxu0 %v11968_v46  ;;  %v11980_v46 = vld [vmem:[#allocation5 + $0x20] ss:$12 sps:$4 sm:$0xff]  }
 0x296   :  { %11255 = vmatprep.subr.bf16.mxu0 %v14830_v40 }
 0x297   :  { %1454 = vmatpush1.bf16.msra.mxu1 %v13249_v5 }
 0x298   :  { %1455 = vmatprep.subr.bf16.mxu1 %v13252_v57 }
 0x299   :  { %11256 = vmatpush3.bf16.msra.mxu0 %v11969_v36  ;;  %v13338_v36 = vld [vmem:[#allocation5 + $0x34] ss:$12 sps:$4 sm:$0xff]  }
 0x29a   :  { %11257 = vmatprep.subr.bf16.mxu0 %v14830_v40 }
 0x29b   :  { %1456 = vmatpush1.bf16.msra.mxu1 %v13255_v0 }
 0x29c   :  { %1457 = vmatprep.subr.bf16.mxu1 %v13258_v47 }
 0x29d   :  { %11258 = vmatpush3.bf16.msra.mxu0 %v11970_v15  ;;  %v13341_v15 = vld [vmem:[#allocation5 + $0x30] ss:$12 sps:$4 sm:$0xff]  }
 0x29e   :  { %11259 = vmatprep.subr.bf16.mxu0 %v14830_v40 }
 0x29f   :  { %1458 = vmatpush1.bf16.msra.mxu1 %v13261_v11 }
 0x2a0   :  { %1459 = vmatprep.subr.bf16.mxu1 %v13264_v17 }
 0x2a1   :  { %11260 = vmatpush3.bf16.msra.mxu0 %v11971_v45  ;;  %v11984_v45 = vld [vmem:[#allocation5 + $0x38] ss:$12 sps:$4 sm:$0xff]  }
 0x2a2   :  { %11261 = vmatprep.subr.bf16.mxu0 %v14830_v40 }
 0x2a3   :  { %1460 = vmatpush1.bf16.msra.mxu1 %v13267_v43 }
 0x2a5   :  { %11262 = vmatpush3.bf16.msra.mxu0 %v11972_v48  ;;  %v13345_v48 = vld [vmem:[#allocation5 + $0x4c] ss:$12 sps:$4 sm:$0xff]  }
 0x2a6   :  { %11267 = vmatprep.subr.bf16.mxu0 %v14830_v40 }
 0x359   :  { %v1209_v52 = vpop.f32.mrb[40].mxu1  ;;  %v1250_v60 = vpop.f32.mrb[24].mxu0 }
 0x35a   :  { %v1257_v62 = vadd.f32 %v1209_v52, %v13116_v14  ;;  %v1211_v33 = vpop.f32.mrb[41].mxu1  ;;  %v11245_v5 = vpop.f32.mrb[25].mxu0  ;;  %v1256_v44 = vadd.f32 %v13215_v51, %v1250_v60  ;;  %v13348_v52 = vld [vmem:[#allocation5 + $0x48] ss:$12 sps:$4 sm:$0xff]   ;;  %v11988_v60 = vld [vmem:[#allocation5 + $0x50] ss:$12 sps:$4 sm:$0xff]  }
 0x35b   :  { %v1264_v57 = vadd.f32 %v1211_v33, %v13119_v16  ;;  %v1213_v0 = vpop.f32.mrb[42].mxu1  ;;  %v1253_v47 = vpop.f32.mrb[26].mxu0  ;;  %v13355_v33 = vld [vmem:[#allocation5 + $0x60] ss:$12 sps:$4 sm:$0xff]   ;;  %v11992_v5 = vld [vmem:[#allocation5 + $0x68] ss:$12 sps:$4 sm:$0xff]  }
 0x35c   :  { %v9971_v11 = vmul.f32 -1.442695, %v1257_v62  ;;  %v1214_v17 = vpop.f32.mrb[43].mxu1  ;;  %v11246_v43 = vpop.f32.mrb[27].mxu0  ;;  %v13352_v62 = vld [vmem:[#allocation5 + $0x64] ss:$12 sps:$4 sm:$0xff]  }
 0x35d   :  { %v9972_v42 = vmul.f32 -1.442695, %v1264_v57  ;;  %v13358_v57 = vld [vmem:[#allocation5 + $0x7c] ss:$12 sps:$4 sm:$0xff]   ;;  %v13361_v0 = vld [vmem:[#allocation5 + $0x78] ss:$12 sps:$4 sm:$0xff]  }
 0x35e   :  { %12425 = vpow2.f32 %v9971_v11  ;;  %v11996_v47 = vld [vmem:[#allocation5 + $0x80] ss:$12 sps:$4 sm:$0xff]   ;;  %v13368_v17 = vld [vmem:[#allocation5 + $0x90] ss:$12 sps:$4 sm:$0xff]   ;;  %v12000_v43 = vld [vmem:[#allocation5 + $0x98] ss:$12 sps:$4 sm:$0xff]  }
 0x35f   :  { %12427 = vpow2.f32 %v9972_v42  ;;  %v13365_v11 = vld [vmem:[#allocation5 + $0x94] ss:$12 sps:$4 sm:$0xff]   ;;  %v13372_v42 = vld [vmem:[#allocation5 + $0xac] ss:$12 sps:$4 sm:$0xff]  }
 0x368   :  { %v12426_v31 = vpop.eup %12425 }
 0x369   :  { %v1261_v39 = vadd.f32 1.0, %v12426_v31  ;;  %v12428_v2 = vpop.eup %12427  ;;  %v13375_v31 = vld [vmem:[#allocation5 + $0xa8] ss:$12 sps:$4 sm:$0xff]  }
 0x36a   :  { %v1268_v53 = vadd.f32 1.0, %v12428_v2 }
 0x36b   :  { %12429 = vrcp.f32 %v1261_v39  ;;  %v12004_v39 = vld [vmem:[#allocation5 + $0xb0] ss:$12 sps:$4 sm:$0xff]  }
 0x36c   :  { %12431 = vrcp.f32 %v1268_v53 }
 0x375   :  { %v12430_v14 = vpop.eup %12429 }
 0x376   :  { %v1271_v1 = vmul.f32 %v12430_v14, %v1256_v44  ;;  %v12432_v41 = vpop.eup %12431 }
 0x377   :  { %v1274_v3 = vsub.f32 1.0, %v12432_v41  ;;  %v1276_v22 = vmul.f32 %v12432_v41, %v13283_v26 }
 0x378   :  { %v1272_v16 = vadd.f32 %v1271_v1, %v13178_v12  ;;  %v13325_v12 = vld [vmem:[#allocation5 + $0x4] ss:$12 sps:$4 sm:$0xff]  }
 0x379   :  { %1715 = vmatprep.subr.bf16.mxu1 %v13325_v12 }
 0x37a   :  { %12433 = vtanh.f32 %v1272_v16 }
 0x384   :  { %v12434_v49 = vpop.eup %12433 }
 0x385   :  { %v1275_v29 = vmul.f32 %v12434_v49, %v1274_v3 }
 0x387   :  { %v13318_v21 = vadd.f32 %v1276_v22, %v1275_v29 }
 0x389   :  { %v1284_v24 = vpack.c.bf16 %v13318_v21, %v13318_v21 }
 0x38b   :  { %1478 = vmatmul.mubr.bf16.vlgmr.msra.gmra.mrb[44].mxu1 %v1284_v24  ;;  %11264 = vmatmul.mubr.bf16.vlgmr.msra.gmra.mrb[28].mxu0 %v1284_v24 }
 0x38c   :  { %1747 = vmatprep.mubr.bf16.mxu1 %v14829_v59  ;;  %11283 = vmatprep.mubr.msk.bf16.mxu0 %vm12846_vm1, %v14830_v40 }
 0x38d   :  { %1716 = vmatpush1.bf16.msra.mxu1 %v13327_v13  ;;  %11268 = vmatpush3.bf16.msra.mxu0 %v11976_v8 }
 0x38e   :  { %11269 = vmatprep.subr.bf16.mxu0 %v14830_v40  ;;  %1717 = vmatprep.subr.bf16.mxu1 %v13331_v10 }
 0x391   :  { %1718 = vmatpush1.bf16.msra.mxu1 %v13334_v50  ;;  %11270 = vmatpush3.bf16.msra.mxu0 %v11980_v46 }
 0x392   :  { %11271 = vmatprep.subr.bf16.mxu0 %v14830_v40  ;;  %1719 = vmatprep.subr.bf16.mxu1 %v13338_v36 }
 0x395   :  { %1720 = vmatpush1.bf16.msra.mxu1 %v13341_v15  ;;  %11272 = vmatpush3.bf16.msra.mxu0 %v11984_v45 }
 0x396   :  { %11273 = vmatprep.subr.bf16.mxu0 %v14830_v40  ;;  %1721 = vmatprep.subr.bf16.mxu1 %v13345_v48 }
 0x399   :  { %1722 = vmatpush1.bf16.msra.mxu1 %v13348_v52  ;;  %11274 = vmatpush3.bf16.msra.mxu0 %v11988_v60 }
 0x39a   :  { %11275 = vmatprep.subr.bf16.mxu0 %v14830_v40  ;;  %1723 = vmatprep.subr.bf16.mxu1 %v13352_v62 }
 0x39d   :  { %1724 = vmatpush1.bf16.msra.mxu1 %v13355_v33  ;;  %11276 = vmatpush3.bf16.msra.mxu0 %v11992_v5 }
 0x39e   :  { %1725 = vmatprep.subr.bf16.mxu1 %v13358_v57  ;;  %11277 = vmatprep.subr.bf16.mxu0 %v14830_v40 }
 0x3a1   :  { %1726 = vmatpush1.bf16.msra.mxu1 %v13361_v0  ;;  %11278 = vmatpush3.bf16.msra.mxu0 %v11996_v47 }
 0x3a2   :  { %1727 = vmatprep.subr.bf16.mxu1 %v13365_v11  ;;  %11279 = vmatprep.subr.bf16.mxu0 %v14830_v40 }
 0x3a5   :  { %1728 = vmatpush1.bf16.msra.mxu1 %v13368_v17  ;;  %11280 = vmatpush3.bf16.msra.mxu0 %v12000_v43 }
 0x3a6   :  { %1729 = vmatprep.subr.bf16.mxu1 %v13372_v42  ;;  %11281 = vmatprep.subr.bf16.mxu0 %v14830_v40 }
 0x3a9   :  { %1730 = vmatpush1.bf16.msra.mxu1 %v13375_v31  ;;  %11282 = vmatpush3.bf16.msra.mxu0 %v12004_v39 }
 0x3aa   :  { %1985 = vmatprep.subr.bf16.mxu1 %v13325_v12  ;;  %11287 = vmatprep.subr.bf16.mxu0 %v14830_v40 }
 0x45e   :  { %v1479_v2 = vpop.f32.mrb[44].mxu1  ;;  %v1520_v53 = vpop.f32.mrb[28].mxu0 }
 0x45f   :  { %v1527_v44 = vadd.f32 %v1479_v2, %v13122_v18  ;;  %v1481_v14 = vpop.f32.mrb[45].mxu1  ;;  %v11265_v1 = vpop.f32.mrb[29].mxu0  ;;  %v1526_v5 = vadd.f32 %v13215_v51, %v1520_v53  ;;  %v12006_v53 = vld [vmem:[#allocation5 + $0x20] ss:$12 sps:$4 sm:$0xff]  }
 0x460   :  { %v1534_v16 = vadd.f32 %v1481_v14, %v13125_v20  ;;  %v1483_v41 = vpop.f32.mrb[46].mxu1  ;;  %v1523_v3 = vpop.f32.mrb[30].mxu0 }
 0x461   :  { %v9997_v49 = vmul.f32 -1.442695, %v1527_v44  ;;  %v1484_v29 = vpop.f32.mrb[47].mxu1  ;;  %v11266_v22 = vpop.f32.mrb[31].mxu0  ;;  %v12007_v41 = vld [vmem:[#allocation5 + $0x38] ss:$12 sps:$4 sm:$0xff]  }
 0x462   :  { %v9998_v24 = vmul.f32 -1.442695, %v1534_v16  ;;  %v12008_v3 = vld [vmem:[#allocation5 + $0x50] ss:$12 sps:$4 sm:$0xff]   ;;  %v12010_v29 = vld [vmem:[#allocation5 + $0x80] ss:$12 sps:$4 sm:$0xff]  }
 0x463   :  { %12435 = vpow2.f32 %v9997_v49  ;;  %v12009_v49 = vld [vmem:[#allocation5 + $0x68] ss:$12 sps:$4 sm:$0xff]   ;;  %v12011_v22 = vld [vmem:[#allocation5 + $0x98] ss:$12 sps:$4 sm:$0xff]  }
 0x464   :  { %12437 = vpow2.f32 %v9998_v24  ;;  %v12012_v24 = vld [vmem:[#allocation5 + $0xb0] ss:$12 sps:$4 sm:$0xff]  }
 0x46d   :  { %v12436_v8 = vpop.eup %12435 }
 0x46e   :  { %v1531_v46 = vadd.f32 1.0, %v12436_v8  ;;  %v12438_v45 = vpop.eup %12437 }
 0x46f   :  { %v1538_v60 = vadd.f32 1.0, %v12438_v45 }
 0x470   :  { %12439 = vrcp.f32 %v1531_v46 }
 0x471   :  { %12441 = vrcp.f32 %v1538_v60 }
 0x47a   :  { %v12440_v18 = vpop.eup %12439 }
 0x47b   :  { %v1541_v47 = vmul.f32 %v12440_v18, %v1526_v5  ;;  %v12442_v43 = vpop.eup %12441 }
 0x47c   :  { %v1544_v39 = vsub.f32 1.0, %v12442_v43  ;;  %v1546_v14 = vmul.f32 %v12442_v43, %v13318_v21 }
 0x47d   :  { %v1542_v20 = vadd.f32 %v1541_v47, %v13180_v19  ;;  %v12005_v19 = vld [vmem:[#allocation5 + $0x8] ss:$12 sps:$4 sm:$0xff]  }
 0x47f   :  { %12443 = vtanh.f32 %v1542_v20 }
 0x489   :  { %v12444_v2 = vpop.eup %12443 }
 0x48a   :  { %v1545_v44 = vmul.f32 %v12444_v2, %v1544_v39 }
 0x48c   :  { %v13387_v1 = vadd.f32 %v1546_v14, %v1545_v44 }
 0x48e   :  { %v1554_v16 = vpack.c.bf16 %v13387_v1, %v13387_v1 }
 0x490   :  { %1748 = vmatmul.mubr.bf16.vlgmr.msra.gmra.mrb[48].mxu1 %v1554_v16  ;;  %11284 = vmatmul.mubr.bf16.vlgmr.msra.gmra.mrb[32].mxu0 %v1554_v16 }
 0x491   :  { %1986 = vmatpush1.bf16.msra.mxu1 %v13327_v13  ;;  %2017 = vmatprep.mubr.bf16.mxu1 %v14829_v59 }
 0x492   :  { %1987 = vmatprep.subr.bf16.mxu1 %v13331_v10  ;;  %11303 = vmatprep.mubr.msk.bf16.mxu0 %vm12846_vm1, %v14830_v40 }
 0x493   :  { %11288 = vmatpush3.bf16.msra.mxu0 %v12005_v19 }
 0x494   :  { %11289 = vmatprep.subr.bf16.mxu0 %v14830_v40 }
 0x495   :  { %1988 = vmatpush1.bf16.msra.mxu1 %v13334_v50 }
 0x496   :  { %1989 = vmatprep.subr.bf16.mxu1 %v13338_v36 }
 0x497   :  { %11290 = vmatpush3.bf16.msra.mxu0 %v12006_v53 }
 0x498   :  { %11291 = vmatprep.subr.bf16.mxu0 %v14830_v40 }
 0x499   :  { %1990 = vmatpush1.bf16.msra.mxu1 %v13341_v15 }
 0x49a   :  { %1991 = vmatprep.subr.bf16.mxu1 %v13345_v48 }
 0x49b   :  { %11292 = vmatpush3.bf16.msra.mxu0 %v12007_v41 }
 0x49c   :  { %11293 = vmatprep.subr.bf16.mxu0 %v14830_v40 }
 0x49d   :  { %1992 = vmatpush1.bf16.msra.mxu1 %v13348_v52 }
 0x49e   :  { %1993 = vmatprep.subr.bf16.mxu1 %v13352_v62 }
 0x49f   :  { %11294 = vmatpush3.bf16.msra.mxu0 %v12008_v3 }
 0x4a0   :  { %11295 = vmatprep.subr.bf16.mxu0 %v14830_v40 }
 0x4a1   :  { %1994 = vmatpush1.bf16.msra.mxu1 %v13355_v33 }
 0x4a2   :  { %1995 = vmatprep.subr.bf16.mxu1 %v13358_v57 }
 0x4a3   :  { %11296 = vmatpush3.bf16.msra.mxu0 %v12009_v49 }
 0x4a4   :  { %11297 = vmatprep.subr.bf16.mxu0 %v14830_v40 }
 0x4a5   :  { %1996 = vmatpush1.bf16.msra.mxu1 %v13361_v0 }
 0x4a6   :  { %1997 = vmatprep.subr.bf16.mxu1 %v13365_v11 }
 0x4a7   :  { %11298 = vmatpush3.bf16.msra.mxu0 %v12010_v29 }
 0x4a8   :  { %11299 = vmatprep.subr.bf16.mxu0 %v14830_v40 }
 0x4a9   :  { %1998 = vmatpush1.bf16.msra.mxu1 %v13368_v17 }
 0x4aa   :  { %1999 = vmatprep.subr.bf16.mxu1 %v13372_v42 }
 0x4ab   :  { %11300 = vmatpush3.bf16.msra.mxu0 %v12011_v22 }
 0x4ac   :  { %11301 = vmatprep.subr.bf16.mxu0 %v14830_v40 }
 0x4ad   :  { %2000 = vmatpush1.bf16.msra.mxu1 %v13375_v31 }
 0x4ae   :  { %2255 = vmatprep.subr.bf16.mxu1 %v13325_v12 }
 0x4af   :  { %11302 = vmatpush3.bf16.msra.mxu0 %v12012_v24 }
 0x4b0   :  { %11307 = vmatprep.subr.bf16.mxu0 %v14830_v40 }
 0x563   :  { %v1749_v8 = vpop.f32.mrb[48].mxu1  ;;  %v1790_v46 = vpop.f32.mrb[32].mxu0 }
 0x564   :  { %v1797_v45 = vadd.f32 %v1749_v8, %v13140_v30  ;;  %v1751_v60 = vpop.f32.mrb[49].mxu1  ;;  %v11285_v5 = vpop.f32.mrb[33].mxu0  ;;  %v1796_v41 = vadd.f32 %v13215_v51, %v1790_v46  ;;  %v12014_v46 = vld [vmem:[#allocation5 + $0x20] ss:$12 sps:$4 sm:$0xff]  }
 0x565   :  { %v1804_v18 = vadd.f32 %v1751_v60, %v13143_v32  ;;  %v1753_v47 = vpop.f32.mrb[50].mxu1  ;;  %v1793_v20 = vpop.f32.mrb[34].mxu0  ;;  %v12015_v5 = vld [vmem:[#allocation5 + $0x38] ss:$12 sps:$4 sm:$0xff]  }
 0x566   :  { %v10023_v43 = vmul.f32 -1.442695, %v1797_v45  ;;  %v1754_v39 = vpop.f32.mrb[51].mxu1  ;;  %v11286_v2 = vpop.f32.mrb[35].mxu0  ;;  %v12017_v47 = vld [vmem:[#allocation5 + $0x68] ss:$12 sps:$4 sm:$0xff]  }
 0x567   :  { %v10024_v44 = vmul.f32 -1.442695, %v1804_v18  ;;  %v12016_v18 = vld [vmem:[#allocation5 + $0x50] ss:$12 sps:$4 sm:$0xff]   ;;  %v12018_v20 = vld [vmem:[#allocation5 + $0x80] ss:$12 sps:$4 sm:$0xff]  }
 0x568   :  { %12445 = vpow2.f32 %v10023_v43  ;;  %v12019_v43 = vld [vmem:[#allocation5 + $0x98] ss:$12 sps:$4 sm:$0xff]   ;;  %v12020_v39 = vld [vmem:[#allocation5 + $0xb0] ss:$12 sps:$4 sm:$0xff]  }
 0x569   :  { %12447 = vpow2.f32 %v10024_v44 }
 0x572   :  { %v12446_v14 = vpop.eup %12445 }
 0x573   :  { %v1801_v16 = vadd.f32 1.0, %v12446_v14  ;;  %v12448_v19 = vpop.eup %12447 }
 0x574   :  { %v1808_v53 = vadd.f32 1.0, %v12448_v19 }
 0x575   :  { %12449 = vrcp.f32 %v1801_v16 }
 0x576   :  { %12451 = vrcp.f32 %v1808_v53 }
 0x57f   :  { %v12450_v30 = vpop.eup %12449 }
 0x580   :  { %v1811_v3 = vmul.f32 %v12450_v30, %v1796_v41  ;;  %v12452_v49 = vpop.eup %12451 }
 0x581   :  { %v1814_v29 = vsub.f32 1.0, %v12452_v49  ;;  %v1816_v8 = vmul.f32 %v12452_v49, %v13387_v1 }
 0x582   :  { %v1812_v32 = vadd.f32 %v1811_v3, %v13186_v28  ;;  %v12013_v28 = vld [vmem:[#allocation5 + $0x8] ss:$12 sps:$4 sm:$0xff]  }
 0x584   :  { %12453 = vtanh.f32 %v1812_v32 }
 0x58e   :  { %v12454_v22 = vpop.eup %12453 }
 0x58f   :  { %v1815_v24 = vmul.f32 %v12454_v22, %v1814_v29 }
 0x591   :  { %v13423_v45 = vadd.f32 %v1816_v8, %v1815_v24 }
 0x593   :  { %v1824_v60 = vpack.c.bf16 %v13423_v45, %v13423_v45 }
 0x595   :  { %2018 = vmatmul.mubr.bf16.vlgmr.msra.gmra.mrb[52].mxu1 %v1824_v60  ;;  %11304 = vmatmul.mubr.bf16.vlgmr.msra.gmra.mrb[36].mxu0 %v1824_v60 }
 0x596   :  { %2256 = vmatpush1.bf16.msra.mxu1 %v13327_v13  ;;  %2287 = vmatprep.mubr.bf16.mxu1 %v14829_v59 }
 0x597   :  { %2257 = vmatprep.subr.bf16.mxu1 %v13331_v10  ;;  %11323 = vmatprep.mubr.msk.bf16.mxu0 %vm12846_vm1, %v14830_v40 }
 0x598   :  { %11308 = vmatpush3.bf16.msra.mxu0 %v12013_v28 }
 0x599   :  { %11309 = vmatprep.subr.bf16.mxu0 %v14830_v40 }
 0x59a   :  { %2258 = vmatpush1.bf16.msra.mxu1 %v13334_v50 }
 0x59b   :  { %2259 = vmatprep.subr.bf16.mxu1 %v13338_v36 }
 0x59c   :  { %11310 = vmatpush3.bf16.msra.mxu0 %v12014_v46 }
 0x59d   :  { %11311 = vmatprep.subr.bf16.mxu0 %v14830_v40 }
 0x59e   :  { %2260 = vmatpush1.bf16.msra.mxu1 %v13341_v15 }
 0x59f   :  { %2261 = vmatprep.subr.bf16.mxu1 %v13345_v48 }
 0x5a0   :  { %11312 = vmatpush3.bf16.msra.mxu0 %v12015_v5 }
 0x5a1   :  { %11313 = vmatprep.subr.bf16.mxu0 %v14830_v40 }
 0x5a2   :  { %2262 = vmatpush1.bf16.msra.mxu1 %v13348_v52 }
 0x5a3   :  { %2263 = vmatprep.subr.bf16.mxu1 %v13352_v62 }
 0x5a4   :  { %11314 = vmatpush3.bf16.msra.mxu0 %v12016_v18 }
 0x5a5   :  { %11315 = vmatprep.subr.bf16.mxu0 %v14830_v40 }
 0x5a6   :  { %2264 = vmatpush1.bf16.msra.mxu1 %v13355_v33 }
 0x5a7   :  { %2265 = vmatprep.subr.bf16.mxu1 %v13358_v57 }
 0x5a8   :  { %11316 = vmatpush3.bf16.msra.mxu0 %v12017_v47 }
 0x5a9   :  { %11317 = vmatprep.subr.bf16.mxu0 %v14830_v40 }
 0x5aa   :  { %2266 = vmatpush1.bf16.msra.mxu1 %v13361_v0 }
 0x5ab   :  { %2267 = vmatprep.subr.bf16.mxu1 %v13365_v11 }
 0x5ac   :  { %11318 = vmatpush3.bf16.msra.mxu0 %v12018_v20 }
 0x5ad   :  { %11319 = vmatprep.subr.bf16.mxu0 %v14830_v40 }
 0x5ae   :  { %2268 = vmatpush1.bf16.msra.mxu1 %v13368_v17 }
 0x5af   :  { %2269 = vmatprep.subr.bf16.mxu1 %v13372_v42 }
 0x5b0   :  { %11320 = vmatpush3.bf16.msra.mxu0 %v12019_v43 }
 0x5b1   :  { %11321 = vmatprep.subr.bf16.mxu0 %v14830_v40 }
 0x5b2   :  { %2270 = vmatpush1.bf16.msra.mxu1 %v13375_v31 }
 0x5b3   :  { %2525 = vmatprep.subr.bf16.mxu1 %v13325_v12 }
 0x5b4   :  { %11322 = vmatpush3.bf16.msra.mxu0 %v12020_v39 }
 0x5b5   :  { %11327 = vmatprep.subr.bf16.mxu0 %v14830_v40 }
 0x668   :  { %v2019_v2 = vpop.f32.mrb[52].mxu1  ;;  %v2060_v44 = vpop.f32.mrb[36].mxu0 }
 0x669   :  { %v2067_v14 = vadd.f32 %v2019_v2, %v13146_v35  ;;  %v2021_v16 = vpop.f32.mrb[53].mxu1  ;;  %v11305_v19 = vpop.f32.mrb[37].mxu0  ;;  %v2066_v28 = vadd.f32 %v13215_v51, %v2060_v44  ;;  %v12022_v44 = vld [vmem:[#allocation5 + $0x20] ss:$12 sps:$4 sm:$0xff]  }
 0x66a   :  { %v2074_v53 = vadd.f32 %v2021_v16, %v13149_v37  ;;  %v2023_v41 = vpop.f32.mrb[54].mxu1  ;;  %v2063_v30 = vpop.f32.mrb[38].mxu0  ;;  %v12024_v16 = vld [vmem:[#allocation5 + $0x50] ss:$12 sps:$4 sm:$0xff]   ;;  %v12025_v19 = vld [vmem:[#allocation5 + $0x68] ss:$12 sps:$4 sm:$0xff]  }
 0x66b   :  { %v10049_v3 = vmul.f32 -1.442695, %v2067_v14  ;;  %v2024_v32 = vpop.f32.mrb[55].mxu1  ;;  %v11306_v49 = vpop.f32.mrb[39].mxu0  ;;  %v12023_v14 = vld [vmem:[#allocation5 + $0x38] ss:$12 sps:$4 sm:$0xff]  }
 0x66c   :  { %v10050_v29 = vmul.f32 -1.442695, %v2074_v53  ;;  %v12026_v53 = vld [vmem:[#allocation5 + $0x80] ss:$12 sps:$4 sm:$0xff]   ;;  %v12028_v41 = vld [vmem:[#allocation5 + $0xb0] ss:$12 sps:$4 sm:$0xff]  }
 0x66d   :  { %12455 = vpow2.f32 %v10049_v3 }
 0x66e   :  { %12457 = vpow2.f32 %v10050_v29 }
 0x677   :  { %v12456_v22 = vpop.eup %12455 }
 0x678   :  { %v2071_v24 = vadd.f32 1.0, %v12456_v22  ;;  %v12458_v8 = vpop.eup %12457 }
 0x679   :  { %v2078_v60 = vadd.f32 1.0, %v12458_v8 }
 0x67a   :  { %12459 = vrcp.f32 %v2071_v24 }
 0x67b   :  { %12461 = vrcp.f32 %v2078_v60 }
 0x684   :  { %v12460_v35 = vpop.eup %12459 }
 0x685   :  { %v2081_v46 = vmul.f32 %v12460_v35, %v2066_v28  ;;  %v12462_v5 = vpop.eup %12461 }
 0x686   :  { %v2084_v18 = vsub.f32 1.0, %v12462_v5  ;;  %v2086_v43 = vmul.f32 %v12462_v5, %v13423_v45 }
 0x687   :  { %v2082_v37 = vadd.f32 %v2081_v46, %v13190_v38  ;;  %v12021_v38 = vld [vmem:[#allocation5 + $0x8] ss:$12 sps:$4 sm:$0xff]  }
 0x689   :  { %12463 = vtanh.f32 %v2082_v37 }
 0x693   :  { %v12464_v47 = vpop.eup %12463 }
 0x694   :  { %v2085_v20 = vmul.f32 %v12464_v47, %v2084_v18 }
 0x696   :  { %v13459_v39 = vadd.f32 %v2086_v43, %v2085_v20 }
 0x698   :  { %v2094_v2 = vpack.c.bf16 %v13459_v39, %v13459_v39 }
 0x69a   :  { %2288 = vmatmul.mubr.bf16.vlgmr.msra.gmra.mrb[56].mxu1 %v2094_v2  ;;  %11324 = vmatmul.mubr.bf16.vlgmr.msra.gmra.mrb[40].mxu0 %v2094_v2 }
 0x69b   :  { %2526 = vmatpush1.bf16.msra.mxu1 %v13327_v13  ;;  %2557 = vmatprep.mubr.bf16.mxu1 %v14829_v59 }
 0x69c   :  { %2527 = vmatprep.subr.bf16.mxu1 %v13331_v10  ;;  %11343 = vmatprep.mubr.msk.bf16.mxu0 %vm12846_vm1, %v14830_v40 }
 0x69d   :  { %11328 = vmatpush3.bf16.msra.mxu0 %v12021_v38 }
 0x69e   :  { %11329 = vmatprep.subr.bf16.mxu0 %v14830_v40 }
 0x69f   :  { %2528 = vmatpush1.bf16.msra.mxu1 %v13334_v50 }
 0x6a0   :  { %2529 = vmatprep.subr.bf16.mxu1 %v13338_v36 }
 0x6a1   :  { %11330 = vmatpush3.bf16.msra.mxu0 %v12022_v44 }
 0x6a2   :  { %11331 = vmatprep.subr.bf16.mxu0 %v14830_v40 }
 0x6a3   :  { %2530 = vmatpush1.bf16.msra.mxu1 %v13341_v15 }
 0x6a4   :  { %2531 = vmatprep.subr.bf16.mxu1 %v13345_v48 }
 0x6a5   :  { %11332 = vmatpush3.bf16.msra.mxu0 %v12023_v14 }
 0x6a6   :  { %11333 = vmatprep.subr.bf16.mxu0 %v14830_v40 }
 0x6a7   :  { %2532 = vmatpush1.bf16.msra.mxu1 %v13348_v52 }
 0x6a8   :  { %2533 = vmatprep.subr.bf16.mxu1 %v13352_v62 }
 0x6a9   :  { %11334 = vmatpush3.bf16.msra.mxu0 %v12024_v16 }
 0x6aa   :  { %11335 = vmatprep.subr.bf16.mxu0 %v14830_v40 }
 0x6ab   :  { %2534 = vmatpush1.bf16.msra.mxu1 %v13355_v33 }
 0x6ac   :  { %2535 = vmatprep.subr.bf16.mxu1 %v13358_v57 }
 0x6ad   :  { %11336 = vmatpush3.bf16.msra.mxu0 %v12025_v19 }
 0x6ae   :  { %11337 = vmatprep.subr.bf16.mxu0 %v14830_v40 }
 0x6af   :  { %2536 = vmatpush1.bf16.msra.mxu1 %v13361_v0 }
 0x6b0   :  { %2537 = vmatprep.subr.bf16.mxu1 %v13365_v11 }
 0x6b1   :  { %11338 = vmatpush3.bf16.msra.mxu0 %v12026_v53 }
 0x6b2   :  { %11339 = vmatprep.subr.bf16.mxu0 %v14830_v40 }
 0x6b3   :  { %2538 = vmatpush1.bf16.msra.mxu1 %v13368_v17 }
 0x6b4   :  { %2539 = vmatprep.subr.bf16.mxu1 %v13372_v42 }
 0x6b7   :  { %2540 = vmatpush1.bf16.msra.mxu1 %v13375_v31 }
 0x6b8   :  { %2795 = vmatprep.subr.bf16.mxu1 %v13325_v12  ;;  %v12027_v12 = vld [vmem:[#allocation5 + $0x98] ss:$12 sps:$4 sm:$0xff]  }
 0x6b9   :  { %11340 = vmatpush3.bf16.msra.mxu0 %v12027_v12 }
 0x6ba   :  { %11341 = vmatprep.subr.bf16.mxu0 %v14830_v40 }
 0x6bd   :  { %11342 = vmatpush3.bf16.msra.mxu0 %v12028_v41 }
 0x6be   :  { %11347 = vmatprep.subr.bf16.mxu0 %v14830_v40 }
 0x76d   :  { %v2289_v30 = vpop.f32.mrb[56].mxu1  ;;  %v2330_v3 = vpop.f32.mrb[40].mxu0 }
 0x76e   :  { %v2337_v32 = vadd.f32 %v2289_v30, %v13165_v55  ;;  %v2291_v49 = vpop.f32.mrb[57].mxu1  ;;  %v11325_v29 = vpop.f32.mrb[41].mxu0  ;;  %v2336_v20 = vadd.f32 %v13215_v51, %v2330_v3  ;;  %v12030_v51 = vld [vmem:[#allocation5 + $0x20] ss:$12 sps:$4 sm:$0xff]  }
 0x76f   :  { %v2344_v22 = vadd.f32 %v2291_v49, %v13170_v63  ;;  %v2293_v24 = vpop.f32.mrb[58].mxu1  ;;  %v2333_v8 = vpop.f32.mrb[42].mxu0 }
 0x770   :  { %v10075_v60 = vmul.f32 -1.442695, %v2337_v32  ;;  %v2294_v28 = vpop.f32.mrb[59].mxu1  ;;  %v11326_v35 = vpop.f32.mrb[43].mxu0 }
 0x771   :  { %v10076_v46 = vmul.f32 -1.442695, %v2344_v22 }
 0x772   :  { %12465 = vpow2.f32 %v10075_v60 }
 0x773   :  { %12467 = vpow2.f32 %v10076_v46 }
 0x77c   :  { %v12466_v37 = vpop.eup %12465 }
 0x77d   :  { %v2341_v5 = vadd.f32 1.0, %v12466_v37  ;;  %v12468_v18 = vpop.eup %12467 }
 0x77e   :  { %v2348_v47 = vadd.f32 1.0, %v12468_v18 }
 0x77f   :  { %12469 = vrcp.f32 %v2341_v5 }
 0x780   :  { %12471 = vrcp.f32 %v2348_v47  ;;  %v13544_v47 = vld [vmem:[#allocation5] ss:$12 sps:$4 sm:$0xff]  }
 0x789   :  { %v12470_v55 = vpop.eup %12469 }
 0x78a   :  { %v2351_v43 = vmul.f32 %v12470_v55, %v2336_v20  ;;  %v12472_v2 = vpop.eup %12471  ;;  %v12040_v20 = vld [vmem:[#allocation5 + $0x8] ss:$12 sps:$4 sm:$0xff]  }
 0x78b   :  { %v2354_v38 = vsub.f32 1.0, %v12472_v2  ;;  %v2356_v16 = vmul.f32 %v12472_v2, %v13459_v39  ;;  %v13548_v55 = vld [vmem:[#allocation5 + $0x1c] ss:$12 sps:$4 sm:$0xff]   ;;  %v13555_v2 = vld [vmem:[#allocation5 + $0x34] ss:$12 sps:$4 sm:$0xff]  }
 0x78c   :  { %v2352_v63 = vadd.f32 %v2351_v43, %v13184_v25  ;;  %v12029_v25 = vld [vmem:[#allocation5 + $0x8] ss:$12 sps:$4 sm:$0xff]   ;;  %v13551_v43 = vld [vmem:[#allocation5 + $0x18] ss:$12 sps:$4 sm:$0xff]  }
 0x78e   :  { %12473 = vtanh.f32 %v2352_v63  ;;  %v12044_v63 = vld [vmem:[#allocation5 + $0x20] ss:$12 sps:$4 sm:$0xff]  }
 0x798   :  { %v12474_v44 = vpop.eup %12473 }
 0x799   :  { %v2355_v14 = vmul.f32 %v12474_v44, %v2354_v38  ;;  %v13558_v38 = vld [vmem:[#allocation5 + $0x30] ss:$12 sps:$4 sm:$0xff]   ;;  %v12048_v44 = vld [vmem:[#allocation5 + $0x38] ss:$12 sps:$4 sm:$0xff]  }
 0x79b   :  { %v13495_v19 = vadd.f32 %v2356_v16, %v2355_v14  ;;  %v13562_v14 = vld [vmem:[#allocation5 + $0x4c] ss:$12 sps:$4 sm:$0xff]   ;;  %v13565_v16 = vld [vmem:[#allocation5 + $0x48] ss:$12 sps:$4 sm:$0xff]  }
 0x79d   :  { %v2364_v53 = vpack.c.bf16 %v13495_v19, %v13495_v19 }
 0x79f   :  { %2558 = vmatmul.mubr.bf16.vlgmr.msra.gmra.mrb[60].mxu1 %v2364_v53  ;;  %11344 = vmatmul.mubr.bf16.vlgmr.msra.gmra.mrb[44].mxu0 %v2364_v53  ;;  %v12052_v53 = vld [vmem:[#allocation5 + $0x50] ss:$12 sps:$4 sm:$0xff]  }
 0x7a0   :  { %2796 = vmatpush1.bf16.msra.mxu1 %v13327_v13  ;;  %2827 = vmatprep.mubr.bf16.mxu1 %v14829_v59  ;;  %v12031_v13 = vld [vmem:[#allocation5 + $0x38] ss:$12 sps:$4 sm:$0xff]  }
 0x7a1   :  { %2797 = vmatprep.subr.bf16.mxu1 %v13331_v10  ;;  %11363 = vmatprep.mubr.msk.bf16.mxu0 %vm12846_vm1, %v14830_v40  ;;  %v12032_v10 = vld [vmem:[#allocation5 + $0x50] ss:$12 sps:$4 sm:$0xff]  }
 0x7a2   :  { %11348 = vmatpush3.bf16.msra.mxu0 %v12029_v25  ;;  %v13569_v25 = vld [vmem:[#allocation5 + $0x64] ss:$12 sps:$4 sm:$0xff]  }
 0x7a3   :  { %11349 = vmatprep.subr.bf16.mxu0 %v14830_v40 }
 0x7a4   :  { %2798 = vmatpush1.bf16.msra.mxu1 %v13334_v50  ;;  %v12033_v50 = vld [vmem:[#allocation5 + $0x68] ss:$12 sps:$4 sm:$0xff]  }
 0x7a5   :  { %2799 = vmatprep.subr.bf16.mxu1 %v13338_v36  ;;  %v12034_v36 = vld [vmem:[#allocation5 + $0x80] ss:$12 sps:$4 sm:$0xff]  }
 0x7a6   :  { %11350 = vmatpush3.bf16.msra.mxu0 %v12030_v51  ;;  %v13572_v51 = vld [vmem:[#allocation5 + $0x60] ss:$12 sps:$4 sm:$0xff]  }
 0x7a7   :  { %11351 = vmatprep.subr.bf16.mxu0 %v14830_v40 }
 0x7a8   :  { %2800 = vmatpush1.bf16.msra.mxu1 %v13341_v15  ;;  %v12035_v15 = vld [vmem:[#allocation5 + $0x98] ss:$12 sps:$4 sm:$0xff]  }
 0x7a9   :  { %2801 = vmatprep.subr.bf16.mxu1 %v13345_v48  ;;  %v12036_v48 = vld [vmem:[#allocation5 + $0xb0] ss:$12 sps:$4 sm:$0xff]  }
 0x7aa   :  { %11352 = vmatpush3.bf16.msra.mxu0 %v12031_v13  ;;  %v12056_v13 = vld [vmem:[#allocation5 + $0x68] ss:$12 sps:$4 sm:$0xff]  }
 0x7ab   :  { %11353 = vmatprep.subr.bf16.mxu0 %v14830_v40 }
 0x7ac   :  { %2802 = vmatpush1.bf16.msra.mxu1 %v13348_v52 }
 0x7ad   :  { %2803 = vmatprep.subr.bf16.mxu1 %v13352_v62 }
 0x7ae   :  { %11354 = vmatpush3.bf16.msra.mxu0 %v12032_v10  ;;  %v13575_v10 = vld [vmem:[#allocation5 + $0x7c] ss:$12 sps:$4 sm:$0xff]  }
 0x7af   :  { %11355 = vmatprep.subr.bf16.mxu0 %v14830_v40 }
 0x7b0   :  { %2804 = vmatpush1.bf16.msra.mxu1 %v13355_v33 }
 0x7b1   :  { %2805 = vmatprep.subr.bf16.mxu1 %v13358_v57 }
 0x7b2   :  { %11356 = vmatpush3.bf16.msra.mxu0 %v12033_v50  ;;  %v13578_v50 = vld [vmem:[#allocation5 + $0x78] ss:$12 sps:$4 sm:$0xff]  }
 0x7b3   :  { %11357 = vmatprep.subr.bf16.mxu0 %v14830_v40 }
 0x7b4   :  { %2806 = vmatpush1.bf16.msra.mxu1 %v13361_v0 }
 0x7b5   :  { %2807 = vmatprep.subr.bf16.mxu1 %v13365_v11 }
 0x7b6   :  { %11358 = vmatpush3.bf16.msra.mxu0 %v12034_v36  ;;  %v12060_v36 = vld [vmem:[#allocation5 + $0x80] ss:$12 sps:$4 sm:$0xff]  }
 0x7b7   :  { %11359 = vmatprep.subr.bf16.mxu0 %v14830_v40 }
 0x7b8   :  { %2808 = vmatpush1.bf16.msra.mxu1 %v13368_v17 }
 0x7b9   :  { %2809 = vmatprep.subr.bf16.mxu1 %v13372_v42 }
 0x7ba   :  { %11360 = vmatpush3.bf16.msra.mxu0 %v12035_v15  ;;  %v13582_v15 = vld [vmem:[#allocation5 + $0x94] ss:$12 sps:$4 sm:$0xff]  }
 0x7bb   :  { %11361 = vmatprep.subr.bf16.mxu0 %v14830_v40 }
 0x7bc   :  { %2810 = vmatpush1.bf16.msra.mxu1 %v13375_v31 }
 0x7be   :  { %11362 = vmatpush3.bf16.msra.mxu0 %v12036_v48  ;;  %v13585_v48 = vld [vmem:[#allocation5 + $0x90] ss:$12 sps:$4 sm:$0xff]  }
 0x7bf   :  { %11367 = vmatprep.subr.bf16.mxu0 %v14830_v40 }
 0x872   :  { %v2559_v52 = vpop.f32.mrb[60].mxu1  ;;  %v2600_v62 = vpop.f32.mrb[44].mxu0 }
 0x873   :  { %v2607_v33 = vadd.f32 %v2559_v52, %v13173_v4  ;;  %v2561_v57 = vpop.f32.mrb[61].mxu1  ;;  %v11345_v0 = vpop.f32.mrb[45].mxu0  ;;  %v13530_v4 = vld [vmem:[%s14792_s4] ss:$0 sm:$0xff]  ;;  %v12064_v52 = vld [vmem:[#allocation5 + $0x98] ss:$12 sps:$4 sm:$0xff]  }
 0x874   :  { %v2614_v11 = vadd.f32 %v2561_v57, %v13176_v9  ;;  %v2563_v17 = vpop.f32.mrb[62].mxu1  ;;  %v2603_v42 = vpop.f32.mrb[46].mxu0  ;;  %v2606_v9 = vadd.f32 %v13530_v4, %v2600_v62  ;;  %v13589_v62 = vld [vmem:[#allocation5 + $0xac] ss:$12 sps:$4 sm:$0xff]   ;;  %v12068_v57 = vld [vmem:[#allocation5 + $0xb0] ss:$12 sps:$4 sm:$0xff]  }
 0x875   :  { %v10101_v31 = vmul.f32 -1.442695, %v2607_v33  ;;  %v2564_v12 = vpop.f32.mrb[63].mxu1  ;;  %v11346_v41 = vpop.f32.mrb[47].mxu0  ;;  %v13592_v33 = vld [vmem:[#allocation5 + $0xa8] ss:$12 sps:$4 sm:$0xff]  }
 0x876   :  { %v10102_v30 = vmul.f32 -1.442695, %v2614_v11 }
 0x877   :  { %12475 = vpow2.f32 %v10101_v31 }
 0x878   :  { %12477 = vpow2.f32 %v10102_v30 }
 0x881   :  { %v12476_v3 = vpop.eup %12475 }
 0x882   :  { %v2611_v32 = vadd.f32 1.0, %v12476_v3  ;;  %v12478_v49 = vpop.eup %12477 }
 0x883   :  { %v2618_v29 = vadd.f32 1.0, %v12478_v49 }
 0x884   :  { %12479 = vrcp.f32 %v2611_v32 }
 0x885   :  { %12481 = vrcp.f32 %v2618_v29 }
 0x88e   :  { %v12480_v22 = vpop.eup %12479 }
 0x88f   :  { %v2621_v24 = vmul.f32 %v12480_v22, %v2606_v9  ;;  %v12482_v60 = vpop.eup %12481 }
 0x890   :  { %v2624_v28 = vsub.f32 1.0, %v12482_v60  ;;  %v2626_v37 = vmul.f32 %v12482_v60, %v13495_v19 }
 0x891   :  { %v2622_v8 = vadd.f32 %v2621_v24, %v13188_v34  ;;  %v13542_v34 = vld [vmem:[#allocation5 + $0x4] ss:$12 sps:$4 sm:$0xff]  }
 0x892   :  { %3065 = vmatprep.subr.bf16.mxu1 %v13542_v34 }
 0x893   :  { %12483 = vtanh.f32 %v2622_v8 }
 0x89d   :  { %v12484_v35 = vpop.eup %12483 }
 0x89e   :  { %v2625_v46 = vmul.f32 %v12484_v35, %v2624_v28 }
 0x8a0   :  { %v13535_v5 = vadd.f32 %v2626_v37, %v2625_v46 }
 0x8a2   :  { %v2634_v18 = vpack.c.bf16 %v13535_v5, %v13535_v5 }
 0x8a4   :  { %2828 = vmatmul.mubr.bf16.vlgmr.msra.gmra.mrb[64].mxu1 %v2634_v18  ;;  %11364 = vmatmul.mubr.bf16.vlgmr.msra.gmra.mrb[48].mxu0 %v2634_v18 }
 0x8a5   :  { %3097 = vmatprep.mubr.bf16.mxu1 %v14829_v59  ;;  %11383 = vmatprep.mubr.msk.bf16.mxu0 %vm12846_vm1, %v14830_v40 }
 0x8a6   :  { %3066 = vmatpush1.bf16.msra.mxu1 %v13544_v47  ;;  %11368 = vmatpush3.bf16.msra.mxu0 %v12040_v20 }
 0x8a7   :  { %11369 = vmatprep.subr.bf16.mxu0 %v14830_v40  ;;  %3067 = vmatprep.subr.bf16.mxu1 %v13548_v55 }
 0x8aa   :  { %3068 = vmatpush1.bf16.msra.mxu1 %v13551_v43  ;;  %11370 = vmatpush3.bf16.msra.mxu0 %v12044_v63 }
 0x8ab   :  { %11371 = vmatprep.subr.bf16.mxu0 %v14830_v40  ;;  %3069 = vmatprep.subr.bf16.mxu1 %v13555_v2 }
 0x8ae   :  { %3070 = vmatpush1.bf16.msra.mxu1 %v13558_v38  ;;  %11372 = vmatpush3.bf16.msra.mxu0 %v12048_v44 }
 0x8af   :  { %11373 = vmatprep.subr.bf16.mxu0 %v14830_v40  ;;  %3071 = vmatprep.subr.bf16.mxu1 %v13562_v14 }
 0x8b2   :  { %3072 = vmatpush1.bf16.msra.mxu1 %v13565_v16  ;;  %11374 = vmatpush3.bf16.msra.mxu0 %v12052_v53  ;;  %v12070_v53 = vld [vmem:[#allocation5 + $0x20] ss:$12 sps:$4 sm:$0xff]  }
 0x8b3   :  { %11375 = vmatprep.subr.bf16.mxu0 %v14830_v40  ;;  %3073 = vmatprep.subr.bf16.mxu1 %v13569_v25 }
 0x8b6   :  { %3074 = vmatpush1.bf16.msra.mxu1 %v13572_v51  ;;  %11376 = vmatpush3.bf16.msra.mxu0 %v12056_v13  ;;  %v12071_v13 = vld [vmem:[#allocation5 + $0x38] ss:$12 sps:$4 sm:$0xff]  }
 0x8b7   :  { %3075 = vmatprep.subr.bf16.mxu1 %v13575_v10  ;;  %11377 = vmatprep.subr.bf16.mxu0 %v14830_v40 }
 0x8ba   :  { %3076 = vmatpush1.bf16.msra.mxu1 %v13578_v50  ;;  %11378 = vmatpush3.bf16.msra.mxu0 %v12060_v36  ;;  %v12072_v36 = vld [vmem:[#allocation5 + $0x50] ss:$12 sps:$4 sm:$0xff]  }
 0x8bb   :  { %3077 = vmatprep.subr.bf16.mxu1 %v13582_v15  ;;  %11379 = vmatprep.subr.bf16.mxu0 %v14830_v40 }
 0x8be   :  { %3078 = vmatpush1.bf16.msra.mxu1 %v13585_v48  ;;  %11380 = vmatpush3.bf16.msra.mxu0 %v12064_v52  ;;  %v12073_v52 = vld [vmem:[#allocation5 + $0x68] ss:$12 sps:$4 sm:$0xff]  }
 0x8bf   :  { %3079 = vmatprep.subr.bf16.mxu1 %v13589_v62  ;;  %11381 = vmatprep.subr.bf16.mxu0 %v14830_v40 }
 0x8c2   :  { %3080 = vmatpush1.bf16.msra.mxu1 %v13592_v33  ;;  %11382 = vmatpush3.bf16.msra.mxu0 %v12068_v57  ;;  %v12074_v57 = vld [vmem:[#allocation5 + $0x80] ss:$12 sps:$4 sm:$0xff]  }
 0x8c3   :  { %3335 = vmatprep.subr.bf16.mxu1 %v13542_v34  ;;  %11387 = vmatprep.subr.bf16.mxu0 %v14830_v40 }
 0x977   :  { %v2829_v0 = vpop.f32.mrb[64].mxu1  ;;  %v2870_v11 = vpop.f32.mrb[48].mxu0 }
 0x978   :  { %v2877_v17 = vadd.f32 %v2829_v0, %v13082_v54  ;;  %v2831_v42 = vpop.f32.mrb[65].mxu1  ;;  %v11365_v31 = vpop.f32.mrb[49].mxu0  ;;  %v2876_v60 = vadd.f32 %v13530_v4, %v2870_v11  ;;  %v12075_v0 = vld [vmem:[#allocation5 + $0x98] ss:$12 sps:$4 sm:$0xff]   ;;  %v12076_v11 = vld [vmem:[#allocation5 + $0xb0] ss:$12 sps:$4 sm:$0xff]  }
 0x979   :  { %v2884_v12 = vadd.f32 %v2831_v42, %v13085_v56  ;;  %v2833_v41 = vpop.f32.mrb[66].mxu1  ;;  %v2873_v30 = vpop.f32.mrb[50].mxu0 }
 0x97a   :  { %v10127_v3 = vmul.f32 -1.442695, %v2877_v17  ;;  %v2834_v32 = vpop.f32.mrb[67].mxu1  ;;  %v11366_v49 = vpop.f32.mrb[51].mxu0 }
 0x97b   :  { %v10128_v29 = vmul.f32 -1.442695, %v2884_v12 }
 0x97c   :  { %12485 = vpow2.f32 %v10127_v3 }
 0x97d   :  { %12487 = vpow2.f32 %v10128_v29 }
 0x986   :  { %v12486_v9 = vpop.eup %12485 }
 0x987   :  { %v2881_v22 = vadd.f32 1.0, %v12486_v9  ;;  %v12488_v24 = vpop.eup %12487 }
 0x988   :  { %v2888_v8 = vadd.f32 1.0, %v12488_v24 }
 0x989   :  { %12489 = vrcp.f32 %v2881_v22 }
 0x98a   :  { %12491 = vrcp.f32 %v2888_v8 }
 0x993   :  { %v12490_v54 = vpop.eup %12489 }
 0x994   :  { %v2891_v28 = vmul.f32 %v12490_v54, %v2876_v60  ;;  %v12492_v35 = vpop.eup %12491 }
 0x995   :  { %v2894_v46 = vsub.f32 1.0, %v12492_v35  ;;  %v2896_v20 = vmul.f32 %v12492_v35, %v13535_v5 }
 0x996   :  { %v2892_v56 = vadd.f32 %v2891_v28, %v13194_v7  ;;  %v12069_v7 = vld [vmem:[#allocation5 + $0x8] ss:$12 sps:$4 sm:$0xff]  }
 0x998   :  { %12493 = vtanh.f32 %v2892_v56 }
 0x9a2   :  { %v12494_v37 = vpop.eup %12493 }
 0x9a3   :  { %v2895_v18 = vmul.f32 %v12494_v37, %v2894_v46 }
 0x9a5   :  { %v13604_v63 = vadd.f32 %v2896_v20, %v2895_v18 }
 0x9a7   :  { %v2904_v44 = vpack.c.bf16 %v13604_v63, %v13604_v63 }
 0x9a9   :  { %3098 = vmatmul.mubr.bf16.vlgmr.msra.gmra.mrb[68].mxu1 %v2904_v44  ;;  %11384 = vmatmul.mubr.bf16.vlgmr.msra.gmra.mrb[52].mxu0 %v2904_v44 }
 0x9aa   :  { %3336 = vmatpush1.bf16.msra.mxu1 %v13544_v47  ;;  %3367 = vmatprep.mubr.bf16.mxu1 %v14829_v59 }
 0x9ab   :  { %3337 = vmatprep.subr.bf16.mxu1 %v13548_v55  ;;  %11403 = vmatprep.mubr.msk.bf16.mxu0 %vm12846_vm1, %v14830_v40 }
 0x9ac   :  { %11388 = vmatpush3.bf16.msra.mxu0 %v12069_v7 }
 0x9ad   :  { %11389 = vmatprep.subr.bf16.mxu0 %v14830_v40 }
 0x9ae   :  { %3338 = vmatpush1.bf16.msra.mxu1 %v13551_v43 }
 0x9af   :  { %3339 = vmatprep.subr.bf16.mxu1 %v13555_v2 }
 0x9b0   :  { %11390 = vmatpush3.bf16.msra.mxu0 %v12070_v53  ;;  %v12078_v53 = vld [vmem:[#allocation5 + $0x20] ss:$12 sps:$4 sm:$0xff]  }
 0x9b1   :  { %11391 = vmatprep.subr.bf16.mxu0 %v14830_v40 }
 0x9b2   :  { %3340 = vmatpush1.bf16.msra.mxu1 %v13558_v38 }
 0x9b3   :  { %3341 = vmatprep.subr.bf16.mxu1 %v13562_v14 }
 0x9b4   :  { %11392 = vmatpush3.bf16.msra.mxu0 %v12071_v13  ;;  %v12079_v13 = vld [vmem:[#allocation5 + $0x38] ss:$12 sps:$4 sm:$0xff]  }
 0x9b5   :  { %11393 = vmatprep.subr.bf16.mxu0 %v14830_v40 }
 0x9b6   :  { %3342 = vmatpush1.bf16.msra.mxu1 %v13565_v16 }
 0x9b7   :  { %3343 = vmatprep.subr.bf16.mxu1 %v13569_v25 }
 0x9b8   :  { %11394 = vmatpush3.bf16.msra.mxu0 %v12072_v36  ;;  %v12080_v36 = vld [vmem:[#allocation5 + $0x50] ss:$12 sps:$4 sm:$0xff]  }
 0x9b9   :  { %11395 = vmatprep.subr.bf16.mxu0 %v14830_v40 }
 0x9ba   :  { %3344 = vmatpush1.bf16.msra.mxu1 %v13572_v51 }
 0x9bb   :  { %3345 = vmatprep.subr.bf16.mxu1 %v13575_v10 }
 0x9bc   :  { %11396 = vmatpush3.bf16.msra.mxu0 %v12073_v52  ;;  %v12081_v52 = vld [vmem:[#allocation5 + $0x68] ss:$12 sps:$4 sm:$0xff]  }
 0x9bd   :  { %11397 = vmatprep.subr.bf16.mxu0 %v14830_v40 }
 0x9be   :  { %3346 = vmatpush1.bf16.msra.mxu1 %v13578_v50 }
 0x9bf   :  { %3347 = vmatprep.subr.bf16.mxu1 %v13582_v15 }
 0x9c0   :  { %11398 = vmatpush3.bf16.msra.mxu0 %v12074_v57  ;;  %v12082_v57 = vld [vmem:[#allocation5 + $0x80] ss:$12 sps:$4 sm:$0xff]  }
 0x9c1   :  { %11399 = vmatprep.subr.bf16.mxu0 %v14830_v40 }
 0x9c2   :  { %3348 = vmatpush1.bf16.msra.mxu1 %v13585_v48 }
 0x9c3   :  { %3349 = vmatprep.subr.bf16.mxu1 %v13589_v62 }
 0x9c4   :  { %11400 = vmatpush3.bf16.msra.mxu0 %v12075_v0  ;;  %v12083_v0 = vld [vmem:[#allocation5 + $0x98] ss:$12 sps:$4 sm:$0xff]  }
 0x9c5   :  { %11401 = vmatprep.subr.bf16.mxu0 %v14830_v40 }
 0x9c6   :  { %3350 = vmatpush1.bf16.msra.mxu1 %v13592_v33 }
 0x9c7   :  { %3605 = vmatprep.subr.bf16.mxu1 %v13542_v34 }
 0x9c8   :  { %11402 = vmatpush3.bf16.msra.mxu0 %v12076_v11  ;;  %v12084_v11 = vld [vmem:[#allocation5 + $0xb0] ss:$12 sps:$4 sm:$0xff]  }
 0x9c9   :  { %11407 = vmatprep.subr.bf16.mxu0 %v14830_v40 }
 0xa7c   :  { %v3099_v17 = vpop.f32.mrb[68].mxu1  ;;  %v3140_v42 = vpop.f32.mrb[52].mxu0 }
 0xa7d   :  { %v3147_v31 = vadd.f32 %v3099_v17, %v13088_v58  ;;  %v3101_v12 = vpop.f32.mrb[69].mxu1  ;;  %v11385_v41 = vpop.f32.mrb[53].mxu0  ;;  %v3146_v28 = vadd.f32 %v13530_v4, %v3140_v42 }
 0xa7e   :  { %v3154_v30 = vadd.f32 %v3101_v12, %v13093_v61  ;;  %v3103_v3 = vpop.f32.mrb[70].mxu1  ;;  %v3143_v32 = vpop.f32.mrb[54].mxu0 }
 0xa7f   :  { %v10153_v49 = vmul.f32 -1.442695, %v3147_v31  ;;  %v3104_v29 = vpop.f32.mrb[71].mxu1  ;;  %v11386_v9 = vpop.f32.mrb[55].mxu0 }
 0xa80   :  { %v10154_v22 = vmul.f32 -1.442695, %v3154_v30  ;;  %v14831_v30 = vld [vmem:[#allocation16_spill] sm:$0xff] }
 0xa81   :  { %12495 = vpow2.f32 %v10153_v49 }
 0xa82   :  { %12497 = vpow2.f32 %v10154_v22 }
 0xa8b   :  { %v12496_v24 = vpop.eup %12495 }
 0xa8c   :  { %v3151_v8 = vadd.f32 1.0, %v12496_v24  ;;  %v12498_v60 = vpop.eup %12497 }
 0xa8d   :  { %v3158_v54 = vadd.f32 1.0, %v12498_v60 }
 0xa8e   :  { %12499 = vrcp.f32 %v3151_v8 }
 0xa8f   :  { %12501 = vrcp.f32 %v3158_v54 }
 0xa98   :  { %v12500_v58 = vpop.eup %12499 }
 0xa99   :  { %v3161_v56 = vmul.f32 %v12500_v58, %v3146_v28  ;;  %v12502_v35 = vpop.eup %12501 }
 0xa9a   :  { %v3164_v46 = vsub.f32 1.0, %v12502_v35  ;;  %v3166_v20 = vmul.f32 %v12502_v35, %v13604_v63 }
 0xa9b   :  { %v3162_v61 = vadd.f32 %v3161_v56, %v13198_v27  ;;  %v12077_v27 = vld [vmem:[#allocation5 + $0x8] ss:$12 sps:$4 sm:$0xff]  }
 0xa9d   :  { %12503 = vtanh.f32 %v3162_v61  ;;  %v14832_v61 = vld [vmem:[#allocation27_spill] sm:$0xff] }
 0xaa7   :  { %v12504_v37 = vpop.eup %12503 }
 0xaa8   :  { %v3165_v18 = vmul.f32 %v12504_v37, %v3164_v46 }
 0xaaa   :  { %v13640_v44 = vadd.f32 %v3166_v20, %v3165_v18 }
 0xaac   :  { %v3174_v7 = vpack.c.bf16 %v13640_v44, %v13640_v44 }
 0xaae   :  { %3368 = vmatmul.mubr.bf16.vlgmr.msra.gmra.mrb[72].mxu1 %v3174_v7  ;;  %11404 = vmatmul.mubr.bf16.vlgmr.msra.gmra.mrb[56].mxu0 %v3174_v7 }
 0xaaf   :  { %3606 = vmatpush1.bf16.msra.mxu1 %v13544_v47  ;;  %3637 = vmatprep.mubr.bf16.mxu1 %v14829_v59 }
 0xab0   :  { %3607 = vmatprep.subr.bf16.mxu1 %v13548_v55  ;;  %11423 = vmatprep.mubr.msk.bf16.mxu0 %vm12846_vm1, %v14830_v40 }
 0xab1   :  { %11408 = vmatpush3.bf16.msra.mxu0 %v12077_v27 }
 0xab2   :  { %11409 = vmatprep.subr.bf16.mxu0 %v14830_v40 }
 0xab3   :  { %3608 = vmatpush1.bf16.msra.mxu1 %v13551_v43 }
 0xab4   :  { %3609 = vmatprep.subr.bf16.mxu1 %v13555_v2 }
 0xab5   :  { %11410 = vmatpush3.bf16.msra.mxu0 %v12078_v53 }
 0xab6   :  { %11411 = vmatprep.subr.bf16.mxu0 %v14830_v40 }
 0xab7   :  { %3610 = vmatpush1.bf16.msra.mxu1 %v13558_v38 }
 0xab8   :  { %3611 = vmatprep.subr.bf16.mxu1 %v13562_v14 }
 0xab9   :  { %11412 = vmatpush3.bf16.msra.mxu0 %v12079_v13  ;;  %v12085_v13 = vld [vmem:[#allocation5 + $0x8] ss:$12 sps:$4 sm:$0xff]  }
 0xaba   :  { %11413 = vmatprep.subr.bf16.mxu0 %v14830_v40 }
 0xabb   :  { %3612 = vmatpush1.bf16.msra.mxu1 %v13565_v16 }
 0xabc   :  { %3613 = vmatprep.subr.bf16.mxu1 %v13569_v25 }
 0xabd   :  { %11414 = vmatpush3.bf16.msra.mxu0 %v12080_v36  ;;  %v12086_v36 = vld [vmem:[#allocation5 + $0x20] ss:$12 sps:$4 sm:$0xff]  }
 0xabe   :  { %11415 = vmatprep.subr.bf16.mxu0 %v14830_v40 }
 0xabf   :  { %3614 = vmatpush1.bf16.msra.mxu1 %v13572_v51 }
 0xac0   :  { %3615 = vmatprep.subr.bf16.mxu1 %v13575_v10 }
 0xac1   :  { %11416 = vmatpush3.bf16.msra.mxu0 %v12081_v52  ;;  %v12087_v52 = vld [vmem:[#allocation5 + $0x38] ss:$12 sps:$4 sm:$0xff]  }
 0xac2   :  { %11417 = vmatprep.subr.bf16.mxu0 %v14830_v40 }
 0xac3   :  { %3616 = vmatpush1.bf16.msra.mxu1 %v13578_v50 }
 0xac4   :  { %3617 = vmatprep.subr.bf16.mxu1 %v13582_v15 }
 0xac5   :  { %11418 = vmatpush3.bf16.msra.mxu0 %v12082_v57  ;;  %v12088_v57 = vld [vmem:[#allocation5 + $0x50] ss:$12 sps:$4 sm:$0xff]  }
 0xac6   :  { %11419 = vmatprep.subr.bf16.mxu0 %v14830_v40 }
 0xac7   :  { %3618 = vmatpush1.bf16.msra.mxu1 %v13585_v48 }
 0xac8   :  { %3619 = vmatprep.subr.bf16.mxu1 %v13589_v62 }
 0xac9   :  { %11420 = vmatpush3.bf16.msra.mxu0 %v12083_v0  ;;  %v12089_v0 = vld [vmem:[#allocation5 + $0x68] ss:$12 sps:$4 sm:$0xff]  }
 0xaca   :  { %11421 = vmatprep.subr.bf16.mxu0 %v14830_v40 }
 0xacb   :  { %3620 = vmatpush1.bf16.msra.mxu1 %v13592_v33 }
 0xacc   :  { %3875 = vmatprep.subr.bf16.mxu1 %v13542_v34 }
 0xacd   :  { %11422 = vmatpush3.bf16.msra.mxu0 %v12084_v11  ;;  %v12090_v11 = vld [vmem:[#allocation5 + $0x80] ss:$12 sps:$4 sm:$0xff]  }
 0xace   :  { %11427 = vmatprep.subr.bf16.mxu0 %v14830_v40 }
 0xb81   :  { %v3369_v17 = vpop.f32.mrb[72].mxu1  ;;  %v3410_v42 = vpop.f32.mrb[56].mxu0 }
 0xb82   :  { %v3417_v31 = vadd.f32 %v3369_v17, %v13104_v6  ;;  %v3371_v12 = vpop.f32.mrb[73].mxu1  ;;  %v11405_v41 = vpop.f32.mrb[57].mxu0  ;;  %v3416_v58 = vadd.f32 %v13530_v4, %v3410_v42  ;;  %v12092_v17 = vld [vmem:[#allocation5 + $0xb0] ss:$12 sps:$4 sm:$0xff]  }
 0xb83   :  { %v3424_v3 = vadd.f32 %v3371_v12, %v14831_v30  ;;  %v3373_v32 = vpop.f32.mrb[74].mxu1  ;;  %v3413_v49 = vpop.f32.mrb[58].mxu0  ;;  %v14833_v12 = vld [vmem:[#allocation17_spill] sm:$0xff] }
 0xb84   :  { %v10179_v29 = vmul.f32 -1.442695, %v3417_v31  ;;  %v3374_v9 = vpop.f32.mrb[75].mxu1  ;;  %v11406_v22 = vpop.f32.mrb[59].mxu0  ;;  %v14834_v32 = vld [vmem:[#allocation18_spill] sm:$0xff] }
 0xb85   :  { %v10180_v24 = vmul.f32 -1.442695, %v3424_v3 }
 0xb86   :  { %12505 = vpow2.f32 %v10179_v29 }
 0xb87   :  { %12507 = vpow2.f32 %v10180_v24 }
 0xb90   :  { %v12506_v8 = vpop.eup %12505 }
 0xb91   :  { %v3421_v60 = vadd.f32 1.0, %v12506_v8  ;;  %v12508_v54 = vpop.eup %12507 }
 0xb92   :  { %v3428_v28 = vadd.f32 1.0, %v12508_v54 }
 0xb93   :  { %12509 = vrcp.f32 %v3421_v60 }
 0xb94   :  { %12511 = vrcp.f32 %v3428_v28 }
 0xb9d   :  { %v12510_v6 = vpop.eup %12509 }
 0xb9e   :  { %v3431_v56 = vmul.f32 %v12510_v6, %v3416_v58  ;;  %v12512_v46 = vpop.eup %12511 }
 0xb9f   :  { %v3434_v37 = vsub.f32 1.0, %v12512_v46  ;;  %v3436_v7 = vmul.f32 %v12512_v46, %v13640_v44  ;;  %v14835_v46 = vld [vmem:[#allocation28_spill] sm:$0xff] }
 0xba0   :  { %v3432_v35 = vadd.f32 %v3431_v56, %v14832_v61 }
 0xba2   :  { %12513 = vtanh.f32 %v3432_v35 }
 0xbac   :  { %v12514_v18 = vpop.eup %12513 }
 0xbad   :  { %v3435_v20 = vmul.f32 %v12514_v18, %v3434_v37 }
 0xbaf   :  { %v13676_v27 = vadd.f32 %v3436_v7, %v3435_v20 }
 0xbb1   :  { %v3444_v53 = vpack.c.bf16 %v13676_v27, %v13676_v27 }
 0xbb3   :  { %3638 = vmatmul.mubr.bf16.vlgmr.msra.gmra.mrb[76].mxu1 %v3444_v53  ;;  %11424 = vmatmul.mubr.bf16.vlgmr.msra.gmra.mrb[60].mxu0 %v3444_v53 }
 0xbb4   :  { %3876 = vmatpush1.bf16.msra.mxu1 %v13544_v47  ;;  %3907 = vmatprep.mubr.bf16.mxu1 %v14829_v59 }
 0xbb5   :  { %3877 = vmatprep.subr.bf16.mxu1 %v13548_v55  ;;  %11443 = vmatprep.mubr.msk.bf16.mxu0 %vm12846_vm1, %v14830_v40 }
 0xbb6   :  { %11428 = vmatpush3.bf16.msra.mxu0 %v12085_v13 }
 0xbb7   :  { %11429 = vmatprep.subr.bf16.mxu0 %v14830_v40 }
 0xbb8   :  { %3878 = vmatpush1.bf16.msra.mxu1 %v13551_v43 }
 0xbb9   :  { %3879 = vmatprep.subr.bf16.mxu1 %v13555_v2 }
 0xbba   :  { %11430 = vmatpush3.bf16.msra.mxu0 %v12086_v36 }
 0xbbb   :  { %11431 = vmatprep.subr.bf16.mxu0 %v14830_v40 }
 0xbbc   :  { %3880 = vmatpush1.bf16.msra.mxu1 %v13558_v38 }
 0xbbd   :  { %3881 = vmatprep.subr.bf16.mxu1 %v13562_v14 }
 0xbbe   :  { %11432 = vmatpush3.bf16.msra.mxu0 %v12087_v52 }
 0xbbf   :  { %11433 = vmatprep.subr.bf16.mxu0 %v14830_v40 }
 0xbc0   :  { %3882 = vmatpush1.bf16.msra.mxu1 %v13565_v16 }
 0xbc1   :  { %3883 = vmatprep.subr.bf16.mxu1 %v13569_v25 }
 0xbc2   :  { %11434 = vmatpush3.bf16.msra.mxu0 %v12088_v57 }
 0xbc3   :  { %11435 = vmatprep.subr.bf16.mxu0 %v14830_v40 }
 0xbc4   :  { %3884 = vmatpush1.bf16.msra.mxu1 %v13572_v51 }
 0xbc5   :  { %3885 = vmatprep.subr.bf16.mxu1 %v13575_v10 }
 0xbc6   :  { %11436 = vmatpush3.bf16.msra.mxu0 %v12089_v0 }
 0xbc7   :  { %11437 = vmatprep.subr.bf16.mxu0 %v14830_v40 }
 0xbc8   :  { %3886 = vmatpush1.bf16.msra.mxu1 %v13578_v50 }
 0xbc9   :  { %3887 = vmatprep.subr.bf16.mxu1 %v13582_v15 }
 0xbca   :  { %11438 = vmatpush3.bf16.msra.mxu0 %v12090_v11 }
 0xbcb   :  { %11439 = vmatprep.subr.bf16.mxu0 %v14830_v40 }
 0xbcc   :  { %3888 = vmatpush1.bf16.msra.mxu1 %v13585_v48 }
 0xbcd   :  { %3889 = vmatprep.subr.bf16.mxu1 %v13589_v62 }
 0xbd0   :  { %3890 = vmatpush1.bf16.msra.mxu1 %v13592_v33 }
 0xbd1   :  { %4145 = vmatprep.subr.bf16.mxu1 %v13542_v34  ;;  %v12091_v34 = vld [vmem:[#allocation5 + $0x98] ss:$12 sps:$4 sm:$0xff]  }
 0xbd2   :  { %11440 = vmatpush3.bf16.msra.mxu0 %v12091_v34 }
 0xbd3   :  { %11441 = vmatprep.subr.bf16.mxu0 %v14830_v40 }
 0xbd6   :  { %11442 = vmatpush3.bf16.msra.mxu0 %v12092_v17 }
 0xbd7   :  { %11447 = vmatprep.subr.bf16.mxu0 %v14830_v40 }
 0xc86   :  { %v3639_v42 = vpop.f32.mrb[76].mxu1  ;;  %v3680_v31 = vpop.f32.mrb[60].mxu0 }
 0xc87   :  { %v3687_v41 = vadd.f32 %v3639_v42, %v14833_v12  ;;  %v3641_v30 = vpop.f32.mrb[77].mxu1  ;;  %v11425_v3 = vpop.f32.mrb[61].mxu0  ;;  %v3686_v56 = vadd.f32 %v13530_v4, %v3680_v31 }
 0xc88   :  { %v3694_v49 = vadd.f32 %v3641_v30, %v14834_v32  ;;  %v3643_v29 = vpop.f32.mrb[78].mxu1  ;;  %v3683_v9 = vpop.f32.mrb[62].mxu0 }
 0xc89   :  { %v10205_v22 = vmul.f32 -1.442695, %v3687_v41  ;;  %v3644_v24 = vpop.f32.mrb[79].mxu1  ;;  %v11426_v8 = vpop.f32.mrb[63].mxu0  ;;  %v14838_v9 = vld [vmem:[#allocation30_spill] sm:$0xff] }
 0xc8a   :  { %v10206_v60 = vmul.f32 -1.442695, %v3694_v49 }
 0xc8b   :  { %12515 = vpow2.f32 %v10205_v22 }
 0xc8c   :  { %12517 = vpow2.f32 %v10206_v60 }
 0xc95   :  { %v12516_v54 = vpop.eup %12515 }
 0xc96   :  { %v3691_v28 = vadd.f32 1.0, %v12516_v54  ;;  %v12518_v58 = vpop.eup %12517 }
 0xc97   :  { %v3698_v6 = vadd.f32 1.0, %v12518_v58 }
 0xc98   :  { %12519 = vrcp.f32 %v3691_v28 }
 0xc99   :  { %12521 = vrcp.f32 %v3698_v6 }
 0xca2   :  { %v12520_v61 = vpop.eup %12519 }
 0xca3   :  { %v3701_v35 = vmul.f32 %v12520_v61, %v3686_v56  ;;  %v12522_v18 = vpop.eup %12521  ;;  %v12103_v56 = vld [vmem:[#allocation5 + $0x4] ss:$12 sps:$4 sm:$0xff]   ;;  %v13754_v61 = vld [vmem:[#allocation5] ss:$12 sps:$4 sm:$0xff]  }
 0xca4   :  { %v3704_v20 = vsub.f32 1.0, %v12522_v18  ;;  %v3706_v13 = vmul.f32 %v12522_v18, %v13676_v27  ;;  %v12108_v18 = vld [vmem:[#allocation5 + $0x20] ss:$12 sps:$4 sm:$0xff]  }
 0xca5   :  { %v3702_v37 = vadd.f32 %v3701_v35, %v14835_v46  ;;  %v12104_v35 = vld [vmem:[#allocation5 + $0x8] ss:$12 sps:$4 sm:$0xff]  }
 0xca6   :  { %v13757_v46 = vld [vmem:[#allocation5 + $0x1c] ss:$12 sps:$4 sm:$0xff]  }
 0xca7   :  { %12523 = vtanh.f32 %v3702_v37  ;;  %v13760_v37 = vld [vmem:[#allocation5 + $0x18] ss:$12 sps:$4 sm:$0xff]  }
 0xcb1   :  { %v12524_v7 = vpop.eup %12523 }
 0xcb2   :  { %v3705_v53 = vmul.f32 %v12524_v7, %v3704_v20  ;;  %v13764_v20 = vld [vmem:[#allocation5 + $0x34] ss:$12 sps:$4 sm:$0xff]   ;;  %v13767_v7 = vld [vmem:[#allocation5 + $0x30] ss:$12 sps:$4 sm:$0xff]  }
 0xcb4   :  { %v13712_v36 = vadd.f32 %v3706_v13, %v3705_v53  ;;  %v12112_v53 = vld [vmem:[#allocation5 + $0x38] ss:$12 sps:$4 sm:$0xff]  }
 0xcb5   :  { %v13771_v13 = vld [vmem:[#allocation5 + $0x4c] ss:$12 sps:$4 sm:$0xff]  }
 0xcb6   :  { %v3714_v52 = vpack.c.bf16 %v13712_v36, %v13712_v36 }
 0xcb8   :  { %3908 = vmatmul.mubr.bf16.vlgmr.msra.gmra.mrb[80].mxu1 %v3714_v52  ;;  %11444 = vmatmul.mubr.bf16.vlgmr.msra.gmra.mrb[64].mxu0 %v3714_v52  ;;  %v13774_v52 = vld [vmem:[#allocation5 + $0x48] ss:$12 sps:$4 sm:$0xff]  }
 0xcb9   :  { %4146 = vmatpush1.bf16.msra.mxu1 %v13544_v47  ;;  %4177 = vmatprep.mubr.bf16.mxu1 %v14829_v59  ;;  %v12093_v47 = vld [vmem:[#allocation5 + $0x8] ss:$12 sps:$4 sm:$0xff]  }
 0xcba   :  { %4147 = vmatprep.subr.bf16.mxu1 %v13548_v55  ;;  %11463 = vmatprep.mubr.msk.bf16.mxu0 %vm12846_vm1, %v14830_v40  ;;  %v12094_v55 = vld [vmem:[#allocation5 + $0x20] ss:$12 sps:$4 sm:$0xff]  }
 0xcbb   :  { %11448 = vmatpush3.bf16.msra.mxu0 %v12093_v47  ;;  %v12116_v47 = vld [vmem:[#allocation5 + $0x50] ss:$12 sps:$4 sm:$0xff]  }
 0xcbc   :  { %11449 = vmatprep.subr.bf16.mxu0 %v14830_v40 }
 0xcbd   :  { %4148 = vmatpush1.bf16.msra.mxu1 %v13551_v43  ;;  %v12095_v43 = vld [vmem:[#allocation5 + $0x38] ss:$12 sps:$4 sm:$0xff]  }
 0xcbe   :  { %4149 = vmatprep.subr.bf16.mxu1 %v13555_v2  ;;  %v12096_v2 = vld [vmem:[#allocation5 + $0x50] ss:$12 sps:$4 sm:$0xff]  }
 0xcbf   :  { %11450 = vmatpush3.bf16.msra.mxu0 %v12094_v55  ;;  %v13778_v55 = vld [vmem:[#allocation5 + $0x64] ss:$12 sps:$4 sm:$0xff]  }
 0xcc0   :  { %11451 = vmatprep.subr.bf16.mxu0 %v14830_v40 }
 0xcc1   :  { %4150 = vmatpush1.bf16.msra.mxu1 %v13558_v38  ;;  %v12097_v38 = vld [vmem:[#allocation5 + $0x68] ss:$12 sps:$4 sm:$0xff]  }
 0xcc2   :  { %4151 = vmatprep.subr.bf16.mxu1 %v13562_v14  ;;  %v12098_v14 = vld [vmem:[#allocation5 + $0x80] ss:$12 sps:$4 sm:$0xff]  }
 0xcc3   :  { %11452 = vmatpush3.bf16.msra.mxu0 %v12095_v43  ;;  %v13781_v43 = vld [vmem:[#allocation5 + $0x60] ss:$12 sps:$4 sm:$0xff]  }
 0xcc4   :  { %11453 = vmatprep.subr.bf16.mxu0 %v14830_v40 }
 0xcc5   :  { %4152 = vmatpush1.bf16.msra.mxu1 %v13565_v16  ;;  %v12099_v16 = vld [vmem:[#allocation5 + $0x98] ss:$12 sps:$4 sm:$0xff]  }
 0xcc6   :  { %4153 = vmatprep.subr.bf16.mxu1 %v13569_v25  ;;  %v12100_v25 = vld [vmem:[#allocation5 + $0xb0] ss:$12 sps:$4 sm:$0xff]  }
 0xcc7   :  { %11454 = vmatpush3.bf16.msra.mxu0 %v12096_v2  ;;  %v12120_v2 = vld [vmem:[#allocation5 + $0x68] ss:$12 sps:$4 sm:$0xff]  }
 0xcc8   :  { %11455 = vmatprep.subr.bf16.mxu0 %v14830_v40 }
 0xcc9   :  { %4154 = vmatpush1.bf16.msra.mxu1 %v13572_v51 }
 0xcca   :  { %4155 = vmatprep.subr.bf16.mxu1 %v13575_v10 }
 0xccb   :  { %11456 = vmatpush3.bf16.msra.mxu0 %v12097_v38  ;;  %v13784_v38 = vld [vmem:[#allocation5 + $0x7c] ss:$12 sps:$4 sm:$0xff]  }
 0xccc   :  { %11457 = vmatprep.subr.bf16.mxu0 %v14830_v40 }
 0xccd   :  { %4156 = vmatpush1.bf16.msra.mxu1 %v13578_v50  ;;  %v14836_v50 = vld [vmem:[#allocation19_spill] sm:$0xff] }
 0xcce   :  { %4157 = vmatprep.subr.bf16.mxu1 %v13582_v15 }
 0xccf   :  { %11458 = vmatpush3.bf16.msra.mxu0 %v12098_v14  ;;  %v13787_v14 = vld [vmem:[#allocation5 + $0x78] ss:$12 sps:$4 sm:$0xff]  }
 0xcd0   :  { %11459 = vmatprep.subr.bf16.mxu0 %v14830_v40 }
 0xcd1   :  { %4158 = vmatpush1.bf16.msra.mxu1 %v13585_v48 }
 0xcd2   :  { %4159 = vmatprep.subr.bf16.mxu1 %v13589_v62 }
 0xcd3   :  { %11460 = vmatpush3.bf16.msra.mxu0 %v12099_v16  ;;  %v12124_v16 = vld [vmem:[#allocation5 + $0x80] ss:$12 sps:$4 sm:$0xff]  }
 0xcd4   :  { %11461 = vmatprep.subr.bf16.mxu0 %v14830_v40 }
 0xcd5   :  { %4160 = vmatpush1.bf16.msra.mxu1 %v13592_v33  ;;  %v14837_v33 = vld [vmem:[#allocation20_spill] sm:$0xff] }
 0xcd6   :  { %4415 = vmatprep.subr.bf16.mxu1 %v12103_v56 }
 0xcd7   :  { %11462 = vmatpush3.bf16.msra.mxu0 %v12100_v25  ;;  %v13791_v25 = vld [vmem:[#allocation5 + $0x94] ss:$12 sps:$4 sm:$0xff]  }
 0xcd8   :  { %11467 = vmatprep.subr.bf16.mxu0 %v14830_v40 }
 0xd8b   :  { %v3909_v51 = vpop.f32.mrb[80].mxu1  ;;  %v3950_v10 = vpop.f32.mrb[64].mxu0 }
 0xd8c   :  { %v3957_v15 = vadd.f32 %v3909_v51, %v14836_v50  ;;  %v3911_v48 = vpop.f32.mrb[81].mxu1  ;;  %v11445_v62 = vpop.f32.mrb[65].mxu0  ;;  %v3956_v32 = vadd.f32 %v13530_v4, %v3950_v10  ;;  %v12125_v51 = vld [vmem:[#allocation5 + $0x90] ss:$12 sps:$4 sm:$0xff]   ;;  %v12128_v10 = vld [vmem:[#allocation5 + $0x98] ss:$12 sps:$4 sm:$0xff]  }
 0xd8d   :  { %v3964_v57 = vadd.f32 %v3911_v48, %v14837_v33  ;;  %v3913_v0 = vpop.f32.mrb[82].mxu1  ;;  %v3953_v11 = vpop.f32.mrb[66].mxu0  ;;  %v12131_v50 = vld [vmem:[#allocation5 + $0xac] ss:$12 sps:$4 sm:$0xff]   ;;  %v12132_v48 = vld [vmem:[#allocation5 + $0xb0] ss:$12 sps:$4 sm:$0xff]  }
 0xd8e   :  { %v10231_v34 = vmul.f32 -1.442695, %v3957_v15  ;;  %v3914_v17 = vpop.f32.mrb[83].mxu1  ;;  %v11446_v42 = vpop.f32.mrb[67].mxu0  ;;  %v12129_v15 = vld [vmem:[#allocation5 + $0xa8] ss:$12 sps:$4 sm:$0xff]  }
 0xd8f   :  { %v10232_v31 = vmul.f32 -1.442695, %v3964_v57  ;;  %v14839_v57 = vld [vmem:[#allocation21_spill] sm:$0xff]  ;;  %v14840_v17 = vld [vmem:[#allocation22_spill] sm:$0xff] }
 0xd90   :  { %12525 = vpow2.f32 %v10231_v34 }
 0xd91   :  { %12527 = vpow2.f32 %v10232_v31 }
 0xd9a   :  { %v12526_v12 = vpop.eup %12525 }
 0xd9b   :  { %v3961_v41 = vadd.f32 1.0, %v12526_v12  ;;  %v12528_v30 = vpop.eup %12527 }
 0xd9c   :  { %v3968_v3 = vadd.f32 1.0, %v12528_v30 }
 0xd9d   :  { %12529 = vrcp.f32 %v3961_v41 }
 0xd9e   :  { %12531 = vrcp.f32 %v3968_v3 }
 0xda7   :  { %v12530_v49 = vpop.eup %12529 }
 0xda8   :  { %v3971_v29 = vmul.f32 %v12530_v49, %v3956_v32  ;;  %v12532_v24 = vpop.eup %12531 }
 0xda9   :  { %v3974_v8 = vsub.f32 1.0, %v12532_v24  ;;  %v3976_v28 = vmul.f32 %v12532_v24, %v13712_v36 }
 0xdaa   :  { %v3972_v22 = vadd.f32 %v3971_v29, %v14838_v9 }
 0xdac   :  { %12533 = vtanh.f32 %v3972_v22 }
 0xdb6   :  { %v12534_v60 = vpop.eup %12533 }
 0xdb7   :  { %v3975_v54 = vmul.f32 %v12534_v60, %v3974_v8 }
 0xdb9   :  { %v13747_v58 = vadd.f32 %v3976_v28, %v3975_v54  ;;  %v14841_v54 = vld [vmem:[#allocation32_spill] sm:$0xff] }
 0xdbb   :  { %v3984_v6 = vpack.c.bf16 %v13747_v58, %v13747_v58 }
 0xdbd   :  { %4178 = vmatmul.mubr.bf16.vlgmr.msra.gmra.mrb[84].mxu1 %v3984_v6  ;;  %11464 = vmatmul.mubr.bf16.vlgmr.msra.gmra.mrb[68].mxu0 %v3984_v6 }
 0xdbe   :  { %4447 = vmatprep.mubr.bf16.mxu1 %v14829_v59  ;;  %11483 = vmatprep.mubr.msk.bf16.mxu0 %vm12846_vm1, %v14830_v40 }
 0xdbf   :  { %4416 = vmatpush1.bf16.msra.mxu1 %v13754_v61  ;;  %11468 = vmatpush3.bf16.msra.mxu0 %v12104_v35 }
 0xdc0   :  { %11469 = vmatprep.subr.bf16.mxu0 %v14830_v40  ;;  %4417 = vmatprep.subr.bf16.mxu1 %v13757_v46 }
 0xdc3   :  { %4418 = vmatpush1.bf16.msra.mxu1 %v13760_v37  ;;  %11470 = vmatpush3.bf16.msra.mxu0 %v12108_v18 }
 0xdc4   :  { %11471 = vmatprep.subr.bf16.mxu0 %v14830_v40  ;;  %4419 = vmatprep.subr.bf16.mxu1 %v13764_v20 }
 0xdc7   :  { %4420 = vmatpush1.bf16.msra.mxu1 %v13767_v7  ;;  %11472 = vmatpush3.bf16.msra.mxu0 %v12112_v53 }
 0xdc8   :  { %11473 = vmatprep.subr.bf16.mxu0 %v14830_v40  ;;  %4421 = vmatprep.subr.bf16.mxu1 %v13771_v13 }
 0xdcb   :  { %4422 = vmatpush1.bf16.msra.mxu1 %v13774_v52  ;;  %11474 = vmatpush3.bf16.msra.mxu0 %v12116_v47 }
 0xdcc   :  { %11475 = vmatprep.subr.bf16.mxu0 %v14830_v40  ;;  %4423 = vmatprep.subr.bf16.mxu1 %v13778_v55 }
 0xdcf   :  { %4424 = vmatpush1.bf16.msra.mxu1 %v13781_v43  ;;  %11476 = vmatpush3.bf16.msra.mxu0 %v12120_v2 }
 0xdd0   :  { %4425 = vmatprep.subr.bf16.mxu1 %v13784_v38  ;;  %11477 = vmatprep.subr.bf16.mxu0 %v14830_v40 }
 0xdd3   :  { %4426 = vmatpush1.bf16.msra.mxu1 %v13787_v14  ;;  %11478 = vmatpush3.bf16.msra.mxu0 %v12124_v16  ;;  %v14842_v16 = vld [vmem:[#allocation23_spill] sm:$0xff] }
 0xdd4   :  { %4427 = vmatprep.subr.bf16.mxu1 %v13791_v25  ;;  %11479 = vmatprep.subr.bf16.mxu0 %v14830_v40 }
 0xdd7   :  { %4428 = vmatpush1.bf16.msra.mxu1 %v12125_v51  ;;  %11480 = vmatpush3.bf16.msra.mxu0 %v12128_v10 }
 0xdd8   :  { %4429 = vmatprep.subr.bf16.mxu1 %v12131_v50  ;;  %11481 = vmatprep.subr.bf16.mxu0 %v14830_v40 }
 0xddb   :  { %4430 = vmatpush1.bf16.msra.mxu1 %v12129_v15  ;;  %11482 = vmatpush3.bf16.msra.mxu0 %v12132_v48 }
 0xddc   :  { %4685 = vmatprep.subr.bf16.mxu1 %v12103_v56  ;;  %11487 = vmatprep.subr.bf16.mxu0 %v14830_v40 }
 0xe90   :  { %v4179_v62 = vpop.f32.mrb[84].mxu1  ;;  %v4220_v33 = vpop.f32.mrb[68].mxu0 }
 0xe91   :  { %v4227_v0 = vadd.f32 %v4179_v62, %v14839_v57  ;;  %v4181_v11 = vpop.f32.mrb[85].mxu1  ;;  %v11465_v34 = vpop.f32.mrb[69].mxu0  ;;  %v4226_v24 = vadd.f32 %v13530_v4, %v4220_v33  ;;  %v12133_v4 = vld [vmem:[#allocation5 + $0x8] ss:$12 sps:$4 sm:$0xff]  }
 0xe92   :  { %v4234_v42 = vadd.f32 %v4181_v11, %v14840_v17  ;;  %v4183_v31 = vpop.f32.mrb[86].mxu1  ;;  %v4223_v12 = vpop.f32.mrb[70].mxu0 }
 0xe93   :  { %v10257_v41 = vmul.f32 -1.442695, %v4227_v0  ;;  %v4184_v30 = vpop.f32.mrb[87].mxu1  ;;  %v11466_v3 = vpop.f32.mrb[71].mxu0  ;;  %v13834_v12 = vld [vmem:[%s14792_s4] ss:$0 sm:$0xff] }
 0xe94   :  { %v10258_v32 = vmul.f32 -1.442695, %v4234_v42 }
 0xe95   :  { %12535 = vpow2.f32 %v10257_v41 }
 0xe96   :  { %12537 = vpow2.f32 %v10258_v32  ;;  %v14844_v32 = vld [vmem:[#allocation29_spill] sm:$0xff] }
 0xe9f   :  { %v12536_v49 = vpop.eup %12535 }
 0xea0   :  { %v4231_v29 = vadd.f32 1.0, %v12536_v49  ;;  %v12538_v9 = vpop.eup %12537 }
 0xea1   :  { %v4238_v22 = vadd.f32 1.0, %v12538_v9 }
 0xea2   :  { %12539 = vrcp.f32 %v4231_v29 }
 0xea3   :  { %12541 = vrcp.f32 %v4238_v22 }
 0xeac   :  { %v12540_v8 = vpop.eup %12539 }
 0xead   :  { %v4241_v60 = vmul.f32 %v12540_v8, %v4226_v24  ;;  %v12542_v6 = vpop.eup %12541 }
 0xeae   :  { %v4244_v56 = vsub.f32 1.0, %v12542_v6  ;;  %v4246_v53 = vmul.f32 %v12542_v6, %v13747_v58  ;;  %v12147_v6 = vld [vmem:[#allocation8 + $0x1c] ss:$12 sps:$4 sm:$0xff]  }
 0xeaf   :  { %v4242_v28 = vadd.f32 %v4241_v60, %v14841_v54  ;;  %v12141_v54 = vld [vmem:[#allocation8] ss:$12 sps:$4 sm:$0xff]  }
 0xeb1   :  { %12543 = vtanh.f32 %v4242_v28 }
 0xebb   :  { %v12544_v35 = vpop.eup %12543 }
 0xebc   :  { %v4245_v18 = vmul.f32 %v12544_v35, %v4244_v56  ;;  %v12148_v56 = vld [vmem:[#allocation8 + $0x20] ss:$12 sps:$4 sm:$0xff]   ;;  %v4806_v35 = vpack.c.bf16 %v13283_v26, %v13218_v23  ;;  %v12153_v23 = vld [vmem:[#allocation8 + $0x48] ss:$12 sps:$4 sm:$0xff]   ;;  %v12159_v26 = vld [vmem:[#allocation8 + $0x64] ss:$12 sps:$4 sm:$0xff]  }
 0xebe   :  { %v13803_v47 = vadd.f32 %v4246_v53, %v4245_v18  ;;  %v12145_v18 = vld [vmem:[#allocation8 + $0x18] ss:$12 sps:$4 sm:$0xff]   ;;  %v12151_v53 = vld [vmem:[#allocation8 + $0x34] ss:$12 sps:$4 sm:$0xff]  }
 0xec0   :  { %v4254_v2 = vpack.c.bf16 %v13803_v47, %v13803_v47 }
 0xec2   :  { %4448 = vmatmul.mubr.bf16.vlgmr.msra.gmra.mrb[88].mxu1 %v4254_v2  ;;  %11484 = vmatmul.mubr.bf16.vlgmr.msra.gmra.mrb[72].mxu0 %v4254_v2  ;;  %v12152_v2 = vld [vmem:[#allocation8 + $0x38] ss:$12 sps:$4 sm:$0xff]  }
 0xec3   :  { %4686 = vmatpush1.bf16.msra.mxu1 %v13754_v61  ;;  %4717 = vmatprep.mubr.bf16.mxu1 %v14829_v59  ;;  %v12134_v61 = vld [vmem:[#allocation5 + $0x20] ss:$12 sps:$4 sm:$0xff]  }
 0xec4   :  { %4687 = vmatprep.subr.bf16.mxu1 %v13757_v46  ;;  %11503 = vmatprep.mubr.msk.bf16.mxu0 %vm12846_vm1, %v14830_v40  ;;  %v12135_v46 = vld [vmem:[#allocation5 + $0x38] ss:$12 sps:$4 sm:$0xff]  }
 0xec5   :  { %11488 = vmatpush3.bf16.msra.mxu0 %v12133_v4  ;;  %v12149_v4 = vld [vmem:[#allocation8 + $0x30] ss:$12 sps:$4 sm:$0xff]  }
 0xec6   :  { %11489 = vmatprep.subr.bf16.mxu0 %v14830_v40 }
 0xec7   :  { %4688 = vmatpush1.bf16.msra.mxu1 %v13760_v37  ;;  %v12136_v37 = vld [vmem:[#allocation5 + $0x50] ss:$12 sps:$4 sm:$0xff]  }
 0xec8   :  { %4689 = vmatprep.subr.bf16.mxu1 %v13764_v20  ;;  %v12137_v20 = vld [vmem:[#allocation5 + $0x68] ss:$12 sps:$4 sm:$0xff]  }
 0xec9   :  { %11490 = vmatpush3.bf16.msra.mxu0 %v12134_v61  ;;  %v12155_v61 = vld [vmem:[#allocation8 + $0x4c] ss:$12 sps:$4 sm:$0xff]  }
 0xeca   :  { %11491 = vmatprep.subr.bf16.mxu0 %v14830_v40 }
 0xecb   :  { %4690 = vmatpush1.bf16.msra.mxu1 %v13767_v7  ;;  %v12138_v7 = vld [vmem:[#allocation5 + $0x80] ss:$12 sps:$4 sm:$0xff]  }
 0xecc   :  { %4691 = vmatprep.subr.bf16.mxu1 %v13771_v13  ;;  %v12143_v13 = vld [vmem:[#allocation8 + $0x4] ss:$12 sps:$4 sm:$0xff]  }
 0xecd   :  { %11492 = vmatpush3.bf16.msra.mxu0 %v12135_v46  ;;  %v12156_v46 = vld [vmem:[#allocation8 + $0x50] ss:$12 sps:$4 sm:$0xff]  }
 0xece   :  { %11493 = vmatprep.subr.bf16.mxu0 %v14830_v40 }
 0xecf   :  { %4692 = vmatpush1.bf16.msra.mxu1 %v13774_v52  ;;  %v12139_v52 = vld [vmem:[#allocation5 + $0x98] ss:$12 sps:$4 sm:$0xff]  }
 0xed0   :  { %4693 = vmatprep.subr.bf16.mxu1 %v13778_v55  ;;  %v12140_v55 = vld [vmem:[#allocation5 + $0xb0] ss:$12 sps:$4 sm:$0xff]  }
 0xed1   :  { %11494 = vmatpush3.bf16.msra.mxu0 %v12136_v37  ;;  %v12160_v37 = vld [vmem:[#allocation8 + $0x68] ss:$12 sps:$4 sm:$0xff]  }
 0xed2   :  { %11495 = vmatprep.subr.bf16.mxu0 %v14830_v40 }
 0xed3   :  { %4694 = vmatpush1.bf16.msra.mxu1 %v13781_v43  ;;  %v12144_v43 = vld [vmem:[#allocation8 + $0x8] ss:$12 sps:$4 sm:$0xff]  }
 0xed4   :  { %4695 = vmatprep.subr.bf16.mxu1 %v13784_v38 }
 0xed5   :  { %11496 = vmatpush3.bf16.msra.mxu0 %v12137_v20  ;;  %v12157_v20 = vld [vmem:[#allocation8 + $0x60] ss:$12 sps:$4 sm:$0xff]  }
 0xed6   :  { %11497 = vmatprep.subr.bf16.mxu0 %v14830_v40 }
 0xed7   :  { %4696 = vmatpush1.bf16.msra.mxu1 %v13787_v14 }
 0xed8   :  { %4697 = vmatprep.subr.bf16.mxu1 %v13791_v25 }
 0xed9   :  { %11498 = vmatpush3.bf16.msra.mxu0 %v12138_v7  ;;  %v12163_v7 = vld [vmem:[#allocation8 + $0x7c] ss:$12 sps:$4 sm:$0xff]  }
 0xeda   :  { %11499 = vmatprep.subr.bf16.mxu0 %v14830_v40 }
 0xedb   :  { %4698 = vmatpush1.bf16.msra.mxu1 %v12125_v51 }
 0xedc   :  { %4699 = vmatprep.subr.bf16.mxu1 %v12131_v50  ;;  %v14843_v50 = vld [vmem:[#allocation24_spill] sm:$0xff] }
 0xedd   :  { %11500 = vmatpush3.bf16.msra.mxu0 %v12139_v52  ;;  %v12161_v52 = vld [vmem:[#allocation8 + $0x78] ss:$12 sps:$4 sm:$0xff]  }
 0xede   :  { %11501 = vmatprep.subr.bf16.mxu0 %v14830_v40 }
 0xedf   :  { %4700 = vmatpush1.bf16.msra.mxu1 %v12129_v15 }
 0xee0   :  { %4991 = vmatprep.subr.bf16.mxu1 %v12143_v13  ;;  %v12164_v13 = vld [vmem:[#allocation8 + $0x80] ss:$12 sps:$4 sm:$0xff]  }
 0xee1   :  { %11502 = vmatpush3.bf16.msra.mxu0 %v12140_v55  ;;  %v12167_v55 = vld [vmem:[#allocation8 + $0x94] ss:$12 sps:$4 sm:$0xff]  }
 0xee2   :  { %11507 = vmatprep.subr.bf16.mxu0 %v12144_v43 }
 0xf95   :  { %v4449_v38 = vpop.f32.mrb[88].mxu1  ;;  %v4490_v14 = vpop.f32.mrb[72].mxu0 }
 0xf96   :  { %v4497_v25 = vadd.f32 %v4449_v38, %v14842_v16  ;;  %v4451_v51 = vpop.f32.mrb[89].mxu1  ;;  %v11485_v10 = vpop.f32.mrb[73].mxu0  ;;  %v4496_v41 = vadd.f32 %v13834_v12, %v4490_v14  ;;  %v12165_v38 = vld [vmem:[#allocation8 + $0x90] ss:$12 sps:$4 sm:$0xff]   ;;  %v12171_v14 = vld [vmem:[#allocation8 + $0xac] ss:$12 sps:$4 sm:$0xff]  }
 0xf97   :  { %v4504_v15 = vadd.f32 %v4451_v51, %v14843_v50  ;;  %v4453_v48 = vpop.f32.mrb[90].mxu1  ;;  %v4493_v62 = vpop.f32.mrb[74].mxu0  ;;  %v12172_v16 = vld [vmem:[#allocation8 + $0xb0] ss:$12 sps:$4 sm:$0xff]   ;;  %v4807_v51 = vpack.c.bf16 %v13387_v1, %v13318_v21  ;;  %v4808_v10 = vpack.c.bf16 %v13459_v39, %v13423_v45  ;;  %v4809_v50 = vpack.c.bf16 %v13535_v5, %v13495_v19  ;;  %v13868_v39 = vld [vmem:[#allocation10] ss:$12 sps:$4 sm:$0xff]  }
 0xf98   :  { %v10283_v33 = vmul.f32 -1.442695, %v4497_v25  ;;  %v4454_v57 = vpop.f32.mrb[91].mxu1  ;;  %v11486_v0 = vpop.f32.mrb[75].mxu0  ;;  %v12169_v25 = vld [vmem:[#allocation8 + $0xa8] ss:$12 sps:$4 sm:$0xff]   ;;  %v4811_v21 = vpack.c.bf16 %v13712_v36, %v13676_v27  ;;  %v4812_v1 = vpack.c.bf16 %v13803_v47, %v13747_v58 }
 0xf99   :  { %v10284_v11 = vmul.f32 -1.442695, %v4504_v15  ;;  %v4810_v15 = vpack.c.bf16 %v13640_v44, %v13604_v63  ;;  %v13866_v45 = vld [vmem:[#allocation10 + $0x4] ss:$12 sps:$4 sm:$0xff]   ;;  %v13872_v19 = vld [vmem:[#allocation10 + $0x1c] ss:$12 sps:$4 sm:$0xff]  }
 0xf9a   :  { %12545 = vpow2.f32 %v10283_v33  ;;  %v13874_v5 = vld [vmem:[#allocation10 + $0x18] ss:$12 sps:$4 sm:$0xff]   ;;  %v12173_v63 = vld [vmem:[#allocation10 + $0x8] ss:$12 sps:$4 sm:$0xff]   ;;  %v13880_v27 = vld [vmem:[#allocation10 + $0x30] ss:$12 sps:$4 sm:$0xff]  }
 0xf9b   :  { %12547 = vpow2.f32 %v10284_v11  ;;  %v13878_v44 = vld [vmem:[#allocation10 + $0x34] ss:$12 sps:$4 sm:$0xff]   ;;  %v12184_v48 = vld [vmem:[#allocation10 + $0x38] ss:$12 sps:$4 sm:$0xff]   ;;  %v12191_v57 = vld [vmem:[#allocation10 + $0x50] ss:$12 sps:$4 sm:$0xff]  }
 0xf9c   :  { %v12177_v36 = vld [vmem:[#allocation10 + $0x20] ss:$12 sps:$4 sm:$0xff]   ;;  %v13885_v58 = vld [vmem:[#allocation10 + $0x48] ss:$12 sps:$4 sm:$0xff]   ;;  %v13892_v62 = vld [vmem:[#allocation10 + $0x64] ss:$12 sps:$4 sm:$0xff]  }
 0xf9d   :  { %v13894_v33 = vld [vmem:[#allocation10 + $0x60] ss:$12 sps:$4 sm:$0xff]   ;;  %v13899_v0 = vld [vmem:[#allocation10 + $0x78] ss:$12 sps:$4 sm:$0xff]   ;;  %v13901_v11 = vld [vmem:[#allocation10 + $0x7c] ss:$12 sps:$4 sm:$0xff]  }
 0xfa4   :  { %v12546_v34 = vpop.eup %12545 }
 0xfa5   :  { %v4501_v17 = vadd.f32 1.0, %v12546_v34  ;;  %v12548_v42 = vpop.eup %12547  ;;  %v13906_v34 = vld [vmem:[#allocation10 + $0x94] ss:$12 sps:$4 sm:$0xff]  }
 0xfa6   :  { %v4508_v31 = vadd.f32 1.0, %v12548_v42  ;;  %v12198_v42 = vld [vmem:[#allocation10 + $0x68] ss:$12 sps:$4 sm:$0xff]  }
 0xfa7   :  { %12549 = vrcp.f32 %v4501_v17  ;;  %v13908_v17 = vld [vmem:[#allocation10 + $0x90] ss:$12 sps:$4 sm:$0xff]  }
 0xfa8   :  { %12551 = vrcp.f32 %v4508_v31  ;;  %v13912_v31 = vld [vmem:[#allocation10 + $0xa8] ss:$12 sps:$4 sm:$0xff]  }
 0xfb1   :  { %v12550_v30 = vpop.eup %12549 }
 0xfb2   :  { %v4511_v3 = vmul.f32 %v12550_v30, %v4496_v41  ;;  %v12552_v29 = vpop.eup %12551  ;;  %v13914_v41 = vld [vmem:[#allocation10 + $0xac] ss:$12 sps:$4 sm:$0xff]  }
 0xfb3   :  { %v4514_v9 = vsub.f32 1.0, %v12552_v29  ;;  %v4516_v8 = vmul.f32 %v12552_v29, %v13803_v47  ;;  %v13887_v47 = vld [vmem:[#allocation10 + $0x4c] ss:$12 sps:$4 sm:$0xff]  }
 0xfb4   :  { %v4512_v49 = vadd.f32 %v4511_v3, %v14844_v32  ;;  %v12202_v30 = vld [vmem:[#allocation10 + $0x80] ss:$12 sps:$4 sm:$0xff]   ;;  %v12203_v3 = vld [vmem:[#allocation10 + $0x98] ss:$12 sps:$4 sm:$0xff]   ;;  %v12204_v32 = vld [vmem:[#allocation10 + $0xb0] ss:$12 sps:$4 sm:$0xff]  }
 0xfb6   :  { %12553 = vtanh.f32 %v4512_v49 }
 0xfc0   :  { %v12554_v22 = vpop.eup %12553 }
 0xfc1   :  { %v4515_v24 = vmul.f32 %v12554_v22, %v4514_v9  ;;  %v14845_v9 = vld [vmem:[#allocation25_spill] sm:$0xff] }
 0xfc3   :  { %v13839_v60 = vadd.f32 %v4516_v8, %v4515_v24 }
 0xfc5   :  { %v4524_v28 = vpack.c.bf16 %v13839_v60, %v13839_v60 }
 0xfc7   :  { %4718 = vmatmul.mubr.bf16.vlgmr.msra.gmra.mrb[92].mxu1 %v4524_v28  ;;  %11504 = vmatmul.mubr.bf16.vlgmr.msra.gmra.mrb[76].mxu0 %v4524_v28 }
 0xfc8   :  { %4992 = vmatpush1.bf16.msra.mxu1 %v12141_v54  ;;  %11508 = vmatpush3.bf16.msra.mxu0 %v12144_v43  ;;  %v12168_v43 = vld [vmem:[#allocation8 + $0x98] ss:$12 sps:$4 sm:$0xff]  }
 0xfc9   :  { %11523 = vmatprep.mubr.bf16.mxu0 %v4806_v35  ;;  %4993 = vmatprep.subr.bf16.mxu1 %v12147_v6  ;;  %v14846_v54 = vld [vmem:[#allocation26_spill] sm:$0xff] }
 0xfca   :  { %11509 = vmatprep.subr.bf16.mxu0 %v12148_v56  ;;  %5023 = vmatprep.mubr.bf16.mxu1 %v14829_v59 }
 0xfcc   :  { %4994 = vmatpush1.bf16.msra.mxu1 %v12145_v18  ;;  %11510 = vmatpush3.bf16.msra.mxu0 %v12148_v56 }
 0xfcd   :  { %4995 = vmatprep.subr.bf16.mxu1 %v12151_v53  ;;  %11511 = vmatprep.subr.bf16.mxu0 %v12152_v2 }
 0xfd0   :  { %4996 = vmatpush1.bf16.msra.mxu1 %v12149_v4  ;;  %11512 = vmatpush3.bf16.msra.mxu0 %v12152_v2 }
 0xfd1   :  { %4997 = vmatprep.subr.bf16.mxu1 %v12155_v61  ;;  %11513 = vmatprep.subr.bf16.mxu0 %v12156_v46 }
 0xfd4   :  { %4998 = vmatpush1.bf16.msra.mxu1 %v12153_v23  ;;  %11514 = vmatpush3.bf16.msra.mxu0 %v12156_v46 }
 0xfd5   :  { %4999 = vmatprep.subr.bf16.mxu1 %v12159_v26  ;;  %11515 = vmatprep.subr.bf16.mxu0 %v12160_v37 }
 0xfd8   :  { %5000 = vmatpush1.bf16.msra.mxu1 %v12157_v20  ;;  %11516 = vmatpush3.bf16.msra.mxu0 %v12160_v37 }
 0xfd9   :  { %5001 = vmatprep.subr.bf16.mxu1 %v12163_v7  ;;  %11517 = vmatprep.subr.bf16.mxu0 %v12164_v13  ;;  %v14847_v7 = vld [vmem:[#allocation31_spill] sm:$0xff] }
 0xfdc   :  { %5002 = vmatpush1.bf16.msra.mxu1 %v12161_v52  ;;  %11518 = vmatpush3.bf16.msra.mxu0 %v12164_v13 }
 0xfdd   :  { %5003 = vmatprep.subr.bf16.mxu1 %v12167_v55  ;;  %11519 = vmatprep.subr.bf16.mxu0 %v12168_v43 }
 0xfe0   :  { %5004 = vmatpush1.bf16.msra.mxu1 %v12165_v38  ;;  %11520 = vmatpush3.bf16.msra.mxu0 %v12168_v43 }
 0xfe1   :  { %5005 = vmatprep.subr.bf16.mxu1 %v12171_v14  ;;  %11521 = vmatprep.subr.bf16.mxu0 %v12172_v16 }
 0xfe4   :  { %5006 = vmatpush1.bf16.msra.mxu1 %v12169_v25  ;;  %11522 = vmatpush3.bf16.msra.mxu0 %v12172_v16 }
 0xfe5   :  { %11539 = vmatprep.subr.bf16.mxu1 %v14830_v40  ;;  %5416 = vmatprep.subr.bf16.mxu0 %v13866_v45 }
 0xfe7   :  { %5024 = vmatmul.mubr.bf16.vlgmr.msra.gmra.mrb[96].mxu1 %v4806_v35  ;;  %11524 = vmatmul.mubr.bf16.vlgmr.msra.gmra.mrb[80].mxu0 %v4807_v51 }
 0xfe8   :  { %11527 = vmatprep.mubr.bf16.mxu0 %v4808_v10  ;;  %5033 = vmatprep.mubr.bf16.mxu1 %v14829_v59 }
 0xfe9   :  { %5417 = vmatpush1.bf16.msra.mxu0 %v13868_v39  ;;  %11540 = vmatpush3.bf16.msra.mxu1 %v12173_v63 }
 0xfea   :  { %5418 = vmatprep.subr.bf16.mxu0 %v13872_v19  ;;  %11541 = vmatprep.subr.bf16.mxu1 %v14830_v40 }
 0xfed   :  { %5419 = vmatpush1.bf16.msra.mxu0 %v13874_v5  ;;  %11542 = vmatpush3.bf16.msra.mxu1 %v12177_v36 }
 0xfee   :  { %5420 = vmatprep.subr.bf16.mxu0 %v13878_v44  ;;  %11543 = vmatprep.subr.bf16.mxu1 %v14830_v40 }
 0xfef   :  { %5034 = vmatmul.mubr.bf16.gmra.mrb[100].mxu1 %v4807_v51  ;;  %11528 = vmatmul.mubr.bf16.gmra.mrb[84].mxu0 %v4809_v50 }
 0xff0   :  { %11531 = vmatprep.mubr.bf16.mxu0 %v4810_v15  ;;  %5043 = vmatprep.mubr.bf16.mxu1 %v14829_v59 }
 0xff1   :  { %5421 = vmatpush1.bf16.msra.mxu0 %v13880_v27  ;;  %11544 = vmatpush3.bf16.msra.mxu1 %v12184_v48 }
 0xff2   :  { %5422 = vmatprep.subr.bf16.mxu0 %v13887_v47  ;;  %11545 = vmatprep.subr.bf16.mxu1 %v14830_v40 }
 0xff5   :  { %5423 = vmatpush1.bf16.msra.mxu0 %v13885_v58  ;;  %11546 = vmatpush3.bf16.msra.mxu1 %v12191_v57 }
 0xff6   :  { %5424 = vmatprep.subr.bf16.mxu0 %v13892_v62  ;;  %11547 = vmatprep.subr.bf16.mxu1 %v14830_v40 }
 0xff7   :  { %5044 = vmatmul.mubr.bf16.gmra.mrb[104].mxu1 %v4808_v10  ;;  %11532 = vmatmul.mubr.bf16.gmra.mrb[88].mxu0 %v4811_v21 }
 0xff8   :  { %11535 = vmatprep.mubr.bf16.mxu0 %v4812_v1  ;;  %5053 = vmatprep.mubr.bf16.mxu1 %v14829_v59 }
 0xff9   :  { %5425 = vmatpush1.bf16.msra.mxu0 %v13894_v33  ;;  %11548 = vmatpush3.bf16.msra.mxu1 %v12198_v42 }
 0xffa   :  { %5426 = vmatprep.subr.bf16.mxu0 %v13901_v11  ;;  %11549 = vmatprep.subr.bf16.mxu1 %v14830_v40 }
 0xffd   :  { %5427 = vmatpush1.bf16.msra.mxu0 %v13899_v0  ;;  %11550 = vmatpush3.bf16.msra.mxu1 %v12202_v30 }
 0xffe   :  { %5428 = vmatprep.subr.bf16.mxu0 %v13906_v34  ;;  %11551 = vmatprep.subr.bf16.mxu1 %v14830_v40 }
 0xfff   :  { %5054 = vmatmul.mubr.bf16.gmra.mrb[108].mxu1 %v4809_v50 }
0x1000   :  { %5063 = vmatprep.mubr.bf16.mxu1 %v14829_v59 }
0x1001   :  { %5429 = vmatpush1.bf16.msra.mxu0 %v13908_v17  ;;  %11552 = vmatpush3.bf16.msra.mxu1 %v12203_v3 }
0x1002   :  { %5430 = vmatprep.subr.bf16.mxu0 %v13914_v41  ;;  %11553 = vmatprep.subr.bf16.mxu1 %v14830_v40 }
0x1005   :  { %5431 = vmatpush1.bf16.msra.mxu0 %v13912_v31  ;;  %11554 = vmatpush3.bf16.msra.mxu1 %v12204_v32 }
0x1006   :  { %5692 = vmatprep.subr.bf16.mxu0 %v13866_v45  ;;  %11559 = vmatprep.subr.bf16.mxu1 %v14830_v40 }
0x1007   :  { %5064 = vmatmul.mubr.bf16.gmra.mrb[112].mxu1 %v4810_v15 }
0x1008   :  { %5073 = vmatprep.mubr.bf16.mxu1 %v14829_v59 }
0x100f   :  { %5074 = vmatmul.mubr.bf16.gmra.mrb[116].mxu1 %v4811_v21 }
0x1010   :  { %5083 = vmatprep.mubr.bf16.mxu1 %v14829_v59 }
0x1017   :  { %5084 = vmatmul.mubr.bf16.gmra.mrb[120].mxu1 %v4812_v1 }
0x1018   :  { %5093 = vmatprep.mubr.bf16.mxu1 %v14829_v59 }
0x109a   :  { %v4719_v49 = vpop.f32.mrb[92].mxu1  ;;  %v4760_v29 = vpop.f32.mrb[76].mxu0 }
0x109b   :  { %v4767_v22 = vadd.f32 %v4719_v49, %v14845_v9  ;;  %v4721_v24 = vpop.f32.mrb[93].mxu1  ;;  %v11505_v8 = vpop.f32.mrb[77].mxu0  ;;  %v4766_v26 = vadd.f32 %v13834_v12, %v4760_v29 }
0x109c   :  { %v4774_v28 = vadd.f32 %v4721_v24, %v14846_v54  ;;  %v4723_v6 = vpop.f32.mrb[94].mxu1  ;;  %v4763_v56 = vpop.f32.mrb[78].mxu0 }
0x109d   :  { %v10309_v35 = vmul.f32 -1.442695, %v4767_v22  ;;  %v4724_v18 = vpop.f32.mrb[95].mxu1  ;;  %v11506_v53 = vpop.f32.mrb[79].mxu0 }
0x109e   :  { %v10310_v2 = vmul.f32 -1.442695, %v4774_v28  ;;  %v14852_v18 = vmov 0.0|0.0  }
0x109f   :  { %12555 = vpow2.f32 %v10309_v35 }
0x10a0   :  { %12557 = vpow2.f32 %v10310_v2 }
0x10a9   :  { %v12556_v4 = vpop.eup %12555 }
0x10aa   :  { %v4771_v61 = vadd.f32 1.0, %v12556_v4  ;;  %v12558_v46 = vpop.eup %12557 }
0x10ab   :  { %v4778_v23 = vadd.f32 1.0, %v12558_v46 }
0x10ac   :  { %12559 = vrcp.f32 %v4771_v61 }
0x10ad   :  { %12561 = vrcp.f32 %v4778_v23 }
0x10b6   :  { %v12560_v37 = vpop.eup %12559 }
0x10b7   :  { %v4781_v20 = vmul.f32 %v12560_v37, %v4766_v26  ;;  %v12562_v51 = vpop.eup %12561 }
0x10b8   :  { %v4784_v36 = vsub.f32 1.0, %v12562_v51  ;;  %v4786_v3 = vmul.f32 %v12562_v51, %v13839_v60 }
0x10b9   :  { %v4782_v13 = vadd.f32 %v4781_v20, %v14847_v7 }
0x10ba   :  { %v13927_v52 = vpop.f32.mrb[96].mxu1  ;;  %v13929_v55 = vpop.f32.mrb[80].mxu0 }
0x10bb   :  { %12563 = vtanh.f32 %v4782_v13  ;;  %v13931_v43 = vpop.f32.mrb[97].mxu1  ;;  %v13933_v38 = vpop.f32.mrb[81].mxu0 }
0x10bc   :  { %v13935_v14 = vpop.f32.mrb[98].mxu1  ;;  %v13937_v16 = vpop.f32.mrb[82].mxu0 }
0x10bd   :  { %v13939_v25 = vpop.f32.mrb[99].mxu1  ;;  %v13941_v12 = vpop.f32.mrb[83].mxu0 }
0x10c2   :  { %v13943_v10 = vpop.f32.mrb[100].mxu1  ;;  %v13945_v50 = vpop.f32.mrb[84].mxu0 }
0x10c3   :  { %v13947_v15 = vpop.f32.mrb[101].mxu1  ;;  %v13949_v21 = vpop.f32.mrb[85].mxu0 }
0x10c4   :  { %v13951_v1 = vpop.f32.mrb[102].mxu1  ;;  %v13953_v63 = vpop.f32.mrb[86].mxu0 }
0x10c5   :  { %v12564_v48 = vpop.eup %12563  ;;  %v13955_v57 = vpop.f32.mrb[103].mxu1 }
0x10c6   :  { %v13957_v42 = vpop.f32.mrb[87].mxu0  ;;  %v4785_v30 = vmul.f32 %v12564_v48, %v4784_v36  ;;  %v12205_v48 = vld [vmem:[#allocation10 + $0x8] ss:$12 sps:$4 sm:$0xff]  }
0x10c8   :  { %v4787_v32 = vadd.f32 %v4786_v3, %v4785_v30  ;;  %v12206_v30 = vld [vmem:[#allocation10 + $0x20] ss:$12 sps:$4 sm:$0xff]   ;;  %v12207_v3 = vld [vmem:[#allocation10 + $0x38] ss:$12 sps:$4 sm:$0xff]  }
0x10ca   :  { %v13960_v49 = vpop.f32.mrb[104].mxu1  ;;  %v13962_v29 = vpop.f32.mrb[88].mxu0  ;;  %v4813_v9 = vpack.c.bf16 %v4787_v32, %v13839_v60  ;;  %v12208_v32 = vld [vmem:[#allocation10 + $0x50] ss:$12 sps:$4 sm:$0xff]  }
0x10cb   :  { %14848 = vst [vmem:[#allocation16_spill] sm:$0xff] %v13962_v29  ;;  %v13965_v22 = vpop.f32.mrb[105].mxu1  ;;  %v13967_v24 = vpop.f32.mrb[89].mxu0 }
0x10cc   :  { %14849 = vst [vmem:[#allocation27_spill] sm:$0xff] %v13967_v24  ;;  %v13969_v8 = vpop.f32.mrb[106].mxu1  ;;  %v13971_v54 = vpop.f32.mrb[90].mxu0  ;;  %5094 = vmatmul.mubr.bf16.gmra.mrb[124].mxu1 %v4813_v9  ;;  %11536 = vmatmul.mubr.bf16.gmra.mrb[92].mxu0 %v4813_v9  ;;  %v12209_v9 = vld [vmem:[#allocation10 + $0x68] ss:$12 sps:$4 sm:$0xff]  }
0x10cd   :  { %14850 = vst [vmem:[#allocation17_spill] sm:$0xff] %v13971_v54  ;;  %v13973_v28 = vpop.f32.mrb[107].mxu1  ;;  %v13975_v6 = vpop.f32.mrb[91].mxu0  ;;  %5448 = vmatprep.mubr.bf16.mxu0 %v14829_v59  ;;  %11555 = vmatprep.mubr.msk.bf16.mxu1 %vm12846_vm1, %v14830_v40 }
0x10ce   :  { %14851 = vst [vmem:[#allocation18_spill] sm:$0xff] %v13975_v6 }
0x10d2   :  { %v13980_v60 = vpop.f32.mrb[108].mxu1 }
0x10d3   :  { %v13982_v56 = vpop.f32.mrb[109].mxu1 }
0x10d4   :  { %v13984_v35 = vpop.f32.mrb[110].mxu1  ;;  %5449 = vmatmul.mubr.bf16.vlgmr.msra.gmra.mrb[96].mxu0 %v14852_v18  ;;  %11556 = vmatmul.mubr.bf16.vlgmr.msra.gmra.mrb[128].mxu1 %v14852_v18  ;;  %v12210_v18 = vld [vmem:[#allocation10 + $0x80] ss:$12 sps:$4 sm:$0xff]  }
0x10d5   :  { %v13988_v53 = vpop.f32.mrb[111].mxu1  ;;  %5693 = vmatpush1.bf16.msra.mxu0 %v13868_v39  ;;  %5724 = vmatprep.mubr.bf16.mxu0 %v14829_v59 }
0x10d6   :  { %5694 = vmatprep.subr.bf16.mxu0 %v13872_v19  ;;  %11575 = vmatprep.mubr.msk.bf16.mxu1 %vm12846_vm1, %v14830_v40 }
0x10d7   :  { %11560 = vmatpush3.bf16.msra.mxu1 %v12205_v48  ;;  %v12211_v48 = vld [vmem:[#allocation10 + $0x98] ss:$12 sps:$4 sm:$0xff]  }
0x10d8   :  { %11561 = vmatprep.subr.bf16.mxu1 %v14830_v40 }
0x10d9   :  { %5695 = vmatpush1.bf16.msra.mxu0 %v13874_v5 }
0x10da   :  { %v13996_v2 = vpop.f32.mrb[112].mxu1  ;;  %5696 = vmatprep.subr.bf16.mxu0 %v13878_v44 }
0x10db   :  { %v13999_v4 = vpop.f32.mrb[113].mxu1  ;;  %11562 = vmatpush3.bf16.msra.mxu1 %v12206_v30  ;;  %v12212_v30 = vld [vmem:[#allocation10 + $0xb0] ss:$12 sps:$4 sm:$0xff]  }
0x10dc   :  { %v14001_v61 = vpop.f32.mrb[114].mxu1  ;;  %11563 = vmatprep.subr.bf16.mxu1 %v14830_v40 }
0x10dd   :  { %14853 = vst [vmem:[#allocation28_spill] sm:$0xff] %v14001_v61  ;;  %v14003_v46 = vpop.f32.mrb[115].mxu1  ;;  %5697 = vmatpush1.bf16.msra.mxu0 %v13880_v27 }
0x10de   :  { %14854 = vst [vmem:[#allocation19_spill] sm:$0xff] %v14003_v46  ;;  %5698 = vmatprep.subr.bf16.mxu0 %v13887_v47 }
0x10df   :  { %11564 = vmatpush3.bf16.msra.mxu1 %v12207_v3  ;;  %v4846_v3 = vld [vmem:[%s14794_s6] sm:$0x7] }
0x10e0   :  { %11565 = vmatprep.subr.bf16.mxu1 %v14830_v40 }
0x10e1   :  { %5699 = vmatpush1.bf16.msra.mxu0 %v13885_v58 }
0x10e2   :  { %v14008_v23 = vpop.f32.mrb[116].mxu1  ;;  %5700 = vmatprep.subr.bf16.mxu0 %v13892_v62 }
0x10e3   :  { %14855 = vst [vmem:[#allocation20_spill] sm:$0xff] %v14008_v23  ;;  %v14011_v26 = vpop.f32.mrb[117].mxu1  ;;  %11566 = vmatpush3.bf16.msra.mxu1 %v12208_v32 }
0x10e4   :  { %14856 = vst [vmem:[#allocation30_spill] sm:$0xff] %v14011_v26  ;;  %v14013_v37 = vpop.f32.mrb[118].mxu1  ;;  %11567 = vmatprep.subr.bf16.mxu1 %v14830_v40 }
0x10e5   :  { %14857 = vst [vmem:[#allocation21_spill] sm:$0xff] %v14013_v37  ;;  %v14015_v20 = vpop.f32.mrb[119].mxu1  ;;  %5701 = vmatpush1.bf16.msra.mxu0 %v13894_v33 }
0x10e6   :  { %14858 = vst [vmem:[#allocation22_spill] sm:$0xff] %v14015_v20  ;;  %5702 = vmatprep.subr.bf16.mxu0 %v13901_v11 }
0x10e7   :  { %11568 = vmatpush3.bf16.msra.mxu1 %v12209_v9 }
0x10e8   :  { %11569 = vmatprep.subr.bf16.mxu1 %v14830_v40 }
0x10e9   :  { %5703 = vmatpush1.bf16.msra.mxu0 %v13899_v0 }
0x10ea   :  { %v14020_v7 = vpop.f32.mrb[120].mxu1  ;;  %5704 = vmatprep.subr.bf16.mxu0 %v13906_v34 }
0x10eb   :  { %14859 = vst [vmem:[#allocation32_spill] sm:$0xff] %v14020_v7  ;;  %v14023_v13 = vpop.f32.mrb[121].mxu1  ;;  %11570 = vmatpush3.bf16.msra.mxu1 %v12210_v18 }
0x10ec   :  { %14860 = vst [vmem:[#allocation23_spill] sm:$0xff] %v14023_v13  ;;  %v14025_v51 = vpop.f32.mrb[122].mxu1  ;;  %11571 = vmatprep.subr.bf16.mxu1 %v14830_v40  ;;  %v14869_v13 = vld [vmem:[#allocation15_spill] sm:$0xff] }
0x10ed   :  { %14861 = vst [vmem:[#allocation24_spill] sm:$0xff] %v14025_v51  ;;  %v14027_v36 = vpop.f32.mrb[123].mxu1  ;;  %5705 = vmatpush1.bf16.msra.mxu0 %v13908_v17 }
0x10ee   :  { %14862 = vst [vmem:[#allocation29_spill] sm:$0xff] %v14027_v36  ;;  %5706 = vmatprep.subr.bf16.mxu0 %v13914_v41 }
0x10ef   :  { %11572 = vmatpush3.bf16.msra.mxu1 %v12211_v48 }
0x10f0   :  { %11573 = vmatprep.subr.bf16.mxu1 %v14830_v40 }
0x10f1   :  { %5707 = vmatpush1.bf16.msra.mxu0 %v13912_v31 }
0x10f2   :  { %5962 = vmatprep.subr.bf16.mxu0 %v13866_v45 }
0x10f3   :  { %11574 = vmatpush3.bf16.msra.mxu1 %v12212_v30  ;;  %v14870_v30 = vsub.s32 0, %v14869_v13 }
0x10f4   :  { %11579 = vmatprep.subr.bf16.mxu1 %v14830_v40 }
0x10f5   :  { %v14058_v7 = vrot.slane %v4846_v3, %v14870_v30 }
0x119f   :  { %v14044_v32 = vpop.f32.mrb[124].mxu1  ;;  %v14046_v9 = vpop.f32.mrb[92].mxu0 }
0x11a0   :  { %14863 = vst [vmem:[#allocation25_spill] sm:$0xff] %v14044_v32  ;;  %14864 = vst [vmem:[#allocation26_spill] sm:$0xff] %v14046_v9  ;;  %v14048_v36 = vpop.f32.mrb[125].mxu1  ;;  %v14050_v18 = vpop.f32.mrb[93].mxu0  ;;  %v14873_v32 = vsub.s32 1, %v14869_v13  ;;  %v5026_v9 = vadd.f32 %v13927_v52, %v14058_v7 }
0x11a1   :  { %14865 = vst [vmem:[#allocation31_spill] sm:$0xff] %v14048_v36  ;;  %14866 = vst [vmem:[#allocation33_spill] sm:$0xff] %v14050_v18  ;;  %v14052_v51 = vpop.f32.mrb[126].mxu1  ;;  %v14054_v48 = vpop.f32.mrb[94].mxu0 }
0x11a2   :  { %14867 = vst [vmem:[#allocation34_spill] sm:$0xff] %v14052_v51  ;;  %14868 = vst [vmem:[#allocation35_spill] sm:$0xff] %v14054_v48  ;;  %v14060_v54 = vpop.f32.mrb[127].mxu1  ;;  %v14062_v20 = vpop.f32.mrb[95].mxu0  ;;  %v14066_v37 = vrot.slane %v4846_v3, %v14873_v32 }
0x11a3   :  { %14871 = vst [vmem:[#allocation15_spill] sm:$0xff] %v14060_v54  ;;  %14872 = vst [vmem:[#allocation36_spill] sm:$0xff] %v14062_v20 }
0x11a4   :  { %v5028_v51 = vadd.f32 %v13931_v43, %v14066_v37  ;;  %v14075_v43 = vld [vmem:[%s14796_s8] ss:$0 sm:$0xff] }
0x11a7   :  { %v5450_v36 = vpop.f32.mrb[96].mxu0  ;;  %v5491_v48 = vpop.f32.mrb[128].mxu1 }
0x11a8   :  { %v5504_v18 = vadd.f32 %v5450_v36, %v5026_v9  ;;  %v5452_v29 = vpop.f32.mrb[97].mxu0  ;;  %v11557_v30 = vpop.f32.mrb[129].mxu1  ;;  %v14874_v36 = vsub.s32 2, %v14869_v13 }
0x11a9   :  { %v5511_v26 = vadd.f32 %v5452_v29, %v5028_v51  ;;  %v5454_v23 = vpop.f32.mrb[98].mxu0  ;;  %v5494_v54 = vpop.f32.mrb[130].mxu1 }
0x11aa   :  { %v10360_v6 = vmul.f32 -1.442695, %v5504_v18  ;;  %v5455_v20 = vpop.f32.mrb[99].mxu0  ;;  %v11558_v46 = vpop.f32.mrb[131].mxu1  ;;  %v14079_v29 = vrot.slane %v4846_v3, %v14874_v36  ;;  %v5503_v23 = vadd.f32 %v14075_v43, %v5491_v48  ;;  %v12214_v3 = vld [vmem:[#allocation10 + $0x20] ss:$12 sps:$4 sm:$0xff]  }
0x11ab   :  { %v10361_v32 = vmul.f32 -1.442695, %v5511_v26  ;;  %v12215_v48 = vld [vmem:[#allocation10 + $0x38] ss:$12 sps:$4 sm:$0xff]   ;;  %v12218_v36 = vld [vmem:[#allocation10 + $0x80] ss:$12 sps:$4 sm:$0xff]  }
0x11ac   :  { %12565 = vpow2.f32 %v10360_v6  ;;  %v5139_v6 = vadd.f32 %v13933_v38, %v14079_v29  ;;  %v12213_v38 = vld [vmem:[#allocation10 + $0x8] ss:$12 sps:$4 sm:$0xff]  }
0x11ad   :  { %12567 = vpow2.f32 %v10361_v32  ;;  %v12216_v32 = vld [vmem:[#allocation10 + $0x50] ss:$12 sps:$4 sm:$0xff]  }
0x11b6   :  { %v12566_v61 = vpop.eup %12565 }
0x11b7   :  { %v5508_v24 = vadd.f32 1.0, %v12566_v61  ;;  %v12568_v52 = vpop.eup %12567 }
0x11b8   :  { %v5515_v54 = vadd.f32 1.0, %v12568_v52  ;;  %v12217_v52 = vld [vmem:[#allocation10 + $0x68] ss:$12 sps:$4 sm:$0xff]  }
0x11b9   :  { %12569 = vrcp.f32 %v5508_v24 }
0x11ba   :  { %12571 = vrcp.f32 %v5515_v54  ;;  %v12220_v54 = vld [vmem:[#allocation10 + $0xb0] ss:$12 sps:$4 sm:$0xff]  }
0x11c3   :  { %v12570_v46 = vpop.eup %12569 }
0x11c4   :  { %v5518_v61 = vmul.f32 %v12570_v46, %v5503_v23  ;;  %v12572_v26 = vpop.eup %12571  ;;  %v5030_v23 = vadd.f32 %v13935_v14, %v14058_v7  ;;  %v5032_v46 = vadd.f32 %v13939_v25, %v14066_v37 }
0x11c5   :  { %v5521_v20 = vsub.f32 1.0, %v12572_v26  ;;  %v5523_v18 = vmul.f32 0.0, %v12572_v26 }
0x11c6   :  { %v5519_v24 = vadd.f32 %v5518_v61, %v5139_v6 }
0x11c8   :  { %12573 = vtanh.f32 %v5519_v24 }
0x11d2   :  { %v12574_v51 = vpop.eup %12573 }
0x11d3   :  { %v5522_v9 = vmul.f32 %v12574_v51, %v5521_v20 }
0x11d5   :  { %v14084_v30 = vadd.f32 %v5523_v18, %v5522_v9 }
0x11d7   :  { %v5531_v13 = vpack.c.bf16 %v14084_v30, %v14084_v30 }
0x11d9   :  { %5725 = vmatmul.mubr.bf16.vlgmr.msra.gmra.mrb[100].mxu0 %v5531_v13  ;;  %11576 = vmatmul.mubr.bf16.vlgmr.msra.gmra.mrb[132].mxu1 %v5531_v13 }
0x11da   :  { %5963 = vmatpush1.bf16.msra.mxu0 %v13868_v39  ;;  %5994 = vmatprep.mubr.bf16.mxu0 %v14829_v59 }
0x11db   :  { %5964 = vmatprep.subr.bf16.mxu0 %v13872_v19  ;;  %11595 = vmatprep.mubr.msk.bf16.mxu1 %vm12846_vm1, %v14830_v40 }
0x11dc   :  { %11580 = vmatpush3.bf16.msra.mxu1 %v12213_v38 }
0x11dd   :  { %11581 = vmatprep.subr.bf16.mxu1 %v14830_v40 }
0x11de   :  { %5965 = vmatpush1.bf16.msra.mxu0 %v13874_v5 }
0x11df   :  { %5966 = vmatprep.subr.bf16.mxu0 %v13878_v44 }
0x11e0   :  { %11582 = vmatpush3.bf16.msra.mxu1 %v12214_v3 }
0x11e1   :  { %11583 = vmatprep.subr.bf16.mxu1 %v14830_v40 }
0x11e2   :  { %5967 = vmatpush1.bf16.msra.mxu0 %v13880_v27 }
0x11e3   :  { %5968 = vmatprep.subr.bf16.mxu0 %v13887_v47 }
0x11e4   :  { %11584 = vmatpush3.bf16.msra.mxu1 %v12215_v48 }
0x11e5   :  { %11585 = vmatprep.subr.bf16.mxu1 %v14830_v40 }
0x11e6   :  { %5969 = vmatpush1.bf16.msra.mxu0 %v13885_v58 }
0x11e7   :  { %5970 = vmatprep.subr.bf16.mxu0 %v13892_v62 }
0x11e8   :  { %11586 = vmatpush3.bf16.msra.mxu1 %v12216_v32 }
0x11e9   :  { %11587 = vmatprep.subr.bf16.mxu1 %v14830_v40 }
0x11ea   :  { %5971 = vmatpush1.bf16.msra.mxu0 %v13894_v33 }
0x11eb   :  { %5972 = vmatprep.subr.bf16.mxu0 %v13901_v11 }
0x11ec   :  { %11588 = vmatpush3.bf16.msra.mxu1 %v12217_v52 }
0x11ed   :  { %11589 = vmatprep.subr.bf16.mxu1 %v14830_v40 }
0x11ee   :  { %5973 = vmatpush1.bf16.msra.mxu0 %v13899_v0 }
0x11ef   :  { %5974 = vmatprep.subr.bf16.mxu0 %v13906_v34 }
0x11f0   :  { %11590 = vmatpush3.bf16.msra.mxu1 %v12218_v36 }
0x11f1   :  { %11591 = vmatprep.subr.bf16.mxu1 %v14830_v40 }
0x11f2   :  { %5975 = vmatpush1.bf16.msra.mxu0 %v13908_v17 }
0x11f3   :  { %5976 = vmatprep.subr.bf16.mxu0 %v13914_v41 }
0x11f6   :  { %5977 = vmatpush1.bf16.msra.mxu0 %v13912_v31 }
0x11f7   :  { %6232 = vmatprep.subr.bf16.mxu0 %v13866_v45  ;;  %v12219_v45 = vld [vmem:[#allocation10 + $0x98] ss:$12 sps:$4 sm:$0xff]  }
0x11f8   :  { %11592 = vmatpush3.bf16.msra.mxu1 %v12219_v45 }
0x11f9   :  { %11593 = vmatprep.subr.bf16.mxu1 %v14830_v40 }
0x11fc   :  { %11594 = vmatpush3.bf16.msra.mxu1 %v12220_v54  ;;  %v5142_v54 = vadd.f32 %v13941_v12, %v14079_v29 }
0x11fd   :  { %11599 = vmatprep.subr.bf16.mxu1 %v14830_v40 }
0x12ac   :  { %v5726_v6 = vpop.f32.mrb[100].mxu0  ;;  %v5767_v61 = vpop.f32.mrb[132].mxu1 }
0x12ad   :  { %v5774_v24 = vadd.f32 %v5726_v6, %v5030_v23  ;;  %v5728_v26 = vpop.f32.mrb[101].mxu0  ;;  %v11577_v20 = vpop.f32.mrb[133].mxu1  ;;  %v5773_v25 = vadd.f32 %v14075_v43, %v5767_v61 }
0x12ae   :  { %v5781_v51 = vadd.f32 %v5728_v26, %v5032_v46  ;;  %v5730_v9 = vpop.f32.mrb[102].mxu0  ;;  %v5770_v18 = vpop.f32.mrb[134].mxu1 }
0x12af   :  { %v10386_v13 = vmul.f32 -1.442695, %v5774_v24  ;;  %v5731_v38 = vpop.f32.mrb[103].mxu0  ;;  %v11578_v3 = vpop.f32.mrb[135].mxu1 }
0x12b0   :  { %v10387_v48 = vmul.f32 -1.442695, %v5781_v51 }
0x12b1   :  { %12575 = vpow2.f32 %v10386_v13 }
0x12b2   :  { %12577 = vpow2.f32 %v10387_v48 }
0x12bb   :  { %v12576_v32 = vpop.eup %12575 }
0x12bc   :  { %v5778_v52 = vadd.f32 1.0, %v12576_v32  ;;  %v12578_v14 = vpop.eup %12577 }
0x12bd   :  { %v5785_v36 = vadd.f32 1.0, %v12578_v14 }
0x12be   :  { %12579 = vrcp.f32 %v5778_v52 }
0x12bf   :  { %12581 = vrcp.f32 %v5785_v36 }
0x12c8   :  { %v12580_v45 = vpop.eup %12579 }
0x12c9   :  { %v5788_v23 = vmul.f32 %v12580_v45, %v5773_v25  ;;  %v12582_v6 = vpop.eup %12581  ;;  %v5147_v45 = vadd.f32 %v13929_v55, %v14079_v29  ;;  %v14168_v55 = vld [vmem:[#allocation10 + $0x4] ss:$12 sps:$4 sm:$0xff]  }
0x12ca   :  { %v5791_v24 = vsub.f32 1.0, %v12582_v6  ;;  %v5793_v51 = vmul.f32 %v12582_v6, %v14084_v30 }
0x12cb   :  { %v5789_v46 = vadd.f32 %v5788_v23, %v5142_v54 }
0x12cd   :  { %12583 = vtanh.f32 %v5789_v46 }
0x12d7   :  { %v12584_v26 = vpop.eup %12583 }
0x12d8   :  { %v5792_v20 = vmul.f32 %v12584_v26, %v5791_v24 }
0x12da   :  { %v14123_v9 = vadd.f32 %v5793_v51, %v5792_v20 }
0x12dc   :  { %v5801_v18 = vpack.c.bf16 %v14123_v9, %v14123_v9 }
0x12de   :  { %5995 = vmatmul.mubr.bf16.vlgmr.msra.gmra.mrb[104].mxu0 %v5801_v18  ;;  %11596 = vmatmul.mubr.bf16.vlgmr.msra.gmra.mrb[136].mxu1 %v5801_v18 }
0x12df   :  { %6233 = vmatpush1.bf16.msra.mxu0 %v13868_v39  ;;  %6264 = vmatprep.mubr.bf16.mxu0 %v14829_v59  ;;  %v12221_v39 = vld [vmem:[#allocation10 + $0x8] ss:$12 sps:$4 sm:$0xff]  }
0x12e0   :  { %6234 = vmatprep.subr.bf16.mxu0 %v13872_v19  ;;  %11615 = vmatprep.mubr.msk.bf16.mxu1 %vm12846_vm1, %v14830_v40  ;;  %v12222_v19 = vld [vmem:[#allocation10 + $0x20] ss:$12 sps:$4 sm:$0xff]  }
0x12e1   :  { %11600 = vmatpush3.bf16.msra.mxu1 %v12221_v39  ;;  %v14170_v39 = vld [vmem:[#allocation10] ss:$12 sps:$4 sm:$0xff]  }
0x12e2   :  { %11601 = vmatprep.subr.bf16.mxu1 %v14830_v40 }
0x12e3   :  { %6235 = vmatpush1.bf16.msra.mxu0 %v13874_v5  ;;  %v12223_v5 = vld [vmem:[#allocation10 + $0x38] ss:$12 sps:$4 sm:$0xff]  }
0x12e4   :  { %6236 = vmatprep.subr.bf16.mxu0 %v13878_v44  ;;  %v12224_v44 = vld [vmem:[#allocation10 + $0x50] ss:$12 sps:$4 sm:$0xff]  }
0x12e5   :  { %11602 = vmatpush3.bf16.msra.mxu1 %v12222_v19  ;;  %v12232_v19 = vld [vmem:[#allocation10 + $0x8] ss:$12 sps:$4 sm:$0xff]  }
0x12e6   :  { %11603 = vmatprep.subr.bf16.mxu1 %v14830_v40 }
0x12e7   :  { %6237 = vmatpush1.bf16.msra.mxu0 %v13880_v27  ;;  %v12225_v27 = vld [vmem:[#allocation10 + $0x68] ss:$12 sps:$4 sm:$0xff]  }
0x12e8   :  { %6238 = vmatprep.subr.bf16.mxu0 %v13887_v47  ;;  %v12227_v47 = vld [vmem:[#allocation10 + $0x98] ss:$12 sps:$4 sm:$0xff]  }
0x12e9   :  { %11604 = vmatpush3.bf16.msra.mxu1 %v12223_v5  ;;  %v14174_v5 = vld [vmem:[#allocation10 + $0x1c] ss:$12 sps:$4 sm:$0xff]  }
0x12ea   :  { %11605 = vmatprep.subr.bf16.mxu1 %v14830_v40 }
0x12eb   :  { %6239 = vmatpush1.bf16.msra.mxu0 %v13885_v58  ;;  %v12226_v58 = vld [vmem:[#allocation10 + $0x80] ss:$12 sps:$4 sm:$0xff]  }
0x12ec   :  { %6240 = vmatprep.subr.bf16.mxu0 %v13892_v62  ;;  %v12228_v62 = vld [vmem:[#allocation10 + $0xb0] ss:$12 sps:$4 sm:$0xff]  }
0x12ed   :  { %11606 = vmatpush3.bf16.msra.mxu1 %v12224_v44  ;;  %v14177_v44 = vld [vmem:[#allocation10 + $0x18] ss:$12 sps:$4 sm:$0xff]  }
0x12ee   :  { %11607 = vmatprep.subr.bf16.mxu1 %v14830_v40 }
0x12ef   :  { %6241 = vmatpush1.bf16.msra.mxu0 %v13894_v33  ;;  %v5036_v33 = vadd.f32 %v13943_v10, %v14058_v7 }
0x12f0   :  { %6242 = vmatprep.subr.bf16.mxu0 %v13901_v11 }
0x12f1   :  { %11608 = vmatpush3.bf16.msra.mxu1 %v12225_v27  ;;  %v12236_v27 = vld [vmem:[#allocation10 + $0x20] ss:$12 sps:$4 sm:$0xff]  }
0x12f2   :  { %11609 = vmatprep.subr.bf16.mxu1 %v14830_v40 }
0x12f3   :  { %6243 = vmatpush1.bf16.msra.mxu0 %v13899_v0  ;;  %v5038_v0 = vadd.f32 %v13947_v15, %v14066_v37 }
0x12f4   :  { %6244 = vmatprep.subr.bf16.mxu0 %v13906_v34 }
0x12f5   :  { %11610 = vmatpush3.bf16.msra.mxu1 %v12226_v58  ;;  %v14181_v58 = vld [vmem:[#allocation10 + $0x34] ss:$12 sps:$4 sm:$0xff]  }
0x12f6   :  { %11611 = vmatprep.subr.bf16.mxu1 %v14830_v40 }
0x12f7   :  { %6245 = vmatpush1.bf16.msra.mxu0 %v13908_v17 }
0x12f8   :  { %6246 = vmatprep.subr.bf16.mxu0 %v13914_v41 }
0x12f9   :  { %11612 = vmatpush3.bf16.msra.mxu1 %v12227_v47  ;;  %v14184_v47 = vld [vmem:[#allocation10 + $0x30] ss:$12 sps:$4 sm:$0xff]  }
0x12fa   :  { %11613 = vmatprep.subr.bf16.mxu1 %v14830_v40 }
0x12fb   :  { %6247 = vmatpush1.bf16.msra.mxu0 %v13912_v31 }
0x12fc   :  { %6502 = vmatprep.subr.bf16.mxu0 %v14168_v55 }
0x12fd   :  { %11614 = vmatpush3.bf16.msra.mxu1 %v12228_v62  ;;  %v12240_v62 = vld [vmem:[#allocation10 + $0x38] ss:$12 sps:$4 sm:$0xff]  }
0x12fe   :  { %11619 = vmatprep.subr.bf16.mxu1 %v14830_v40 }
0x13b1   :  { %v5996_v11 = vpop.f32.mrb[104].mxu0  ;;  %v6037_v34 = vpop.f32.mrb[136].mxu1 }
0x13b2   :  { %v6044_v17 = vadd.f32 %v5996_v11, %v5036_v33  ;;  %v5998_v31 = vpop.f32.mrb[105].mxu0  ;;  %v11597_v41 = vpop.f32.mrb[137].mxu1  ;;  %v6043_v15 = vadd.f32 %v14075_v43, %v6037_v34  ;;  %v14188_v33 = vld [vmem:[#allocation10 + $0x4c] ss:$12 sps:$4 sm:$0xff]   ;;  %v12244_v11 = vld [vmem:[#allocation10 + $0x50] ss:$12 sps:$4 sm:$0xff]  }
0x13b3   :  { %v6051_v12 = vadd.f32 %v5998_v31, %v5038_v0  ;;  %v6000_v61 = vpop.f32.mrb[106].mxu0  ;;  %v6040_v13 = vpop.f32.mrb[138].mxu1  ;;  %v14191_v0 = vld [vmem:[#allocation10 + $0x48] ss:$12 sps:$4 sm:$0xff]   ;;  %v14195_v34 = vld [vmem:[#allocation10 + $0x60] ss:$12 sps:$4 sm:$0xff]  }
0x13b4   :  { %v10412_v38 = vmul.f32 -1.442695, %v6044_v17  ;;  %v6001_v3 = vpop.f32.mrb[107].mxu0  ;;  %v11598_v48 = vpop.f32.mrb[139].mxu1  ;;  %v14197_v17 = vld [vmem:[#allocation10 + $0x64] ss:$12 sps:$4 sm:$0xff]  }
0x13b5   :  { %v10413_v32 = vmul.f32 -1.442695, %v6051_v12  ;;  %v12248_v31 = vld [vmem:[#allocation10 + $0x68] ss:$12 sps:$4 sm:$0xff]   ;;  %v14204_v12 = vld [vmem:[#allocation10 + $0x78] ss:$12 sps:$4 sm:$0xff]  }
0x13b6   :  { %12585 = vpow2.f32 %v10412_v38  ;;  %v14200_v41 = vld [vmem:[#allocation10 + $0x7c] ss:$12 sps:$4 sm:$0xff]   ;;  %v12252_v61 = vld [vmem:[#allocation10 + $0x80] ss:$12 sps:$4 sm:$0xff]   ;;  %v12256_v3 = vld [vmem:[#allocation10 + $0x98] ss:$12 sps:$4 sm:$0xff]  }
0x13b7   :  { %12587 = vpow2.f32 %v10413_v32  ;;  %v14208_v13 = vld [vmem:[#allocation10 + $0x94] ss:$12 sps:$4 sm:$0xff]   ;;  %v14211_v38 = vld [vmem:[#allocation10 + $0x90] ss:$12 sps:$4 sm:$0xff]   ;;  %v14215_v48 = vld [vmem:[#allocation10 + $0xac] ss:$12 sps:$4 sm:$0xff]  }
0x13b8   :  { %v14218_v32 = vld [vmem:[#allocation10 + $0xa8] ss:$12 sps:$4 sm:$0xff]  }
0x13c0   :  { %v12586_v52 = vpop.eup %12585 }
0x13c1   :  { %v6048_v14 = vadd.f32 1.0, %v12586_v52  ;;  %v12588_v10 = vpop.eup %12587  ;;  %v12260_v52 = vld [vmem:[#allocation10 + $0xb0] ss:$12 sps:$4 sm:$0xff]  }
0x13c2   :  { %v6055_v36 = vadd.f32 1.0, %v12588_v10  ;;  %v5042_v10 = vadd.f32 %v13955_v57, %v14066_v37 }
0x13c3   :  { %12589 = vrcp.f32 %v6048_v14  ;;  %v5040_v14 = vadd.f32 %v13951_v1, %v14058_v7 }
0x13c4   :  { %12591 = vrcp.f32 %v6055_v36 }
0x13cd   :  { %v12590_v25 = vpop.eup %12589 }
0x13ce   :  { %v6058_v54 = vmul.f32 %v12590_v25, %v6043_v15  ;;  %v12592_v46 = vpop.eup %12591 }
0x13cf   :  { %v6061_v6 = vsub.f32 1.0, %v12592_v46  ;;  %v6063_v20 = vmul.f32 %v12592_v46, %v14123_v9 }
0x13d0   :  { %v6059_v23 = vadd.f32 %v6058_v54, %v5147_v45 }
0x13d2   :  { %12593 = vtanh.f32 %v6059_v23 }
0x13dc   :  { %v12594_v24 = vpop.eup %12593 }
0x13dd   :  { %v6062_v26 = vmul.f32 %v12594_v24, %v6061_v6 }
0x13df   :  { %v14161_v51 = vadd.f32 %v6063_v20, %v6062_v26 }
0x13e1   :  { %v6071_v18 = vpack.c.bf16 %v14161_v51, %v14161_v51 }
0x13e3   :  { %6265 = vmatmul.mubr.bf16.vlgmr.msra.gmra.mrb[108].mxu0 %v6071_v18  ;;  %11616 = vmatmul.mubr.bf16.vlgmr.msra.gmra.mrb[140].mxu1 %v6071_v18 }
0x13e4   :  { %6534 = vmatprep.mubr.bf16.mxu0 %v14829_v59  ;;  %11635 = vmatprep.mubr.msk.bf16.mxu1 %vm12846_vm1, %v14830_v40 }
0x13e5   :  { %6503 = vmatpush1.bf16.msra.mxu0 %v14170_v39  ;;  %11620 = vmatpush3.bf16.msra.mxu1 %v12232_v19 }
0x13e6   :  { %11621 = vmatprep.subr.bf16.mxu1 %v14830_v40  ;;  %6504 = vmatprep.subr.bf16.mxu0 %v14174_v5 }
0x13e9   :  { %6505 = vmatpush1.bf16.msra.mxu0 %v14177_v44  ;;  %11622 = vmatpush3.bf16.msra.mxu1 %v12236_v27 }
0x13ea   :  { %11623 = vmatprep.subr.bf16.mxu1 %v14830_v40  ;;  %6506 = vmatprep.subr.bf16.mxu0 %v14181_v58 }
0x13ed   :  { %6507 = vmatpush1.bf16.msra.mxu0 %v14184_v47  ;;  %11624 = vmatpush3.bf16.msra.mxu1 %v12240_v62 }
0x13ee   :  { %11625 = vmatprep.subr.bf16.mxu1 %v14830_v40  ;;  %6508 = vmatprep.subr.bf16.mxu0 %v14188_v33 }
0x13f1   :  { %6509 = vmatpush1.bf16.msra.mxu0 %v14191_v0  ;;  %11626 = vmatpush3.bf16.msra.mxu1 %v12244_v11 }
0x13f2   :  { %11627 = vmatprep.subr.bf16.mxu1 %v14830_v40  ;;  %6510 = vmatprep.subr.bf16.mxu0 %v14197_v17 }
0x13f5   :  { %6511 = vmatpush1.bf16.msra.mxu0 %v14195_v34  ;;  %11628 = vmatpush3.bf16.msra.mxu1 %v12248_v31  ;;  %v5150_v31 = vadd.f32 %v13937_v16, %v14079_v29  ;;  %v12261_v16 = vld [vmem:[#allocation10 + $0x8] ss:$12 sps:$4 sm:$0xff]  }
0x13f6   :  { %6512 = vmatprep.subr.bf16.mxu0 %v14200_v41  ;;  %11629 = vmatprep.subr.bf16.mxu1 %v14830_v40 }
0x13f9   :  { %6513 = vmatpush1.bf16.msra.mxu0 %v14204_v12  ;;  %11630 = vmatpush3.bf16.msra.mxu1 %v12252_v61 }
0x13fa   :  { %6514 = vmatprep.subr.bf16.mxu0 %v14208_v13  ;;  %11631 = vmatprep.subr.bf16.mxu1 %v14830_v40 }
0x13fd   :  { %6515 = vmatpush1.bf16.msra.mxu0 %v14211_v38  ;;  %11632 = vmatpush3.bf16.msra.mxu1 %v12256_v3 }
0x13fe   :  { %6516 = vmatprep.subr.bf16.mxu0 %v14215_v48  ;;  %11633 = vmatprep.subr.bf16.mxu1 %v14830_v40 }
0x1401   :  { %6517 = vmatpush1.bf16.msra.mxu0 %v14218_v32  ;;  %11634 = vmatpush3.bf16.msra.mxu1 %v12260_v52 }
0x1402   :  { %6772 = vmatprep.subr.bf16.mxu0 %v14168_v55  ;;  %11639 = vmatprep.subr.bf16.mxu1 %v14830_v40 }
0x14b6   :  { %v6266_v36 = vpop.f32.mrb[108].mxu0  ;;  %v6307_v15 = vpop.f32.mrb[140].mxu1 }
0x14b7   :  { %v6314_v25 = vadd.f32 %v6266_v36, %v5040_v14  ;;  %v6268_v45 = vpop.f32.mrb[109].mxu0  ;;  %v11617_v54 = vpop.f32.mrb[141].mxu1  ;;  %v6313_v57 = vadd.f32 %v14075_v43, %v6307_v15  ;;  %v12262_v15 = vld [vmem:[#allocation10 + $0x20] ss:$12 sps:$4 sm:$0xff]  }
0x14b8   :  { %v6321_v23 = vadd.f32 %v6268_v45, %v5042_v10  ;;  %v6270_v46 = vpop.f32.mrb[110].mxu0  ;;  %v6310_v6 = vpop.f32.mrb[142].mxu1 }
0x14b9   :  { %v10438_v24 = vmul.f32 -1.442695, %v6314_v25  ;;  %v6271_v26 = vpop.f32.mrb[111].mxu0  ;;  %v11618_v20 = vpop.f32.mrb[143].mxu1  ;;  %v12264_v46 = vld [vmem:[#allocation10 + $0x50] ss:$12 sps:$4 sm:$0xff]  }
0x14ba   :  { %v10439_v18 = vmul.f32 -1.442695, %v6321_v23  ;;  %v12263_v23 = vld [vmem:[#allocation10 + $0x38] ss:$12 sps:$4 sm:$0xff]   ;;  %v12265_v6 = vld [vmem:[#allocation10 + $0x68] ss:$12 sps:$4 sm:$0xff]  }
0x14bb   :  { %12595 = vpow2.f32 %v10438_v24  ;;  %v12266_v24 = vld [vmem:[#allocation10 + $0x80] ss:$12 sps:$4 sm:$0xff]   ;;  %v12267_v26 = vld [vmem:[#allocation10 + $0x98] ss:$12 sps:$4 sm:$0xff]   ;;  %v12268_v20 = vld [vmem:[#allocation10 + $0xb0] ss:$12 sps:$4 sm:$0xff]  }
0x14bc   :  { %12597 = vpow2.f32 %v10439_v18  ;;  %v5046_v18 = vadd.f32 %v13960_v49, %v14058_v7 }
0x14c5   :  { %v12596_v19 = vpop.eup %12595 }
0x14c6   :  { %v6318_v27 = vadd.f32 1.0, %v12596_v19  ;;  %v12598_v1 = vpop.eup %12597  ;;  %v5048_v19 = vadd.f32 %v13965_v22, %v14066_v37 }
0x14c7   :  { %v6325_v62 = vadd.f32 1.0, %v12598_v1 }
0x14c8   :  { %12599 = vrcp.f32 %v6318_v27 }
0x14c9   :  { %12601 = vrcp.f32 %v6325_v62 }
0x14d2   :  { %v12600_v11 = vpop.eup %12599 }
0x14d3   :  { %v6328_v61 = vmul.f32 %v12600_v11, %v6313_v57  ;;  %v12602_v52 = vpop.eup %12601 }
0x14d4   :  { %v6331_v14 = vsub.f32 1.0, %v12602_v52  ;;  %v6333_v25 = vmul.f32 %v12602_v52, %v14161_v51 }
0x14d5   :  { %v6329_v3 = vadd.f32 %v6328_v61, %v5150_v31 }
0x14d7   :  { %12603 = vtanh.f32 %v6329_v3 }
0x14e1   :  { %v12604_v10 = vpop.eup %12603 }
0x14e2   :  { %v6332_v36 = vmul.f32 %v12604_v10, %v6331_v14 }
0x14e4   :  { %v14233_v45 = vadd.f32 %v6333_v25, %v6332_v36 }
0x14e6   :  { %v6341_v54 = vpack.c.bf16 %v14233_v45, %v14233_v45 }
0x14e8   :  { %6535 = vmatmul.mubr.bf16.vlgmr.msra.gmra.mrb[112].mxu0 %v6341_v54  ;;  %11636 = vmatmul.mubr.bf16.vlgmr.msra.gmra.mrb[144].mxu1 %v6341_v54 }
0x14e9   :  { %6773 = vmatpush1.bf16.msra.mxu0 %v14170_v39  ;;  %6804 = vmatprep.mubr.bf16.mxu0 %v14829_v59 }
0x14ea   :  { %6774 = vmatprep.subr.bf16.mxu0 %v14174_v5  ;;  %11655 = vmatprep.mubr.msk.bf16.mxu1 %vm12846_vm1, %v14830_v40 }
0x14eb   :  { %11640 = vmatpush3.bf16.msra.mxu1 %v12261_v16 }
0x14ec   :  { %11641 = vmatprep.subr.bf16.mxu1 %v14830_v40 }
0x14ed   :  { %6775 = vmatpush1.bf16.msra.mxu0 %v14177_v44 }
0x14ee   :  { %6776 = vmatprep.subr.bf16.mxu0 %v14181_v58 }
0x14ef   :  { %11642 = vmatpush3.bf16.msra.mxu1 %v12262_v15 }
0x14f0   :  { %11643 = vmatprep.subr.bf16.mxu1 %v14830_v40 }
0x14f1   :  { %6777 = vmatpush1.bf16.msra.mxu0 %v14184_v47 }
0x14f2   :  { %6778 = vmatprep.subr.bf16.mxu0 %v14188_v33 }
0x14f3   :  { %11644 = vmatpush3.bf16.msra.mxu1 %v12263_v23  ;;  %v5155_v23 = vadd.f32 %v13949_v21, %v14079_v29  ;;  %v12269_v21 = vld [vmem:[#allocation10 + $0x8] ss:$12 sps:$4 sm:$0xff]  }
0x14f4   :  { %11645 = vmatprep.subr.bf16.mxu1 %v14830_v40 }
0x14f5   :  { %6779 = vmatpush1.bf16.msra.mxu0 %v14191_v0 }
0x14f6   :  { %6780 = vmatprep.subr.bf16.mxu0 %v14197_v17 }
0x14f7   :  { %11646 = vmatpush3.bf16.msra.mxu1 %v12264_v46 }
0x14f8   :  { %11647 = vmatprep.subr.bf16.mxu1 %v14830_v40 }
0x14f9   :  { %6781 = vmatpush1.bf16.msra.mxu0 %v14195_v34 }
0x14fa   :  { %6782 = vmatprep.subr.bf16.mxu0 %v14200_v41 }
0x14fb   :  { %11648 = vmatpush3.bf16.msra.mxu1 %v12265_v6 }
0x14fc   :  { %11649 = vmatprep.subr.bf16.mxu1 %v14830_v40 }
0x14fd   :  { %6783 = vmatpush1.bf16.msra.mxu0 %v14204_v12 }
0x14fe   :  { %6784 = vmatprep.subr.bf16.mxu0 %v14208_v13 }
0x14ff   :  { %11650 = vmatpush3.bf16.msra.mxu1 %v12266_v24 }
0x1500   :  { %11651 = vmatprep.subr.bf16.mxu1 %v14830_v40 }
0x1501   :  { %6785 = vmatpush1.bf16.msra.mxu0 %v14211_v38 }
0x1502   :  { %6786 = vmatprep.subr.bf16.mxu0 %v14215_v48 }
0x1503   :  { %11652 = vmatpush3.bf16.msra.mxu1 %v12267_v26 }
0x1504   :  { %11653 = vmatprep.subr.bf16.mxu1 %v14830_v40 }
0x1505   :  { %6787 = vmatpush1.bf16.msra.mxu0 %v14218_v32 }
0x1506   :  { %7042 = vmatprep.subr.bf16.mxu0 %v14168_v55 }
0x1507   :  { %11654 = vmatpush3.bf16.msra.mxu1 %v12268_v20 }
0x1508   :  { %11659 = vmatprep.subr.bf16.mxu1 %v14830_v40 }
0x15bb   :  { %v6536_v27 = vpop.f32.mrb[112].mxu0  ;;  %v6577_v1 = vpop.f32.mrb[144].mxu1 }
0x15bc   :  { %v6584_v62 = vadd.f32 %v6536_v27, %v5046_v18  ;;  %v6538_v57 = vpop.f32.mrb[113].mxu0  ;;  %v11637_v11 = vpop.f32.mrb[145].mxu1  ;;  %v6583_v22 = vadd.f32 %v14075_v43, %v6577_v1  ;;  %v12270_v1 = vld [vmem:[#allocation10 + $0x20] ss:$12 sps:$4 sm:$0xff]  }
0x15bd   :  { %v6591_v31 = vadd.f32 %v6538_v57, %v5048_v19  ;;  %v6540_v61 = vpop.f32.mrb[114].mxu0  ;;  %v6580_v3 = vpop.f32.mrb[146].mxu1  ;;  %v12271_v57 = vld [vmem:[#allocation10 + $0x38] ss:$12 sps:$4 sm:$0xff]   ;;  %v12272_v11 = vld [vmem:[#allocation10 + $0x50] ss:$12 sps:$4 sm:$0xff]  }
0x15be   :  { %v10464_v52 = vmul.f32 -1.442695, %v6584_v62  ;;  %v6541_v14 = vpop.f32.mrb[115].mxu0  ;;  %v11638_v10 = vpop.f32.mrb[147].mxu1  ;;  %v12274_v61 = vld [vmem:[#allocation10 + $0x80] ss:$12 sps:$4 sm:$0xff]  }
0x15bf   :  { %v10465_v36 = vmul.f32 -1.442695, %v6591_v31  ;;  %v12273_v31 = vld [vmem:[#allocation10 + $0x68] ss:$12 sps:$4 sm:$0xff]   ;;  %v12275_v3 = vld [vmem:[#allocation10 + $0x98] ss:$12 sps:$4 sm:$0xff]   ;;  %v5050_v14 = vadd.f32 %v13969_v8, %v14058_v7  ;;  %v5052_v10 = vadd.f32 %v13973_v28, %v14066_v37 }
0x15c0   :  { %12605 = vpow2.f32 %v10464_v52  ;;  %v12276_v52 = vld [vmem:[#allocation10 + $0xb0] ss:$12 sps:$4 sm:$0xff]  }
0x15c1   :  { %12607 = vpow2.f32 %v10465_v36 }
0x15ca   :  { %v12606_v25 = vpop.eup %12605 }
0x15cb   :  { %v6588_v54 = vadd.f32 1.0, %v12606_v25  ;;  %v12608_v49 = vpop.eup %12607 }
0x15cc   :  { %v6595_v16 = vadd.f32 1.0, %v12608_v49 }
0x15cd   :  { %12609 = vrcp.f32 %v6588_v54 }
0x15ce   :  { %12611 = vrcp.f32 %v6595_v16 }
0x15d7   :  { %v12610_v15 = vpop.eup %12609 }
0x15d8   :  { %v6598_v46 = vmul.f32 %v12610_v15, %v6583_v22  ;;  %v12612_v24 = vpop.eup %12611 }
0x15d9   :  { %v6601_v26 = vsub.f32 1.0, %v12612_v24  ;;  %v6603_v19 = vmul.f32 %v12612_v24, %v14233_v45 }
0x15da   :  { %v6599_v6 = vadd.f32 %v6598_v46, %v5155_v23 }
0x15dc   :  { %12613 = vtanh.f32 %v6599_v6 }
0x15e6   :  { %v12614_v20 = vpop.eup %12613 }
0x15e7   :  { %v6602_v18 = vmul.f32 %v12614_v20, %v6601_v26 }
0x15e9   :  { %v14272_v27 = vadd.f32 %v6603_v19, %v6602_v18 }
0x15eb   :  { %v6611_v62 = vpack.c.bf16 %v14272_v27, %v14272_v27 }
0x15ed   :  { %6805 = vmatmul.mubr.bf16.vlgmr.msra.gmra.mrb[116].mxu0 %v6611_v62  ;;  %11656 = vmatmul.mubr.bf16.vlgmr.msra.gmra.mrb[148].mxu1 %v6611_v62 }
0x15ee   :  { %7043 = vmatpush1.bf16.msra.mxu0 %v14170_v39  ;;  %7074 = vmatprep.mubr.bf16.mxu0 %v14829_v59 }
0x15ef   :  { %7044 = vmatprep.subr.bf16.mxu0 %v14174_v5  ;;  %11675 = vmatprep.mubr.msk.bf16.mxu1 %vm12846_vm1, %v14830_v40 }
0x15f0   :  { %11660 = vmatpush3.bf16.msra.mxu1 %v12269_v21  ;;  %v5158_v21 = vadd.f32 %v13957_v42, %v14079_v29  ;;  %v12277_v42 = vld [vmem:[#allocation10 + $0x8] ss:$12 sps:$4 sm:$0xff]  }
0x15f1   :  { %11661 = vmatprep.subr.bf16.mxu1 %v14830_v40 }
0x15f2   :  { %7045 = vmatpush1.bf16.msra.mxu0 %v14177_v44 }
0x15f3   :  { %7046 = vmatprep.subr.bf16.mxu0 %v14181_v58 }
0x15f4   :  { %11662 = vmatpush3.bf16.msra.mxu1 %v12270_v1 }
0x15f5   :  { %11663 = vmatprep.subr.bf16.mxu1 %v14830_v40 }
0x15f6   :  { %7047 = vmatpush1.bf16.msra.mxu0 %v14184_v47 }
0x15f7   :  { %7048 = vmatprep.subr.bf16.mxu0 %v14188_v33 }
0x15f8   :  { %11664 = vmatpush3.bf16.msra.mxu1 %v12271_v57 }
0x15f9   :  { %11665 = vmatprep.subr.bf16.mxu1 %v14830_v40 }
0x15fa   :  { %7049 = vmatpush1.bf16.msra.mxu0 %v14191_v0 }
0x15fb   :  { %7050 = vmatprep.subr.bf16.mxu0 %v14197_v17 }
0x15fc   :  { %11666 = vmatpush3.bf16.msra.mxu1 %v12272_v11 }
0x15fd   :  { %11667 = vmatprep.subr.bf16.mxu1 %v14830_v40 }
0x15fe   :  { %7051 = vmatpush1.bf16.msra.mxu0 %v14195_v34 }
0x15ff   :  { %7052 = vmatprep.subr.bf16.mxu0 %v14200_v41 }
0x1600   :  { %11668 = vmatpush3.bf16.msra.mxu1 %v12273_v31 }
0x1601   :  { %11669 = vmatprep.subr.bf16.mxu1 %v14830_v40 }
0x1602   :  { %7053 = vmatpush1.bf16.msra.mxu0 %v14204_v12 }
0x1603   :  { %7054 = vmatprep.subr.bf16.mxu0 %v14208_v13 }
0x1604   :  { %11670 = vmatpush3.bf16.msra.mxu1 %v12274_v61 }
0x1605   :  { %11671 = vmatprep.subr.bf16.mxu1 %v14830_v40 }
0x1606   :  { %7055 = vmatpush1.bf16.msra.mxu0 %v14211_v38 }
0x1607   :  { %7056 = vmatprep.subr.bf16.mxu0 %v14215_v48 }
0x1608   :  { %11672 = vmatpush3.bf16.msra.mxu1 %v12275_v3 }
0x1609   :  { %11673 = vmatprep.subr.bf16.mxu1 %v14830_v40 }
0x160a   :  { %7057 = vmatpush1.bf16.msra.mxu0 %v14218_v32 }
0x160b   :  { %7312 = vmatprep.subr.bf16.mxu0 %v14168_v55 }
0x160c   :  { %11674 = vmatpush3.bf16.msra.mxu1 %v12276_v52 }
0x160d   :  { %11679 = vmatprep.subr.bf16.mxu1 %v14830_v40 }
0x16c0   :  { %v6806_v36 = vpop.f32.mrb[116].mxu0  ;;  %v6847_v25 = vpop.f32.mrb[148].mxu1 }
0x16c1   :  { %v6854_v54 = vadd.f32 %v6806_v36, %v5050_v14  ;;  %v6808_v49 = vpop.f32.mrb[117].mxu0  ;;  %v11657_v16 = vpop.f32.mrb[149].mxu1  ;;  %v6853_v28 = vadd.f32 %v14075_v43, %v6847_v25  ;;  %v12278_v36 = vld [vmem:[#allocation10 + $0x20] ss:$12 sps:$4 sm:$0xff]   ;;  %v12279_v25 = vld [vmem:[#allocation10 + $0x38] ss:$12 sps:$4 sm:$0xff]  }
0x16c2   :  { %v6861_v22 = vadd.f32 %v6808_v49, %v5052_v10  ;;  %v6810_v15 = vpop.f32.mrb[118].mxu0  ;;  %v6850_v23 = vpop.f32.mrb[150].mxu1  ;;  %v12281_v49 = vld [vmem:[#allocation10 + $0x68] ss:$12 sps:$4 sm:$0xff]   ;;  %v12282_v16 = vld [vmem:[#allocation10 + $0x80] ss:$12 sps:$4 sm:$0xff]  }
0x16c3   :  { %v10490_v46 = vmul.f32 -1.442695, %v6854_v54  ;;  %v6811_v6 = vpop.f32.mrb[119].mxu0  ;;  %v11658_v24 = vpop.f32.mrb[151].mxu1  ;;  %v12280_v54 = vld [vmem:[#allocation10 + $0x50] ss:$12 sps:$4 sm:$0xff]   ;;  %v5056_v15 = vadd.f32 %v13980_v60, %v14058_v7  ;;  %v5058_v23 = vadd.f32 %v13982_v56, %v14066_v37 }
0x16c4   :  { %v10491_v26 = vmul.f32 -1.442695, %v6861_v22  ;;  %v12284_v22 = vld [vmem:[#allocation10 + $0xb0] ss:$12 sps:$4 sm:$0xff]  }
0x16c5   :  { %12615 = vpow2.f32 %v10490_v46 }
0x16c6   :  { %12617 = vpow2.f32 %v10491_v26 }
0x16cf   :  { %v12616_v20 = vpop.eup %12615 }
0x16d0   :  { %v6858_v18 = vadd.f32 1.0, %v12616_v20  ;;  %v12618_v8 = vpop.eup %12617 }
0x16d1   :  { %v6865_v19 = vadd.f32 1.0, %v12618_v8 }
0x16d2   :  { %12619 = vrcp.f32 %v6858_v18 }
0x16d3   :  { %12621 = vrcp.f32 %v6865_v19 }
0x16dc   :  { %v12620_v62 = vpop.eup %12619 }
0x16dd   :  { %v6868_v1 = vmul.f32 %v12620_v62, %v6853_v28  ;;  %v12622_v11 = vpop.eup %12621 }
0x16de   :  { %v6871_v31 = vsub.f32 1.0, %v12622_v11  ;;  %v6873_v52 = vmul.f32 %v12622_v11, %v14272_v27 }
0x16df   :  { %v6869_v57 = vadd.f32 %v6868_v1, %v5158_v21 }
0x16e1   :  { %12623 = vtanh.f32 %v6869_v57 }
0x16eb   :  { %v12624_v61 = vpop.eup %12623 }
0x16ec   :  { %v6872_v3 = vmul.f32 %v12624_v61, %v6871_v31 }
0x16ee   :  { %v14311_v14 = vadd.f32 %v6873_v52, %v6872_v3  ;;  %v5163_v3 = vadd.f32 %v13945_v50, %v14079_v29  ;;  %v12285_v50 = vld [vmem:[#allocation10 + $0x8] ss:$12 sps:$4 sm:$0xff]  }
0x16f0   :  { %v6881_v10 = vpack.c.bf16 %v14311_v14, %v14311_v14 }
0x16f2   :  { %7075 = vmatmul.mubr.bf16.vlgmr.msra.gmra.mrb[120].mxu0 %v6881_v10  ;;  %11676 = vmatmul.mubr.bf16.vlgmr.msra.gmra.mrb[152].mxu1 %v6881_v10 }
0x16f3   :  { %7313 = vmatpush1.bf16.msra.mxu0 %v14170_v39  ;;  %7344 = vmatprep.mubr.bf16.mxu0 %v14829_v59 }
0x16f4   :  { %7314 = vmatprep.subr.bf16.mxu0 %v14174_v5  ;;  %11695 = vmatprep.mubr.msk.bf16.mxu1 %vm12846_vm1, %v14830_v40 }
0x16f5   :  { %11680 = vmatpush3.bf16.msra.mxu1 %v12277_v42 }
0x16f6   :  { %11681 = vmatprep.subr.bf16.mxu1 %v14830_v40 }
0x16f7   :  { %7315 = vmatpush1.bf16.msra.mxu0 %v14177_v44 }
0x16f8   :  { %7316 = vmatprep.subr.bf16.mxu0 %v14181_v58 }
0x16f9   :  { %11682 = vmatpush3.bf16.msra.mxu1 %v12278_v36 }
0x16fa   :  { %11683 = vmatprep.subr.bf16.mxu1 %v14830_v40 }
0x16fb   :  { %7317 = vmatpush1.bf16.msra.mxu0 %v14184_v47 }
0x16fc   :  { %7318 = vmatprep.subr.bf16.mxu0 %v14188_v33 }
0x16fd   :  { %11684 = vmatpush3.bf16.msra.mxu1 %v12279_v25 }
0x16fe   :  { %11685 = vmatprep.subr.bf16.mxu1 %v14830_v40 }
0x16ff   :  { %7319 = vmatpush1.bf16.msra.mxu0 %v14191_v0 }
0x1700   :  { %7320 = vmatprep.subr.bf16.mxu0 %v14197_v17 }
0x1701   :  { %11686 = vmatpush3.bf16.msra.mxu1 %v12280_v54 }
0x1702   :  { %11687 = vmatprep.subr.bf16.mxu1 %v14830_v40 }
0x1703   :  { %7321 = vmatpush1.bf16.msra.mxu0 %v14195_v34 }
0x1704   :  { %7322 = vmatprep.subr.bf16.mxu0 %v14200_v41 }
0x1705   :  { %11688 = vmatpush3.bf16.msra.mxu1 %v12281_v49 }
0x1706   :  { %11689 = vmatprep.subr.bf16.mxu1 %v14830_v40 }
0x1707   :  { %7323 = vmatpush1.bf16.msra.mxu0 %v14204_v12 }
0x1708   :  { %7324 = vmatprep.subr.bf16.mxu0 %v14208_v13 }
0x1709   :  { %11690 = vmatpush3.bf16.msra.mxu1 %v12282_v16 }
0x170a   :  { %11691 = vmatprep.subr.bf16.mxu1 %v14830_v40 }
0x170b   :  { %7325 = vmatpush1.bf16.msra.mxu0 %v14211_v38 }
0x170c   :  { %7326 = vmatprep.subr.bf16.mxu0 %v14215_v48 }
0x170f   :  { %7327 = vmatpush1.bf16.msra.mxu0 %v14218_v32 }
0x1710   :  { %7582 = vmatprep.subr.bf16.mxu0 %v14168_v55  ;;  %v12283_v55 = vld [vmem:[#allocation10 + $0x98] ss:$12 sps:$4 sm:$0xff]  }
0x1711   :  { %11692 = vmatpush3.bf16.msra.mxu1 %v12283_v55 }
0x1712   :  { %11693 = vmatprep.subr.bf16.mxu1 %v14830_v40 }
0x1715   :  { %11694 = vmatpush3.bf16.msra.mxu1 %v12284_v22 }
0x1716   :  { %11699 = vmatprep.subr.bf16.mxu1 %v14830_v40 }
0x17c5   :  { %v7076_v46 = vpop.f32.mrb[120].mxu0  ;;  %v7117_v6 = vpop.f32.mrb[152].mxu1 }
0x17c6   :  { %v7124_v24 = vadd.f32 %v7076_v46, %v5056_v15  ;;  %v7078_v26 = vpop.f32.mrb[121].mxu0  ;;  %v11677_v20 = vpop.f32.mrb[153].mxu1  ;;  %v7123_v56 = vadd.f32 %v14075_v43, %v7117_v6  ;;  %v12286_v43 = vld [vmem:[#allocation10 + $0x20] ss:$12 sps:$4 sm:$0xff]  }
0x17c7   :  { %v7131_v18 = vadd.f32 %v7078_v26, %v5058_v23  ;;  %v7080_v8 = vpop.f32.mrb[122].mxu0  ;;  %v7120_v19 = vpop.f32.mrb[154].mxu1 }
0x17c8   :  { %v10516_v28 = vmul.f32 -1.442695, %v7124_v24  ;;  %v7081_v62 = vpop.f32.mrb[123].mxu0  ;;  %v11678_v21 = vpop.f32.mrb[155].mxu1  ;;  %v5166_v19 = vadd.f32 %v13953_v63, %v14079_v29  ;;  %v14400_v63 = vld [vmem:[#allocation10 + $0x4] ss:$12 sps:$4 sm:$0xff]  }
0x17c9   :  { %v10517_v1 = vmul.f32 -1.442695, %v7131_v18 }
0x17ca   :  { %12625 = vpow2.f32 %v10516_v28 }
0x17cb   :  { %12627 = vpow2.f32 %v10517_v1 }
0x17d4   :  { %v12626_v57 = vpop.eup %12625 }
0x17d5   :  { %v7128_v11 = vadd.f32 1.0, %v12626_v57  ;;  %v12628_v60 = vpop.eup %12627 }
0x17d6   :  { %v7135_v31 = vadd.f32 1.0, %v12628_v60 }
0x17d7   :  { %12629 = vrcp.f32 %v7128_v11 }
0x17d8   :  { %12631 = vrcp.f32 %v7135_v31 }
0x17e1   :  { %v12630_v61 = vpop.eup %12629 }
0x17e2   :  { %v7138_v52 = vmul.f32 %v12630_v61, %v7123_v56  ;;  %v12632_v42 = vpop.eup %12631  ;;  %v14402_v61 = vld [vmem:[#allocation10] ss:$12 sps:$4 sm:$0xff]  }
0x17e3   :  { %v7141_v36 = vsub.f32 1.0, %v12632_v42  ;;  %v7143_v49 = vmul.f32 %v12632_v42, %v14311_v14  ;;  %v12300_v42 = vld [vmem:[#allocation10 + $0x20] ss:$12 sps:$4 sm:$0xff]  }
0x17e4   :  { %v7139_v10 = vadd.f32 %v7138_v52, %v5163_v3  ;;  %v12296_v3 = vld [vmem:[#allocation10 + $0x8] ss:$12 sps:$4 sm:$0xff]  }
0x17e5   :  { %v14406_v52 = vld [vmem:[#allocation10 + $0x1c] ss:$12 sps:$4 sm:$0xff]  }
0x17e6   :  { %12633 = vtanh.f32 %v7139_v10  ;;  %v14409_v10 = vld [vmem:[#allocation10 + $0x18] ss:$12 sps:$4 sm:$0xff]  }
0x17f0   :  { %v12634_v25 = vpop.eup %12633 }
0x17f1   :  { %v7142_v54 = vmul.f32 %v12634_v25, %v7141_v36  ;;  %v14413_v36 = vld [vmem:[#allocation10 + $0x34] ss:$12 sps:$4 sm:$0xff]   ;;  %v14416_v25 = vld [vmem:[#allocation10 + $0x30] ss:$12 sps:$4 sm:$0xff]  }
0x17f3   :  { %v14350_v16 = vadd.f32 %v7143_v49, %v7142_v54  ;;  %v12304_v54 = vld [vmem:[#allocation10 + $0x38] ss:$12 sps:$4 sm:$0xff]  }
0x17f4   :  { %v14420_v49 = vld [vmem:[#allocation10 + $0x4c] ss:$12 sps:$4 sm:$0xff]  }
0x17f5   :  { %v7151_v55 = vpack.c.bf16 %v14350_v16, %v14350_v16 }
0x17f7   :  { %7345 = vmatmul.mubr.bf16.vlgmr.msra.gmra.mrb[124].mxu0 %v7151_v55  ;;  %11696 = vmatmul.mubr.bf16.vlgmr.msra.gmra.mrb[156].mxu1 %v7151_v55  ;;  %v14423_v55 = vld [vmem:[#allocation10 + $0x48] ss:$12 sps:$4 sm:$0xff]  }
0x17f8   :  { %7583 = vmatpush1.bf16.msra.mxu0 %v14170_v39  ;;  %7614 = vmatprep.mubr.bf16.mxu0 %v14829_v59  ;;  %v12287_v39 = vld [vmem:[#allocation10 + $0x38] ss:$12 sps:$4 sm:$0xff]  }
0x17f9   :  { %7584 = vmatprep.subr.bf16.mxu0 %v14174_v5  ;;  %11715 = vmatprep.mubr.msk.bf16.mxu1 %vm12846_vm1, %v14830_v40  ;;  %v12288_v5 = vld [vmem:[#allocation10 + $0x50] ss:$12 sps:$4 sm:$0xff]  }
0x17fa   :  { %11700 = vmatpush3.bf16.msra.mxu1 %v12285_v50  ;;  %v12308_v50 = vld [vmem:[#allocation10 + $0x50] ss:$12 sps:$4 sm:$0xff]  }
0x17fb   :  { %11701 = vmatprep.subr.bf16.mxu1 %v14830_v40 }
0x17fc   :  { %7585 = vmatpush1.bf16.msra.mxu0 %v14177_v44  ;;  %v12289_v44 = vld [vmem:[#allocation10 + $0x68] ss:$12 sps:$4 sm:$0xff]  }
0x17fd   :  { %7586 = vmatprep.subr.bf16.mxu0 %v14181_v58  ;;  %v12290_v58 = vld [vmem:[#allocation10 + $0x80] ss:$12 sps:$4 sm:$0xff]  }
0x17fe   :  { %11702 = vmatpush3.bf16.msra.mxu1 %v12286_v43  ;;  %v14427_v43 = vld [vmem:[#allocation10 + $0x60] ss:$12 sps:$4 sm:$0xff]  }
0x17ff   :  { %11703 = vmatprep.subr.bf16.mxu1 %v14830_v40 }
0x1800   :  { %7587 = vmatpush1.bf16.msra.mxu0 %v14184_v47  ;;  %v12291_v47 = vld [vmem:[#allocation10 + $0x98] ss:$12 sps:$4 sm:$0xff]  }
0x1801   :  { %7588 = vmatprep.subr.bf16.mxu0 %v14188_v33  ;;  %v12292_v33 = vld [vmem:[#allocation10 + $0xb0] ss:$12 sps:$4 sm:$0xff]  }
0x1802   :  { %11704 = vmatpush3.bf16.msra.mxu1 %v12287_v39  ;;  %v14429_v39 = vld [vmem:[#allocation10 + $0x64] ss:$12 sps:$4 sm:$0xff]  }
0x1803   :  { %11705 = vmatprep.subr.bf16.mxu1 %v14830_v40 }
0x1804   :  { %7589 = vmatpush1.bf16.msra.mxu0 %v14191_v0  ;;  %v5060_v0 = vadd.f32 %v13984_v35, %v14058_v7 }
0x1805   :  { %7590 = vmatprep.subr.bf16.mxu0 %v14197_v17 }
0x1806   :  { %11706 = vmatpush3.bf16.msra.mxu1 %v12288_v5  ;;  %v12312_v5 = vld [vmem:[#allocation10 + $0x68] ss:$12 sps:$4 sm:$0xff]  }
0x1807   :  { %11707 = vmatprep.subr.bf16.mxu1 %v14830_v40 }
0x1808   :  { %7591 = vmatpush1.bf16.msra.mxu0 %v14195_v34  ;;  %v5062_v34 = vadd.f32 %v13988_v53, %v14066_v37  ;;  %v14387_v53 = vld [vmem:[%s14796_s8] ss:$0 sm:$0xff] }
0x1809   :  { %7592 = vmatprep.subr.bf16.mxu0 %v14200_v41 }
0x180a   :  { %11708 = vmatpush3.bf16.msra.mxu1 %v12289_v44  ;;  %v14432_v44 = vld [vmem:[#allocation10 + $0x7c] ss:$12 sps:$4 sm:$0xff]  }
0x180b   :  { %11709 = vmatprep.subr.bf16.mxu1 %v14830_v40 }
0x180c   :  { %7593 = vmatpush1.bf16.msra.mxu0 %v14204_v12 }
0x180d   :  { %7594 = vmatprep.subr.bf16.mxu0 %v14208_v13 }
0x180e   :  { %11710 = vmatpush3.bf16.msra.mxu1 %v12290_v58  ;;  %v14436_v58 = vld [vmem:[#allocation10 + $0x78] ss:$12 sps:$4 sm:$0xff]  }
0x180f   :  { %11711 = vmatprep.subr.bf16.mxu1 %v14830_v40 }
0x1810   :  { %7595 = vmatpush1.bf16.msra.mxu0 %v14211_v38 }
0x1811   :  { %7596 = vmatprep.subr.bf16.mxu0 %v14215_v48 }
0x1812   :  { %11712 = vmatpush3.bf16.msra.mxu1 %v12291_v47  ;;  %v12316_v47 = vld [vmem:[#allocation10 + $0x80] ss:$12 sps:$4 sm:$0xff]  }
0x1813   :  { %11713 = vmatprep.subr.bf16.mxu1 %v14830_v40 }
0x1814   :  { %7597 = vmatpush1.bf16.msra.mxu0 %v14218_v32 }
0x1815   :  { %7852 = vmatprep.subr.bf16.mxu0 %v14400_v63 }
0x1816   :  { %11714 = vmatpush3.bf16.msra.mxu1 %v12292_v33  ;;  %v14440_v33 = vld [vmem:[#allocation10 + $0x94] ss:$12 sps:$4 sm:$0xff]  }
0x1817   :  { %11719 = vmatprep.subr.bf16.mxu1 %v14830_v40 }
0x18ca   :  { %v7346_v17 = vpop.f32.mrb[124].mxu0  ;;  %v7387_v41 = vpop.f32.mrb[156].mxu1 }
0x18cb   :  { %v7394_v12 = vadd.f32 %v7346_v17, %v5060_v0  ;;  %v7348_v13 = vpop.f32.mrb[125].mxu0  ;;  %v11697_v38 = vpop.f32.mrb[157].mxu1  ;;  %v7393_v18 = vadd.f32 %v14387_v53, %v7387_v41  ;;  %v14443_v0 = vld [vmem:[#allocation10 + $0x90] ss:$12 sps:$4 sm:$0xff]   ;;  %v14447_v17 = vld [vmem:[#allocation10 + $0xac] ss:$12 sps:$4 sm:$0xff]  }
0x18cc   :  { %v7401_v48 = vadd.f32 %v7348_v13, %v5062_v34  ;;  %v7350_v32 = vpop.f32.mrb[126].mxu0  ;;  %v7390_v22 = vpop.f32.mrb[158].mxu1  ;;  %v12320_v34 = vld [vmem:[#allocation10 + $0x98] ss:$12 sps:$4 sm:$0xff]   ;;  %v14450_v41 = vld [vmem:[#allocation10 + $0xa8] ss:$12 sps:$4 sm:$0xff]   ;;  %v5066_v13 = vadd.f32 %v13996_v2, %v14058_v7  ;;  %v5068_v38 = vadd.f32 %v13999_v4, %v14066_v37 }
0x18cd   :  { %v10542_v15 = vmul.f32 -1.442695, %v7394_v12  ;;  %v7351_v23 = vpop.f32.mrb[127].mxu0  ;;  %v11698_v46 = vpop.f32.mrb[159].mxu1  ;;  %v12324_v12 = vld [vmem:[#allocation10 + $0xb0] ss:$12 sps:$4 sm:$0xff]  }
0x18ce   :  { %v10543_v6 = vmul.f32 -1.442695, %v7401_v48 }
0x18cf   :  { %12635 = vpow2.f32 %v10542_v15 }
0x18d0   :  { %12637 = vpow2.f32 %v10543_v6 }
0x18d9   :  { %v12636_v24 = vpop.eup %12635 }
0x18da   :  { %v7398_v26 = vadd.f32 1.0, %v12636_v24  ;;  %v12638_v35 = vpop.eup %12637 }
0x18db   :  { %v7405_v20 = vadd.f32 1.0, %v12638_v35 }
0x18dc   :  { %12639 = vrcp.f32 %v7398_v26 }
0x18dd   :  { %12641 = vrcp.f32 %v7405_v20 }
0x18e6   :  { %v12640_v8 = vpop.eup %12639 }
0x18e7   :  { %v7408_v28 = vmul.f32 %v12640_v8, %v7393_v18  ;;  %v12642_v21 = vpop.eup %12641 }
0x18e8   :  { %v7411_v1 = vsub.f32 1.0, %v12642_v21  ;;  %v7413_v60 = vmul.f32 %v12642_v21, %v14350_v16  ;;  %v14875_v21 = vld [vmem:[#allocation27_spill] sm:$0xff] }
0x18e9   :  { %v7409_v62 = vadd.f32 %v7408_v28, %v5166_v19 }
0x18eb   :  { %12643 = vtanh.f32 %v7409_v62 }
0x18f5   :  { %v12644_v57 = vpop.eup %12643 }
0x18f6   :  { %v7412_v11 = vmul.f32 %v12644_v57, %v7411_v1  ;;  %v5171_v1 = vadd.f32 %v14875_v21, %v14079_v29 }
0x18f8   :  { %v14393_v31 = vadd.f32 %v7413_v60, %v7412_v11 }
0x18fa   :  { %v7421_v56 = vpack.c.bf16 %v14393_v31, %v14393_v31 }
0x18fc   :  { %7615 = vmatmul.mubr.bf16.vlgmr.msra.gmra.mrb[128].mxu0 %v7421_v56  ;;  %11716 = vmatmul.mubr.bf16.vlgmr.msra.gmra.mrb[160].mxu1 %v7421_v56 }
0x18fd   :  { %7884 = vmatprep.mubr.bf16.mxu0 %v14829_v59  ;;  %11735 = vmatprep.mubr.msk.bf16.mxu1 %vm12846_vm1, %v14830_v40 }
0x18fe   :  { %7853 = vmatpush1.bf16.msra.mxu0 %v14402_v61  ;;  %11720 = vmatpush3.bf16.msra.mxu1 %v12296_v3 }
0x18ff   :  { %11721 = vmatprep.subr.bf16.mxu1 %v14830_v40  ;;  %7854 = vmatprep.subr.bf16.mxu0 %v14406_v52 }
0x1902   :  { %7855 = vmatpush1.bf16.msra.mxu0 %v14409_v10  ;;  %11722 = vmatpush3.bf16.msra.mxu1 %v12300_v42 }
0x1903   :  { %11723 = vmatprep.subr.bf16.mxu1 %v14830_v40  ;;  %7856 = vmatprep.subr.bf16.mxu0 %v14413_v36 }
0x1906   :  { %7857 = vmatpush1.bf16.msra.mxu0 %v14416_v25  ;;  %11724 = vmatpush3.bf16.msra.mxu1 %v12304_v54 }
0x1907   :  { %11725 = vmatprep.subr.bf16.mxu1 %v14830_v40  ;;  %7858 = vmatprep.subr.bf16.mxu0 %v14420_v49 }
0x190a   :  { %7859 = vmatpush1.bf16.msra.mxu0 %v14423_v55  ;;  %11726 = vmatpush3.bf16.msra.mxu1 %v12308_v50 }
0x190b   :  { %11727 = vmatprep.subr.bf16.mxu1 %v14830_v40  ;;  %7860 = vmatprep.subr.bf16.mxu0 %v14429_v39 }
0x190e   :  { %7861 = vmatpush1.bf16.msra.mxu0 %v14427_v43  ;;  %11728 = vmatpush3.bf16.msra.mxu1 %v12312_v5 }
0x190f   :  { %7862 = vmatprep.subr.bf16.mxu0 %v14432_v44  ;;  %11729 = vmatprep.subr.bf16.mxu1 %v14830_v40 }
0x1912   :  { %7863 = vmatpush1.bf16.msra.mxu0 %v14436_v58  ;;  %11730 = vmatpush3.bf16.msra.mxu1 %v12316_v47  ;;  %v12325_v47 = vld [vmem:[#allocation10 + $0x8] ss:$12 sps:$4 sm:$0xff]  }
0x1913   :  { %7864 = vmatprep.subr.bf16.mxu0 %v14440_v33  ;;  %11731 = vmatprep.subr.bf16.mxu1 %v14830_v40 }
0x1916   :  { %7865 = vmatpush1.bf16.msra.mxu0 %v14443_v0  ;;  %11732 = vmatpush3.bf16.msra.mxu1 %v12320_v34  ;;  %v12326_v34 = vld [vmem:[#allocation10 + $0x20] ss:$12 sps:$4 sm:$0xff]  }
0x1917   :  { %7866 = vmatprep.subr.bf16.mxu0 %v14447_v17  ;;  %11733 = vmatprep.subr.bf16.mxu1 %v14830_v40 }
0x191a   :  { %7867 = vmatpush1.bf16.msra.mxu0 %v14450_v41  ;;  %11734 = vmatpush3.bf16.msra.mxu1 %v12324_v12  ;;  %v12327_v12 = vld [vmem:[#allocation10 + $0x38] ss:$12 sps:$4 sm:$0xff]  }
0x191b   :  { %8122 = vmatprep.subr.bf16.mxu0 %v14400_v63  ;;  %11739 = vmatprep.subr.bf16.mxu1 %v14830_v40 }
0x19cf   :  { %v7616_v48 = vpop.f32.mrb[128].mxu0  ;;  %v7657_v32 = vpop.f32.mrb[160].mxu1 }
0x19d0   :  { %v7664_v22 = vadd.f32 %v7616_v48, %v5066_v13  ;;  %v7618_v15 = vpop.f32.mrb[129].mxu0  ;;  %v11717_v23 = vpop.f32.mrb[161].mxu1  ;;  %v7663_v4 = vadd.f32 %v14387_v53, %v7657_v32  ;;  %v12328_v13 = vld [vmem:[#allocation10 + $0x50] ss:$12 sps:$4 sm:$0xff]   ;;  %v12330_v48 = vld [vmem:[#allocation10 + $0x80] ss:$12 sps:$4 sm:$0xff]  }
0x19d1   :  { %v7671_v46 = vadd.f32 %v7618_v15, %v5068_v38  ;;  %v7620_v6 = vpop.f32.mrb[130].mxu0  ;;  %v7660_v24 = vpop.f32.mrb[162].mxu1  ;;  %v12329_v38 = vld [vmem:[#allocation10 + $0x68] ss:$12 sps:$4 sm:$0xff]   ;;  %v12331_v32 = vld [vmem:[#allocation10 + $0x98] ss:$12 sps:$4 sm:$0xff]  }
0x19d2   :  { %v10568_v26 = vmul.f32 -1.442695, %v7664_v22  ;;  %v7621_v35 = vpop.f32.mrb[131].mxu0  ;;  %v11718_v20 = vpop.f32.mrb[163].mxu1  ;;  %v12332_v22 = vld [vmem:[#allocation10 + $0xb0] ss:$12 sps:$4 sm:$0xff]  }
0x19d3   :  { %v10569_v18 = vmul.f32 -1.442695, %v7671_v46  ;;  %v14876_v15 = vld [vmem:[#allocation28_spill] sm:$0xff]  ;;  %v14877_v46 = vld [vmem:[#allocation19_spill] sm:$0xff] }
0x19d4   :  { %12645 = vpow2.f32 %v10568_v26  ;;  %v5070_v23 = vadd.f32 %v14876_v15, %v14058_v7  ;;  %v5072_v6 = vadd.f32 %v14877_v46, %v14066_v37  ;;  %v12333_v15 = vld [vmem:[#allocation10 + $0x8] ss:$12 sps:$4 sm:$0xff]   ;;  %v12335_v46 = vld [vmem:[#allocation10 + $0x38] ss:$12 sps:$4 sm:$0xff]  }
0x19d5   :  { %12647 = vpow2.f32 %v10569_v18 }
0x19de   :  { %v12646_v8 = vpop.eup %12645 }
0x19df   :  { %v7668_v19 = vadd.f32 1.0, %v12646_v8  ;;  %v12648_v2 = vpop.eup %12647 }
0x19e0   :  { %v7675_v28 = vadd.f32 1.0, %v12648_v2 }
0x19e1   :  { %12649 = vrcp.f32 %v7668_v19 }
0x19e2   :  { %12651 = vrcp.f32 %v7675_v28 }
0x19eb   :  { %v12650_v62 = vpop.eup %12649 }
0x19ec   :  { %v7678_v57 = vmul.f32 %v12650_v62, %v7663_v4  ;;  %v12652_v60 = vpop.eup %12651 }
0x19ed   :  { %v7681_v56 = vsub.f32 1.0, %v12652_v60  ;;  %v7683_v54 = vmul.f32 %v12652_v60, %v14393_v31 }
0x19ee   :  { %v7679_v11 = vadd.f32 %v7678_v57, %v5171_v1 }
0x19f0   :  { %12653 = vtanh.f32 %v7679_v11 }
0x19fa   :  { %v12654_v3 = vpop.eup %12653 }
0x19fb   :  { %v7682_v42 = vmul.f32 %v12654_v3, %v7681_v56 }
0x19fd   :  { %v14465_v50 = vadd.f32 %v7683_v54, %v7682_v42  ;;  %v14878_v42 = vld [vmem:[#allocation18_spill] sm:$0xff] }
0x19fe   :  { %v5174_v54 = vadd.f32 %v14878_v42, %v14079_v29 }
0x19ff   :  { %v7691_v5 = vpack.c.bf16 %v14465_v50, %v14465_v50 }
0x1a01   :  { %7885 = vmatmul.mubr.bf16.vlgmr.msra.gmra.mrb[132].mxu0 %v7691_v5  ;;  %11736 = vmatmul.mubr.bf16.vlgmr.msra.gmra.mrb[164].mxu1 %v7691_v5 }
0x1a02   :  { %8123 = vmatpush1.bf16.msra.mxu0 %v14402_v61  ;;  %8154 = vmatprep.mubr.bf16.mxu0 %v14829_v59 }
0x1a03   :  { %8124 = vmatprep.subr.bf16.mxu0 %v14406_v52  ;;  %11755 = vmatprep.mubr.msk.bf16.mxu1 %vm12846_vm1, %v14830_v40 }
0x1a04   :  { %11740 = vmatpush3.bf16.msra.mxu1 %v12325_v47 }
0x1a05   :  { %11741 = vmatprep.subr.bf16.mxu1 %v14830_v40 }
0x1a06   :  { %8125 = vmatpush1.bf16.msra.mxu0 %v14409_v10 }
0x1a07   :  { %8126 = vmatprep.subr.bf16.mxu0 %v14413_v36 }
0x1a08   :  { %11742 = vmatpush3.bf16.msra.mxu1 %v12326_v34 }
0x1a09   :  { %11743 = vmatprep.subr.bf16.mxu1 %v14830_v40 }
0x1a0a   :  { %8127 = vmatpush1.bf16.msra.mxu0 %v14416_v25 }
0x1a0b   :  { %8128 = vmatprep.subr.bf16.mxu0 %v14420_v49 }
0x1a0c   :  { %11744 = vmatpush3.bf16.msra.mxu1 %v12327_v12 }
0x1a0d   :  { %11745 = vmatprep.subr.bf16.mxu1 %v14830_v40 }
0x1a0e   :  { %8129 = vmatpush1.bf16.msra.mxu0 %v14423_v55 }
0x1a0f   :  { %8130 = vmatprep.subr.bf16.mxu0 %v14429_v39 }
0x1a10   :  { %11746 = vmatpush3.bf16.msra.mxu1 %v12328_v13 }
0x1a11   :  { %11747 = vmatprep.subr.bf16.mxu1 %v14830_v40 }
0x1a12   :  { %8131 = vmatpush1.bf16.msra.mxu0 %v14427_v43 }
0x1a13   :  { %8132 = vmatprep.subr.bf16.mxu0 %v14432_v44 }
0x1a14   :  { %11748 = vmatpush3.bf16.msra.mxu1 %v12329_v38 }
0x1a15   :  { %11749 = vmatprep.subr.bf16.mxu1 %v14830_v40 }
0x1a16   :  { %8133 = vmatpush1.bf16.msra.mxu0 %v14436_v58 }
0x1a17   :  { %8134 = vmatprep.subr.bf16.mxu0 %v14440_v33 }
0x1a18   :  { %11750 = vmatpush3.bf16.msra.mxu1 %v12330_v48 }
0x1a19   :  { %11751 = vmatprep.subr.bf16.mxu1 %v14830_v40 }
0x1a1a   :  { %8135 = vmatpush1.bf16.msra.mxu0 %v14443_v0 }
0x1a1b   :  { %8136 = vmatprep.subr.bf16.mxu0 %v14447_v17 }
0x1a1c   :  { %11752 = vmatpush3.bf16.msra.mxu1 %v12331_v32 }
0x1a1d   :  { %11753 = vmatprep.subr.bf16.mxu1 %v14830_v40 }
0x1a1e   :  { %8137 = vmatpush1.bf16.msra.mxu0 %v14450_v41 }
0x1a1f   :  { %8392 = vmatprep.subr.bf16.mxu0 %v14400_v63 }
0x1a20   :  { %11754 = vmatpush3.bf16.msra.mxu1 %v12332_v22 }
0x1a21   :  { %11759 = vmatprep.subr.bf16.mxu1 %v14830_v40 }
0x1ad4   :  { %v7886_v24 = vpop.f32.mrb[132].mxu0  ;;  %v7927_v26 = vpop.f32.mrb[164].mxu1 }
0x1ad5   :  { %v7934_v35 = vadd.f32 %v7886_v24, %v5070_v23  ;;  %v7888_v20 = vpop.f32.mrb[133].mxu0  ;;  %v11737_v18 = vpop.f32.mrb[165].mxu1  ;;  %v7933_v56 = vadd.f32 %v14387_v53, %v7927_v26  ;;  %v12334_v23 = vld [vmem:[#allocation10 + $0x20] ss:$12 sps:$4 sm:$0xff]   ;;  %v12337_v24 = vld [vmem:[#allocation10 + $0x68] ss:$12 sps:$4 sm:$0xff]  }
0x1ad6   :  { %v7941_v8 = vadd.f32 %v7888_v20, %v5072_v6  ;;  %v7890_v19 = vpop.f32.mrb[134].mxu0  ;;  %v7930_v2 = vpop.f32.mrb[166].mxu1  ;;  %v12336_v6 = vld [vmem:[#allocation10 + $0x50] ss:$12 sps:$4 sm:$0xff]   ;;  %v12338_v26 = vld [vmem:[#allocation10 + $0x80] ss:$12 sps:$4 sm:$0xff]  }
0x1ad7   :  { %v10594_v28 = vmul.f32 -1.442695, %v7934_v35  ;;  %v7891_v4 = vpop.f32.mrb[135].mxu0  ;;  %v11738_v62 = vpop.f32.mrb[167].mxu1  ;;  %v12339_v35 = vld [vmem:[#allocation10 + $0x98] ss:$12 sps:$4 sm:$0xff]  }
0x1ad8   :  { %v10595_v21 = vmul.f32 -1.442695, %v7941_v8  ;;  %v12340_v20 = vld [vmem:[#allocation10 + $0xb0] ss:$12 sps:$4 sm:$0xff]   ;;  %v14879_v18 = vld [vmem:[#allocation20_spill] sm:$0xff] }
0x1ad9   :  { %12655 = vpow2.f32 %v10594_v28  ;;  %v5076_v8 = vadd.f32 %v14879_v18, %v14058_v7  ;;  %v14880_v19 = vld [vmem:[#allocation30_spill] sm:$0xff] }
0x1ada   :  { %12657 = vpow2.f32 %v10595_v21  ;;  %v5078_v2 = vadd.f32 %v14880_v19, %v14066_v37  ;;  %v12342_v19 = vld [vmem:[#allocation10 + $0x20] ss:$12 sps:$4 sm:$0xff]  }
0x1ae3   :  { %v12656_v1 = vpop.eup %12655 }
0x1ae4   :  { %v7938_v57 = vadd.f32 1.0, %v12656_v1  ;;  %v12658_v11 = vpop.eup %12657 }
0x1ae5   :  { %v7945_v60 = vadd.f32 1.0, %v12658_v11 }
0x1ae6   :  { %12659 = vrcp.f32 %v7938_v57 }
0x1ae7   :  { %12661 = vrcp.f32 %v7945_v60 }
0x1af0   :  { %v12660_v3 = vpop.eup %12659 }
0x1af1   :  { %v7948_v5 = vmul.f32 %v12660_v3, %v7933_v56  ;;  %v12662_v34 = vpop.eup %12661 }
0x1af2   :  { %v7951_v12 = vsub.f32 1.0, %v12662_v34  ;;  %v7953_v48 = vmul.f32 %v12662_v34, %v14465_v50 }
0x1af3   :  { %v7949_v47 = vadd.f32 %v7948_v5, %v5174_v54 }
0x1af5   :  { %12663 = vtanh.f32 %v7949_v47 }
0x1aff   :  { %v12664_v13 = vpop.eup %12663 }
0x1b00   :  { %v7952_v38 = vmul.f32 %v12664_v13, %v7951_v12 }
0x1b02   :  { %v14504_v32 = vadd.f32 %v7953_v48, %v7952_v38  ;;  %v14881_v48 = vld [vmem:[#allocation16_spill] sm:$0xff] }
0x1b04   :  { %v7961_v22 = vpack.c.bf16 %v14504_v32, %v14504_v32 }
0x1b06   :  { %8155 = vmatmul.mubr.bf16.vlgmr.msra.gmra.mrb[136].mxu0 %v7961_v22  ;;  %11756 = vmatmul.mubr.bf16.vlgmr.msra.gmra.mrb[168].mxu1 %v7961_v22  ;;  %v5179_v22 = vadd.f32 %v14881_v48, %v14079_v29 }
0x1b07   :  { %8393 = vmatpush1.bf16.msra.mxu0 %v14402_v61  ;;  %8424 = vmatprep.mubr.bf16.mxu0 %v14829_v59 }
0x1b08   :  { %8394 = vmatprep.subr.bf16.mxu0 %v14406_v52  ;;  %11775 = vmatprep.mubr.msk.bf16.mxu1 %vm12846_vm1, %v14830_v40 }
0x1b09   :  { %11760 = vmatpush3.bf16.msra.mxu1 %v12333_v15 }
0x1b0a   :  { %11761 = vmatprep.subr.bf16.mxu1 %v14830_v40 }
0x1b0b   :  { %8395 = vmatpush1.bf16.msra.mxu0 %v14409_v10 }
0x1b0c   :  { %8396 = vmatprep.subr.bf16.mxu0 %v14413_v36 }
0x1b0d   :  { %11762 = vmatpush3.bf16.msra.mxu1 %v12334_v23 }
0x1b0e   :  { %11763 = vmatprep.subr.bf16.mxu1 %v14830_v40 }
0x1b0f   :  { %8397 = vmatpush1.bf16.msra.mxu0 %v14416_v25 }
0x1b10   :  { %8398 = vmatprep.subr.bf16.mxu0 %v14420_v49 }
0x1b11   :  { %11764 = vmatpush3.bf16.msra.mxu1 %v12335_v46 }
0x1b12   :  { %11765 = vmatprep.subr.bf16.mxu1 %v14830_v40 }
0x1b13   :  { %8399 = vmatpush1.bf16.msra.mxu0 %v14423_v55 }
0x1b14   :  { %8400 = vmatprep.subr.bf16.mxu0 %v14429_v39 }
0x1b15   :  { %11766 = vmatpush3.bf16.msra.mxu1 %v12336_v6 }
0x1b16   :  { %11767 = vmatprep.subr.bf16.mxu1 %v14830_v40 }
0x1b17   :  { %8401 = vmatpush1.bf16.msra.mxu0 %v14427_v43 }
0x1b18   :  { %8402 = vmatprep.subr.bf16.mxu0 %v14432_v44 }
0x1b19   :  { %11768 = vmatpush3.bf16.msra.mxu1 %v12337_v24 }
0x1b1a   :  { %11769 = vmatprep.subr.bf16.mxu1 %v14830_v40 }
0x1b1b   :  { %8403 = vmatpush1.bf16.msra.mxu0 %v14436_v58 }
0x1b1c   :  { %8404 = vmatprep.subr.bf16.mxu0 %v14440_v33 }
0x1b1d   :  { %11770 = vmatpush3.bf16.msra.mxu1 %v12338_v26 }
0x1b1e   :  { %11771 = vmatprep.subr.bf16.mxu1 %v14830_v40 }
0x1b1f   :  { %8405 = vmatpush1.bf16.msra.mxu0 %v14443_v0 }
0x1b20   :  { %8406 = vmatprep.subr.bf16.mxu0 %v14447_v17 }
0x1b21   :  { %11772 = vmatpush3.bf16.msra.mxu1 %v12339_v35 }
0x1b22   :  { %11773 = vmatprep.subr.bf16.mxu1 %v14830_v40 }
0x1b23   :  { %8407 = vmatpush1.bf16.msra.mxu0 %v14450_v41 }
0x1b24   :  { %8662 = vmatprep.subr.bf16.mxu0 %v14400_v63 }
0x1b25   :  { %11774 = vmatpush3.bf16.msra.mxu1 %v12340_v20 }
0x1b26   :  { %11779 = vmatprep.subr.bf16.mxu1 %v14830_v40 }
0x1bd9   :  { %v8156_v28 = vpop.f32.mrb[136].mxu0  ;;  %v8197_v4 = vpop.f32.mrb[168].mxu1 }
0x1bda   :  { %v8204_v62 = vadd.f32 %v8156_v28, %v5076_v8  ;;  %v8158_v21 = vpop.f32.mrb[137].mxu0  ;;  %v11757_v1 = vpop.f32.mrb[169].mxu1  ;;  %v8203_v13 = vadd.f32 %v14387_v53, %v8197_v4  ;;  %v12341_v8 = vld [vmem:[#allocation10 + $0x8] ss:$12 sps:$4 sm:$0xff]   ;;  %v12344_v28 = vld [vmem:[#allocation10 + $0x50] ss:$12 sps:$4 sm:$0xff]  }
0x1bdb   :  { %v8211_v57 = vadd.f32 %v8158_v21, %v5078_v2  ;;  %v8160_v11 = vpop.f32.mrb[138].mxu0  ;;  %v8200_v60 = vpop.f32.mrb[170].mxu1  ;;  %v12343_v2 = vld [vmem:[#allocation10 + $0x38] ss:$12 sps:$4 sm:$0xff]   ;;  %v12345_v4 = vld [vmem:[#allocation10 + $0x68] ss:$12 sps:$4 sm:$0xff]  }
0x1bdc   :  { %v10620_v56 = vmul.f32 -1.442695, %v8204_v62  ;;  %v8161_v3 = vpop.f32.mrb[139].mxu0  ;;  %v11758_v42 = vpop.f32.mrb[171].mxu1  ;;  %v12346_v62 = vld [vmem:[#allocation10 + $0x80] ss:$12 sps:$4 sm:$0xff]  }
0x1bdd   :  { %v10621_v54 = vmul.f32 -1.442695, %v8211_v57  ;;  %v12348_v21 = vld [vmem:[#allocation10 + $0xb0] ss:$12 sps:$4 sm:$0xff]  }
0x1bde   :  { %12665 = vpow2.f32 %v10620_v56  ;;  %v14882_v1 = vld [vmem:[#allocation21_spill] sm:$0xff]  ;;  %v14883_v11 = vld [vmem:[#allocation22_spill] sm:$0xff] }
0x1bdf   :  { %12667 = vpow2.f32 %v10621_v54  ;;  %v5080_v57 = vadd.f32 %v14882_v1, %v14058_v7  ;;  %v5082_v60 = vadd.f32 %v14883_v11, %v14066_v37 }
0x1be8   :  { %v12666_v5 = vpop.eup %12665 }
0x1be9   :  { %v8208_v47 = vadd.f32 1.0, %v12666_v5  ;;  %v12668_v34 = vpop.eup %12667 }
0x1bea   :  { %v8215_v12 = vadd.f32 1.0, %v12668_v34 }
0x1beb   :  { %12669 = vrcp.f32 %v8208_v47 }
0x1bec   :  { %12671 = vrcp.f32 %v8215_v12 }
0x1bf5   :  { %v12670_v38 = vpop.eup %12669 }
0x1bf6   :  { %v8218_v15 = vmul.f32 %v12670_v38, %v8203_v13  ;;  %v12672_v46 = vpop.eup %12671 }
0x1bf7   :  { %v8221_v6 = vsub.f32 1.0, %v12672_v46  ;;  %v8223_v35 = vmul.f32 %v12672_v46, %v14504_v32 }
0x1bf8   :  { %v8219_v23 = vadd.f32 %v8218_v15, %v5179_v22 }
0x1bfa   :  { %12673 = vtanh.f32 %v8219_v23 }
0x1c04   :  { %v12674_v24 = vpop.eup %12673 }
0x1c05   :  { %v8222_v26 = vmul.f32 %v12674_v24, %v8221_v6 }
0x1c07   :  { %v14543_v20 = vadd.f32 %v8223_v35, %v8222_v26  ;;  %v14884_v35 = vld [vmem:[#allocation17_spill] sm:$0xff] }
0x1c09   :  { %v8231_v18 = vpack.c.bf16 %v14543_v20, %v14543_v20 }
0x1c0b   :  { %8425 = vmatmul.mubr.bf16.vlgmr.msra.gmra.mrb[140].mxu0 %v8231_v18  ;;  %11776 = vmatmul.mubr.bf16.vlgmr.msra.gmra.mrb[172].mxu1 %v8231_v18  ;;  %v5182_v18 = vadd.f32 %v14884_v35, %v14079_v29 }
0x1c0c   :  { %8663 = vmatpush1.bf16.msra.mxu0 %v14402_v61  ;;  %8694 = vmatprep.mubr.bf16.mxu0 %v14829_v59 }
0x1c0d   :  { %8664 = vmatprep.subr.bf16.mxu0 %v14406_v52  ;;  %11795 = vmatprep.mubr.msk.bf16.mxu1 %vm12846_vm1, %v14830_v40 }
0x1c0e   :  { %11780 = vmatpush3.bf16.msra.mxu1 %v12341_v8 }
0x1c0f   :  { %11781 = vmatprep.subr.bf16.mxu1 %v14830_v40 }
0x1c10   :  { %8665 = vmatpush1.bf16.msra.mxu0 %v14409_v10 }
0x1c11   :  { %8666 = vmatprep.subr.bf16.mxu0 %v14413_v36 }
0x1c12   :  { %11782 = vmatpush3.bf16.msra.mxu1 %v12342_v19 }
0x1c13   :  { %11783 = vmatprep.subr.bf16.mxu1 %v14830_v40 }
0x1c14   :  { %8667 = vmatpush1.bf16.msra.mxu0 %v14416_v25 }
0x1c15   :  { %8668 = vmatprep.subr.bf16.mxu0 %v14420_v49 }
0x1c16   :  { %11784 = vmatpush3.bf16.msra.mxu1 %v12343_v2 }
0x1c17   :  { %11785 = vmatprep.subr.bf16.mxu1 %v14830_v40 }
0x1c18   :  { %8669 = vmatpush1.bf16.msra.mxu0 %v14423_v55 }
0x1c19   :  { %8670 = vmatprep.subr.bf16.mxu0 %v14429_v39 }
0x1c1a   :  { %11786 = vmatpush3.bf16.msra.mxu1 %v12344_v28 }
0x1c1b   :  { %11787 = vmatprep.subr.bf16.mxu1 %v14830_v40 }
0x1c1c   :  { %8671 = vmatpush1.bf16.msra.mxu0 %v14427_v43 }
0x1c1d   :  { %8672 = vmatprep.subr.bf16.mxu0 %v14432_v44 }
0x1c1e   :  { %11788 = vmatpush3.bf16.msra.mxu1 %v12345_v4 }
0x1c1f   :  { %11789 = vmatprep.subr.bf16.mxu1 %v14830_v40 }
0x1c20   :  { %8673 = vmatpush1.bf16.msra.mxu0 %v14436_v58 }
0x1c21   :  { %8674 = vmatprep.subr.bf16.mxu0 %v14440_v33 }
0x1c22   :  { %11790 = vmatpush3.bf16.msra.mxu1 %v12346_v62 }
0x1c23   :  { %11791 = vmatprep.subr.bf16.mxu1 %v14830_v40 }
0x1c24   :  { %8675 = vmatpush1.bf16.msra.mxu0 %v14443_v0 }
0x1c25   :  { %8676 = vmatprep.subr.bf16.mxu0 %v14447_v17 }
0x1c28   :  { %8677 = vmatpush1.bf16.msra.mxu0 %v14450_v41 }
0x1c29   :  { %8932 = vmatprep.subr.bf16.mxu0 %v14400_v63  ;;  %v12347_v63 = vld [vmem:[#allocation10 + $0x98] ss:$12 sps:$4 sm:$0xff]  }
0x1c2a   :  { %11792 = vmatpush3.bf16.msra.mxu1 %v12347_v63 }
0x1c2b   :  { %11793 = vmatprep.subr.bf16.mxu1 %v14830_v40 }
0x1c2e   :  { %11794 = vmatpush3.bf16.msra.mxu1 %v12348_v21 }
0x1c2f   :  { %11799 = vmatprep.subr.bf16.mxu1 %v14830_v40 }
0x1cde   :  { %v8426_v56 = vpop.f32.mrb[140].mxu0  ;;  %v8467_v3 = vpop.f32.mrb[172].mxu1 }
0x1cdf   :  { %v8474_v42 = vadd.f32 %v8426_v56, %v5080_v57  ;;  %v8428_v54 = vpop.f32.mrb[141].mxu0  ;;  %v11777_v5 = vpop.f32.mrb[173].mxu1  ;;  %v8473_v24 = vadd.f32 %v14387_v53, %v8467_v3 }
0x1ce0   :  { %v8481_v47 = vadd.f32 %v8428_v54, %v5082_v60  ;;  %v8430_v34 = vpop.f32.mrb[142].mxu0  ;;  %v8470_v12 = vpop.f32.mrb[174].mxu1 }
0x1ce1   :  { %v10646_v13 = vmul.f32 -1.442695, %v8474_v42  ;;  %v8431_v38 = vpop.f32.mrb[143].mxu0  ;;  %v11778_v48 = vpop.f32.mrb[175].mxu1 }
0x1ce2   :  { %v10647_v22 = vmul.f32 -1.442695, %v8481_v47 }
0x1ce3   :  { %12675 = vpow2.f32 %v10646_v13 }
0x1ce4   :  { %12677 = vpow2.f32 %v10647_v22 }
0x1ced   :  { %v12676_v15 = vpop.eup %12675 }
0x1cee   :  { %v8478_v23 = vadd.f32 1.0, %v12676_v15  ;;  %v12678_v46 = vpop.eup %12677  ;;  %v14887_v15 = vld [vmem:[#allocation33_spill] sm:$0xff] }
0x1cef   :  { %v8485_v6 = vadd.f32 1.0, %v12678_v46 }
0x1cf0   :  { %12679 = vrcp.f32 %v8478_v23  ;;  %v5187_v23 = vadd.f32 %v14887_v15, %v14079_v29 }
0x1cf1   :  { %12681 = vrcp.f32 %v8485_v6 }
0x1cfa   :  { %v12680_v26 = vpop.eup %12679 }
0x1cfb   :  { %v8488_v8 = vmul.f32 %v12680_v26, %v8473_v24  ;;  %v12682_v2 = vpop.eup %12681 }
0x1cfc   :  { %v8491_v28 = vsub.f32 1.0, %v12682_v2  ;;  %v8493_v63 = vmul.f32 %v12682_v2, %v14543_v20 }
0x1cfd   :  { %v8489_v19 = vadd.f32 %v8488_v8, %v5182_v18 }
0x1cff   :  { %12683 = vtanh.f32 %v8489_v19 }
0x1d09   :  { %v12684_v4 = vpop.eup %12683 }
0x1d0a   :  { %v8492_v62 = vmul.f32 %v12684_v4, %v8491_v28  ;;  %v12359_v28 = vld [vmem:[#allocation10 + $0x4] ss:$12 sps:$4 sm:$0xff]   ;;  %v14627_v4 = vld [vmem:[#allocation10] ss:$12 sps:$4 sm:$0xff]  }
0x1d0c   :  { %v14582_v21 = vadd.f32 %v8493_v63, %v8492_v62  ;;  %v12360_v62 = vld [vmem:[#allocation10 + $0x8] ss:$12 sps:$4 sm:$0xff]  }
0x1d0d   :  { %v14630_v63 = vld [vmem:[#allocation10 + $0x1c] ss:$12 sps:$4 sm:$0xff]  }
0x1d0e   :  { %v8501_v1 = vpack.c.bf16 %v14582_v21, %v14582_v21 }
0x1d10   :  { %8695 = vmatmul.mubr.bf16.vlgmr.msra.gmra.mrb[144].mxu0 %v8501_v1  ;;  %11796 = vmatmul.mubr.bf16.vlgmr.msra.gmra.mrb[176].mxu1 %v8501_v1  ;;  %v14633_v1 = vld [vmem:[#allocation10 + $0x18] ss:$12 sps:$4 sm:$0xff]  }
0x1d11   :  { %8933 = vmatpush1.bf16.msra.mxu0 %v14402_v61  ;;  %8964 = vmatprep.mubr.bf16.mxu0 %v14829_v59  ;;  %v12349_v61 = vld [vmem:[#allocation10 + $0x8] ss:$12 sps:$4 sm:$0xff]  }
0x1d12   :  { %8934 = vmatprep.subr.bf16.mxu0 %v14406_v52  ;;  %11815 = vmatprep.mubr.msk.bf16.mxu1 %vm12846_vm1, %v14830_v40  ;;  %v12350_v52 = vld [vmem:[#allocation10 + $0x20] ss:$12 sps:$4 sm:$0xff]  }
0x1d13   :  { %11800 = vmatpush3.bf16.msra.mxu1 %v12349_v61  ;;  %v12364_v61 = vld [vmem:[#allocation10 + $0x20] ss:$12 sps:$4 sm:$0xff]  }
0x1d14   :  { %11801 = vmatprep.subr.bf16.mxu1 %v14830_v40 }
0x1d15   :  { %8935 = vmatpush1.bf16.msra.mxu0 %v14409_v10  ;;  %v12351_v10 = vld [vmem:[#allocation10 + $0x38] ss:$12 sps:$4 sm:$0xff]  }
0x1d16   :  { %8936 = vmatprep.subr.bf16.mxu0 %v14413_v36  ;;  %v12352_v36 = vld [vmem:[#allocation10 + $0x50] ss:$12 sps:$4 sm:$0xff]  }
0x1d17   :  { %11802 = vmatpush3.bf16.msra.mxu1 %v12350_v52  ;;  %v14637_v52 = vld [vmem:[#allocation10 + $0x34] ss:$12 sps:$4 sm:$0xff]  }
0x1d18   :  { %11803 = vmatprep.subr.bf16.mxu1 %v14830_v40 }
0x1d19   :  { %8937 = vmatpush1.bf16.msra.mxu0 %v14416_v25  ;;  %v12353_v25 = vld [vmem:[#allocation10 + $0x68] ss:$12 sps:$4 sm:$0xff]  }
0x1d1a   :  { %8938 = vmatprep.subr.bf16.mxu0 %v14420_v49  ;;  %v12354_v49 = vld [vmem:[#allocation10 + $0x80] ss:$12 sps:$4 sm:$0xff]  }
0x1d1b   :  { %11804 = vmatpush3.bf16.msra.mxu1 %v12351_v10  ;;  %v14640_v10 = vld [vmem:[#allocation10 + $0x30] ss:$12 sps:$4 sm:$0xff]  }
0x1d1c   :  { %11805 = vmatprep.subr.bf16.mxu1 %v14830_v40 }
0x1d1d   :  { %8939 = vmatpush1.bf16.msra.mxu0 %v14423_v55  ;;  %v12355_v55 = vld [vmem:[#allocation10 + $0x98] ss:$12 sps:$4 sm:$0xff]  }
0x1d1e   :  { %8940 = vmatprep.subr.bf16.mxu0 %v14429_v39  ;;  %v14885_v39 = vld [vmem:[#allocation32_spill] sm:$0xff] }
0x1d1f   :  { %11806 = vmatpush3.bf16.msra.mxu1 %v12352_v36  ;;  %v12368_v36 = vld [vmem:[#allocation10 + $0x38] ss:$12 sps:$4 sm:$0xff]  }
0x1d20   :  { %11807 = vmatprep.subr.bf16.mxu1 %v14830_v40 }
0x1d21   :  { %8941 = vmatpush1.bf16.msra.mxu0 %v14427_v43  ;;  %v12356_v43 = vld [vmem:[#allocation10 + $0xb0] ss:$12 sps:$4 sm:$0xff]  }
0x1d22   :  { %8942 = vmatprep.subr.bf16.mxu0 %v14432_v44  ;;  %v5086_v44 = vadd.f32 %v14885_v39, %v14058_v7  ;;  %v14653_v39 = vld [vmem:[#allocation10 + $0x64] ss:$12 sps:$4 sm:$0xff]  }
0x1d23   :  { %11808 = vmatpush3.bf16.msra.mxu1 %v12353_v25  ;;  %v14644_v25 = vld [vmem:[#allocation10 + $0x4c] ss:$12 sps:$4 sm:$0xff]  }
0x1d24   :  { %11809 = vmatprep.subr.bf16.mxu1 %v14830_v40 }
0x1d25   :  { %8943 = vmatpush1.bf16.msra.mxu0 %v14436_v58  ;;  %v14886_v58 = vld [vmem:[#allocation23_spill] sm:$0xff] }
0x1d26   :  { %8944 = vmatprep.subr.bf16.mxu0 %v14440_v33  ;;  %v5088_v33 = vadd.f32 %v14886_v58, %v14066_v37  ;;  %v14656_v58 = vld [vmem:[#allocation10 + $0x7c] ss:$12 sps:$4 sm:$0xff]  }
0x1d27   :  { %11810 = vmatpush3.bf16.msra.mxu1 %v12354_v49  ;;  %v14647_v49 = vld [vmem:[#allocation10 + $0x48] ss:$12 sps:$4 sm:$0xff]  }
0x1d28   :  { %11811 = vmatprep.subr.bf16.mxu1 %v14830_v40 }
0x1d29   :  { %8945 = vmatpush1.bf16.msra.mxu0 %v14443_v0 }
0x1d2a   :  { %8946 = vmatprep.subr.bf16.mxu0 %v14447_v17 }
0x1d2b   :  { %11812 = vmatpush3.bf16.msra.mxu1 %v12355_v55  ;;  %v12372_v55 = vld [vmem:[#allocation10 + $0x50] ss:$12 sps:$4 sm:$0xff]  }
0x1d2c   :  { %11813 = vmatprep.subr.bf16.mxu1 %v14830_v40 }
0x1d2d   :  { %8947 = vmatpush1.bf16.msra.mxu0 %v14450_v41 }
0x1d2e   :  { %9202 = vmatprep.subr.bf16.mxu0 %v12359_v28 }
0x1d2f   :  { %11814 = vmatpush3.bf16.msra.mxu1 %v12356_v43  ;;  %v14651_v43 = vld [vmem:[#allocation10 + $0x60] ss:$12 sps:$4 sm:$0xff]  }
0x1d30   :  { %11819 = vmatprep.subr.bf16.mxu1 %v14830_v40 }
0x1de3   :  { %v8696_v0 = vpop.f32.mrb[144].mxu0  ;;  %v8737_v17 = vpop.f32.mrb[176].mxu1 }
0x1de4   :  { %v8744_v41 = vadd.f32 %v8696_v0, %v5086_v44  ;;  %v8698_v57 = vpop.f32.mrb[145].mxu0  ;;  %v11797_v11 = vpop.f32.mrb[177].mxu1  ;;  %v8743_v48 = vadd.f32 %v14387_v53, %v8737_v17  ;;  %v12376_v44 = vld [vmem:[#allocation10 + $0x68] ss:$12 sps:$4 sm:$0xff]   ;;  %v12380_v0 = vld [vmem:[#allocation10 + $0x80] ss:$12 sps:$4 sm:$0xff]  }
0x1de5   :  { %v8751_v60 = vadd.f32 %v8698_v57, %v5088_v33  ;;  %v8700_v56 = vpop.f32.mrb[146].mxu0  ;;  %v8740_v3 = vpop.f32.mrb[178].mxu1  ;;  %v14660_v33 = vld [vmem:[#allocation10 + $0x78] ss:$12 sps:$4 sm:$0xff]   ;;  %v14664_v17 = vld [vmem:[#allocation10 + $0x94] ss:$12 sps:$4 sm:$0xff]  }
0x1de6   :  { %v10672_v42 = vmul.f32 -1.442695, %v8744_v41  ;;  %v8701_v54 = vpop.f32.mrb[147].mxu0  ;;  %v11798_v5 = vpop.f32.mrb[179].mxu1  ;;  %v14667_v41 = vld [vmem:[#allocation10 + $0x90] ss:$12 sps:$4 sm:$0xff]  }
0x1de7   :  { %v10673_v47 = vmul.f32 -1.442695, %v8751_v60  ;;  %v12384_v57 = vld [vmem:[#allocation10 + $0x98] ss:$12 sps:$4 sm:$0xff]   ;;  %v12385_v60 = vld [vmem:[#allocation10 + $0xa8] ss:$12 sps:$4 sm:$0xff]  }
0x1de8   :  { %12685 = vpow2.f32 %v10672_v42  ;;  %v12387_v11 = vld [vmem:[#allocation10 + $0xac] ss:$12 sps:$4 sm:$0xff]   ;;  %v12388_v56 = vld [vmem:[#allocation10 + $0xb0] ss:$12 sps:$4 sm:$0xff]  }
0x1de9   :  { %12687 = vpow2.f32 %v10673_v47  ;;  %v14888_v3 = vld [vmem:[#allocation24_spill] sm:$0xff]  ;;  %v14889_v54 = vld [vmem:[#allocation29_spill] sm:$0xff] }
0x1dea   :  { %v5090_v42 = vadd.f32 %v14888_v3, %v14058_v7  ;;  %v5092_v5 = vadd.f32 %v14889_v54, %v14066_v37 }
0x1df2   :  { %v12686_v34 = vpop.eup %12685 }
0x1df3   :  { %v8748_v12 = vadd.f32 1.0, %v12686_v34  ;;  %v12688_v13 = vpop.eup %12687 }
0x1df4   :  { %v8755_v38 = vadd.f32 1.0, %v12688_v13 }
0x1df5   :  { %12689 = vrcp.f32 %v8748_v12 }
0x1df6   :  { %12691 = vrcp.f32 %v8755_v38 }
0x1dff   :  { %v12690_v22 = vpop.eup %12689 }
0x1e00   :  { %v8758_v46 = vmul.f32 %v12690_v22, %v8743_v48  ;;  %v12692_v24 = vpop.eup %12691 }
0x1e01   :  { %v8761_v26 = vsub.f32 1.0, %v12692_v24  ;;  %v8763_v8 = vmul.f32 %v12692_v24, %v14582_v21 }
0x1e02   :  { %v8759_v6 = vadd.f32 %v8758_v46, %v5187_v23 }
0x1e04   :  { %12693 = vtanh.f32 %v8759_v6 }
0x1e0e   :  { %v12694_v35 = vpop.eup %12693 }
0x1e0f   :  { %v8762_v18 = vmul.f32 %v12694_v35, %v8761_v26 }
0x1e11   :  { %v14620_v19 = vadd.f32 %v8763_v8, %v8762_v18 }
0x1e13   :  { %v8771_v2 = vpack.c.bf16 %v14620_v19, %v14620_v19 }
0x1e15   :  { %8965 = vmatmul.mubr.bf16.vlgmr.msra.gmra.mrb[148].mxu0 %v8771_v2  ;;  %11816 = vmatmul.mubr.bf16.vlgmr.msra.gmra.mrb[180].mxu1 %v8771_v2 }
0x1e16   :  { %9234 = vmatprep.mubr.bf16.mxu0 %v14829_v59  ;;  %11835 = vmatprep.mubr.msk.bf16.mxu1 %vm12846_vm1, %v14830_v40 }
0x1e17   :  { %9203 = vmatpush1.bf16.msra.mxu0 %v14627_v4  ;;  %11820 = vmatpush3.bf16.msra.mxu1 %v12360_v62  ;;  %v14890_v62 = vld [vmem:[#allocation36_spill] sm:$0xff] }
0x1e18   :  { %11821 = vmatprep.subr.bf16.mxu1 %v14830_v40  ;;  %9204 = vmatprep.subr.bf16.mxu0 %v14630_v63 }
0x1e1b   :  { %9205 = vmatpush1.bf16.msra.mxu0 %v14633_v1  ;;  %11822 = vmatpush3.bf16.msra.mxu1 %v12364_v61  ;;  %v5190_v61 = vadd.f32 %v14890_v62, %v14079_v29 }
0x1e1c   :  { %11823 = vmatprep.subr.bf16.mxu1 %v14830_v40  ;;  %9206 = vmatprep.subr.bf16.mxu0 %v14637_v52 }
0x1e1f   :  { %9207 = vmatpush1.bf16.msra.mxu0 %v14640_v10  ;;  %11824 = vmatpush3.bf16.msra.mxu1 %v12368_v36 }
0x1e20   :  { %11825 = vmatprep.subr.bf16.mxu1 %v14830_v40  ;;  %9208 = vmatprep.subr.bf16.mxu0 %v14644_v25 }
0x1e23   :  { %9209 = vmatpush1.bf16.msra.mxu0 %v14647_v49  ;;  %11826 = vmatpush3.bf16.msra.mxu1 %v12372_v55 }
0x1e24   :  { %11827 = vmatprep.subr.bf16.mxu1 %v14830_v40  ;;  %9210 = vmatprep.subr.bf16.mxu0 %v14653_v39 }
0x1e27   :  { %9211 = vmatpush1.bf16.msra.mxu0 %v14651_v43  ;;  %11828 = vmatpush3.bf16.msra.mxu1 %v12376_v44 }
0x1e28   :  { %9212 = vmatprep.subr.bf16.mxu0 %v14656_v58  ;;  %11829 = vmatprep.subr.bf16.mxu1 %v14830_v40 }
0x1e2b   :  { %9213 = vmatpush1.bf16.msra.mxu0 %v14660_v33  ;;  %11830 = vmatpush3.bf16.msra.mxu1 %v12380_v0 }
0x1e2c   :  { %9214 = vmatprep.subr.bf16.mxu0 %v14664_v17  ;;  %11831 = vmatprep.subr.bf16.mxu1 %v14830_v40 }
0x1e2f   :  { %9215 = vmatpush1.bf16.msra.mxu0 %v14667_v41  ;;  %11832 = vmatpush3.bf16.msra.mxu1 %v12384_v57 }
0x1e30   :  { %9216 = vmatprep.subr.bf16.mxu0 %v12387_v11  ;;  %11833 = vmatprep.subr.bf16.mxu1 %v14830_v40 }
0x1e33   :  { %9217 = vmatpush1.bf16.msra.mxu0 %v12385_v60  ;;  %11834 = vmatpush3.bf16.msra.mxu1 %v12388_v56 }
0x1e34   :  { %9472 = vmatprep.subr.bf16.mxu0 %v12359_v28  ;;  %11839 = vmatprep.subr.bf16.mxu1 %v14830_v40 }
0x1ee8   :  { %v8966_v47 = vpop.f32.mrb[148].mxu0  ;;  %v9007_v34 = vpop.f32.mrb[180].mxu1 }
0x1ee9   :  { %v9014_v12 = vadd.f32 %v8966_v47, %v5090_v42  ;;  %v8968_v13 = vpop.f32.mrb[149].mxu0  ;;  %v11817_v38 = vpop.f32.mrb[181].mxu1  ;;  %v9013_v2 = vadd.f32 %v14387_v53, %v9007_v34  ;;  %v12390_v53 = vld [vmem:[#allocation10 + $0x20] ss:$12 sps:$4 sm:$0xff]  }
0x1eea   :  { %v9021_v48 = vadd.f32 %v8968_v13, %v5092_v5  ;;  %v8970_v22 = vpop.f32.mrb[150].mxu0  ;;  %v9010_v15 = vpop.f32.mrb[182].mxu1 }
0x1eeb   :  { %v10698_v23 = vmul.f32 -1.442695, %v9014_v12  ;;  %v8971_v46 = vpop.f32.mrb[151].mxu0  ;;  %v11818_v6 = vpop.f32.mrb[183].mxu1 }
0x1eec   :  { %v10699_v24 = vmul.f32 -1.442695, %v9021_v48  ;;  %v14719_v6 = vld [vmem:[%s14796_s8] ss:$0 sm:$0xff] }
0x1eed   :  { %12695 = vpow2.f32 %v10698_v23 }
0x1eee   :  { %12697 = vpow2.f32 %v10699_v24 }
0x1ef7   :  { %v12696_v26 = vpop.eup %12695 }
0x1ef8   :  { %v9018_v35 = vadd.f32 1.0, %v12696_v26  ;;  %v12698_v18 = vpop.eup %12697 }
0x1ef9   :  { %v9025_v8 = vadd.f32 1.0, %v12698_v18 }
0x1efa   :  { %12699 = vrcp.f32 %v9018_v35  ;;  %v14893_v35 = vld [vmem:[#allocation26_spill] sm:$0xff] }
0x1efb   :  { %12701 = vrcp.f32 %v9025_v8  ;;  %v5195_v18 = vadd.f32 %v14893_v35, %v14079_v29 }
0x1f04   :  { %v12700_v28 = vpop.eup %12699 }
0x1f05   :  { %v9028_v36 = vmul.f32 %v12700_v28, %v9013_v2  ;;  %v12702_v44 = vpop.eup %12701 }
0x1f06   :  { %v9031_v0 = vsub.f32 1.0, %v12702_v44  ;;  %v9033_v3 = vmul.f32 %v12702_v44, %v14620_v19 }
0x1f07   :  { %v9029_v55 = vadd.f32 %v9028_v36, %v5190_v61 }
0x1f09   :  { %12703 = vtanh.f32 %v9029_v55 }
0x1f13   :  { %v12704_v57 = vpop.eup %12703 }
0x1f14   :  { %v9032_v56 = vmul.f32 %v12704_v57, %v9031_v0  ;;  %v12398_v57 = vld [vmem:[%s14797_s9 + $0x8] sm:$0xff]  }
0x1f16   :  { %v14682_v42 = vadd.f32 %v9033_v3, %v9032_v56  ;;  %v9593_v56 = vpack.c.bf16 %v14123_v9, %v14084_v30  ;;  %v12399_v3 = vld [vmem:[%s14797_s9 + $0x10] sm:$0xff]   ;;  %v12401_v30 = vld [vmem:[%s14797_s9 + $0x20] sm:$0xff]   ;;  %v12402_v9 = vld [vmem:[%s14797_s9 + $0x28] sm:$0xff]  }
0x1f18   :  { %v9041_v54 = vpack.c.bf16 %v14682_v42, %v14682_v42 }
0x1f1a   :  { %9235 = vmatmul.mubr.bf16.vlgmr.msra.gmra.mrb[152].mxu0 %v9041_v54  ;;  %11836 = vmatmul.mubr.bf16.vlgmr.msra.gmra.mrb[184].mxu1 %v9041_v54  ;;  %v12400_v54 = vld [vmem:[%s14797_s9 + $0x18] sm:$0xff]  }
0x1f1b   :  { %9473 = vmatpush1.bf16.msra.mxu0 %v14627_v4  ;;  %9504 = vmatprep.mubr.bf16.mxu0 %v14829_v59  ;;  %v12389_v59 = vld [vmem:[#allocation10 + $0x8] ss:$12 sps:$4 sm:$0xff]   ;;  %v12391_v4 = vld [vmem:[#allocation10 + $0x38] ss:$12 sps:$4 sm:$0xff]  }
0x1f1c   :  { %9474 = vmatprep.subr.bf16.mxu0 %v14630_v63  ;;  %11855 = vmatprep.mubr.msk.bf16.mxu1 %vm12846_vm1, %v14830_v40  ;;  %v12392_v63 = vld [vmem:[#allocation10 + $0x50] ss:$12 sps:$4 sm:$0xff]  }
0x1f1d   :  { %11840 = vmatpush3.bf16.msra.mxu1 %v12389_v59  ;;  %v12403_v59 = vld [vmem:[%s14797_s9 + $0x30] sm:$0xff]  }
0x1f1e   :  { %11841 = vmatprep.subr.bf16.mxu1 %v14830_v40 }
0x1f1f   :  { %9475 = vmatpush1.bf16.msra.mxu0 %v14633_v1  ;;  %v12393_v1 = vld [vmem:[#allocation10 + $0x68] ss:$12 sps:$4 sm:$0xff]  }
0x1f20   :  { %9476 = vmatprep.subr.bf16.mxu0 %v14637_v52  ;;  %v12397_v52 = vld [vmem:[%s14797_s9] sm:$0xff]  }
0x1f21   :  { %11842 = vmatpush3.bf16.msra.mxu1 %v12390_v53  ;;  %v12404_v53 = vld [vmem:[%s14797_s9 + $0x38] sm:$0xff]  }
0x1f22   :  { %11843 = vmatprep.subr.bf16.mxu1 %v14830_v40 }
0x1f23   :  { %9477 = vmatpush1.bf16.msra.mxu0 %v14640_v10  ;;  %v12394_v10 = vld [vmem:[#allocation10 + $0x80] ss:$12 sps:$4 sm:$0xff]  }
0x1f24   :  { %9478 = vmatprep.subr.bf16.mxu0 %v14644_v25  ;;  %v12395_v25 = vld [vmem:[#allocation10 + $0x98] ss:$12 sps:$4 sm:$0xff]  }
0x1f25   :  { %11844 = vmatpush3.bf16.msra.mxu1 %v12391_v4  ;;  %v9594_v4 = vpack.c.bf16 %v14233_v45, %v14161_v51  ;;  %v14894_v51 = vld [vmem:[#allocation34_spill] sm:$0xff] }
0x1f26   :  { %11845 = vmatprep.subr.bf16.mxu1 %v14830_v40  ;;  %v5100_v45 = vadd.f32 %v14894_v51, %v14058_v7 }
0x1f27   :  { %9479 = vmatpush1.bf16.msra.mxu0 %v14647_v49  ;;  %v12396_v49 = vld [vmem:[#allocation10 + $0xb0] ss:$12 sps:$4 sm:$0xff]  }
0x1f28   :  { %9480 = vmatprep.subr.bf16.mxu0 %v14653_v39 }
0x1f29   :  { %11846 = vmatpush3.bf16.msra.mxu1 %v12392_v63  ;;  %v9595_v63 = vpack.c.bf16 %v14311_v14, %v14272_v27  ;;  %v14895_v27 = vld [vmem:[#allocation15_spill] sm:$0xff] }
0x1f2a   :  { %11847 = vmatprep.subr.bf16.mxu1 %v14830_v40  ;;  %v5102_v14 = vadd.f32 %v14895_v27, %v14066_v37 }
0x1f2b   :  { %9481 = vmatpush1.bf16.msra.mxu0 %v14651_v43  ;;  %v14891_v43 = vld [vmem:[#allocation25_spill] sm:$0xff] }
0x1f2c   :  { %9482 = vmatprep.subr.bf16.mxu0 %v14656_v58  ;;  %v5096_v39 = vadd.f32 %v14891_v43, %v14058_v7  ;;  %v14892_v58 = vld [vmem:[#allocation31_spill] sm:$0xff] }
0x1f2d   :  { %11848 = vmatpush3.bf16.msra.mxu1 %v12393_v1  ;;  %v9596_v1 = vpack.c.bf16 %v14393_v31, %v14350_v16 }
0x1f2e   :  { %11849 = vmatprep.subr.bf16.mxu1 %v14830_v40 }
0x1f2f   :  { %9483 = vmatpush1.bf16.msra.mxu0 %v14660_v33  ;;  %v5098_v33 = vadd.f32 %v14892_v58, %v14066_v37 }
0x1f30   :  { %9484 = vmatprep.subr.bf16.mxu0 %v14664_v17 }
0x1f31   :  { %11850 = vmatpush3.bf16.msra.mxu1 %v12394_v10  ;;  %v9598_v10 = vpack.c.bf16 %v14582_v21, %v14543_v20 }
0x1f32   :  { %11851 = vmatprep.subr.bf16.mxu1 %v14830_v40 }
0x1f33   :  { %9485 = vmatpush1.bf16.msra.mxu0 %v14667_v41 }
0x1f34   :  { %9486 = vmatprep.subr.bf16.mxu0 %v12387_v11 }
0x1f35   :  { %11852 = vmatpush3.bf16.msra.mxu1 %v12395_v25  ;;  %v9599_v25 = vpack.c.bf16 %v14682_v42, %v14620_v19 }
0x1f36   :  { %11853 = vmatprep.subr.bf16.mxu1 %v14830_v40 }
0x1f37   :  { %9487 = vmatpush1.bf16.msra.mxu0 %v12385_v60 }
0x1f38   :  { %11859 = vmatprep.subr.bf16.mxu0 %v12397_v52 }
0x1f39   :  { %11854 = vmatpush3.bf16.msra.mxu1 %v12396_v49 }
0x1fed   :  { %v9236_v17 = vpop.f32.mrb[152].mxu0  ;;  %v9277_v41 = vpop.f32.mrb[184].mxu1 }
0x1fee   :  { %v9284_v11 = vadd.f32 %v9236_v17, %v5096_v39  ;;  %v9238_v60 = vpop.f32.mrb[153].mxu0  ;;  %v11837_v5 = vpop.f32.mrb[185].mxu1  ;;  %v9283_v24 = vadd.f32 %v14719_v6, %v9277_v41 }
0x1fef   :  { %v9291_v47 = vadd.f32 %v9238_v60, %v5098_v33  ;;  %v9240_v34 = vpop.f32.mrb[154].mxu0  ;;  %v9280_v12 = vpop.f32.mrb[186].mxu1  ;;  %v14896_v60 = vld [vmem:[#allocation35_spill] sm:$0xff] }
0x1ff0   :  { %v10724_v13 = vmul.f32 -1.442695, %v9284_v11  ;;  %v9241_v38 = vpop.f32.mrb[155].mxu0  ;;  %v11838_v48 = vpop.f32.mrb[187].mxu1  ;;  %v5198_v5 = vadd.f32 %v14896_v60, %v14079_v29 }
0x1ff1   :  { %v10725_v40 = vmul.f32 -1.442695, %v9291_v47 }
0x1ff2   :  { %12705 = vpow2.f32 %v10724_v13  ;;  %v10752_v13 = vld [vmem:[%s14798_s10] ss:$0 sm:$0xff]  ;;  %s12848_s10 = smov [#allocation11]  }
0x1ff3   :  { %12707 = vpow2.f32 %v10725_v40  ;;  %s9854_s21 = sshll.u32 %s12848_s10, 4  ;;  %s9855_s21 = int_to_ptr.vmem [resolvable:$true] %s9854_s21 }
0x1ff4   :  { %s12811_s22 = scalar_lea.vmem %s9855_s21, 1024  ;;  %p12816_p11 = scmp.lt.s32.totalorder %s9855_s21, %s9855_s21 }
0x1ff5   :  { %p12812_p10 = scmp.ne.s32.totalorder %s9855_s21, %s12811_s22  ;;  %p12817_p12 = scmp.lt.s32.totalorder %s12811_s22, %s12811_s22 }
0x1ff7   :  { %p12818_p13 = por %p12817_p12, %p12816_p11 }
0x1ff9   :  { %p12819_p0 = pnand %p12818_p13, %p12812_p10 }
0x1ffc   :  { %v12706_v22 = vpop.eup %12705 }
0x1ffd   :  { %v9288_v15 = vadd.f32 1.0, %v12706_v22  ;;  %v12708_v23 = vpop.eup %12707 }
0x1ffe   :  { %v9295_v46 = vadd.f32 1.0, %v12708_v23 }
0x1fff   :  { %12709 = vrcp.f32 %v9288_v15 }
0x2000   :  { %12711 = vrcp.f32 %v9295_v46 }
0x2009   :  { %v12710_v26 = vpop.eup %12709 }
0x200a   :  { %v9298_v8 = vmul.f32 %v12710_v26, %v9283_v24  ;;  %v12712_v28 = vpop.eup %12711 }
0x200b   :  { %v9301_v62 = vsub.f32 1.0, %v12712_v28  ;;  %v9303_v55 = vmul.f32 %v12712_v28, %v14682_v42 }
0x200c   :  { %v9299_v2 = vadd.f32 %v9298_v8, %v5195_v18 }
0x200e   :  { %12713 = vtanh.f32 %v9299_v2 }
0x2018   :  { %v12714_v61 = vpop.eup %12713 }
0x2019   :  { %v9302_v36 = vmul.f32 %v12714_v61, %v9301_v62 }
0x201b   :  { %v14725_v44 = vadd.f32 %v9303_v55, %v9302_v36 }
0x201d   :  { %v9311_v0 = vpack.c.bf16 %v14725_v44, %v14725_v44 }
0x201f   :  { %9505 = vmatmul.mubr.bf16.vlgmr.msra.gmra.mrb[156].mxu0 %v9311_v0  ;;  %11856 = vmatmul.mubr.bf16.vlgmr.msra.gmra.mrb[188].mxu1 %v9311_v0 }
0x2020   :  { %11860 = vmatpush3.bf16.msra.mxu0 %v12397_v52  ;;  %11875 = vmatprep.mubr.bf16.mxu0 %v9593_v56  ;;  %v9597_v52 = vpack.c.bf16 %v14504_v32, %v14465_v50 }
0x2021   :  { %11861 = vmatprep.subr.bf16.mxu0 %v12398_v57 }
0x2024   :  { %11862 = vmatpush3.bf16.msra.mxu0 %v12398_v57 }
0x2025   :  { %11863 = vmatprep.subr.bf16.mxu0 %v12399_v3 }
0x2028   :  { %11864 = vmatpush3.bf16.msra.mxu0 %v12399_v3 }
0x2029   :  { %11865 = vmatprep.subr.bf16.mxu0 %v12400_v54 }
0x202c   :  { %11866 = vmatpush3.bf16.msra.mxu0 %v12400_v54 }
0x202d   :  { %11867 = vmatprep.subr.bf16.mxu0 %v12401_v30 }
0x2030   :  { %11868 = vmatpush3.bf16.msra.mxu0 %v12401_v30 }
0x2031   :  { %11869 = vmatprep.subr.bf16.mxu0 %v12402_v9 }
0x2034   :  { %11870 = vmatpush3.bf16.msra.mxu0 %v12402_v9 }
0x2035   :  { %11871 = vmatprep.subr.bf16.mxu0 %v12403_v59 }
0x2038   :  { %11872 = vmatpush3.bf16.msra.mxu0 %v12403_v59 }
0x2039   :  { %11873 = vmatprep.subr.bf16.mxu0 %v12404_v53 }
0x203c   :  { %11874 = vmatpush3.bf16.msra.mxu0 %v12404_v53 }
0x203f   :  { %11876 = vmatmul.mubr.bf16.vlgmr.msra.gmra.mrb[160].mxu0 %v9594_v4 }
0x2040   :  { %11879 = vmatprep.mubr.bf16.mxu0 %v9595_v63 }
0x2047   :  { %11880 = vmatmul.mubr.bf16.gmra.mrb[164].mxu0 %v9596_v1 }
0x2048   :  { %11883 = vmatprep.mubr.bf16.mxu0 %v9597_v52 }
0x204f   :  { %11884 = vmatmul.mubr.bf16.gmra.mrb[168].mxu0 %v9598_v10 }
0x2050   :  { %11887 = vmatprep.mubr.bf16.mxu0 %v9599_v25 }
0x20f2   :  { %v9506_v16 = vpop.f32.mrb[156].mxu0  ;;  %v9547_v31 = vpop.f32.mrb[188].mxu1 }
0x20f3   :  { %v9554_v49 = vadd.f32 %v9506_v16, %v5100_v45  ;;  %v9508_v50 = vpop.f32.mrb[157].mxu0  ;;  %v11857_v32 = vpop.f32.mrb[189].mxu1  ;;  %v9553_v37 = vadd.f32 %v14719_v6, %v9547_v31 }
0x20f4   :  { %v9561_v43 = vadd.f32 %v9508_v50, %v5102_v14  ;;  %v9510_v39 = vpop.f32.mrb[158].mxu0  ;;  %v9550_v58 = vpop.f32.mrb[190].mxu1 }
0x20f5   :  { %v10750_v20 = vmul.f32 -1.442695, %v9554_v49  ;;  %v9511_v21 = vpop.f32.mrb[159].mxu0  ;;  %v11858_v33 = vpop.f32.mrb[191].mxu1 }
0x20f6   :  { %v10751_v19 = vmul.f32 -1.442695, %v9561_v43 }
0x20f7   :  { %12715 = vpow2.f32 %v10750_v20 }
0x20f8   :  { %12717 = vpow2.f32 %v10751_v19 }
0x2101   :  { %v12716_v42 = vpop.eup %12715 }
0x2102   :  { %v9558_v17 = vadd.f32 1.0, %v12716_v42  ;;  %v12718_v7 = vpop.eup %12717 }
0x2103   :  { %v9565_v41 = vadd.f32 1.0, %v12718_v7 }
0x2104   :  { %12719 = vrcp.f32 %v9558_v17 }
0x2105   :  { %12721 = vrcp.f32 %v9565_v41 }
0x210e   :  { %v12720_v11 = vpop.eup %12719 }
0x210f   :  { %v9568_v47 = vmul.f32 %v12720_v11, %v9553_v37  ;;  %v12722_v26 = vpop.eup %12721 }
0x2110   :  { %v9571_v8 = vsub.f32 1.0, %v12722_v26  ;;  %v9573_v57 = vmul.f32 %v12722_v26, %v14725_v44 }
0x2111   :  { %v9569_v34 = vadd.f32 %v9568_v47, %v5198_v5 }
0x2112   :  { %v11877_v12 = vpop.f32.mrb[160].mxu0 }
0x2113   :  { %12723 = vtanh.f32 %v9569_v34  ;;  %v9706_v38 = vpop.f32.mrb[161].mxu0  ;;  %v9715_v40 = vadd.f32 %v11877_v12, %v10752_v13 }
0x2114   :  { %v11878_v48 = vpop.f32.mrb[162].mxu0  ;;  %v9707_v23 = vadd.f32 %v10752_v13, %v9706_v38 }
0x2115   :  { %v9718_v22 = vadd.f32 %v11878_v48, %v10752_v13  ;;  %v9709_v15 = vpop.f32.mrb[163].mxu0 }
0x2116   :  { %v9710_v46 = vadd.f32 %v10752_v13, %v9709_v15 }
0x2117   :  { %v10801_v6 = vpack.c.bf16 %v9718_v22, %v9715_v40 }
0x2118   :  { %v10796_v24 = vpack.c.bf16 %v9710_v46, %v9707_v23 }
0x2119   :  { %10833 = vst [vmem:[#allocation11 + $0x8] sm:$0xff] %v10801_v6  }
0x211a   :  { %10797 = vst [vmem:[#allocation11] sm:$0xff] %v10796_v24   ;;  %v11881_v29 = vpop.f32.mrb[164].mxu0 }
0x211b   :  { %v9722_v35 = vpop.f32.mrb[165].mxu0  ;;  %v9731_v28 = vadd.f32 %v11881_v29, %v10752_v13 }
0x211c   :  { %v11882_v18 = vpop.f32.mrb[166].mxu0  ;;  %v9723_v36 = vadd.f32 %v10752_v13, %v9722_v35 }
0x211d   :  { %v12724_v2 = vpop.eup %12723  ;;  %v9734_v62 = vadd.f32 %v11882_v18, %v10752_v13  ;;  %v9725_v61 = vpop.f32.mrb[167].mxu0 }
0x211e   :  { %v9726_v55 = vadd.f32 %v10752_v13, %v9725_v61  ;;  %v9572_v0 = vmul.f32 %v12724_v2, %v9571_v8 }
0x211f   :  { %v10811_v56 = vpack.c.bf16 %v9734_v62, %v9731_v28 }
0x2120   :  { %v10806_v3 = vpack.c.bf16 %v9726_v55, %v9723_v36  ;;  %v9574_v54 = vadd.f32 %v9573_v57, %v9572_v0 }
0x2121   :  { %10835 = vst [vmem:[#allocation11 + $0x18] sm:$0xff] %v10811_v56  }
0x2122   :  { %10834 = vst [vmem:[#allocation11 + $0x10] sm:$0xff] %v10806_v3   ;;  %v11885_v30 = vpop.f32.mrb[168].mxu0  ;;  %v9600_v9 = vpack.c.bf16 %v9574_v54, %v14725_v44 }
0x2123   :  { %v9738_v59 = vpop.f32.mrb[169].mxu0  ;;  %v9747_v4 = vadd.f32 %v11885_v30, %v10752_v13 }
0x2124   :  { %v11886_v53 = vpop.f32.mrb[170].mxu0  ;;  %11888 = vmatmul.mubr.bf16.gmra.mrb[172].mxu0 %v9600_v9  ;;  %v9739_v52 = vadd.f32 %v10752_v13, %v9738_v59 }
0x2125   :  { %v9750_v63 = vadd.f32 %v11886_v53, %v10752_v13  ;;  %v9741_v1 = vpop.f32.mrb[171].mxu0 }
0x2126   :  { %v9742_v10 = vadd.f32 %v10752_v13, %v9741_v1 }
0x2127   :  { %v10821_v25 = vpack.c.bf16 %v9750_v63, %v9747_v4 }
0x2128   :  { %v10816_v51 = vpack.c.bf16 %v9742_v10, %v9739_v52 }
0x2129   :  { %10837 = vst [vmem:[#allocation11 + $0x28] sm:$0xff] %v10821_v25  }
0x212a   :  { %10836 = vst [vmem:[#allocation11 + $0x20] sm:$0xff] %v10816_v51  }
0x21f7   :  { %v11889_v45 = vpop.f32.mrb[172].mxu0 }
0x21f8   :  { %v9754_v27 = vpop.f32.mrb[173].mxu0  ;;  %v9763_v16 = vadd.f32 %v11889_v45, %v10752_v13 }
0x21f9   :  { %v11890_v14 = vpop.f32.mrb[174].mxu0  ;;  %v9755_v44 = vadd.f32 %v10752_v13, %v9754_v27 }
0x21fa   :  { %v9766_v31 = vadd.f32 %v11890_v14, %v10752_v13  ;;  %v9757_v49 = vpop.f32.mrb[175].mxu0 }
0x21fb   :  { %v9758_v50 = vadd.f32 %v10752_v13, %v9757_v49 }
0x21fc   :  { %v10831_v32 = vpack.c.bf16 %v9766_v31, %v9763_v16 }
0x21fd   :  { %v10826_v43 = vpack.c.bf16 %v9758_v50, %v9755_v44 }
0x21fe   :  { %10839 = vst [vmem:[#allocation11 + $0x38] sm:$0xff] %v10831_v32  }
0x21ff   :  { %10838 = vst [vmem:[#allocation11 + $0x30] sm:$0xff] %v10826_v43  }
0x2200   :  { %12822 = shalt.err (!%p12819_p0)
}
0x2201   :  { %s12823_s7 = scalar_lea.hbm %s14799_s11, 1024 }
0x2202   :  { %p12824_p1 = scmp.ne.s32.totalorder %s14799_s11, %s12823_s7  ;;  %p12827_p2 = scmp.lt.u32.totalorder %s12823_s7, %s14799_s11 }
0x2204   :  { %p12829_p3 = pnand %p12827_p2, %p12824_p1 }
0x2206   :  { %12832 = shalt.err (!%p12829_p3)
}
0x2207   :  { %s12849_s18 = smov 64   ;;  %s12850_s1 = smov 4  }
0x2208   :  { %9860 = dma.vmem_to_hbm [thread:$0]  %s9855_s21, 1024, %s14799_s11, [#allocation7], %s12849_s18, %s12849_s18, %s12850_s1  }
0x2209   :  { %12837 = dma.done.wait [#allocation7], 1024  }
0x220a   :  { %12838 = vsyncadd [#allocation7], 4294966272 }
0x220b   :  { %9864 = vsyncpa [#allocation6], 1 }
0x220c   :  { %9865 = vsyncpa [#allocation9], 1 }
0x220d   :  { %9866 = vsyncpa [#allocation7], 1 }

</bundles_post_ra>
